<compile_context>
chip_gen: v7x
topology: tpu7x:2x2x1
jax: 0.10.0
libtpu: 0.0.40
codegen_flags: <defaults>
</compile_context>

<pallas_src>
import jax
import jax.numpy as jnp
from jax.experimental import pallas as pl
from jax.experimental.pallas import tpu as pltpu

# Model dims implied by the PyTorch module (fc1 = 32*48*48 => 100x100 input).
CIN, COUT, KH, KW = 3, 32, 5, 5
HIN = WIN = 100           # conv input spatial
HP = WP = 48              # spatial after valid 5x5 conv + 2x2 max pool
NPIX = HP * WP            # 2304
KPATCH = KH * KW * CIN    # 75 (im2col contraction width)
FEAT = COUT * NPIX        # 73728
HID = 128
NCLS = 2

VMEM_LIMIT = 48 * 1024 * 1024   # <= v7x 64 MiB physical, plenty for v5e/v6e


# ---------------------------------------------------------------------------
# Kernel 1: conv2d(3->32, 5x5, valid) + bias + relu + maxpool(2x2)   (per batch)
#
#   p_ref : (1, 4, 75, 2304) im2col; plane qr = 2*q + r holds the patches for conv
#           output positions (h, w) = (2*hp + q, 2*wp + r), column index hp*48 + wp.
#   w_ref : (32, 75)  conv weight, (cout, kh*15 + kw*3 + cin)
#   b_ref : (32, 1)
#   o_ref : (1, 32, 2304) pooled+relu output, already in torch (C, H, W) flatten order.
# ---------------------------------------------------------------------------
def conv_pool_kernel(p_ref, w_ref, b_ref, o_ref):
    w = w_ref[...]

    def tap(qr):
        return jnp.dot(w, p_ref[0, qr], preferred_element_type=jnp.float32)

    # max over the 4 pooling parities == 2x2 max-pool (relu/bias commute with max).
    m = jnp.maximum(jnp.maximum(tap(0), tap(1)), jnp.maximum(tap(2), tap(3)))
    o_ref[0] = jnp.maximum(m + b_ref[...], 0.0)


def conv_pool(x_im2col, w_t, b_col):
    B = x_im2col.shape[0]
    return pl.pallas_call(
        conv_pool_kernel,
        out_shape=jax.ShapeDtypeStruct((B, COUT, NPIX), jnp.float32),
        grid_spec=pltpu.PrefetchScalarGridSpec(
            num_scalar_prefetch=0,
            grid=(B,),
            in_specs=[
                pl.BlockSpec((1, 4, KPATCH, NPIX), lambda b: (b, 0, 0, 0)),
                pl.BlockSpec((COUT, KPATCH), lambda b: (0, 0)),
                pl.BlockSpec((COUT, 1), lambda b: (0, 0)),
            ],
            out_specs=pl.BlockSpec((1, COUT, NPIX), lambda b: (b, 0, 0)),
        ),
        compiler_params=pltpu.CompilerParams(
            dimension_semantics=("parallel",),          # batch axis -> v7x dual-TC
            vmem_limit_bytes=VMEM_LIMIT),
    )(x_im2col, w_t, b_col)


# ---------------------------------------------------------------------------
# Kernel 2: fused fc1 (73728 -> 128) + relu + fc2 (128 -> 2), tiled over K
# ---------------------------------------------------------------------------
def mlp_kernel(x_ref, w1_ref, b1_ref, w2_ref, b2_ref, o_ref, acc_ref):
    k = pl.program_id(0)

    @pl.when(k == 0)
    def _():
        acc_ref[...] = jnp.zeros_like(acc_ref)

    acc_ref[...] += jnp.dot(x_ref[...], w1_ref[...],
                            preferred_element_type=jnp.float32)

    @pl.when(k == pl.num_programs(0) - 1)
    def _():
        h = jnp.maximum(acc_ref[...] + b1_ref[...], 0.0)          # fc1 + relu
        o_ref[...] = (jnp.dot(h, w2_ref[...],
                              preferred_element_type=jnp.float32)
                      + b2_ref[...]).astype(o_ref.dtype)          # fc2


def mlp_head(x, w1, b1, w2, b2, *, tk=9216):
    # tk=9216 -> 8 grid steps, w1 tile = 4.5 MB per buffer (double-buffered: 9 MB).
    B, K = x.shape
    assert K % tk == 0
    return pl.pallas_call(
        mlp_kernel,
        out_shape=jax.ShapeDtypeStruct((B, NCLS), jnp.float32),
        grid_spec=pltpu.PrefetchScalarGridSpec(
            num_scalar_prefetch=0,
            grid=(K // tk,),
            in_specs=[
                pl.BlockSpec((B, tk), lambda k: (0, k)),
                pl.BlockSpec((tk, HID), lambda k: (k, 0)),
                pl.BlockSpec((1, HID), lambda k: (0, 0)),
                pl.BlockSpec((HID, NCLS), lambda k: (0, 0)),
                pl.BlockSpec((1, NCLS), lambda k: (0, 0)),
            ],
            out_specs=pl.BlockSpec((B, NCLS), lambda k: (0, 0)),
            scratch_shapes=[pltpu.VMEM((B, HID), jnp.float32)],
        ),
        compiler_params=pltpu.CompilerParams(
            dimension_semantics=("arbitrary",),
            vmem_limit_bytes=VMEM_LIMIT),
    )(x, w1, b1.reshape(1, HID), w2, b2.reshape(1, NCLS))


# ---------------------------------------------------------------------------
# Wrapper glue: im2col construction (layout plumbing only) + full forward
# ---------------------------------------------------------------------------
def build_im2col(x_nchw):
    """(B, 3, 100, 100) NCHW -> (B, 4, 75, 2304) pooling-parity im2col planes."""
    B = x_nchw.shape[0]
    planes = []
    for q in range(2):            # H parity of the pooled output
        for r in range(2):        # W parity of the pooled output
            taps = []
            for kh in range(KH):
                for kw in range(KW):
                    # conv output (2*hp + q, 2*wp + r) reads input row 2*hp + q + kh,
                    # col 2*wp + r + kw  ->  strided slice, 48 elements each axis.
                    taps.append(x_nchw[:, :,
                                       q + kh: q + kh + 2 * HP: 2,
                                       r + kw: r + kw + 2 * WP: 2])   # (B, 3, 48, 48)
            tap = jnp.stack(taps, axis=1)                 # (B, 25, 3, 48, 48)
            planes.append(tap.reshape(B, KPATCH, NPIX))   # k = kh*15 + kw*3 + c
    return jnp.stack(planes, axis=1)                      # (B, 4, 75, 2304)


def cnn_forward(x_nchw, params):
    wc, bc, w1, b1, w2, b2 = params
    B = x_nchw.shape[0]
    x_im2col = build_im2col(x_nchw)                        # (B, 4, 75, 2304)
    w_t = wc.reshape(KPATCH, COUT).T                       # (32, 75), tiny transform
    pooled = conv_pool(x_im2col, w_t, bc.reshape(COUT, 1)) # (B, 32, 2304)
    feat = pooled.reshape(B, FEAT)                         # free merge == torch view order
    return mlp_head(feat, w1, b1, w2, b2)                  # (B, 2)


def init_params(key):
    k1, k2, k3, k4, k5, k6 = jax.random.split(key, 6)
    wc = jax.random.normal(k1, (KH, KW, CIN, COUT), jnp.float32) / (CIN * KH * KW) ** 0.5
    bc = jax.random.normal(k2, (COUT,), jnp.float32) * 0.1
    w1 = jax.random.normal(k3, (FEAT, HID), jnp.float32) / FEAT ** 0.5
    b1 = jax.random.normal(k4, (HID,), jnp.float32) * 0.1
    w2 = jax.random.normal(k5, (HID, NCLS), jnp.float32) / HID ** 0.5
    b2 = jax.random.normal(k6, (NCLS,), jnp.float32) * 0.1
    return wc, bc, w1, b1, w2, b2


def reference(x_nchw, wc, bc, w1, b1, w2, b2):
    wc_oihw = jnp.transpose(wc, (3, 2, 0, 1))  # HWIO -> OIHW
    y = jax.lax.conv_general_dilated(
        x_nchw, wc_oihw, window_strides=(1, 1), padding='VALID',
        dimension_numbers=('NCHW', 'OIHW', 'NCHW'))
    y = jnp.maximum(y + bc[None, :, None, None], 0.0)
    y = jax.lax.reduce_window(y, -jnp.inf, jax.lax.max,
                              (1, 1, 2, 2), (1, 1, 2, 2), 'VALID')
    f = y.reshape(y.shape[0], -1)
    h = jnp.maximum(f @ w1 + b1, 0.0)
    return h @ w2 + b2


if __name__ == "__main__":
    key = jax.random.PRNGKey(0)
    kx, kp = jax.random.split(key)
    # 100x100 input is implied by fc1 = 32*48*48.
    x = jax.random.normal(kx, (2, CIN, HIN, WIN), jnp.float32)  # (B, 3, 100, 100) NCHW
    params = init_params(kp)

    out = jax.jit(cnn_forward)(x, params)
    out = jax.block_until_ready(out)
    assert out.shape == (2, NCLS) and out.dtype == jnp.float32

    ref = reference(x, *params)
    if not jnp.allclose(out, ref, rtol=1e-2, atol=1e-2):
        raise AssertionError(
            f"mismatch vs reference, max abs diff = {float(jnp.max(jnp.abs(out - ref)))}")

    print("KERNEL_OK")
</pallas_src>

<mosaic_0001>
module attributes {stable_mosaic.version = 11 : i64} {
  func.func @conv_pool_kernel(%arg0: i32, %arg1: memref<1x4x75x2304xf32, #tpu.memory_space<vmem>>, %arg2: memref<32x75xf32, #tpu.memory_space<vmem>>, %arg3: memref<32x1xf32, #tpu.memory_space<vmem>>, %arg4: memref<1x32x2304xf32, #tpu.memory_space<vmem>>) attributes {dimension_semantics = [#tpu.dimension_semantics<parallel>], iteration_bounds = array<i64: 2>, scalar_prefetch = 0 : i64, scratch_operands = 0 : i64, tpu.core_type = #tpu.core_type<tc>, window_params = [{transform_indices = @transform_0, window_bounds = array<i64: 1, 4, 75, 2304>}, {pipeline_mode = #tpu.pipeline_mode<synchronous>, transform_indices = @transform_1, window_bounds = array<i64: 32, 75>}, {pipeline_mode = #tpu.pipeline_mode<synchronous>, transform_indices = @transform_2, window_bounds = array<i64: 32, 1>}, {transform_indices = @transform_3, window_bounds = array<i64: 1, 32, 2304>}]} {
    %c0 = arith.constant 0 : index
    %c0_0 = arith.constant 0 : index
    %0 = vector.load %arg2[%c0, %c0_0] : memref<32x75xf32, #tpu.memory_space<vmem>>, vector<32x75xf32>
    %c0_1 = arith.constant 0 : index
    %c0_2 = arith.constant 0 : index
    %c0_3 = arith.constant 0 : index
    %c0_4 = arith.constant 0 : index
    %1 = vector.load %arg1[%c0_1, %c0_2, %c0_3, %c0_4] : memref<1x4x75x2304xf32, #tpu.memory_space<vmem>>, vector<1x1x75x2304xf32>
    %2 = vector.shape_cast %1 : vector<1x1x75x2304xf32> to vector<75x2304xf32>
    %cst = arith.constant dense<0.000000e+00> : vector<32x2304xf32>
    %3 = tpu.matmul %0, %2, %cst {dimension_numbers = #tpu.dot_dimension_numbers<[1], [0], [0], [1], [0, 0, 1, 1], [], []>} : vector<32x75xf32>, vector<75x2304xf32>, vector<32x2304xf32> -> vector<32x2304xf32>
    %c0_5 = arith.constant 0 : index
    %c1 = arith.constant 1 : index
    %c0_6 = arith.constant 0 : index
    %c0_7 = arith.constant 0 : index
    %4 = vector.load %arg1[%c0_5, %c1, %c0_6, %c0_7] : memref<1x4x75x2304xf32, #tpu.memory_space<vmem>>, vector<1x1x75x2304xf32>
    %5 = vector.shape_cast %4 : vector<1x1x75x2304xf32> to vector<75x2304xf32>
    %cst_8 = arith.constant dense<0.000000e+00> : vector<32x2304xf32>
    %6 = tpu.matmul %0, %5, %cst_8 {dimension_numbers = #tpu.dot_dimension_numbers<[1], [0], [0], [1], [0, 0, 1, 1], [], []>} : vector<32x75xf32>, vector<75x2304xf32>, vector<32x2304xf32> -> vector<32x2304xf32>
    %7 = arith.maximumf %3, %6 : vector<32x2304xf32>
    %c0_9 = arith.constant 0 : index
    %c2 = arith.constant 2 : index
    %c0_10 = arith.constant 0 : index
    %c0_11 = arith.constant 0 : index
    %8 = vector.load %arg1[%c0_9, %c2, %c0_10, %c0_11] : memref<1x4x75x2304xf32, #tpu.memory_space<vmem>>, vector<1x1x75x2304xf32>
    %9 = vector.shape_cast %8 : vector<1x1x75x2304xf32> to vector<75x2304xf32>
    %cst_12 = arith.constant dense<0.000000e+00> : vector<32x2304xf32>
    %10 = tpu.matmul %0, %9, %cst_12 {dimension_numbers = #tpu.dot_dimension_numbers<[1], [0], [0], [1], [0, 0, 1, 1], [], []>} : vector<32x75xf32>, vector<75x2304xf32>, vector<32x2304xf32> -> vector<32x2304xf32>
    %c0_13 = arith.constant 0 : index
    %c3 = arith.constant 3 : index
    %c0_14 = arith.constant 0 : index
    %c0_15 = arith.constant 0 : index
    %11 = vector.load %arg1[%c0_13, %c3, %c0_14, %c0_15] : memref<1x4x75x2304xf32, #tpu.memory_space<vmem>>, vector<1x1x75x2304xf32>
    %12 = vector.shape_cast %11 : vector<1x1x75x2304xf32> to vector<75x2304xf32>
    %cst_16 = arith.constant dense<0.000000e+00> : vector<32x2304xf32>
    %13 = tpu.matmul %0, %12, %cst_16 {dimension_numbers = #tpu.dot_dimension_numbers<[1], [0], [0], [1], [0, 0, 1, 1], [], []>} : vector<32x75xf32>, vector<75x2304xf32>, vector<32x2304xf32> -> vector<32x2304xf32>
    %14 = arith.maximumf %10, %13 : vector<32x2304xf32>
    %15 = arith.maximumf %7, %14 : vector<32x2304xf32>
    %c0_17 = arith.constant 0 : index
    %c0_18 = arith.constant 0 : index
    %16 = vector.load %arg3[%c0_17, %c0_18] : memref<32x1xf32, #tpu.memory_space<vmem>>, vector<32x1xf32>
    %17 = vector.broadcast %16 : vector<32x1xf32> to vector<32x2304xf32>
    %18 = arith.addf %15, %17 : vector<32x2304xf32>
    %cst_19 = arith.constant 0.000000e+00 : f32
    %19 = vector.broadcast %cst_19 : f32 to vector<32x2304xf32>
    %20 = arith.maximumf %18, %19 : vector<32x2304xf32>
    %c0_20 = arith.constant 0 : index
    %c0_21 = arith.constant 0 : index
    %c0_22 = arith.constant 0 : index
    %21 = vector.load %arg4[%c0_20, %c0_21, %c0_22] : memref<1x32x2304xf32, #tpu.memory_space<vmem>>, vector<1x32x2304xf32>
    %22 = vector.shape_cast %21 : vector<1x32x2304xf32> to vector<32x2304xf32>
    %23 = vector.shape_cast %20 : vector<32x2304xf32> to vector<1x32x2304xf32>
    tpu.vector_store %arg4[%c0_20, %c0_21, %c0_22], %23 {strides = array<i32>} : memref<1x32x2304xf32, #tpu.memory_space<vmem>>, vector<1x32x2304xf32>,
    return
  }
  func.func @transform_0(%arg0: i32) -> (i32, i32, i32, i32) {
    %c0_i32 = arith.constant 0 : i32
    %c0_i32_0 = arith.constant 0 : i32
    %c0_i32_1 = arith.constant 0 : i32
    %c0_i32_2 = arith.constant 0 : i32
    return %arg0, %c0_i32, %c0_i32_0, %c0_i32_1 : i32, i32, i32, i32
  }
  func.func @transform_1(%arg0: i32) -> (i32, i32) {
    %c0_i32 = arith.constant 0 : i32
    %c0_i32_0 = arith.constant 0 : i32
    %c0_i32_1 = arith.constant 0 : i32
    return %c0_i32, %c0_i32_0 : i32, i32
  }
  func.func @transform_2(%arg0: i32) -> (i32, i32) {
    %c0_i32 = arith.constant 0 : i32
    %c0_i32_0 = arith.constant 0 : i32
    %c0_i32_1 = arith.constant 0 : i32
    return %c0_i32, %c0_i32_0 : i32, i32
  }
  func.func @transform_3(%arg0: i32) -> (i32, i32, i32) {
    %c0_i32 = arith.constant 0 : i32
    %c0_i32_0 = arith.constant 0 : i32
    %c0_i32_1 = arith.constant 0 : i32
    return %arg0, %c0_i32, %c0_i32_0 : i32, i32, i32
  }
}

module attributes {stable_mosaic.version = 11 : i64} {
  func.func @mlp_kernel(%arg0: i32, %arg1: memref<2x9216xf32, #tpu.memory_space<vmem>>, %arg2: memref<9216x128xf32, #tpu.memory_space<vmem>>, %arg3: memref<1x128xf32, #tpu.memory_space<vmem>>, %arg4: memref<128x2xf32, #tpu.memory_space<vmem>>, %arg5: memref<1x2xf32, #tpu.memory_space<vmem>>, %arg6: memref<2x2xf32, #tpu.memory_space<vmem>>, %arg7: memref<2x128xf32, #tpu.memory_space<vmem>>) attributes {dimension_semantics = [#tpu.dimension_semantics<arbitrary>], iteration_bounds = array<i64: 8>, scalar_prefetch = 0 : i64, scratch_operands = 1 : i64, tpu.core_type = #tpu.core_type<tc>, window_params = [{transform_indices = @transform_0, window_bounds = array<i64: 2, 9216>}, {transform_indices = @transform_1, window_bounds = array<i64: 9216, 128>}, {pipeline_mode = #tpu.pipeline_mode<synchronous>, transform_indices = @transform_2, window_bounds = array<i64: 1, 128>}, {pipeline_mode = #tpu.pipeline_mode<synchronous>, transform_indices = @transform_3, window_bounds = array<i64: 128, 2>}, {pipeline_mode = #tpu.pipeline_mode<synchronous>, transform_indices = @transform_4, window_bounds = array<i64: 1, 2>}, {pipeline_mode = #tpu.pipeline_mode<synchronous>, transform_indices = @transform_5, window_bounds = array<i64: 2, 2>}]} {
    %c0_i32 = arith.constant 0 : i32
    %0 = arith.cmpi eq, %arg0, %c0_i32 : i32
    %1 = arith.extui %0 : i1 to i32
    %c0_i32_0 = arith.constant 0 : i32
    %2 = arith.cmpi ne, %1, %c0_i32_0 : i32
    scf.if %2 {
      %cst_9 = arith.constant 0.000000e+00 : f32
      %12 = vector.broadcast %cst_9 : f32 to vector<2x128xf32>
      %c0_10 = arith.constant 0 : index
      %c0_11 = arith.constant 0 : index
      %13 = vector.load %arg7[%c0_10, %c0_11] : memref<2x128xf32, #tpu.memory_space<vmem>>, vector<2x128xf32>
      tpu.vector_store %arg7[%c0_10, %c0_11], %12 {strides = array<i32>} : memref<2x128xf32, #tpu.memory_space<vmem>>, vector<2x128xf32>,
    } else {
    }
    %c0 = arith.constant 0 : index
    %c0_1 = arith.constant 0 : index
    %3 = vector.load %arg7[%c0, %c0_1] : memref<2x128xf32, #tpu.memory_space<vmem>>, vector<2x128xf32>
    %c0_2 = arith.constant 0 : index
    %c0_3 = arith.constant 0 : index
    %4 = vector.load %arg1[%c0_2, %c0_3] : memref<2x9216xf32, #tpu.memory_space<vmem>>, vector<2x9216xf32>
    %c0_4 = arith.constant 0 : index
    %c0_5 = arith.constant 0 : index
    %5 = vector.load %arg2[%c0_4, %c0_5] : memref<9216x128xf32, #tpu.memory_space<vmem>>, vector<9216x128xf32>
    %cst = arith.constant dense<0.000000e+00> : vector<2x128xf32>
    %6 = tpu.matmul %4, %5, %cst {dimension_numbers = #tpu.dot_dimension_numbers<[1], [0], [0], [1], [0, 0, 1, 1], [], []>} : vector<2x9216xf32>, vector<9216x128xf32>, vector<2x128xf32> -> vector<2x128xf32>
    %7 = arith.addf %3, %6 : vector<2x128xf32>
    %c0_6 = arith.constant 0 : index
    %c0_7 = arith.constant 0 : index
    %8 = vector.load %arg7[%c0_6, %c0_7] : memref<2x128xf32, #tpu.memory_space<vmem>>, vector<2x128xf32>
    tpu.vector_store %arg7[%c0_6, %c0_7], %7 {strides = array<i32>} : memref<2x128xf32, #tpu.memory_space<vmem>>, vector<2x128xf32>,
    %c7_i32 = arith.constant 7 : i32
    %9 = arith.cmpi eq, %arg0, %c7_i32 : i32
    %10 = arith.extui %9 : i1 to i32
    %c0_i32_8 = arith.constant 0 : i32
    %11 = arith.cmpi ne, %10, %c0_i32_8 : i32
    scf.if %11 {
      %c0_9 = arith.constant 0 : index
      %c0_10 = arith.constant 0 : index
      %12 = vector.load %arg7[%c0_9, %c0_10] : memref<2x128xf32, #tpu.memory_space<vmem>>, vector<2x128xf32>
      %c0_11 = arith.constant 0 : index
      %c0_12 = arith.constant 0 : index
      %13 = vector.load %arg3[%c0_11, %c0_12] : memref<1x128xf32, #tpu.memory_space<vmem>>, vector<1x128xf32>
      %14 = vector.broadcast %13 : vector<1x128xf32> to vector<2x128xf32>
      %15 = arith.addf %12, %14 : vector<2x128xf32>
      %cst_13 = arith.constant 0.000000e+00 : f32
      %16 = vector.broadcast %cst_13 : f32 to vector<2x128xf32>
      %17 = arith.maximumf %15, %16 : vector<2x128xf32>
      %c0_14 = arith.constant 0 : index
      %c0_15 = arith.constant 0 : index
      %18 = vector.load %arg4[%c0_14, %c0_15] : memref<128x2xf32, #tpu.memory_space<vmem>>, vector<128x2xf32>
      %cst_16 = arith.constant dense<0.000000e+00> : vector<2x2xf32>
      %19 = tpu.matmul %17, %18, %cst_16 {dimension_numbers = #tpu.dot_dimension_numbers<[1], [0], [0], [1], [0, 0, 1, 1], [], []>} : vector<2x128xf32>, vector<128x2xf32>, vector<2x2xf32> -> vector<2x2xf32>
      %c0_17 = arith.constant 0 : index
      %c0_18 = arith.constant 0 : index
      %20 = vector.load %arg5[%c0_17, %c0_18] : memref<1x2xf32, #tpu.memory_space<vmem>>, vector<1x2xf32>
      %21 = vector.broadcast %20 : vector<1x2xf32> to vector<2x2xf32>
      %22 = arith.addf %19, %21 : vector<2x2xf32>
      %c0_19 = arith.constant 0 : index
      %c0_20 = arith.constant 0 : index
      %23 = vector.load %arg6[%c0_19, %c0_20] : memref<2x2xf32, #tpu.memory_space<vmem>>, vector<2x2xf32>
      tpu.vector_store %arg6[%c0_19, %c0_20], %22 {strides = array<i32>} : memref<2x2xf32, #tpu.memory_space<vmem>>, vector<2x2xf32>,
    } else {
    }
    return
  }
  func.func @transform_0(%arg0: i32) -> (i32, i32) {
    %c0_i32 = arith.constant 0 : i32
    %c0_i32_0 = arith.constant 0 : i32
    return %c0_i32, %arg0 : i32, i32
  }
  func.func @transform_1(%arg0: i32) -> (i32, i32) {
    %c0_i32 = arith.constant 0 : i32
    %c0_i32_0 = arith.constant 0 : i32
    return %arg0, %c0_i32 : i32, i32
  }
  func.func @transform_2(%arg0: i32) -> (i32, i32) {
    %c0_i32 = arith.constant 0 : i32
    %c0_i32_0 = arith.constant 0 : i32
    %c0_i32_1 = arith.constant 0 : i32
    return %c0_i32, %c0_i32_0 : i32, i32
  }
  func.func @transform_3(%arg0: i32) -> (i32, i32) {
    %c0_i32 = arith.constant 0 : i32
    %c0_i32_0 = arith.constant 0 : i32
    %c0_i32_1 = arith.constant 0 : i32
    return %c0_i32, %c0_i32_0 : i32, i32
  }
  func.func @transform_4(%arg0: i32) -> (i32, i32) {
    %c0_i32 = arith.constant 0 : i32
    %c0_i32_0 = arith.constant 0 : i32
    %c0_i32_1 = arith.constant 0 : i32
    return %c0_i32, %c0_i32_0 : i32, i32
  }
  func.func @transform_5(%arg0: i32) -> (i32, i32) {
    %c0_i32 = arith.constant 0 : i32
    %c0_i32_0 = arith.constant 0 : i32
    %c0_i32_1 = arith.constant 0 : i32
    return %c0_i32, %c0_i32_0 : i32, i32
  }
}

</mosaic_0001>

<bundles_post_ra>
// kernel: cnn_forward.2
= control target key start
LH: loop header
LB: loop body
LE: loop exit
PB: predicated region body
PF: predicated region fallthrough
CT: control target
= control target key end

     0   :  { %s6458_s12 = smov 0   ;;  %s8877_s0 = inlined_call_operand.vmem [shape: f32[2,4,75,2304], index: 0, kind: input, shape index: {}]   ;;  %s8878_s1 = inlined_call_operand.vmem [shape: f32[32,75], index: 1, kind: input, shape index: {}]   ;;  %s8879_s2 = inlined_call_operand.vmem [shape: f32[32,1], index: 2, kind: input, shape index: {}]   ;;  %s8880_s3 = inlined_call_operand.vmem [shape: f32[2,32,2304], index: 3, kind: output, shape index: {}]  }
   0x1 LB: > { %s4843_s13 = sadd.s32 4294967295, %s6433_s12   ;;  %p4847_p0 = scmp.ge.s32.totalorder %s6433_s12, 1  ;;  %s6433_s12 = sphi %s6458_s12, %s13_s12  }
   0x2   : > { %p137_p1 = scmp.lt.s32.totalorder %s6433_s12, 3 }
   0x4   : > { %p138_p2 = pnand %p4847_p0, %p137_p1 }
   0x6   : > { %141 = sbr.rel (%p138_p2) target bundleno = 622 (0x26e), region = 32 }
   0xd   : > { %p161_p3 = scmp.lt.s32.totalorder %s4843_s13, 1  ;;  %v8881_v0 = vmov 0.0   ;;  %vm368_vm0 = vcmask 1042432   ;;  %vm6436_vm1 = vmmov 1   ;;  %vm355_vm3 = vcmask 613376  }
   0xe   : > { %487 = vmatprep.mubr.f32.mxu0 %v8881_v0  ;;  %576 = vmatprep.mubr.f32.mxu1 %v8881_v0  ;;  %vm6512_vm2 = vmpackc.low %vm368_vm0, %vm6436_vm1 }
   0xf   : > { %s9444_s13 = smov (!%p161_p3, %s4843_s13), 1 }
  0x10   : > { %s6400_s14 = smul.u32 5760, %s9444_s13 }
  0x11   : > { %s6401_s6 = smul.u32 576, %s9444_s13 }
  0x12   : > { %s6474_s17 = scalar_lea.vmem %s8877_s0, %s6400_s14 }
  0x13   : > { %v176_v1 = vld [vmem:[%s6474_s17 + $0x8] sm:$0xff]  ;;  %v194_v2 = vld [vmem:[%s6474_s17 + $0x98] sm:$0xff]  ;;  %v175_v6 = vld [vmem:[%s6474_s17] sm:$0xff]  ;;  %s8432_s9 = scalar_lea.vmem %s8880_s3, %s6401_s6 }
  0x14   : > { %v178_v3 = vld [vmem:[%s6474_s17 + $0x18] sm:$0xff]  ;;  %v5608_v4 = vpack.c.bf16 %v194_v2, %v176_v1  ;;  %v196_v5 = vld [vmem:[%s6474_s17 + $0xa8] sm:$0xff]  ;;  %v193_v7 = vld [vmem:[%s6474_s17 + $0x90] sm:$0xff] }
  0x15   : > { %v5630_v8 = vpack.c.bf16 %v196_v5, %v178_v3  ;;  %v5610_v9 = vpack.c.bf16 %v193_v7, %v175_v6  ;;  %v177_v10 = vld [vmem:[%s6474_s17 + $0x10] sm:$0xff]  ;;  %v195_v11 = vld [vmem:[%s6474_s17 + $0xa0] sm:$0xff]  ;;  %v212_v12 = vld [vmem:[%s6474_s17 + $0x128] sm:$0xff] }
  0x16   : > { %5609 = vmatprep.subr.bf16.mxu0 %v5608_v4  ;;  %v5632_v13 = vpack.c.bf16 %v195_v11, %v177_v10  ;;  %v230_v14 = vld [vmem:[%s6474_s17 + $0x1b8] sm:$0xff]  ;;  %v232_v16 = vld [vmem:[%s6474_s17 + $0x1c8] sm:$0xff]  ;;  %v211_v19 = vld [vmem:[%s6474_s17 + $0x120] sm:$0xff] }
  0x17   : > { %v214_v15 = vld [vmem:[%s6474_s17 + $0x138] sm:$0xff]  ;;  %5631 = vmatprep.subr.bf16.mxu1 %v5630_v8  ;;  %5611 = vmatpush1.bf16.msra.mxu0 %v5610_v9  ;;  %v5612_v17 = vpack.c.bf16 %v230_v14, %v212_v12  ;;  %v229_v20 = vld [vmem:[%s6474_s17 + $0x1b0] sm:$0xff]  ;;  %v231_v23 = vld [vmem:[%s6474_s17 + $0x1c0] sm:$0xff] }
  0x18   : > { %v5634_v18 = vpack.c.bf16 %v232_v16, %v214_v15  ;;  %v213_v21 = vld [vmem:[%s6474_s17 + $0x130] sm:$0xff]  ;;  %5633 = vmatpush1.bf16.msra.mxu1 %v5632_v13  ;;  %v5614_v22 = vpack.c.bf16 %v229_v20, %v211_v19  ;;  %v248_v24 = vld [vmem:[%s6474_s17 + $0x248] sm:$0xff]  ;;  %v266_v25 = vld [vmem:[%s6474_s17 + $0x2d8] sm:$0xff] }
  0x19   : > { %5613 = vmatprep.subr.bf16.mxu0 %v5612_v17  ;;  %v5636_v26 = vpack.c.bf16 %v231_v23, %v213_v21  ;;  %v5616_v27 = vpack.c.bf16 %v266_v25, %v248_v24  ;;  %v250_v28 = vld [vmem:[%s6474_s17 + $0x258] sm:$0xff]  ;;  %v268_v29 = vld [vmem:[%s6474_s17 + $0x2e8] sm:$0xff]  ;;  %v247_v30 = vld [vmem:[%s6474_s17 + $0x240] sm:$0xff] }
  0x1a   : > { %5635 = vmatprep.subr.bf16.mxu1 %v5634_v18  ;;  %v5638_v31 = vpack.c.bf16 %v268_v29, %v250_v28  ;;  %v265_v32 = vld [vmem:[%s6474_s17 + $0x2d0] sm:$0xff]  ;;  %v267_v34 = vld [vmem:[%s6474_s17 + $0x2e0] sm:$0xff]  ;;  %v284_v36 = vld [vmem:[%s6474_s17 + $0x368] sm:$0xff] }
  0x1b   : > { %v249_v33 = vld [vmem:[%s6474_s17 + $0x250] sm:$0xff]  ;;  %5615 = vmatpush1.bf16.msra.mxu0 %v5614_v22  ;;  %v5618_v35 = vpack.c.bf16 %v265_v32, %v247_v30  ;;  %v302_v37 = vld [vmem:[%s6474_s17 + $0x3f8] sm:$0xff]  ;;  %v304_v41 = vld [vmem:[%s6474_s17 + $0x408] sm:$0xff] }
  0x1c   : > { %v286_v38 = vld [vmem:[%s6474_s17 + $0x378] sm:$0xff]  ;;  %5637 = vmatpush1.bf16.msra.mxu1 %v5636_v26  ;;  %5617 = vmatprep.subr.bf16.mxu0 %v5616_v27  ;;  %v5640_v39 = vpack.c.bf16 %v267_v34, %v249_v33  ;;  %v5620_v40 = vpack.c.bf16 %v302_v37, %v284_v36  ;;  %v283_v42 = vld [vmem:[%s6474_s17 + $0x360] sm:$0xff]  ;;  %v301_v43 = vld [vmem:[%s6474_s17 + $0x3f0] sm:$0xff] }
  0x1d   : > { %5639 = vmatprep.subr.bf16.mxu1 %v5638_v31  ;;  %v5642_v44 = vpack.c.bf16 %v304_v41, %v286_v38  ;;  %v285_v45 = vld [vmem:[%s6474_s17 + $0x370] sm:$0xff]  ;;  %v303_v46 = vld [vmem:[%s6474_s17 + $0x400] sm:$0xff]  ;;  %v320_v47 = vld [vmem:[%s6474_s17 + $0x488] sm:$0xff]  ;;  %v5622_v51 = vpack.c.bf16 %v301_v43, %v283_v42 }
  0x1e   : > { %v338_v48 = vld [vmem:[%s6474_s17 + $0x518] sm:$0x7]  ;;  %v340_v50 = vld [vmem:[%s6474_s17 + $0x528] sm:$0x7]  ;;  %v5644_v53 = vpack.c.bf16 %v303_v46, %v285_v45  ;;  %v319_v55 = vld [vmem:[%s6474_s17 + $0x480] sm:$0xff] }
  0x1f   : > { %v322_v49 = vld [vmem:[%s6474_s17 + $0x498] sm:$0xff]  ;;  %5619 = vmatpush1.bf16.msra.mxu0 %v5618_v35  ;;  %v5624_v54 = vpack.c.bf16 %v338_v48, %v320_v47  ;;  %v337_v56 = vld [vmem:[%s6474_s17 + $0x510] sm:$0x7]  ;;  %v339_v59 = vld [vmem:[%s6474_s17 + $0x520] sm:$0x7] }
  0x20   : > { %5641 = vmatpush1.bf16.msra.mxu1 %v5640_v39  ;;  %5621 = vmatprep.subr.bf16.mxu0 %v5620_v40  ;;  %v321_v57 = vld [vmem:[%s6474_s17 + $0x490] sm:$0xff]  ;;  %v5646_v58 = vpack.c.bf16 %v340_v50, %v322_v49  ;;  %v180_v60 = vld [vmem:[%s6474_s17 + $0x28] sm:$0xff]  ;;  %v198_v61 = vld [vmem:[%s6474_s17 + $0xb8] sm:$0xff]  ;;  %v5627_v1 = vpack.c.bf16 %v337_v56, %v319_v55 }
  0x21   : > { %5643 = vmatprep.subr.bf16.mxu1 %v5642_v44  ;;  %v182_v62 = vld [vmem:[%s6474_s17 + $0x38] sm:$0xff]  ;;  %v200_v63 = vld [vmem:[%s6474_s17 + $0xc8] sm:$0xff]  ;;  %v5649_v2 = vpack.c.bf16 %v339_v59, %v321_v57  ;;  %v5652_v3 = vpack.c.bf16 %v198_v61, %v180_v60  ;;  %v179_v4 = vld [vmem:[%s6474_s17 + $0x20] sm:$0xff] }
  0x22   : > { %v197_v5 = vld [vmem:[%s6474_s17 + $0xb0] sm:$0xff]  ;;  %v5674_v7 = vpack.c.bf16 %v200_v63, %v182_v62  ;;  %v199_v8 = vld [vmem:[%s6474_s17 + $0xc0] sm:$0xff]  ;;  %v216_v9 = vld [vmem:[%s6474_s17 + $0x148] sm:$0xff] }
  0x23   : > { %5623 = vmatpush1.bf16.msra.mxu0 %v5622_v51  ;;  %v181_v6 = vld [vmem:[%s6474_s17 + $0x30] sm:$0xff]  ;;  %v234_v10 = vld [vmem:[%s6474_s17 + $0x1d8] sm:$0xff]  ;;  %v236_v12 = vld [vmem:[%s6474_s17 + $0x1e8] sm:$0xff]  ;;  %v5654_v14 = vpack.c.bf16 %v197_v5, %v179_v4 }
  0x24   : > { %5645 = vmatpush1.bf16.msra.mxu1 %v5644_v53  ;;  %5626 = vmatprep.subr.msk.bf16.mxu0 %vm6512_vm2, %v5624_v54  ;;  %v218_v11 = vld [vmem:[%s6474_s17 + $0x158] sm:$0xff]  ;;  %v6541_v13 = vld [vmem:[%s8878_s1] sm:$0xff]  ;;  %v5676_v15 = vpack.c.bf16 %v199_v8, %v181_v6  ;;  %v5656_v16 = vpack.c.bf16 %v234_v10, %v216_v9  ;;  %v233_v18 = vld [vmem:[%s6474_s17 + $0x1d0] sm:$0xff] }
  0x25   : > { %5648 = vmatprep.subr.msk.bf16.mxu1 %vm6512_vm2, %v5646_v58  ;;  %v215_v17 = vld [vmem:[%s6474_s17 + $0x140] sm:$0xff]  ;;  %v217_v19 = vld [vmem:[%s6474_s17 + $0x150] sm:$0xff]  ;;  %v5678_v20 = vpack.c.bf16 %v236_v12, %v218_v11  ;;  %v252_v22 = vld [vmem:[%s6474_s17 + $0x268] sm:$0xff] }
  0x26   : > { %v235_v21 = vld [vmem:[%s6474_s17 + $0x1e0] sm:$0xff]  ;;  %v270_v23 = vld [vmem:[%s6474_s17 + $0x2f8] sm:$0xff]  ;;  %v272_v25 = vld [vmem:[%s6474_s17 + $0x308] sm:$0xff]  ;;  %v5658_v26 = vpack.c.bf16 %v233_v18, %v215_v17 }
  0x27   : > { %5629 = vmatpush1.bf16.msk.msra.mxu0 %vm6512_vm2, %v5627_v1  ;;  %v254_v24 = vld [vmem:[%s6474_s17 + $0x278] sm:$0xff]  ;;  %v6560_v27 = vld [vmem:[%s8878_s1 + $0x8] sm:$0xff]  ;;  %v5680_v28 = vpack.c.bf16 %v235_v21, %v217_v19  ;;  %v5660_v29 = vpack.c.bf16 %v270_v23, %v252_v22  ;;  %v251_v30 = vld [vmem:[%s6474_s17 + $0x260] sm:$0xff] }
  0x28   : > { %5651 = vmatpush1.bf16.msk.msra.mxu1 %vm6512_vm2, %v5649_v2  ;;  %5653 = vmatprep.subr.bf16.mxu0 %v5652_v3  ;;  %v269_v31 = vld [vmem:[%s6474_s17 + $0x2f0] sm:$0xff]  ;;  %v5682_v33 = vpack.c.bf16 %v272_v25, %v254_v24  ;;  %v271_v34 = vld [vmem:[%s6474_s17 + $0x300] sm:$0xff]  ;;  %v288_v35 = vld [vmem:[%s6474_s17 + $0x388] sm:$0xff] }
  0x29   : > { %5675 = vmatprep.subr.bf16.mxu1 %v5674_v7  ;;  %v253_v32 = vld [vmem:[%s6474_s17 + $0x270] sm:$0xff]  ;;  %v306_v36 = vld [vmem:[%s6474_s17 + $0x418] sm:$0xff]  ;;  %v308_v38 = vld [vmem:[%s6474_s17 + $0x428] sm:$0xff]  ;;  %v5662_v39 = vpack.c.bf16 %v269_v31, %v251_v30 }
  0x2a   : > { %4852 = vmatmul.mubr.msk.f32.vlgmr.msra.gmra.mrb[0].mxu0 %vm355_vm3, %v6541_v13  ;;  %v290_v37 = vld [vmem:[%s6474_s17 + $0x398] sm:$0xff]  ;;  %v6579_v40 = vld [vmem:[%s8878_s1 + $0x10] sm:$0xff]  ;;  %v5684_v41 = vpack.c.bf16 %v271_v34, %v253_v32  ;;  %v5664_v42 = vpack.c.bf16 %v306_v36, %v288_v35  ;;  %v287_v43 = vld [vmem:[%s6474_s17 + $0x380] sm:$0xff] }
  0x2b   : > { %4858 = vmatmul.mubr.msk.f32.vlgmr.msra.gmra.mrb[0].mxu1 %vm355_vm3, %v6541_v13  ;;  %5655 = vmatpush1.bf16.msra.mxu0 %v5654_v14  ;;  %v305_v44 = vld [vmem:[%s6474_s17 + $0x410] sm:$0xff]  ;;  %v5686_v46 = vpack.c.bf16 %v308_v38, %v290_v37  ;;  %v307_v47 = vld [vmem:[%s6474_s17 + $0x420] sm:$0xff]  ;;  %v324_v48 = vld [vmem:[%s6474_s17 + $0x4a8] sm:$0xff] }
  0x2c   : > { %5677 = vmatpush1.bf16.msra.mxu1 %v5676_v15  ;;  %5657 = vmatprep.subr.bf16.mxu0 %v5656_v16  ;;  %v289_v45 = vld [vmem:[%s6474_s17 + $0x390] sm:$0xff]  ;;  %v342_v49 = vld [vmem:[%s6474_s17 + $0x538] sm:$0x7]  ;;  %v344_v51 = vld [vmem:[%s6474_s17 + $0x548] sm:$0x7]  ;;  %v5666_v53 = vpack.c.bf16 %v305_v44, %v287_v43 }
  0x2d   : > { %5679 = vmatprep.subr.bf16.mxu1 %v5678_v20  ;;  %493 = vmatprep.mubr.f32.mxu0 %v8881_v0  ;;  %v326_v50 = vld [vmem:[%s6474_s17 + $0x4b8] sm:$0xff]  ;;  %v5688_v55 = vpack.c.bf16 %v307_v47, %v289_v45  ;;  %v5668_v56 = vpack.c.bf16 %v342_v49, %v324_v48  ;;  %v323_v57 = vld [vmem:[%s6474_s17 + $0x4a0] sm:$0xff]  ;;  %v341_v58 = vld [vmem:[%s6474_s17 + $0x530] sm:$0x7] }
  0x2e   : > { %582 = vmatprep.mubr.f32.mxu1 %v8881_v0  ;;  %4853 = vmatmul.mubr.msk.f32.gmra.mrb[2].mxu0 %vm355_vm3, %v6560_v27  ;;  %v6598_v54 = vld [vmem:[%s8878_s1 + $0x18] sm:$0xff]  ;;  %v325_v59 = vld [vmem:[%s6474_s17 + $0x4b0] sm:$0xff]  ;;  %v5690_v60 = vpack.c.bf16 %v344_v51, %v326_v50  ;;  %v343_v61 = vld [vmem:[%s6474_s17 + $0x540] sm:$0x7]  ;;  %v5671_v3 = vpack.c.bf16 %v341_v58, %v323_v57 }
  0x2f   : > { %5659 = vmatpush1.bf16.msra.mxu0 %v5658_v26  ;;  %4859 = vmatmul.mubr.msk.f32.gmra.mrb[2].mxu1 %vm355_vm3, %v6560_v27  ;;  %v184_v62 = vld [vmem:[%s6474_s17 + $0x48] sm:$0xff]  ;;  %v202_v63 = vld [vmem:[%s6474_s17 + $0xd8] sm:$0xff]  ;;  %v5693_v4 = vpack.c.bf16 %v343_v61, %v325_v59  ;;  %v183_v6 = vld [vmem:[%s6474_s17 + $0x40] sm:$0xff] }
  0x30   : > { %5681 = vmatpush1.bf16.msra.mxu1 %v5680_v28  ;;  %5661 = vmatprep.subr.bf16.mxu0 %v5660_v29  ;;  %v186_v1 = vld [vmem:[%s6474_s17 + $0x58] sm:$0xff]  ;;  %v204_v2 = vld [vmem:[%s6474_s17 + $0xe8] sm:$0xff]  ;;  %v5696_v5 = vpack.c.bf16 %v202_v63, %v184_v62  ;;  %v201_v7 = vld [vmem:[%s6474_s17 + $0xd0] sm:$0xff] }
  0x31   : > { %5683 = vmatprep.subr.bf16.mxu1 %v5682_v33  ;;  %499 = vmatprep.mubr.f32.mxu0 %v8881_v0  ;;  %v185_v8 = vld [vmem:[%s6474_s17 + $0x50] sm:$0xff]  ;;  %v5718_v9 = vpack.c.bf16 %v204_v2, %v186_v1  ;;  %v203_v10 = vld [vmem:[%s6474_s17 + $0xe0] sm:$0xff]  ;;  %v220_v11 = vld [vmem:[%s6474_s17 + $0x168] sm:$0xff]  ;;  %v5698_v16 = vpack.c.bf16 %v201_v7, %v183_v6 }
  0x32   : > { %588 = vmatprep.mubr.f32.mxu1 %v8881_v0  ;;  %4854 = vmatmul.mubr.msk.f32.gmra.mrb[4].mxu0 %vm355_vm3, %v6579_v40  ;;  %v238_v12 = vld [vmem:[%s6474_s17 + $0x1f8] sm:$0xff]  ;;  %v240_v15 = vld [vmem:[%s6474_s17 + $0x208] sm:$0xff]  ;;  %v5720_v17 = vpack.c.bf16 %v203_v10, %v185_v8  ;;  %v219_v19 = vld [vmem:[%s6474_s17 + $0x160] sm:$0xff] }
  0x33   : > { %5663 = vmatpush1.bf16.msra.mxu0 %v5662_v39  ;;  %4860 = vmatmul.mubr.msk.f32.gmra.mrb[4].mxu1 %vm355_vm3, %v6579_v40  ;;  %v222_v14 = vld [vmem:[%s6474_s17 + $0x178] sm:$0xff]  ;;  %v5700_v18 = vpack.c.bf16 %v238_v12, %v220_v11  ;;  %v237_v20 = vld [vmem:[%s6474_s17 + $0x1f0] sm:$0xff]  ;;  %v239_v23 = vld [vmem:[%s6474_s17 + $0x200] sm:$0xff] }
  0x34   : > { %5685 = vmatpush1.bf16.msra.mxu1 %v5684_v41  ;;  %5665 = vmatprep.subr.bf16.mxu0 %v5664_v42  ;;  %v221_v21 = vld [vmem:[%s6474_s17 + $0x170] sm:$0xff]  ;;  %v5722_v22 = vpack.c.bf16 %v240_v15, %v222_v14  ;;  %v256_v24 = vld [vmem:[%s6474_s17 + $0x288] sm:$0xff]  ;;  %v274_v25 = vld [vmem:[%s6474_s17 + $0x318] sm:$0xff]  ;;  %v5702_v29 = vpack.c.bf16 %v237_v20, %v219_v19 }
  0x35   : > { %5687 = vmatprep.subr.bf16.mxu1 %v5686_v46  ;;  %505 = vmatprep.mubr.f32.mxu0 %v8881_v0  ;;  %v258_v26 = vld [vmem:[%s6474_s17 + $0x298] sm:$0xff]  ;;  %v276_v28 = vld [vmem:[%s6474_s17 + $0x328] sm:$0xff]  ;;  %v5724_v30 = vpack.c.bf16 %v239_v23, %v221_v21  ;;  %v5704_v31 = vpack.c.bf16 %v274_v25, %v256_v24  ;;  %v255_v32 = vld [vmem:[%s6474_s17 + $0x280] sm:$0xff] }
  0x36   : > { %594 = vmatprep.mubr.f32.mxu1 %v8881_v0  ;;  %4855 = vmatmul.mubr.msk.f32.gmra.mrb[6].mxu0 %vm355_vm3, %v6598_v54  ;;  %v273_v33 = vld [vmem:[%s6474_s17 + $0x310] sm:$0xff]  ;;  %v5726_v35 = vpack.c.bf16 %v276_v28, %v258_v26  ;;  %v275_v36 = vld [vmem:[%s6474_s17 + $0x320] sm:$0xff]  ;;  %v292_v37 = vld [vmem:[%s6474_s17 + $0x3a8] sm:$0xff] }
  0x37   : > { %5667 = vmatpush1.bf16.msra.mxu0 %v5666_v53  ;;  %4861 = vmatmul.mubr.msk.f32.gmra.mrb[6].mxu1 %vm355_vm3, %v6598_v54  ;;  %v257_v34 = vld [vmem:[%s6474_s17 + $0x290] sm:$0xff]  ;;  %v310_v38 = vld [vmem:[%s6474_s17 + $0x438] sm:$0xff]  ;;  %v312_v41 = vld [vmem:[%s6474_s17 + $0x448] sm:$0xff]  ;;  %v5706_v42 = vpack.c.bf16 %v273_v33, %v255_v32 }
  0x38   : > { %5689 = vmatpush1.bf16.msra.mxu1 %v5688_v55  ;;  %5670 = vmatprep.subr.msk.bf16.mxu0 %vm6512_vm2, %v5668_v56  ;;  %v294_v39 = vld [vmem:[%s6474_s17 + $0x3b8] sm:$0xff]  ;;  %v5728_v43 = vpack.c.bf16 %v275_v36, %v257_v34  ;;  %v5708_v44 = vpack.c.bf16 %v310_v38, %v292_v37  ;;  %v291_v45 = vld [vmem:[%s6474_s17 + $0x3a0] sm:$0xff]  ;;  %v309_v46 = vld [vmem:[%s6474_s17 + $0x430] sm:$0xff] }
  0x39   : > { %5692 = vmatprep.subr.msk.bf16.mxu1 %vm6512_vm2, %v5690_v60  ;;  %665 = vmatprep.mubr.f32.mxu0 %v8881_v0  ;;  %v293_v47 = vld [vmem:[%s6474_s17 + $0x3b0] sm:$0xff]  ;;  %v5730_v48 = vpack.c.bf16 %v312_v41, %v294_v39  ;;  %v311_v49 = vld [vmem:[%s6474_s17 + $0x440] sm:$0xff]  ;;  %v328_v50 = vld [vmem:[%s6474_s17 + $0x4c8] sm:$0xff]  ;;  %v5710_v56 = vpack.c.bf16 %v309_v46, %v291_v45 }
  0x3a   : > { %754 = vmatprep.mubr.f32.mxu1 %v8881_v0  ;;  %v346_v51 = vld [vmem:[%s6474_s17 + $0x558] sm:$0x7]  ;;  %v348_v55 = vld [vmem:[%s6474_s17 + $0x568] sm:$0x7]  ;;  %v5732_v57 = vpack.c.bf16 %v311_v49, %v293_v47  ;;  %v327_v59 = vld [vmem:[%s6474_s17 + $0x4c0] sm:$0xff] }
  0x3b   : > { %5673 = vmatpush1.bf16.msk.msra.mxu0 %vm6512_vm2, %v5671_v3  ;;  %v330_v53 = vld [vmem:[%s6474_s17 + $0x4d8] sm:$0xff]  ;;  %v5712_v58 = vpack.c.bf16 %v346_v51, %v328_v50  ;;  %v345_v60 = vld [vmem:[%s6474_s17 + $0x550] sm:$0x7]  ;;  %v347_v63 = vld [vmem:[%s6474_s17 + $0x560] sm:$0x7] }
  0x3c   : > { %5695 = vmatpush1.bf16.msk.msra.mxu1 %vm6512_vm2, %v5693_v4  ;;  %5697 = vmatprep.subr.bf16.mxu0 %v5696_v5  ;;  %v329_v61 = vld [vmem:[%s6474_s17 + $0x4d0] sm:$0xff]  ;;  %v5734_v62 = vpack.c.bf16 %v348_v55, %v330_v53  ;;  %v188_v1 = vld [vmem:[%s6474_s17 + $0x68] sm:$0xff]  ;;  %v206_v2 = vld [vmem:[%s6474_s17 + $0xf8] sm:$0xff]  ;;  %v5715_v5 = vpack.c.bf16 %v345_v60, %v327_v59 }
  0x3d   : > { %5719 = vmatprep.subr.bf16.mxu1 %v5718_v9  ;;  %v190_v3 = vld [vmem:[%s6474_s17 + $0x78] sm:$0xff]  ;;  %v208_v4 = vld [vmem:[%s6474_s17 + $0x108] sm:$0xff]  ;;  %v5737_v6 = vpack.c.bf16 %v347_v63, %v329_v61  ;;  %v5740_v7 = vpack.c.bf16 %v206_v2, %v188_v1  ;;  %v187_v8 = vld [vmem:[%s6474_s17 + $0x60] sm:$0xff] }
  0x3e   : > { %4864 = vmatmul.mubr.msk.f32.vlgmr.msra.gmra.mrb[8].mxu0 %vm355_vm3, %v6541_v13  ;;  %v205_v9 = vld [vmem:[%s6474_s17 + $0xf0] sm:$0xff]  ;;  %v5762_v11 = vpack.c.bf16 %v208_v4, %v190_v3  ;;  %v207_v12 = vld [vmem:[%s6474_s17 + $0x100] sm:$0xff]  ;;  %v224_v14 = vld [vmem:[%s6474_s17 + $0x188] sm:$0xff] }
  0x3f   : > { %4870 = vmatmul.mubr.msk.f32.vlgmr.msra.gmra.mrb[8].mxu1 %vm355_vm3, %v6541_v13  ;;  %5699 = vmatpush1.bf16.msra.mxu0 %v5698_v16  ;;  %v189_v10 = vld [vmem:[%s6474_s17 + $0x70] sm:$0xff]  ;;  %v242_v15 = vld [vmem:[%s6474_s17 + $0x218] sm:$0xff]  ;;  %v223_v21 = vld [vmem:[%s6474_s17 + $0x180] sm:$0xff] }
  0x40   : > { %5721 = vmatpush1.bf16.msra.mxu1 %v5720_v17  ;;  %5701 = vmatprep.subr.bf16.mxu0 %v5700_v18  ;;  %v226_v16 = vld [vmem:[%s6474_s17 + $0x198] sm:$0xff]  ;;  %v244_v17 = vld [vmem:[%s6474_s17 + $0x228] sm:$0xff]  ;;  %v5742_v18 = vpack.c.bf16 %v205_v9, %v187_v8  ;;  %v5764_v19 = vpack.c.bf16 %v207_v12, %v189_v10  ;;  %v5744_v20 = vpack.c.bf16 %v242_v15, %v224_v14  ;;  %v225_v23 = vld [vmem:[%s6474_s17 + $0x190] sm:$0xff] }
  0x41   : > { %5723 = vmatprep.subr.bf16.mxu1 %v5722_v22  ;;  %671 = vmatprep.mubr.f32.mxu0 %v8881_v0  ;;  %v241_v22 = vld [vmem:[%s6474_s17 + $0x210] sm:$0xff]  ;;  %v5766_v24 = vpack.c.bf16 %v244_v17, %v226_v16  ;;  %v243_v25 = vld [vmem:[%s6474_s17 + $0x220] sm:$0xff]  ;;  %v260_v26 = vld [vmem:[%s6474_s17 + $0x2a8] sm:$0xff] }
  0x42   : > { %760 = vmatprep.mubr.f32.mxu1 %v8881_v0  ;;  %4865 = vmatmul.mubr.msk.f32.gmra.mrb[10].mxu0 %vm355_vm3, %v6560_v27  ;;  %v278_v28 = vld [vmem:[%s6474_s17 + $0x338] sm:$0xff]  ;;  %v5768_v32 = vpack.c.bf16 %v243_v25, %v225_v23  ;;  %v259_v34 = vld [vmem:[%s6474_s17 + $0x2a0] sm:$0xff]  ;;  %v261_v36 = vld [vmem:[%s6474_s17 + $0x2b0] sm:$0xff] }
  0x43   : > { %5703 = vmatpush1.bf16.msra.mxu0 %v5702_v29  ;;  %4871 = vmatmul.mubr.msk.f32.gmra.mrb[10].mxu1 %vm355_vm3, %v6560_v27  ;;  %v262_v29 = vld [vmem:[%s6474_s17 + $0x2b8] sm:$0xff]  ;;  %v5748_v33 = vpack.c.bf16 %v278_v28, %v260_v26  ;;  %v279_v38 = vld [vmem:[%s6474_s17 + $0x340] sm:$0xff]  ;;  %v296_v39 = vld [vmem:[%s6474_s17 + $0x3c8] sm:$0xff] }
  0x44   : > { %5725 = vmatpush1.bf16.msra.mxu1 %v5724_v30  ;;  %5705 = vmatprep.subr.bf16.mxu0 %v5704_v31  ;;  %v280_v30 = vld [vmem:[%s6474_s17 + $0x348] sm:$0xff]  ;;  %v5746_v31 = vpack.c.bf16 %v241_v22, %v223_v21  ;;  %v314_v41 = vld [vmem:[%s6474_s17 + $0x458] sm:$0xff]  ;;  %v5772_v45 = vpack.c.bf16 %v279_v38, %v261_v36  ;;  %v295_v47 = vld [vmem:[%s6474_s17 + $0x3c0] sm:$0xff] }
  0x45   : > { %5727 = vmatprep.subr.bf16.mxu1 %v5726_v35  ;;  %677 = vmatprep.mubr.f32.mxu0 %v8881_v0  ;;  %v277_v35 = vld [vmem:[%s6474_s17 + $0x330] sm:$0xff]  ;;  %v5770_v37 = vpack.c.bf16 %v280_v30, %v262_v29  ;;  %v5752_v46 = vpack.c.bf16 %v314_v41, %v296_v39  ;;  %v315_v51 = vld [vmem:[%s6474_s17 + $0x460] sm:$0xff]  ;;  %v332_v53 = vld [vmem:[%s6474_s17 + $0x4e8] sm:$0xff] }
  0x46   : > { %766 = vmatprep.mubr.f32.mxu1 %v8881_v0  ;;  %4866 = vmatmul.mubr.msk.f32.gmra.mrb[12].mxu0 %vm355_vm3, %v6579_v40  ;;  %v297_v49 = vld [vmem:[%s6474_s17 + $0x3d0] sm:$0xff]  ;;  %v350_v55 = vld [vmem:[%s6474_s17 + $0x578] sm:$0x7]  ;;  %v331_v61 = vld [vmem:[%s6474_s17 + $0x4e0] sm:$0xff] }
  0x47   : > { %5707 = vmatpush1.bf16.msra.mxu0 %v5706_v42  ;;  %4872 = vmatmul.mubr.msk.f32.gmra.mrb[12].mxu1 %vm355_vm3, %v6579_v40  ;;  %v298_v42 = vld [vmem:[%s6474_s17 + $0x3d8] sm:$0xff]  ;;  %v5776_v59 = vpack.c.bf16 %v315_v51, %v297_v49  ;;  %v5756_v60 = vpack.c.bf16 %v350_v55, %v332_v53  ;;  %v333_v63 = vld [vmem:[%s6474_s17 + $0x4f0] sm:$0xff]  ;;  %v351_v2 = vld [vmem:[%s6474_s17 + $0x580] sm:$0x7] }
  0x48   : > { %5729 = vmatpush1.bf16.msra.mxu1 %v5728_v43  ;;  %5709 = vmatprep.subr.bf16.mxu0 %v5708_v44  ;;  %v316_v43 = vld [vmem:[%s6474_s17 + $0x468] sm:$0xff]  ;;  %v5750_v44 = vpack.c.bf16 %v277_v35, %v259_v34  ;;  %v210_v4 = vld [vmem:[%s6474_s17 + $0x118] sm:$0xff]  ;;  %v5781_v8 = vpack.c.bf16 %v351_v2, %v333_v63  ;;  %v191_v10 = vld [vmem:[%s6474_s17 + $0x80] sm:$0xff] }
  0x49   : > { %5731 = vmatprep.subr.bf16.mxu1 %v5730_v48  ;;  %683 = vmatprep.mubr.f32.mxu0 %v8881_v0  ;;  %v313_v48 = vld [vmem:[%s6474_s17 + $0x450] sm:$0xff]  ;;  %v5774_v50 = vpack.c.bf16 %v316_v43, %v298_v42  ;;  %v192_v3 = vld [vmem:[%s6474_s17 + $0x88] sm:$0xff]  ;;  %v4904_v12 = vld [vmem:[%s6474_s17 + $0x5a0] sm:$0xff] }
  0x4a   : > { %772 = vmatprep.mubr.f32.mxu1 %v8881_v0  ;;  %4867 = vmatmul.mubr.msk.f32.gmra.mrb[14].mxu0 %vm355_vm3, %v6598_v54  ;;  %v5784_v9 = vpack.c.bf16 %v210_v4, %v192_v3  ;;  %v4922_v15 = vld [vmem:[%s6474_s17 + $0x630] sm:$0xff]  ;;  %v228_v16 = vld [vmem:[%s6474_s17 + $0x1a8] sm:$0xff]  ;;  %v246_v17 = vld [vmem:[%s6474_s17 + $0x238] sm:$0xff] }
  0x4b   : > { %5711 = vmatpush1.bf16.msra.mxu0 %v5710_v56  ;;  %4873 = vmatmul.mubr.msk.f32.gmra.mrb[14].mxu1 %vm355_vm3, %v6598_v54  ;;  %v334_v56 = vld [vmem:[%s6474_s17 + $0x4f8] sm:$0xff]  ;;  %v5808_v21 = vpack.c.bf16 %v4922_v15, %v4904_v12  ;;  %v5788_v22 = vpack.c.bf16 %v246_v17, %v228_v16  ;;  %v227_v23 = vld [vmem:[%s6474_s17 + $0x1a0] sm:$0xff]  ;;  %v4958_v28 = vld [vmem:[%s6474_s17 + $0x750] sm:$0xff] }
  0x4c   : > { %5733 = vmatpush1.bf16.msra.mxu1 %v5732_v57  ;;  %5714 = vmatprep.subr.msk.bf16.mxu0 %vm6512_vm2, %v5712_v58  ;;  %v352_v57 = vld [vmem:[%s6474_s17 + $0x588] sm:$0x7]  ;;  %v5754_v58 = vpack.c.bf16 %v313_v48, %v295_v47  ;;  %v4940_v25 = vld [vmem:[%s6474_s17 + $0x6c0] sm:$0xff]  ;;  %v282_v30 = vld [vmem:[%s6474_s17 + $0x358] sm:$0xff] }
  0x4d   : > { %5736 = vmatprep.subr.msk.bf16.mxu1 %vm6512_vm2, %v5734_v62  ;;  %843 = vmatprep.mubr.f32.mxu0 %v8881_v0  ;;  %v349_v62 = vld [vmem:[%s6474_s17 + $0x570] sm:$0x7]  ;;  %v5778_v1 = vpack.c.bf16 %v352_v57, %v334_v56  ;;  %v264_v29 = vld [vmem:[%s6474_s17 + $0x2c8] sm:$0xff]  ;;  %v5812_v34 = vpack.c.bf16 %v4958_v28, %v4940_v25  ;;  %v263_v36 = vld [vmem:[%s6474_s17 + $0x2c0] sm:$0xff] }
  0x4e   : > { %932 = vmatprep.mubr.f32.mxu1 %v8881_v0  ;;  %v5792_v35 = vpack.c.bf16 %v282_v30, %v264_v29  ;;  %v4976_v38 = vld [vmem:[%s6474_s17 + $0x7e0] sm:$0xff]  ;;  %v4994_v41 = vld [vmem:[%s6474_s17 + $0x870] sm:$0xff]  ;;  %v300_v42 = vld [vmem:[%s6474_s17 + $0x3e8] sm:$0xff] }
  0x4f   : > { %5717 = vmatpush1.bf16.msk.msra.mxu0 %vm6512_vm2, %v5715_v5  ;;  %v4905_v5 = vld [vmem:[%s6474_s17 + $0x5a8] sm:$0xff]  ;;  %v318_v43 = vld [vmem:[%s6474_s17 + $0x478] sm:$0xff]  ;;  %v5816_v47 = vpack.c.bf16 %v4994_v41, %v4976_v38  ;;  %v299_v49 = vld [vmem:[%s6474_s17 + $0x3e0] sm:$0xff] }
  0x50   : > { %5739 = vmatpush1.bf16.msk.msra.mxu1 %vm6512_vm2, %v5737_v6  ;;  %5741 = vmatprep.subr.bf16.mxu0 %v5740_v7  ;;  %v4923_v6 = vld [vmem:[%s6474_s17 + $0x638] sm:$0xff]  ;;  %v5759_v7 = vpack.c.bf16 %v349_v62, %v331_v61  ;;  %v5796_v48 = vpack.c.bf16 %v318_v43, %v300_v42  ;;  %v5012_v51 = vld [vmem:[%s6474_s17 + $0x900] sm:$0xff]  ;;  %v5030_v55 = vld [vmem:[%s6474_s17 + $0x990] sm:$0xff] }
  0x51   : > { %5763 = vmatprep.subr.bf16.mxu1 %v5762_v11  ;;  %v209_v11 = vld [vmem:[%s6474_s17 + $0x110] sm:$0xff]  ;;  %v5806_v14 = vpack.c.bf16 %v4923_v6, %v4905_v5  ;;  %v336_v56 = vld [vmem:[%s6474_s17 + $0x508] sm:$0xff]  ;;  %v354_v57 = vld [vmem:[%s6474_s17 + $0x598] sm:$0x7]  ;;  %v5820_v61 = vpack.c.bf16 %v5030_v55, %v5012_v51 }
  0x52   : > { %4876 = vmatmul.mubr.msk.f32.vlgmr.msra.gmra.mrb[16].mxu0 %vm355_vm3, %v6541_v13  ;;  %v5800_v62 = vpack.c.bf16 %v354_v57, %v336_v56  ;;  %v335_v63 = vld [vmem:[%s6474_s17 + $0x500] sm:$0xff]  ;;  %v5066_v4 = vld [vmem:[%s6474_s17 + $0xab0] sm:$0x7]  ;;  %v4907_v5 = vld [vmem:[%s6474_s17 + $0x5b8] sm:$0xff] }
  0x53   : > { %4882 = vmatmul.mubr.msk.f32.vlgmr.msra.gmra.mrb[16].mxu1 %vm355_vm3, %v6541_v13  ;;  %5743 = vmatpush1.bf16.msra.mxu0 %v5742_v18  ;;  %v4941_v18 = vld [vmem:[%s6474_s17 + $0x6c8] sm:$0xff]  ;;  %v5048_v2 = vld [vmem:[%s6474_s17 + $0xa20] sm:$0xff]  ;;  %v4906_v12 = vld [vmem:[%s6474_s17 + $0x5b0] sm:$0xff] }
  0x54   : > { %5765 = vmatpush1.bf16.msra.mxu1 %v5764_v19  ;;  %5745 = vmatprep.subr.bf16.mxu0 %v5744_v20  ;;  %v4959_v19 = vld [vmem:[%s6474_s17 + $0x758] sm:$0xff]  ;;  %v5786_v20 = vpack.c.bf16 %v209_v11, %v191_v10  ;;  %v4925_v6 = vld [vmem:[%s6474_s17 + $0x648] sm:$0xff]  ;;  %v5825_v10 = vpack.c.bf16 %v5066_v4, %v5048_v2  ;;  %v4908_v16 = vld [vmem:[%s6474_s17 + $0x5c0] sm:$0xff] }
  0x55   : > { %5767 = vmatprep.subr.bf16.mxu1 %v5766_v24  ;;  %849 = vmatprep.mubr.f32.mxu0 %v8881_v0  ;;  %v245_v24 = vld [vmem:[%s6474_s17 + $0x230] sm:$0xff]  ;;  %v5810_v26 = vpack.c.bf16 %v4959_v19, %v4941_v18  ;;  %v5828_v11 = vpack.c.bf16 %v4925_v6, %v4907_v5  ;;  %v4943_v18 = vld [vmem:[%s6474_s17 + $0x6d8] sm:$0xff]  ;;  %v4961_v19 = vld [vmem:[%s6474_s17 + $0x768] sm:$0xff] }
  0x56   : > { %938 = vmatprep.mubr.f32.mxu1 %v8881_v0  ;;  %4877 = vmatmul.mubr.msk.f32.gmra.mrb[18].mxu0 %vm355_vm3, %v6560_v27  ;;  %v4926_v17 = vld [vmem:[%s6474_s17 + $0x650] sm:$0xff]  ;;  %v4960_v25 = vld [vmem:[%s6474_s17 + $0x760] sm:$0xff]  ;;  %v5051_v57 = vld [vmem:[%s6474_s17 + $0xa38] sm:$0xff] }
  0x57   : > { %5747 = vmatpush1.bf16.msra.mxu0 %v5746_v31  ;;  %4883 = vmatmul.mubr.msk.f32.gmra.mrb[18].mxu1 %vm355_vm3, %v6560_v27  ;;  %v4977_v31 = vld [vmem:[%s6474_s17 + $0x7e8] sm:$0xff]  ;;  %v4944_v29 = vld [vmem:[%s6474_s17 + $0x6e0] sm:$0xff]  ;;  %v4962_v30 = vld [vmem:[%s6474_s17 + $0x770] sm:$0xff] }
  0x58   : > { %5769 = vmatpush1.bf16.msra.mxu1 %v5768_v32  ;;  %5749 = vmatprep.subr.bf16.mxu0 %v5748_v33  ;;  %v4995_v32 = vld [vmem:[%s6474_s17 + $0x878] sm:$0xff]  ;;  %v5790_v33 = vpack.c.bf16 %v245_v24, %v227_v23  ;;  %v5852_v23 = vpack.c.bf16 %v4926_v17, %v4908_v16  ;;  %v4942_v24 = vld [vmem:[%s6474_s17 + $0x6d0] sm:$0xff]  ;;  %v4996_v38 = vld [vmem:[%s6474_s17 + $0x880] sm:$0xff] }
  0x59   : > { %5771 = vmatprep.subr.bf16.mxu1 %v5770_v37  ;;  %855 = vmatprep.mubr.f32.mxu0 %v8881_v0  ;;  %v281_v37 = vld [vmem:[%s6474_s17 + $0x350] sm:$0xff]  ;;  %v5814_v39 = vpack.c.bf16 %v4995_v32, %v4977_v31  ;;  %v4979_v31 = vld [vmem:[%s6474_s17 + $0x7f8] sm:$0xff]  ;;  %v4997_v32 = vld [vmem:[%s6474_s17 + $0x888] sm:$0xff] }
  0x5a   : > { %944 = vmatprep.mubr.f32.mxu1 %v8881_v0  ;;  %4878 = vmatmul.mubr.msk.f32.gmra.mrb[20].mxu0 %vm355_vm3, %v6579_v40  ;;  %v4980_v41 = vld [vmem:[%s6474_s17 + $0x800] sm:$0xff]  ;;  %v4998_v42 = vld [vmem:[%s6474_s17 + $0x890] sm:$0xff] }
  0x5b   : > { %5751 = vmatpush1.bf16.msra.mxu0 %v5750_v44  ;;  %4884 = vmatmul.mubr.msk.f32.gmra.mrb[20].mxu1 %vm355_vm3, %v6579_v40  ;;  %v5013_v44 = vld [vmem:[%s6474_s17 + $0x908] sm:$0xff]  ;;  %v5032_v51 = vld [vmem:[%s6474_s17 + $0x9a0] sm:$0xff]  ;;  %v5034_v56 = vld [vmem:[%s6474_s17 + $0x9b0] sm:$0xff] }
  0x5c   : > { %5773 = vmatpush1.bf16.msra.mxu1 %v5772_v45  ;;  %5753 = vmatprep.subr.bf16.mxu0 %v5752_v46  ;;  %v5031_v45 = vld [vmem:[%s6474_s17 + $0x998] sm:$0xff]  ;;  %v5794_v46 = vpack.c.bf16 %v281_v37, %v263_v36  ;;  %v5856_v36 = vpack.c.bf16 %v4962_v30, %v4944_v29  ;;  %v4978_v37 = vld [vmem:[%s6474_s17 + $0x7f0] sm:$0xff]  ;;  %v5052_v4 = vld [vmem:[%s6474_s17 + $0xa40] sm:$0xff] }
  0x5d   : > { %5775 = vmatprep.subr.bf16.mxu1 %v5774_v50  ;;  %861 = vmatprep.mubr.f32.mxu0 %v8881_v0  ;;  %v317_v50 = vld [vmem:[%s6474_s17 + $0x470] sm:$0xff]  ;;  %v5818_v53 = vpack.c.bf16 %v5031_v45, %v5013_v44  ;;  %v5015_v44 = vld [vmem:[%s6474_s17 + $0x918] sm:$0xff]  ;;  %v5033_v45 = vld [vmem:[%s6474_s17 + $0x9a8] sm:$0xff] }
  0x5e   : > { %950 = vmatprep.mubr.f32.mxu1 %v8881_v0  ;;  %4879 = vmatmul.mubr.msk.f32.gmra.mrb[22].mxu0 %vm355_vm3, %v6598_v54  ;;  %v5840_v55 = vpack.c.bf16 %v5033_v45, %v5015_v44  ;;  %v5050_v2 = vld [vmem:[%s6474_s17 + $0xa30] sm:$0xff]  ;;  %v4928_v16 = vld [vmem:[%s6474_s17 + $0x660] sm:$0xff]  ;;  %v5019_v45 = vld [vmem:[%s6474_s17 + $0x938] sm:$0xff] }
  0x5f   : > { %5755 = vmatpush1.bf16.msra.mxu0 %v5754_v58  ;;  %4885 = vmatmul.mubr.msk.f32.gmra.mrb[22].mxu1 %vm355_vm3, %v6598_v54  ;;  %v5049_v58 = vld [vmem:[%s6474_s17 + $0xa28] sm:$0xff]  ;;  %v5070_v6 = vld [vmem:[%s6474_s17 + $0xad0] sm:$0x7]  ;;  %v4948_v30 = vld [vmem:[%s6474_s17 + $0x700] sm:$0xff] }
  0x60   : > { %5777 = vmatpush1.bf16.msra.mxu1 %v5776_v59  ;;  %5758 = vmatprep.subr.msk.bf16.mxu0 %vm6512_vm2, %v5756_v60  ;;  %v5067_v59 = vld [vmem:[%s6474_s17 + $0xab8] sm:$0x7]  ;;  %v5798_v60 = vpack.c.bf16 %v317_v50, %v299_v49  ;;  %v5860_v49 = vpack.c.bf16 %v4998_v42, %v4980_v41  ;;  %v5014_v50 = vld [vmem:[%s6474_s17 + $0x910] sm:$0xff]  ;;  %v5000_v41 = vld [vmem:[%s6474_s17 + $0x8a0] sm:$0xff] }
  0x61   : > { %5780 = vmatprep.subr.msk.bf16.mxu1 %vm6512_vm2, %v5778_v1  ;;  %1021 = vmatprep.mubr.f32.mxu0 %v8881_v0  ;;  %v353_v1 = vld [vmem:[%s6474_s17 + $0x590] sm:$0x7]  ;;  %v5822_v3 = vpack.c.bf16 %v5067_v59, %v5049_v58  ;;  %v5069_v58 = vld [vmem:[%s6474_s17 + $0xac8] sm:$0x7] }
  0x62   : > { %1110 = vmatprep.mubr.f32.mxu1 %v8881_v0 }
  0x63   : > { %5761 = vmatpush1.bf16.msk.msra.mxu0 %vm6512_vm2, %v5759_v7  ;;  %v4909_v7 = vld [vmem:[%s6474_s17 + $0x5c8] sm:$0xff] }
  0x64   : > { %5783 = vmatpush1.bf16.msk.msra.mxu1 %vm6512_vm2, %v5781_v8  ;;  %5785 = vmatprep.subr.bf16.mxu0 %v5784_v9  ;;  %v4927_v8 = vld [vmem:[%s6474_s17 + $0x658] sm:$0xff]  ;;  %v5803_v9 = vpack.c.bf16 %v353_v1, %v335_v63  ;;  %v5844_v1 = vpack.c.bf16 %v5069_v58, %v5051_v57  ;;  %v5073_v58 = vld [vmem:[%s6474_s17 + $0xae8] sm:$0x7] }
  0x65   : > { %5807 = vmatprep.subr.bf16.mxu1 %v5806_v14  ;;  %v4924_v14 = vld [vmem:[%s6474_s17 + $0x640] sm:$0xff]  ;;  %v5850_v15 = vpack.c.bf16 %v4927_v8, %v4909_v7  ;;  %v4911_v7 = vld [vmem:[%s6474_s17 + $0x5d8] sm:$0xff]  ;;  %v4929_v8 = vld [vmem:[%s6474_s17 + $0x668] sm:$0xff] }
  0x66   : > { %4888 = vmatmul.mubr.msk.f32.vlgmr.msra.gmra.mrb[24].mxu0 %vm355_vm3, %v6541_v13  ;;  %v5055_v57 = vld [vmem:[%s6474_s17 + $0xa58] sm:$0xff] }
  0x67   : > { %4894 = vmatmul.mubr.msk.f32.vlgmr.msra.gmra.mrb[24].mxu1 %vm355_vm3, %v6541_v13  ;;  %5787 = vmatpush1.bf16.msra.mxu0 %v5786_v20  ;;  %v4945_v20 = vld [vmem:[%s6474_s17 + $0x6e8] sm:$0xff] }
  0x68   : > { %5809 = vmatpush1.bf16.msra.mxu1 %v5808_v21  ;;  %5789 = vmatprep.subr.bf16.mxu0 %v5788_v22  ;;  %v4963_v21 = vld [vmem:[%s6474_s17 + $0x778] sm:$0xff]  ;;  %v5830_v22 = vpack.c.bf16 %v4924_v14, %v4906_v12  ;;  %v5869_v12 = vpack.c.bf16 %v5070_v6, %v5052_v4  ;;  %v5872_v14 = vpack.c.bf16 %v4929_v8, %v4911_v7  ;;  %v5056_v4 = vld [vmem:[%s6474_s17 + $0xa60] sm:$0xff]  ;;  %v5074_v6 = vld [vmem:[%s6474_s17 + $0xaf0] sm:$0x7] }
  0x69   : > { %5811 = vmatprep.subr.bf16.mxu1 %v5810_v26  ;;  %1027 = vmatprep.mubr.f32.mxu0 %v8881_v0  ;;  %v5832_v26 = vpack.c.bf16 %v4961_v19, %v4943_v18  ;;  %v5854_v28 = vpack.c.bf16 %v4963_v21, %v4945_v20  ;;  %v4912_v18 = vld [vmem:[%s6474_s17 + $0x5e0] sm:$0xff]  ;;  %v4930_v19 = vld [vmem:[%s6474_s17 + $0x670] sm:$0xff]  ;;  %v4947_v20 = vld [vmem:[%s6474_s17 + $0x6f8] sm:$0xff] }
  0x6a   : > { %1116 = vmatprep.mubr.f32.mxu1 %v8881_v0  ;;  %4889 = vmatmul.mubr.msk.f32.gmra.mrb[26].mxu0 %vm355_vm3, %v6560_v27  ;;  %v4965_v21 = vld [vmem:[%s6474_s17 + $0x788] sm:$0xff] }
  0x6b   : > { %5791 = vmatpush1.bf16.msra.mxu0 %v5790_v33  ;;  %4895 = vmatmul.mubr.msk.f32.gmra.mrb[26].mxu1 %vm355_vm3, %v6560_v27  ;;  %v5834_v33 = vpack.c.bf16 %v4960_v25, %v4942_v24  ;;  %v4967_v24 = vld [vmem:[%s6474_s17 + $0x798] sm:$0xff]  ;;  %v5896_v25 = vpack.c.bf16 %v4930_v19, %v4912_v18  ;;  %v5876_v29 = vpack.c.bf16 %v4965_v21, %v4947_v20  ;;  %v4933_v7 = vld [vmem:[%s6474_s17 + $0x688] sm:$0xff] }
  0x6c   : > { %5813 = vmatpush1.bf16.msra.mxu1 %v5812_v34  ;;  %5793 = vmatprep.subr.bf16.mxu0 %v5792_v35  ;;  %v4981_v34 = vld [vmem:[%s6474_s17 + $0x808] sm:$0xff]  ;;  %v4999_v35 = vld [vmem:[%s6474_s17 + $0x898] sm:$0xff] }
  0x6d   : > { %5815 = vmatprep.subr.bf16.mxu1 %v5814_v39  ;;  %1033 = vmatprep.mubr.f32.mxu0 %v8881_v0  ;;  %v5836_v39 = vpack.c.bf16 %v4997_v32, %v4979_v31  ;;  %v5858_v43 = vpack.c.bf16 %v4999_v35, %v4981_v34  ;;  %v4966_v31 = vld [vmem:[%s6474_s17 + $0x790] sm:$0xff]  ;;  %v5001_v34 = vld [vmem:[%s6474_s17 + $0x8a8] sm:$0xff]  ;;  %v4951_v18 = vld [vmem:[%s6474_s17 + $0x718] sm:$0xff] }
  0x6e   : > { %1122 = vmatprep.mubr.f32.mxu1 %v8881_v0  ;;  %4890 = vmatmul.mubr.msk.f32.gmra.mrb[28].mxu0 %vm355_vm3, %v6579_v40  ;;  %v4917_v8 = vld [vmem:[%s6474_s17 + $0x608] sm:$0xff] }
  0x6f   : > { %5795 = vmatpush1.bf16.msra.mxu0 %v5794_v46  ;;  %4896 = vmatmul.mubr.msk.f32.gmra.mrb[28].mxu1 %vm355_vm3, %v6579_v40  ;;  %v5838_v46 = vpack.c.bf16 %v4996_v38, %v4978_v37  ;;  %v5003_v37 = vld [vmem:[%s6474_s17 + $0x8b8] sm:$0xff]  ;;  %v5900_v38 = vpack.c.bf16 %v4966_v31, %v4948_v30  ;;  %v4969_v19 = vld [vmem:[%s6474_s17 + $0x7a8] sm:$0xff]  ;;  %v6999_v30 = vld [vmem:[%s8878_s1] sm:$0xff] }
  0x70   : > { %5817 = vmatpush1.bf16.msra.mxu1 %v5816_v47  ;;  %5797 = vmatprep.subr.bf16.mxu0 %v5796_v48  ;;  %v5017_v47 = vld [vmem:[%s6474_s17 + $0x928] sm:$0xff]  ;;  %v5035_v48 = vld [vmem:[%s6474_s17 + $0x9b8] sm:$0xff] }
  0x71   : > { %5819 = vmatprep.subr.bf16.mxu1 %v5818_v53  ;;  %1039 = vmatprep.mubr.f32.mxu0 %v8881_v0  ;;  %v5016_v53 = vld [vmem:[%s6474_s17 + $0x920] sm:$0xff]  ;;  %v5862_v59 = vpack.c.bf16 %v5035_v48, %v5017_v47  ;;  %v5021_v48 = vld [vmem:[%s6474_s17 + $0x948] sm:$0xff] }
  0x72   : > { %1128 = vmatprep.mubr.f32.mxu1 %v8881_v0  ;;  %4891 = vmatmul.mubr.msk.f32.gmra.mrb[30].mxu0 %vm355_vm3, %v6598_v54  ;;  %v5864_v63 = vpack.c.bf16 %v5034_v56, %v5016_v53  ;;  %v5036_v53 = vld [vmem:[%s6474_s17 + $0x9c0] sm:$0xff]  ;;  %v4953_v21 = vld [vmem:[%s6474_s17 + $0x728] sm:$0xff] }
  0x73   : > { %5799 = vmatpush1.bf16.msra.mxu0 %v5798_v60  ;;  %4897 = vmatmul.mubr.msk.f32.gmra.mrb[30].mxu1 %vm355_vm3, %v6598_v54  ;;  %v5053_v60 = vld [vmem:[%s6474_s17 + $0xa48] sm:$0xff] }
  0x74   : > { %5821 = vmatpush1.bf16.msra.mxu1 %v5820_v61  ;;  %5802 = vmatprep.subr.msk.bf16.mxu0 %vm6512_vm2, %v5800_v62  ;;  %v5071_v61 = vld [vmem:[%s6474_s17 + $0xad8] sm:$0x7]  ;;  %v5842_v62 = vpack.c.bf16 %v5032_v51, %v5014_v50  ;;  %v5018_v51 = vld [vmem:[%s6474_s17 + $0x930] sm:$0xff] }
  0x75   : > { %5824 = vmatprep.subr.msk.bf16.mxu1 %vm6512_vm2, %v5822_v3  ;;  %1199 = vmatprep.mubr.f32.mxu0 %v8881_v0  ;;  %v5068_v3 = vld [vmem:[%s6474_s17 + $0xac0] sm:$0x7]  ;;  %v5866_v5 = vpack.c.bf16 %v5071_v61, %v5053_v60  ;;  %v5057_v60 = vld [vmem:[%s6474_s17 + $0xa68] sm:$0xff]  ;;  %v5075_v61 = vld [vmem:[%s6474_s17 + $0xaf8] sm:$0x7] }
  0x76   : > { %1523 = vmatprep.mubr.f32.mxu1 %v8881_v0 }
  0x77   : > { %5805 = vmatpush1.bf16.msk.msra.mxu0 %vm6512_vm2, %v5803_v9  ;;  %v4913_v9 = vld [vmem:[%s6474_s17 + $0x5e8] sm:$0xff] }
  0x78   : > { %5827 = vmatpush1.bf16.msk.msra.mxu1 %vm6512_vm2, %v5825_v10  ;;  %5829 = vmatprep.subr.bf16.mxu0 %v5828_v11  ;;  %v4931_v10 = vld [vmem:[%s6474_s17 + $0x678] sm:$0xff]  ;;  %v5847_v11 = vpack.c.bf16 %v5068_v3, %v5050_v2  ;;  %v5054_v2 = vld [vmem:[%s6474_s17 + $0xa50] sm:$0xff]  ;;  %v5072_v3 = vld [vmem:[%s6474_s17 + $0xae0] sm:$0x7] }
  0x79   : > { %5851 = vmatprep.subr.bf16.mxu1 %v5850_v15  ;;  %v4910_v15 = vld [vmem:[%s6474_s17 + $0x5d0] sm:$0xff]  ;;  %v5894_v17 = vpack.c.bf16 %v4931_v10, %v4913_v9  ;;  %v4935_v9 = vld [vmem:[%s6474_s17 + $0x698] sm:$0xff]  ;;  %v5891_v10 = vpack.c.bf16 %v5072_v3, %v5054_v2 }
  0x7a   : > { %4900 = vmatmul.mubr.msk.f32.vlgmr.msra.gmra.mrb[32].mxu0 %vm355_vm3, %v6541_v13  ;;  %v5058_v3 = vld [vmem:[%s6474_s17 + $0xa70] sm:$0xff] }
  0x7b   : > { %5086 = vmatmul.mubr.msk.f32.vlgmr.msra.gmra.mrb[32].mxu1 %vm355_vm3, %v6541_v13  ;;  %5831 = vmatpush1.bf16.msra.mxu0 %v5830_v22  ;;  %v5874_v22 = vpack.c.bf16 %v4928_v16, %v4910_v15  ;;  %v4932_v15 = vld [vmem:[%s6474_s17 + $0x680] sm:$0xff] }
  0x7c   : > { %5853 = vmatpush1.bf16.msra.mxu1 %v5852_v23  ;;  %1529 = vmatprep.mubr.f32.mxu1 %v8881_v0  ;;  %v4949_v23 = vld [vmem:[%s6474_s17 + $0x708] sm:$0xff]  ;;  %v4916_v16 = vld [vmem:[%s6474_s17 + $0x600] sm:$0xff] }
  0x7d   : > { %5833 = vmatprep.subr.bf16.mxu0 %v5832_v26  ;;  %5855 = vmatprep.subr.bf16.mxu1 %v5854_v28  ;;  %v4946_v26 = vld [vmem:[%s6474_s17 + $0x6f0] sm:$0xff]  ;;  %v4964_v28 = vld [vmem:[%s6474_s17 + $0x780] sm:$0xff]  ;;  %v5898_v32 = vpack.c.bf16 %v4967_v24, %v4949_v23 }
  0x7e   : > { %1205 = vmatprep.mubr.f32.mxu0 %v8881_v0  ;;  %v5878_v35 = vpack.c.bf16 %v4964_v28, %v4946_v26  ;;  %v4950_v24 = vld [vmem:[%s6474_s17 + $0x710] sm:$0xff]  ;;  %v5920_v26 = vpack.c.bf16 %v4969_v19, %v4951_v18  ;;  %v4952_v28 = vld [vmem:[%s6474_s17 + $0x720] sm:$0xff] }
  0x7f   : > { %5087 = vmatmul.mubr.msk.f32.gmra.mrb[34].mxu1 %vm355_vm3, %v6560_v27  ;;  %5835 = vmatpush1.bf16.msra.mxu0 %v5834_v33  ;;  %v4983_v33 = vld [vmem:[%s6474_s17 + $0x818] sm:$0xff]  ;;  %v4920_v18 = vld [vmem:[%s6474_s17 + $0x620] sm:$0xff]  ;;  %v4938_v19 = vld [vmem:[%s6474_s17 + $0x6b0] sm:$0xff] }
  0x80   : > { %5857 = vmatpush1.bf16.msra.mxu1 %v5856_v36  ;;  %1535 = vmatprep.mubr.f32.mxu1 %v8881_v0  ;;  %v4985_v36 = vld [vmem:[%s6474_s17 + $0x828] sm:$0xff]  ;;  %v5880_v42 = vpack.c.bf16 %v5001_v34, %v4983_v33 }
  0x81   : > { %4901 = vmatmul.mubr.msk.f32.gmra.mrb[34].mxu0 %vm355_vm3, %v6560_v27  ;;  %5837 = vmatprep.subr.bf16.mxu0 %v5836_v39  ;;  %v4982_v39 = vld [vmem:[%s6474_s17 + $0x810] sm:$0xff]  ;;  %v5902_v44 = vpack.c.bf16 %v5003_v37, %v4985_v36  ;;  %v5005_v33 = vld [vmem:[%s6474_s17 + $0x8c8] sm:$0xff]  ;;  %v5007_v36 = vld [vmem:[%s6474_s17 + $0x8d8] sm:$0xff] }
  0x82   : > { %5859 = vmatprep.subr.bf16.mxu1 %v5858_v43  ;;  %1211 = vmatprep.mubr.f32.mxu0 %v8881_v0  ;;  %v5002_v43 = vld [vmem:[%s6474_s17 + $0x8b0] sm:$0xff]  ;;  %v5882_v47 = vpack.c.bf16 %v5000_v41, %v4982_v39  ;;  %v5004_v39 = vld [vmem:[%s6474_s17 + $0x8c0] sm:$0xff] }
  0x83   : > { %5088 = vmatmul.mubr.msk.f32.gmra.mrb[36].mxu1 %vm355_vm3, %v6579_v40  ;;  %5839 = vmatpush1.bf16.msra.mxu0 %v5838_v46  ;;  %v5037_v46 = vld [vmem:[%s6474_s17 + $0x9c8] sm:$0xff] }
  0x84   : > { %5861 = vmatpush1.bf16.msra.mxu1 %v5860_v49  ;;  %1541 = vmatprep.mubr.f32.mxu1 %v8881_v0  ;;  %v5039_v49 = vld [vmem:[%s6474_s17 + $0x9d8] sm:$0xff]  ;;  %v5884_v56 = vpack.c.bf16 %v5037_v46, %v5019_v45  ;;  %v5041_v46 = vld [vmem:[%s6474_s17 + $0x9e8] sm:$0xff] }
  0x85   : > { %4902 = vmatmul.mubr.msk.f32.gmra.mrb[36].mxu0 %vm355_vm3, %v6579_v40  ;;  %5841 = vmatprep.subr.bf16.mxu0 %v5840_v55  ;;  %v5020_v55 = vld [vmem:[%s6474_s17 + $0x940] sm:$0xff]  ;;  %v5023_v45 = vld [vmem:[%s6474_s17 + $0x958] sm:$0xff] }
  0x86   : > { %5863 = vmatprep.subr.bf16.mxu1 %v5862_v59  ;;  %1217 = vmatprep.mubr.f32.mxu0 %v8881_v0  ;;  %v5906_v59 = vpack.c.bf16 %v5039_v49, %v5021_v48  ;;  %v5025_v48 = vld [vmem:[%s6474_s17 + $0x968] sm:$0xff]  ;;  %v5043_v49 = vld [vmem:[%s6474_s17 + $0x9f8] sm:$0xff] }
  0x87   : > { %5089 = vmatmul.mubr.msk.f32.gmra.mrb[38].mxu1 %vm355_vm3, %v6598_v54  ;;  %5843 = vmatpush1.bf16.msra.mxu0 %v5842_v62  ;;  %v5886_v62 = vpack.c.bf16 %v5036_v53, %v5018_v51  ;;  %v5022_v51 = vld [vmem:[%s6474_s17 + $0x950] sm:$0xff]  ;;  %v5040_v53 = vld [vmem:[%s6474_s17 + $0x9e0] sm:$0xff] }
  0x88   : > { %5865 = vmatpush1.bf16.msra.mxu1 %v5864_v63  ;;  %5846 = vmatprep.subr.msk.bf16.mxu0 %vm6512_vm2, %v5844_v1  ;;  %v5888_v1 = vpack.c.bf16 %v5073_v58, %v5055_v57  ;;  %v5059_v57 = vld [vmem:[%s6474_s17 + $0xa78] sm:$0xff]  ;;  %v5077_v58 = vld [vmem:[%s6474_s17 + $0xb08] sm:$0x7] }
  0x89   : > { %4903 = vmatmul.mubr.msk.f32.gmra.mrb[38].mxu0 %vm355_vm3, %v6598_v54  ;;  %5868 = vmatprep.subr.msk.bf16.mxu1 %vm6512_vm2, %v5866_v5  ;;  %v5910_v5 = vpack.c.bf16 %v5075_v61, %v5057_v60  ;;  %v5950_v60 = vpack.c.bf16 %v5043_v49, %v5025_v48  ;;  %v5061_v61 = vld [vmem:[%s6474_s17 + $0xa88] sm:$0xff]  ;;  %v5932_v2 = vpack.c.bf16 %v5077_v58, %v5059_v57  ;;  %v5046_v58 = vld [vmem:[%s6474_s17 + $0xa10] sm:$0xff] }
  0x8a   : > { %1612 = vmatprep.mubr.f32.mxu0 %v8881_v0  ;;  %1701 = vmatprep.mubr.f32.mxu1 %v8881_v0  ;;  %v5045_v48 = vld [vmem:[%s6474_s17 + $0xa08] sm:$0xff] }
  0x8b   : > { %5849 = vmatpush1.bf16.msk.msra.mxu0 %vm6512_vm2, %v5847_v11  ;;  %v5913_v11 = vpack.c.bf16 %v5074_v6, %v5056_v4  ;;  %v5076_v4 = vld [vmem:[%s6474_s17 + $0xb00] sm:$0x7] }
  0x8c   : > { %5871 = vmatpush1.bf16.msk.msra.mxu1 %vm6512_vm2, %v5869_v12  ;;  %5873 = vmatprep.subr.bf16.mxu0 %v5872_v14  ;;  %v4914_v14 = vld [vmem:[%s6474_s17 + $0x5f0] sm:$0xff] }
  0x8d   : > { %5895 = vmatprep.subr.bf16.mxu1 %v5894_v17  ;;  %v4934_v17 = vld [vmem:[%s6474_s17 + $0x690] sm:$0xff]  ;;  %v5918_v20 = vpack.c.bf16 %v4932_v15, %v4914_v14 }
  0x8e   : > { %5092 = vmatmul.mubr.msk.f32.vlgmr.msra.gmra.mrb[40].mxu0 %vm355_vm3, %v6541_v13  ;;  %v5940_v23 = vpack.c.bf16 %v4934_v17, %v4916_v16  ;;  %v4936_v16 = vld [vmem:[%s6474_s17 + $0x6a0] sm:$0xff] }
  0x8f   : > { %5098 = vmatmul.mubr.msk.f32.vlgmr.msra.gmra.mrb[40].mxu1 %vm355_vm3, %v6541_v13  ;;  %5875 = vmatpush1.bf16.msra.mxu0 %v5874_v22  ;;  %v4984_v13 = vld [vmem:[%s6474_s17 + $0x820] sm:$0xff]  ;;  %v4971_v22 = vld [vmem:[%s6474_s17 + $0x7b8] sm:$0xff] }
  0x90   : > { %5897 = vmatpush1.bf16.msra.mxu1 %v5896_v25  ;;  %1618 = vmatprep.mubr.f32.mxu0 %v8881_v0  ;;  %v5904_v50 = vpack.c.bf16 %v5002_v43, %v4984_v13  ;;  %v4968_v25 = vld [vmem:[%s6474_s17 + $0x7a0] sm:$0xff]  ;;  %v5942_v31 = vpack.c.bf16 %v4971_v22, %v4953_v21  ;;  %v5006_v13 = vld [vmem:[%s6474_s17 + $0x8d0] sm:$0xff]  ;;  %v7018_v43 = vld [vmem:[%s8878_s1 + $0x8] sm:$0xff] }
  0x91   : > { %1707 = vmatprep.mubr.f32.mxu1 %v8881_v0  ;;  %5877 = vmatprep.subr.bf16.mxu0 %v5876_v29  ;;  %v4970_v29 = vld [vmem:[%s6474_s17 + $0x7b0] sm:$0xff]  ;;  %v5922_v34 = vpack.c.bf16 %v4968_v25, %v4950_v24  ;;  %v4973_v21 = vld [vmem:[%s6474_s17 + $0x7c8] sm:$0xff]  ;;  %v4975_v24 = vld [vmem:[%s6474_s17 + $0x7d8] sm:$0xff]  ;;  %v5984_v25 = vpack.c.bf16 %v4938_v19, %v4920_v18 }
  0x92   : > { %5093 = vmatmul.mubr.msk.f32.gmra.mrb[42].mxu0 %vm355_vm3, %v6560_v27  ;;  %5899 = vmatprep.subr.bf16.mxu1 %v5898_v32  ;;  %v4987_v32 = vld [vmem:[%s6474_s17 + $0x838] sm:$0xff]  ;;  %v5944_v37 = vpack.c.bf16 %v4970_v29, %v4952_v28  ;;  %v4972_v28 = vld [vmem:[%s6474_s17 + $0x7c0] sm:$0xff]  ;;  %v5156_v18 = vld [vmem:[%s6474_s17 + $0xbd0] sm:$0xff] }
  0x93   : > { %5099 = vmatmul.mubr.msk.f32.gmra.mrb[42].mxu1 %vm355_vm3, %v6560_v27  ;;  %5879 = vmatpush1.bf16.msra.mxu0 %v5878_v35  ;;  %v5038_v27 = vld [vmem:[%s6474_s17 + $0x9d0] sm:$0xff]  ;;  %v4989_v35 = vld [vmem:[%s6474_s17 + $0x848] sm:$0xff]  ;;  %v5924_v41 = vpack.c.bf16 %v5005_v33, %v4987_v32 }
  0x94   : > { %5901 = vmatpush1.bf16.msra.mxu1 %v5900_v38  ;;  %1624 = vmatprep.mubr.f32.mxu0 %v8881_v0  ;;  %v5908_v63 = vpack.c.bf16 %v5038_v27, %v5020_v55  ;;  %v4986_v38 = vld [vmem:[%s6474_s17 + $0x830] sm:$0xff]  ;;  %v5024_v55 = vld [vmem:[%s6474_s17 + $0x960] sm:$0xff] }
  0x95   : > { %1713 = vmatprep.mubr.f32.mxu1 %v8881_v0  ;;  %5881 = vmatprep.subr.bf16.mxu0 %v5880_v42  ;;  %v4988_v42 = vld [vmem:[%s6474_s17 + $0x840] sm:$0xff]  ;;  %v5042_v27 = vld [vmem:[%s6474_s17 + $0x9f0] sm:$0xff] }
  0x96   : > { %5094 = vmatmul.mubr.msk.f32.gmra.mrb[44].mxu0 %vm355_vm3, %v6579_v40  ;;  %5903 = vmatprep.subr.bf16.mxu1 %v5902_v44  ;;  %v5946_v44 = vpack.c.bf16 %v5007_v36, %v4989_v35  ;;  %v4974_v32 = vld [vmem:[%s6474_s17 + $0x7d0] sm:$0xff]  ;;  %v5009_v35 = vld [vmem:[%s6474_s17 + $0x8e8] sm:$0xff] }
  0x97   : > { %5100 = vmatmul.mubr.msk.f32.gmra.mrb[44].mxu1 %vm355_vm3, %v6579_v40  ;;  %5883 = vmatpush1.bf16.msra.mxu0 %v5882_v47  ;;  %v4915_v40 = vld [vmem:[%s6474_s17 + $0x5f8] sm:$0xff]  ;;  %v5926_v47 = vpack.c.bf16 %v5004_v39, %v4986_v38 }
  0x98   : > { %5905 = vmatpush1.bf16.msra.mxu1 %v5904_v50  ;;  %1630 = vmatprep.mubr.f32.mxu0 %v8881_v0  ;;  %v5916_v12 = vpack.c.bf16 %v4933_v7, %v4915_v40  ;;  %v5948_v50 = vpack.c.bf16 %v5006_v13, %v4988_v42  ;;  %v5078_v40 = vld [vmem:[%s6474_s17 + $0xb10] sm:$0x7]  ;;  %v4919_v7 = vld [vmem:[%s6474_s17 + $0x618] sm:$0xff]  ;;  %v5008_v42 = vld [vmem:[%s6474_s17 + $0x8e0] sm:$0xff] }
  0x99   : > { %1719 = vmatprep.mubr.f32.mxu1 %v8881_v0  ;;  %5885 = vmatprep.subr.bf16.mxu0 %v5884_v56  ;;  %v5928_v56 = vpack.c.bf16 %v5041_v46, %v5023_v45  ;;  %v5011_v38 = vld [vmem:[%s6474_s17 + $0x8f8] sm:$0xff]  ;;  %v5010_v45 = vld [vmem:[%s6474_s17 + $0x8f0] sm:$0xff] }
  0x9a   : > { %5095 = vmatmul.mubr.msk.f32.gmra.mrb[46].mxu0 %vm355_vm3, %v6598_v54  ;;  %5907 = vmatprep.subr.bf16.mxu1 %v5906_v59  ;;  %v7039_v59 = vld [vmem:[%s8878_s1 + $0x10] sm:$0xff] }
  0x9b   : > { %5101 = vmatmul.mubr.msk.f32.gmra.mrb[46].mxu1 %vm355_vm3, %v6598_v54  ;;  %5887 = vmatpush1.bf16.msra.mxu0 %v5886_v62  ;;  %v5938_v54 = vpack.c.bf16 %v4935_v9, %v4917_v8  ;;  %v5079_v62 = vld [vmem:[%s6474_s17 + $0xb18] sm:$0x7]  ;;  %v4937_v8 = vld [vmem:[%s6474_s17 + $0x6a8] sm:$0xff] }
  0x9c   : > { %5909 = vmatpush1.bf16.msra.mxu1 %v5908_v63  ;;  %5890 = vmatprep.subr.msk.bf16.mxu0 %vm6512_vm2, %v5888_v1  ;;  %v5930_v63 = vpack.c.bf16 %v5040_v53, %v5022_v51  ;;  %v5952_v1 = vpack.c.bf16 %v5042_v27, %v5024_v55  ;;  %v5954_v6 = vpack.c.bf16 %v5079_v62, %v5061_v61  ;;  %v7058_v9 = vld [vmem:[%s8878_s1 + $0x18] sm:$0xff]  ;;  %v5026_v55 = vld [vmem:[%s6474_s17 + $0x970] sm:$0xff]  ;;  %v5028_v27 = vld [vmem:[%s6474_s17 + $0x980] sm:$0xff] }
  0x9d   : > { %5912 = vmatprep.subr.msk.bf16.mxu1 %vm6512_vm2, %v5910_v5  ;;  %1790 = vmatprep.mubr.f32.mxu0 %v8881_v0  ;;  %v5060_v5 = vld [vmem:[%s6474_s17 + $0xa80] sm:$0xff]  ;;  %v5960_v15 = vpack.c.bf16 %v4937_v8, %v4919_v7  ;;  %v5047_v51 = vld [vmem:[%s6474_s17 + $0xa18] sm:$0xff]  ;;  %v5081_v61 = vld [vmem:[%s6474_s17 + $0xb28] sm:$0x7] }
  0x9e   : > { %1879 = vmatprep.mubr.f32.mxu1 %v8881_v0  ;;  %v5957_v14 = vpack.c.bf16 %v5078_v40, %v5060_v5  ;;  %v5062_v5 = vld [vmem:[%s6474_s17 + $0xa90] sm:$0xff]  ;;  %v5064_v40 = vld [vmem:[%s6474_s17 + $0xaa0] sm:$0xff] }
  0x9f   : > { %5893 = vmatpush1.bf16.msk.msra.mxu0 %vm6512_vm2, %v5891_v10  ;;  %v4921_v10 = vld [vmem:[%s6474_s17 + $0x628] sm:$0xff]  ;;  %v5082_v8 = vld [vmem:[%s6474_s17 + $0xb30] sm:$0x7] }
  0xa0   : > { %5915 = vmatpush1.bf16.msk.msra.mxu1 %vm6512_vm2, %v5913_v11  ;;  %5917 = vmatprep.subr.bf16.mxu0 %v5916_v12  ;;  %v4939_v11 = vld [vmem:[%s6474_s17 + $0x6b8] sm:$0xff]  ;;  %v5935_v12 = vpack.c.bf16 %v5076_v4, %v5058_v3  ;;  %v5996_v3 = vpack.c.bf16 %v5046_v58, %v5028_v27  ;;  %v5246_v27 = vld [vmem:[%s6474_s17 + $0xea0] sm:$0xff]  ;;  %v5248_v58 = vld [vmem:[%s6474_s17 + $0xeb0] sm:$0xff] }
  0xa1   : > { %5939 = vmatprep.subr.bf16.mxu1 %v5938_v54  ;;  %v4918_v54 = vld [vmem:[%s6474_s17 + $0x610] sm:$0xff]  ;;  %v5982_v17 = vpack.c.bf16 %v4939_v11, %v4921_v10  ;;  %v5139_v10 = vld [vmem:[%s6474_s17 + $0xb48] sm:$0xff]  ;;  %v5157_v11 = vld [vmem:[%s6474_s17 + $0xbd8] sm:$0xff] }
  0xa2   : > { %5104 = vmatmul.mubr.msk.f32.vlgmr.msra.gmra.mrb[48].mxu0 %vm355_vm3, %v6999_v30  ;;  %v5962_v22 = vpack.c.bf16 %v4936_v16, %v4918_v54  ;;  %v6001_v54 = vpack.c.bf16 %v5082_v8, %v5064_v40  ;;  %v6004_v16 = vpack.c.bf16 %v5157_v11, %v5139_v10  ;;  %v5282_v40 = vld [vmem:[%s6474_s17 + $0xfc0] sm:$0xff]  ;;  %v5284_v8 = vld [vmem:[%s6474_s17 + $0xfd0] sm:$0xff] }
  0xa3   : > { %5110 = vmatmul.mubr.msk.f32.vlgmr.msra.gmra.mrb[48].mxu1 %vm355_vm3, %v6999_v30  ;;  %5919 = vmatpush1.bf16.msra.mxu0 %v5918_v20  ;;  %v4955_v20 = vld [vmem:[%s6474_s17 + $0x738] sm:$0xff]  ;;  %v5302_v11 = vld [vmem:[%s6474_s17 + $0x1060] sm:$0x7] }
  0xa4   : > { %5941 = vmatpush1.bf16.msra.mxu1 %v5940_v23  ;;  %1796 = vmatprep.mubr.f32.mxu0 %v8881_v0  ;;  %v4957_v23 = vld [vmem:[%s6474_s17 + $0x748] sm:$0xff]  ;;  %v5964_v29 = vpack.c.bf16 %v4973_v21, %v4955_v20  ;;  %v5140_v20 = vld [vmem:[%s6474_s17 + $0xb50] sm:$0xff]  ;;  %v5158_v21 = vld [vmem:[%s6474_s17 + $0xbe0] sm:$0xff] }
  0xa5   : > { %1885 = vmatprep.mubr.f32.mxu1 %v8881_v0  ;;  %5921 = vmatprep.subr.bf16.mxu0 %v5920_v26  ;;  %v4954_v26 = vld [vmem:[%s6474_s17 + $0x730] sm:$0xff]  ;;  %v5986_v33 = vpack.c.bf16 %v4975_v24, %v4957_v23  ;;  %v5193_v23 = vld [vmem:[%s6474_s17 + $0xcf8] sm:$0xff] }
  0xa6   : > { %5105 = vmatmul.mubr.msk.f32.gmra.mrb[50].mxu0 %vm355_vm3, %v7018_v43  ;;  %5943 = vmatprep.subr.bf16.mxu1 %v5942_v31  ;;  %v4956_v31 = vld [vmem:[%s6474_s17 + $0x740] sm:$0xff]  ;;  %v5966_v36 = vpack.c.bf16 %v4972_v28, %v4954_v26  ;;  %v5195_v26 = vld [vmem:[%s6474_s17 + $0xd08] sm:$0xff]  ;;  %v6028_v28 = vpack.c.bf16 %v5158_v21, %v5140_v20  ;;  %v5160_v20 = vld [vmem:[%s6474_s17 + $0xbf0] sm:$0xff] }
  0xa7   : > { %5111 = vmatmul.mubr.msk.f32.gmra.mrb[50].mxu1 %vm355_vm3, %v7018_v43  ;;  %5923 = vmatpush1.bf16.msra.mxu0 %v5922_v34  ;;  %v4991_v34 = vld [vmem:[%s6474_s17 + $0x858] sm:$0xff]  ;;  %v5988_v39 = vpack.c.bf16 %v4974_v32, %v4956_v31  ;;  %v5192_v31 = vld [vmem:[%s6474_s17 + $0xcf0] sm:$0xff] }
  0xa8   : > { %5945 = vmatpush1.bf16.msra.mxu1 %v5944_v37  ;;  %1802 = vmatprep.mubr.f32.mxu0 %v8881_v0  ;;  %v4993_v37 = vld [vmem:[%s6474_s17 + $0x868] sm:$0xff]  ;;  %v5968_v13 = vpack.c.bf16 %v5009_v35, %v4991_v34  ;;  %v5194_v34 = vld [vmem:[%s6474_s17 + $0xd00] sm:$0xff]  ;;  %v5144_v21 = vld [vmem:[%s6474_s17 + $0xb70] sm:$0xff] }
  0xa9   : > { %1891 = vmatprep.mubr.f32.mxu1 %v8881_v0  ;;  %5925 = vmatprep.subr.bf16.mxu0 %v5924_v41  ;;  %v4990_v41 = vld [vmem:[%s6474_s17 + $0x850] sm:$0xff]  ;;  %v5990_v46 = vpack.c.bf16 %v5011_v38, %v4993_v37  ;;  %v5229_v37 = vld [vmem:[%s6474_s17 + $0xe18] sm:$0xff] }
  0xaa   : > { %5106 = vmatmul.mubr.msk.f32.gmra.mrb[52].mxu0 %vm355_vm3, %v7039_v59  ;;  %5947 = vmatprep.subr.bf16.mxu1 %v5946_v44  ;;  %v4992_v44 = vld [vmem:[%s6474_s17 + $0x860] sm:$0xff]  ;;  %v5970_v49 = vpack.c.bf16 %v5008_v42, %v4990_v41  ;;  %v5231_v41 = vld [vmem:[%s6474_s17 + $0xe28] sm:$0xff] }
  0xab   : > { %5112 = vmatmul.mubr.msk.f32.gmra.mrb[52].mxu1 %vm355_vm3, %v7039_v59  ;;  %5927 = vmatpush1.bf16.msra.mxu0 %v5926_v47  ;;  %v5027_v47 = vld [vmem:[%s6474_s17 + $0x978] sm:$0xff]  ;;  %v5992_v53 = vpack.c.bf16 %v5010_v45, %v4992_v44  ;;  %v5228_v44 = vld [vmem:[%s6474_s17 + $0xe10] sm:$0xff] }
  0xac   : > { %5949 = vmatpush1.bf16.msra.mxu1 %v5948_v50  ;;  %1808 = vmatprep.mubr.f32.mxu0 %v8881_v0  ;;  %v5029_v50 = vld [vmem:[%s6474_s17 + $0x988] sm:$0xff]  ;;  %v5972_v57 = vpack.c.bf16 %v5045_v48, %v5027_v47  ;;  %v5230_v47 = vld [vmem:[%s6474_s17 + $0xe20] sm:$0xff] }
  0xad   : > { %1897 = vmatprep.mubr.f32.mxu1 %v8881_v0  ;;  %5929 = vmatprep.subr.bf16.mxu0 %v5928_v56  ;;  %v5044_v56 = vld [vmem:[%s6474_s17 + $0xa00] sm:$0xff]  ;;  %v5994_v62 = vpack.c.bf16 %v5047_v51, %v5029_v50  ;;  %v5265_v50 = vld [vmem:[%s6474_s17 + $0xf38] sm:$0xff] }
  0xae   : > { %5107 = vmatmul.mubr.msk.f32.gmra.mrb[54].mxu0 %vm355_vm3, %v7058_v9  ;;  %5951 = vmatprep.subr.bf16.mxu1 %v5950_v60  ;;  %v5063_v60 = vld [vmem:[%s6474_s17 + $0xa98] sm:$0xff] }
  0xaf   : > { %5113 = vmatmul.mubr.msk.f32.gmra.mrb[54].mxu1 %vm355_vm3, %v7058_v9  ;;  %5931 = vmatpush1.bf16.msra.mxu0 %v5930_v63  ;;  %v5065_v63 = vld [vmem:[%s6474_s17 + $0xaa8] sm:$0xff]  ;;  %v5976_v4 = vpack.c.bf16 %v5081_v61, %v5063_v60  ;;  %v5266_v61 = vld [vmem:[%s6474_s17 + $0xf40] sm:$0xff] }
  0xb0   : > { %5953 = vmatpush1.bf16.msra.mxu1 %v5952_v1  ;;  %5934 = vmatprep.subr.msk.bf16.mxu0 %vm6512_vm2, %v5932_v2  ;;  %v5083_v1 = vld [vmem:[%s6474_s17 + $0xb38] sm:$0x7]  ;;  %v5974_v2 = vpack.c.bf16 %v5044_v56, %v5026_v55  ;;  %v5267_v55 = vld [vmem:[%s6474_s17 + $0xf48] sm:$0xff] }
  0xb1   : > { %5956 = vmatprep.subr.msk.bf16.mxu1 %vm6512_vm2, %v5954_v6  ;;  %1968 = vmatprep.mubr.f32.mxu0 %v8881_v0  ;;  %v5080_v6 = vld [vmem:[%s6474_s17 + $0xb20] sm:$0x7]  ;;  %v5998_v7 = vpack.c.bf16 %v5083_v1, %v5065_v63  ;;  %v5301_v63 = vld [vmem:[%s6474_s17 + $0x1058] sm:$0x7] }
  0xb2   : > { %2057 = vmatprep.mubr.f32.mxu1 %v8881_v0 }
  0xb3   : > { %5937 = vmatpush1.bf16.msk.msra.mxu0 %vm6512_vm2, %v5935_v12  ;;  %v5141_v12 = vld [vmem:[%s6474_s17 + $0xb58] sm:$0xff] }
  0xb4   : > { %5959 = vmatpush1.bf16.msk.msra.mxu1 %vm6512_vm2, %v5957_v14  ;;  %5961 = vmatprep.subr.bf16.mxu0 %v5960_v15  ;;  %v5159_v14 = vld [vmem:[%s6474_s17 + $0xbe8] sm:$0xff]  ;;  %v5979_v15 = vpack.c.bf16 %v5080_v6, %v5062_v5  ;;  %v6040_v5 = vpack.c.bf16 %v5266_v61, %v5248_v58  ;;  %v5268_v61 = vld [vmem:[%s6474_s17 + $0xf50] sm:$0xff] }
  0xb5   : > { %5983 = vmatprep.subr.bf16.mxu1 %v5982_v17  ;;  %v5138_v17 = vld [vmem:[%s6474_s17 + $0xb40] sm:$0xff]  ;;  %v6026_v19 = vpack.c.bf16 %v5159_v14, %v5141_v12  ;;  %v5143_v12 = vld [vmem:[%s6474_s17 + $0xb68] sm:$0xff]  ;;  %v5161_v14 = vld [vmem:[%s6474_s17 + $0xbf8] sm:$0xff] }
  0xb6   : > { %5116 = vmatmul.mubr.msk.f32.vlgmr.msra.gmra.mrb[56].mxu0 %vm355_vm3, %v6999_v30  ;;  %v6006_v24 = vpack.c.bf16 %v5156_v18, %v5138_v17  ;;  %v6045_v17 = vpack.c.bf16 %v5302_v11, %v5284_v8  ;;  %v6048_v18 = vpack.c.bf16 %v5161_v14, %v5143_v12  ;;  %v5286_v8 = vld [vmem:[%s6474_s17 + $0xfe0] sm:$0xff]  ;;  %v5288_v11 = vld [vmem:[%s6474_s17 + $0xff0] sm:$0xff] }
  0xb7   : > { %5122 = vmatmul.mubr.msk.f32.vlgmr.msra.gmra.mrb[56].mxu1 %vm355_vm3, %v6999_v30  ;;  %5963 = vmatpush1.bf16.msra.mxu0 %v5962_v22  ;;  %v5175_v22 = vld [vmem:[%s6474_s17 + $0xc68] sm:$0xff]  ;;  %v5306_v14 = vld [vmem:[%s6474_s17 + $0x1080] sm:$0x7] }
  0xb8   : > { %5985 = vmatpush1.bf16.msra.mxu1 %v5984_v25  ;;  %1974 = vmatprep.mubr.f32.mxu0 %v8881_v0  ;;  %v5177_v25 = vld [vmem:[%s6474_s17 + $0xc78] sm:$0xff]  ;;  %v6008_v32 = vpack.c.bf16 %v5193_v23, %v5175_v22  ;;  %v5162_v23 = vld [vmem:[%s6474_s17 + $0xc00] sm:$0xff] }
  0xb9   : > { %2063 = vmatprep.mubr.f32.mxu1 %v8881_v0  ;;  %5965 = vmatprep.subr.bf16.mxu0 %v5964_v29  ;;  %v5174_v29 = vld [vmem:[%s6474_s17 + $0xc60] sm:$0xff]  ;;  %v6030_v35 = vpack.c.bf16 %v5195_v26, %v5177_v25  ;;  %v5197_v25 = vld [vmem:[%s6474_s17 + $0xd18] sm:$0xff] }
  0xba   : > { %5117 = vmatmul.mubr.msk.f32.gmra.mrb[58].mxu0 %vm355_vm3, %v7018_v43  ;;  %5987 = vmatprep.subr.bf16.mxu1 %v5986_v33  ;;  %v5176_v33 = vld [vmem:[%s6474_s17 + $0xc70] sm:$0xff]  ;;  %v6010_v38 = vpack.c.bf16 %v5192_v31, %v5174_v29  ;;  %v5181_v26 = vld [vmem:[%s6474_s17 + $0xc98] sm:$0xff]  ;;  %v6072_v31 = vpack.c.bf16 %v5162_v23, %v5144_v21  ;;  %v5146_v21 = vld [vmem:[%s6474_s17 + $0xb80] sm:$0xff] }
  0xbb   : > { %5123 = vmatmul.mubr.msk.f32.gmra.mrb[58].mxu1 %vm355_vm3, %v7018_v43  ;;  %5967 = vmatpush1.bf16.msra.mxu0 %v5966_v36  ;;  %v5211_v36 = vld [vmem:[%s6474_s17 + $0xd88] sm:$0xff]  ;;  %v6032_v42 = vpack.c.bf16 %v5194_v34, %v5176_v33  ;;  %v5178_v33 = vld [vmem:[%s6474_s17 + $0xc80] sm:$0xff]  ;;  %v5196_v34 = vld [vmem:[%s6474_s17 + $0xd10] sm:$0xff] }
  0xbc   : > { %5989 = vmatpush1.bf16.msra.mxu1 %v5988_v39  ;;  %1980 = vmatprep.mubr.f32.mxu0 %v8881_v0  ;;  %v5213_v39 = vld [vmem:[%s6474_s17 + $0xd98] sm:$0xff]  ;;  %v6012_v45 = vpack.c.bf16 %v5229_v37, %v5211_v36  ;;  %v5198_v37 = vld [vmem:[%s6474_s17 + $0xd20] sm:$0xff]  ;;  %v5148_v23 = vld [vmem:[%s6474_s17 + $0xb90] sm:$0xff] }
  0xbd   : > { %2069 = vmatprep.mubr.f32.mxu1 %v8881_v0  ;;  %5969 = vmatprep.subr.bf16.mxu0 %v5968_v13  ;;  %v5210_v13 = vld [vmem:[%s6474_s17 + $0xd80] sm:$0xff]  ;;  %v6034_v48 = vpack.c.bf16 %v5231_v41, %v5213_v39  ;;  %v5233_v39 = vld [vmem:[%s6474_s17 + $0xe38] sm:$0xff] }
  0xbe   : > { %5118 = vmatmul.mubr.msk.f32.gmra.mrb[60].mxu0 %vm355_vm3, %v7039_v59  ;;  %5991 = vmatprep.subr.bf16.mxu1 %v5990_v46  ;;  %v5212_v46 = vld [vmem:[%s6474_s17 + $0xd90] sm:$0xff]  ;;  %v6014_v51 = vpack.c.bf16 %v5228_v44, %v5210_v13  ;;  %v5217_v41 = vld [vmem:[%s6474_s17 + $0xdb8] sm:$0xff]  ;;  %v6054_v13 = vpack.c.bf16 %v5196_v34, %v5178_v33 }
  0xbf   : > { %5124 = vmatmul.mubr.msk.f32.gmra.mrb[60].mxu1 %vm355_vm3, %v7039_v59  ;;  %5971 = vmatpush1.bf16.msra.mxu0 %v5970_v49  ;;  %v5247_v49 = vld [vmem:[%s6474_s17 + $0xea8] sm:$0xff]  ;;  %v6036_v56 = vpack.c.bf16 %v5230_v47, %v5212_v46  ;;  %v5214_v46 = vld [vmem:[%s6474_s17 + $0xda0] sm:$0xff]  ;;  %v5232_v47 = vld [vmem:[%s6474_s17 + $0xe30] sm:$0xff] }
  0xc0   : > { %5993 = vmatpush1.bf16.msra.mxu1 %v5992_v53  ;;  %1986 = vmatprep.mubr.f32.mxu0 %v8881_v0  ;;  %v5249_v53 = vld [vmem:[%s6474_s17 + $0xeb8] sm:$0xff]  ;;  %v6016_v60 = vpack.c.bf16 %v5265_v50, %v5247_v49  ;;  %v5234_v50 = vld [vmem:[%s6474_s17 + $0xe40] sm:$0xff] }
  0xc1   : > { %2075 = vmatprep.mubr.f32.mxu1 %v8881_v0  ;;  %5973 = vmatprep.subr.bf16.mxu0 %v5972_v57  ;;  %v5264_v57 = vld [vmem:[%s6474_s17 + $0xf30] sm:$0xff]  ;;  %v6038_v1 = vpack.c.bf16 %v5267_v55, %v5249_v53  ;;  %v5269_v53 = vld [vmem:[%s6474_s17 + $0xf58] sm:$0xff] }
  0xc2   : > { %5119 = vmatmul.mubr.msk.f32.gmra.mrb[62].mxu0 %vm355_vm3, %v7058_v9  ;;  %5995 = vmatprep.subr.bf16.mxu1 %v5994_v62  ;;  %v5283_v62 = vld [vmem:[%s6474_s17 + $0xfc8] sm:$0xff]  ;;  %v5253_v55 = vld [vmem:[%s6474_s17 + $0xed8] sm:$0xff] }
  0xc3   : > { %5125 = vmatmul.mubr.msk.f32.gmra.mrb[62].mxu1 %vm355_vm3, %v7058_v9  ;;  %5975 = vmatpush1.bf16.msra.mxu0 %v5974_v2  ;;  %v5285_v2 = vld [vmem:[%s6474_s17 + $0xfd8] sm:$0xff]  ;;  %v6020_v6 = vpack.c.bf16 %v5301_v63, %v5283_v62  ;;  %v5252_v62 = vld [vmem:[%s6474_s17 + $0xed0] sm:$0xff] }
  0xc4   : > { %5997 = vmatpush1.bf16.msra.mxu1 %v5996_v3  ;;  %5978 = vmatprep.subr.msk.bf16.mxu0 %vm6512_vm2, %v5976_v4  ;;  %v5303_v3 = vld [vmem:[%s6474_s17 + $0x1068] sm:$0x7]  ;;  %v6018_v4 = vpack.c.bf16 %v5264_v57, %v5246_v27  ;;  %v6058_v27 = vpack.c.bf16 %v5232_v47, %v5214_v46 }
  0xc5   : > { %6000 = vmatprep.subr.msk.bf16.mxu1 %vm6512_vm2, %v5998_v7  ;;  %2146 = vmatprep.mubr.f32.mxu0 %v8881_v0  ;;  %v5300_v7 = vld [vmem:[%s6474_s17 + $0x1050] sm:$0x7]  ;;  %v6042_v10 = vpack.c.bf16 %v5303_v3, %v5285_v2  ;;  %v5287_v2 = vld [vmem:[%s6474_s17 + $0xfe8] sm:$0xff]  ;;  %v5305_v3 = vld [vmem:[%s6474_s17 + $0x1078] sm:$0x7] }
  0xc6   : > { %2235 = vmatprep.mubr.f32.mxu1 %v8881_v0 }
  0xc7   : > { %5981 = vmatpush1.bf16.msk.msra.mxu0 %vm6512_vm2, %v5979_v15  ;;  %v5145_v15 = vld [vmem:[%s6474_s17 + $0xb78] sm:$0xff] }
  0xc8   : > { %6003 = vmatpush1.bf16.msk.msra.mxu1 %vm6512_vm2, %v6001_v54  ;;  %6005 = vmatprep.subr.bf16.mxu0 %v6004_v16  ;;  %v5163_v54 = vld [vmem:[%s6474_s17 + $0xc08] sm:$0xff]  ;;  %v6023_v16 = vpack.c.bf16 %v5300_v7, %v5282_v40  ;;  %v6064_v7 = vpack.c.bf16 %v5305_v3, %v5287_v2  ;;  %v5274_v3 = vld [vmem:[%s6474_s17 + $0xf80] sm:$0xff] }
  0xc9   : > { %6027 = vmatprep.subr.bf16.mxu1 %v6026_v19  ;;  %v5142_v19 = vld [vmem:[%s6474_s17 + $0xb60] sm:$0xff]  ;;  %v6070_v22 = vpack.c.bf16 %v5163_v54, %v5145_v15  ;;  %v5147_v15 = vld [vmem:[%s6474_s17 + $0xb88] sm:$0xff]  ;;  %v5165_v54 = vld [vmem:[%s6474_s17 + $0xc18] sm:$0xff] }
  0xca   : > { %5128 = vmatmul.mubr.msk.f32.vlgmr.msra.gmra.mrb[64].mxu0 %vm355_vm3, %v6999_v30  ;;  %v6050_v29 = vpack.c.bf16 %v5160_v20, %v5142_v19  ;;  %v6089_v19 = vpack.c.bf16 %v5306_v14, %v5288_v11  ;;  %v6092_v20 = vpack.c.bf16 %v5165_v54, %v5147_v15  ;;  %v5290_v11 = vld [vmem:[%s6474_s17 + $0x1000] sm:$0xff]  ;;  %v5292_v14 = vld [vmem:[%s6474_s17 + $0x1010] sm:$0xff] }
  0xcb   : > { %5134 = vmatmul.mubr.msk.f32.vlgmr.msra.gmra.mrb[64].mxu1 %vm355_vm3, %v6999_v30  ;;  %6007 = vmatpush1.bf16.msra.mxu0 %v6006_v24  ;;  %v5179_v24 = vld [vmem:[%s6474_s17 + $0xc88] sm:$0xff] }
  0xcc   : > { %6029 = vmatpush1.bf16.msra.mxu1 %v6028_v28  ;;  %2152 = vmatprep.mubr.f32.mxu0 %v8881_v0  ;;  %v5199_v28 = vld [vmem:[%s6474_s17 + $0xd28] sm:$0xff] }
  0xcd   : > { %2241 = vmatprep.mubr.f32.mxu1 %v8881_v0  ;;  %6009 = vmatprep.subr.bf16.mxu0 %v6008_v32  ;;  %v6052_v32 = vpack.c.bf16 %v5197_v25, %v5179_v24  ;;  %v6074_v36 = vpack.c.bf16 %v5199_v28, %v5181_v26  ;;  %v5166_v25 = vld [vmem:[%s6474_s17 + $0xc20] sm:$0xff]  ;;  %v5183_v26 = vld [vmem:[%s6474_s17 + $0xca8] sm:$0xff]  ;;  %v5201_v28 = vld [vmem:[%s6474_s17 + $0xd38] sm:$0xff] }
  0xce   : > { %5129 = vmatmul.mubr.msk.f32.gmra.mrb[66].mxu0 %vm355_vm3, %v7018_v43  ;;  %6031 = vmatprep.subr.bf16.mxu1 %v6030_v35  ;;  %v5180_v35 = vld [vmem:[%s6474_s17 + $0xc90] sm:$0xff]  ;;  %v6116_v33 = vpack.c.bf16 %v5166_v25, %v5148_v23  ;;  %v6096_v34 = vpack.c.bf16 %v5201_v28, %v5183_v26  ;;  %v5150_v28 = vld [vmem:[%s6474_s17 + $0xba0] sm:$0xff] }
  0xcf   : > { %5135 = vmatmul.mubr.msk.f32.gmra.mrb[66].mxu1 %vm355_vm3, %v7018_v43  ;;  %6011 = vmatpush1.bf16.msra.mxu0 %v6010_v38  ;;  %v5215_v38 = vld [vmem:[%s6474_s17 + $0xda8] sm:$0xff]  ;;  %v6076_v44 = vpack.c.bf16 %v5198_v37, %v5180_v35  ;;  %v5182_v35 = vld [vmem:[%s6474_s17 + $0xca0] sm:$0xff]  ;;  %v5184_v37 = vld [vmem:[%s6474_s17 + $0xcb0] sm:$0xff] }
  0xd0   : > { %6033 = vmatpush1.bf16.msra.mxu1 %v6032_v42  ;;  %2158 = vmatprep.mubr.f32.mxu0 %v8881_v0  ;;  %v5235_v42 = vld [vmem:[%s6474_s17 + $0xe48] sm:$0xff] }
  0xd1   : > { %2247 = vmatprep.mubr.f32.mxu1 %v8881_v0  ;;  %6013 = vmatprep.subr.bf16.mxu0 %v6012_v45  ;;  %v6056_v45 = vpack.c.bf16 %v5233_v39, %v5215_v38  ;;  %v6078_v49 = vpack.c.bf16 %v5235_v42, %v5217_v41  ;;  %v5202_v39 = vld [vmem:[%s6474_s17 + $0xd40] sm:$0xff]  ;;  %v5219_v41 = vld [vmem:[%s6474_s17 + $0xdc8] sm:$0xff]  ;;  %v5237_v42 = vld [vmem:[%s6474_s17 + $0xe58] sm:$0xff] }
  0xd2   : > { %5130 = vmatmul.mubr.msk.f32.gmra.mrb[68].mxu0 %vm355_vm3, %v7039_v59  ;;  %6035 = vmatprep.subr.bf16.mxu1 %v6034_v48  ;;  %v5216_v48 = vld [vmem:[%s6474_s17 + $0xdb0] sm:$0xff]  ;;  %v6120_v46 = vpack.c.bf16 %v5202_v39, %v5184_v37  ;;  %v6100_v47 = vpack.c.bf16 %v5237_v42, %v5219_v41  ;;  %v5189_v39 = vld [vmem:[%s6474_s17 + $0xcd8] sm:$0xff]  ;;  %v5207_v41 = vld [vmem:[%s6474_s17 + $0xd68] sm:$0xff] }
  0xd3   : > { %5136 = vmatmul.mubr.msk.f32.gmra.mrb[68].mxu1 %vm355_vm3, %v7039_v59  ;;  %6015 = vmatpush1.bf16.msra.mxu0 %v6014_v51  ;;  %v5251_v51 = vld [vmem:[%s6474_s17 + $0xec8] sm:$0xff]  ;;  %v6080_v57 = vpack.c.bf16 %v5234_v50, %v5216_v48  ;;  %v5218_v48 = vld [vmem:[%s6474_s17 + $0xdc0] sm:$0xff]  ;;  %v5220_v50 = vld [vmem:[%s6474_s17 + $0xdd0] sm:$0xff] }
  0xd4   : > { %6037 = vmatpush1.bf16.msra.mxu1 %v6036_v56  ;;  %2164 = vmatprep.mubr.f32.mxu0 %v8881_v0  ;;  %v5271_v56 = vld [vmem:[%s6474_s17 + $0xf68] sm:$0xff]  ;;  %v6060_v58 = vpack.c.bf16 %v5269_v53, %v5251_v51  ;;  %v5238_v53 = vld [vmem:[%s6474_s17 + $0xe60] sm:$0xff] }
  0xd5   : > { %2253 = vmatprep.mubr.f32.mxu1 %v8881_v0  ;;  %6017 = vmatprep.subr.bf16.mxu0 %v6016_v60  ;;  %v5250_v60 = vld [vmem:[%s6474_s17 + $0xec0] sm:$0xff]  ;;  %v6082_v63 = vpack.c.bf16 %v5271_v56, %v5253_v55  ;;  %v5255_v55 = vld [vmem:[%s6474_s17 + $0xee8] sm:$0xff]  ;;  %v5273_v56 = vld [vmem:[%s6474_s17 + $0xf78] sm:$0xff] }
  0xd6   : > { %5131 = vmatmul.mubr.msk.f32.gmra.mrb[70].mxu0 %vm355_vm3, %v7058_v9  ;;  %6039 = vmatprep.subr.bf16.mxu1 %v6038_v1  ;;  %v5270_v1 = vld [vmem:[%s6474_s17 + $0xf60] sm:$0xff] }
  0xd7   : > { %5137 = vmatmul.mubr.msk.f32.gmra.mrb[70].mxu1 %vm355_vm3, %v7058_v9  ;;  %6019 = vmatpush1.bf16.msra.mxu0 %v6018_v4  ;;  %v5289_v4 = vld [vmem:[%s6474_s17 + $0xff8] sm:$0xff]  ;;  %v6084_v40 = vpack.c.bf16 %v5270_v1, %v5252_v62  ;;  %v5254_v62 = vld [vmem:[%s6474_s17 + $0xee0] sm:$0xff]  ;;  %v5256_v1 = vld [vmem:[%s6474_s17 + $0xef0] sm:$0xff] }
  0xd8   : > { %6041 = vmatpush1.bf16.msra.mxu1 %v6040_v5  ;;  %6022 = vmatprep.subr.msk.bf16.mxu0 %vm6512_vm2, %v6020_v6  ;;  %v5307_v5 = vld [vmem:[%s6474_s17 + $0x1088] sm:$0x7]  ;;  %v6062_v6 = vpack.c.bf16 %v5268_v61, %v5250_v60  ;;  %v6124_v60 = vpack.c.bf16 %v5238_v53, %v5220_v50  ;;  %v6104_v61 = vpack.c.bf16 %v5273_v56, %v5255_v55  ;;  %v5206_v53 = vld [vmem:[%s6474_s17 + $0xd60] sm:$0xff]  ;;  %v5241_v56 = vld [vmem:[%s6474_s17 + $0xe78] sm:$0xff] }
  0xd9   : > { %6044 = vmatprep.subr.msk.bf16.mxu1 %vm6512_vm2, %v6042_v10  ;;  %2631 = vmatprep.mubr.f32.mxu0 %v8881_v0  ;;  %v5304_v10 = vld [vmem:[%s6474_s17 + $0x1070] sm:$0x7]  ;;  %v6086_v12 = vpack.c.bf16 %v5307_v5, %v5289_v4  ;;  %v5291_v4 = vld [vmem:[%s6474_s17 + $0x1008] sm:$0xff]  ;;  %v5309_v5 = vld [vmem:[%s6474_s17 + $0x1098] sm:$0x7] }
  0xda   : > { %2720 = vmatprep.mubr.f32.mxu1 %v8881_v0  ;;  %v5223_v55 = vld [vmem:[%s6474_s17 + $0xde8] sm:$0xff] }
  0xdb   : > { %6025 = vmatpush1.bf16.msk.msra.mxu0 %vm6512_vm2, %v6023_v16  ;;  %v5149_v16 = vld [vmem:[%s6474_s17 + $0xb98] sm:$0xff] }
  0xdc   : > { %6047 = vmatpush1.bf16.msk.msra.mxu1 %vm6512_vm2, %v6045_v17  ;;  %6049 = vmatprep.subr.bf16.mxu0 %v6048_v18  ;;  %v5167_v17 = vld [vmem:[%s6474_s17 + $0xc28] sm:$0xff]  ;;  %v6067_v18 = vpack.c.bf16 %v5304_v10, %v5286_v8  ;;  %v6128_v8 = vpack.c.bf16 %v5274_v3, %v5256_v1  ;;  %v6108_v10 = vpack.c.bf16 %v5309_v5, %v5291_v4  ;;  %v5222_v3 = vld [vmem:[%s6474_s17 + $0xde0] sm:$0xff]  ;;  %v5240_v4 = vld [vmem:[%s6474_s17 + $0xe70] sm:$0xff] }
  0xdd   : > { %6071 = vmatprep.subr.bf16.mxu1 %v6070_v22  ;;  %v5164_v22 = vld [vmem:[%s6474_s17 + $0xc10] sm:$0xff]  ;;  %v6114_v24 = vpack.c.bf16 %v5167_v17, %v5149_v16  ;;  %v5310_v16 = vld [vmem:[%s6474_s17 + $0x10a0] sm:$0x7]  ;;  %v5151_v17 = vld [vmem:[%s6474_s17 + $0xba8] sm:$0xff] }
  0xde   : > { %5320 = vmatmul.mubr.msk.f32.vlgmr.msra.gmra.mrb[72].mxu0 %vm355_vm3, %v6999_v30  ;;  %v6133_v25 = vpack.c.bf16 %v5310_v16, %v5292_v14  ;;  %v5224_v5 = vld [vmem:[%s6474_s17 + $0xdf0] sm:$0xff]  ;;  %v5279_v14 = vld [vmem:[%s6474_s17 + $0xfa8] sm:$0xff]  ;;  %v6146_v16 = vpack.c.bf16 %v5240_v4, %v5222_v3 }
  0xdf   : > { %5326 = vmatmul.mubr.msk.f32.vlgmr.msra.gmra.mrb[72].mxu1 %vm355_vm3, %v6999_v30  ;;  %6051 = vmatpush1.bf16.msra.mxu0 %v6050_v29  ;;  %v5185_v29 = vld [vmem:[%s6474_s17 + $0xcb8] sm:$0xff]  ;;  %v5390_v4 = vld [vmem:[%s6474_s17 + $0x1170] sm:$0xff] }
  0xe0   : > { %6073 = vmatpush1.bf16.msra.mxu1 %v6072_v31  ;;  %6053 = vmatprep.subr.bf16.mxu0 %v6052_v32  ;;  %v5203_v31 = vld [vmem:[%s6474_s17 + $0xd48] sm:$0xff]  ;;  %v6094_v32 = vpack.c.bf16 %v5164_v22, %v5146_v21  ;;  %v5153_v21 = vld [vmem:[%s6474_s17 + $0xbb8] sm:$0xff] }
  0xe1   : > { %6075 = vmatprep.subr.bf16.mxu1 %v6074_v36  ;;  %2637 = vmatprep.mubr.f32.mxu0 %v8881_v0  ;;  %v5200_v36 = vld [vmem:[%s6474_s17 + $0xd30] sm:$0xff]  ;;  %v6118_v38 = vpack.c.bf16 %v5203_v31, %v5185_v29  ;;  %v5171_v22 = vld [vmem:[%s6474_s17 + $0xc48] sm:$0xff] }
  0xe2   : > { %2726 = vmatprep.mubr.f32.mxu1 %v8881_v0  ;;  %5321 = vmatmul.mubr.msk.f32.gmra.mrb[74].mxu0 %vm355_vm3, %v7018_v43  ;;  %v5168_v29 = vld [vmem:[%s6474_s17 + $0xc30] sm:$0xff] }
  0xe3   : > { %6055 = vmatpush1.bf16.msra.mxu0 %v6054_v13  ;;  %5327 = vmatmul.mubr.msk.f32.gmra.mrb[74].mxu1 %vm355_vm3, %v7018_v43  ;;  %v5221_v13 = vld [vmem:[%s6474_s17 + $0xdd8] sm:$0xff]  ;;  %v5152_v31 = vld [vmem:[%s6474_s17 + $0xbb0] sm:$0xff] }
  0xe4   : > { %6077 = vmatpush1.bf16.msra.mxu1 %v6076_v44  ;;  %6057 = vmatprep.subr.bf16.mxu0 %v6056_v45  ;;  %v5239_v44 = vld [vmem:[%s6474_s17 + $0xe68] sm:$0xff]  ;;  %v6098_v45 = vpack.c.bf16 %v5200_v36, %v5182_v35  ;;  %v5205_v36 = vld [vmem:[%s6474_s17 + $0xd58] sm:$0xff] }
  0xe5   : > { %6079 = vmatprep.subr.bf16.mxu1 %v6078_v49  ;;  %2643 = vmatprep.mubr.f32.mxu0 %v8881_v0  ;;  %v5236_v49 = vld [vmem:[%s6474_s17 + $0xe50] sm:$0xff]  ;;  %v6122_v51 = vpack.c.bf16 %v5239_v44, %v5221_v13  ;;  %v5187_v35 = vld [vmem:[%s6474_s17 + $0xcc8] sm:$0xff]  ;;  %v6138_v13 = vpack.c.bf16 %v5168_v29, %v5150_v28  ;;  %v5186_v44 = vld [vmem:[%s6474_s17 + $0xcc0] sm:$0xff] }
  0xe6   : > { %2732 = vmatprep.mubr.f32.mxu1 %v8881_v0  ;;  %5322 = vmatmul.mubr.msk.f32.gmra.mrb[76].mxu0 %vm355_vm3, %v7039_v59  ;;  %v5295_v28 = vld [vmem:[%s6474_s17 + $0x1028] sm:$0xff]  ;;  %v5297_v29 = vld [vmem:[%s6474_s17 + $0x1038] sm:$0xff] }
  0xe7   : > { %6059 = vmatpush1.bf16.msra.mxu0 %v6058_v27  ;;  %5328 = vmatmul.mubr.msk.f32.gmra.mrb[76].mxu1 %vm355_vm3, %v7039_v59  ;;  %v5257_v27 = vld [vmem:[%s6474_s17 + $0xef8] sm:$0xff] }
  0xe8   : > { %6081 = vmatpush1.bf16.msra.mxu1 %v6080_v57  ;;  %6061 = vmatprep.subr.bf16.mxu0 %v6060_v58  ;;  %v5275_v57 = vld [vmem:[%s6474_s17 + $0xf88] sm:$0xff]  ;;  %v6102_v58 = vpack.c.bf16 %v5236_v49, %v5218_v48  ;;  %v5188_v48 = vld [vmem:[%s6474_s17 + $0xcd0] sm:$0xff]  ;;  %v4548_v49 = vld [vmem:[%s8879_s2] sm:$0xff] }
  0xe9   : > { %6083 = vmatprep.subr.bf16.mxu1 %v6082_v63  ;;  %2649 = vmatprep.mubr.f32.mxu0 %v8881_v0  ;;  %v5272_v63 = vld [vmem:[%s6474_s17 + $0xf70] sm:$0xff]  ;;  %v6126_v2 = vpack.c.bf16 %v5275_v57, %v5257_v27  ;;  %v6437_v27 = vmov 0   ;;  %v6164_v1 = vpack.c.bf16 %v5206_v53, %v5188_v48 }
  0xea   : > { %2738 = vmatprep.mubr.f32.mxu1 %v8881_v0  ;;  %5323 = vmatmul.mubr.msk.f32.gmra.mrb[78].mxu0 %vm355_vm3, %v7058_v9 }
  0xeb   : > { %6063 = vmatpush1.bf16.msra.mxu0 %v6062_v6  ;;  %5329 = vmatmul.mubr.msk.f32.gmra.mrb[78].mxu1 %vm355_vm3, %v7058_v9  ;;  %v5293_v6 = vld [vmem:[%s6474_s17 + $0x1018] sm:$0xff] }
  0xec   : > { %6085 = vmatpush1.bf16.msra.mxu1 %v6084_v40  ;;  %6066 = vmatprep.subr.msk.bf16.mxu0 %vm6512_vm2, %v6064_v7  ;;  %v5311_v40 = vld [vmem:[%s6474_s17 + $0x10a8] sm:$0x7]  ;;  %v6106_v7 = vpack.c.bf16 %v5272_v63, %v5254_v62 }
  0xed   : > { %6088 = vmatprep.subr.msk.bf16.mxu1 %vm6512_vm2, %v6086_v12  ;;  %2809 = vmatprep.mubr.f32.mxu0 %v8881_v0  ;;  %v5308_v12 = vld [vmem:[%s6474_s17 + $0x1090] sm:$0x7]  ;;  %v6130_v54 = vpack.c.bf16 %v5311_v40, %v5293_v6  ;;  %v5242_v40 = vld [vmem:[%s6474_s17 + $0xe80] sm:$0xff] }
  0xee   : > { %2898 = vmatprep.mubr.f32.mxu1 %v8881_v0  ;;  %6413 = vset.pattern.permute.xlu0 %v6437_v27 }
  0xef   : > { %6069 = vmatpush1.bf16.msk.msra.mxu0 %vm6512_vm2, %v6067_v18  ;;  %v5169_v18 = vld [vmem:[%s6474_s17 + $0xc38] sm:$0xff]  ;;  %4554 = vperm.xlu0 %6413, %v4548_v49   ;;  %v5373_v49 = vld [vmem:[%s6474_s17 + $0x10e8] sm:$0xff] }
  0xf0   : > { %6091 = vmatpush1.bf16.msk.msra.mxu1 %vm6512_vm2, %v6089_v19  ;;  %6093 = vmatprep.subr.bf16.mxu0 %v6092_v20  ;;  %v6136_v26 = vpack.c.bf16 %v5169_v18, %v5151_v17  ;;  %v6168_v17 = vpack.c.bf16 %v5242_v40, %v5224_v5  ;;  %v5191_v5 = vld [vmem:[%s6474_s17 + $0xce8] sm:$0xff] }
  0xf1   : > { %6115 = vmatprep.subr.bf16.mxu1 %v6114_v24  ;;  %v6111_v24 = vpack.c.bf16 %v5308_v12, %v5290_v11  ;;  %v5261_v12 = vld [vmem:[%s6474_s17 + $0xf18] sm:$0xff]  ;;  %6414 = vset.pattern.permute.xlu1 %v6437_v27  ;;  %v7514_v27 = vld [vmem:[%s8878_s1] sm:$0xff] }
  0xf2   : > { %5332 = vmatmul.mubr.msk.f32.vlgmr.msra.gmra.mrb[80].mxu0 %vm355_vm3, %v6999_v30 }
  0xf3   : > { %5338 = vmatmul.mubr.msk.f32.vlgmr.msra.gmra.mrb[80].mxu1 %vm355_vm3, %v6999_v30  ;;  %6095 = vmatpush1.bf16.msra.mxu0 %v6094_v32 }
  0xf4   : > { %6117 = vmatpush1.bf16.msra.mxu1 %v6116_v33  ;;  %6097 = vmatprep.subr.bf16.mxu0 %v6096_v34  ;;  %v6158_v33 = vpack.c.bf16 %v5171_v22, %v5153_v21  ;;  %v5170_v34 = vld [vmem:[%s6474_s17 + $0xc40] sm:$0xff]  ;;  %v5276_v22 = vld [vmem:[%s6474_s17 + $0xf90] sm:$0xff] }
  0xf5   : > { %6119 = vmatprep.subr.bf16.mxu1 %v6118_v38  ;;  %2815 = vmatprep.mubr.f32.mxu0 %v8881_v0  ;;  %v5258_v21 = vld [vmem:[%s6474_s17 + $0xf00] sm:$0xff] }
  0xf6   : > { %2904 = vmatprep.mubr.f32.mxu1 %v8881_v0  ;;  %5333 = vmatmul.mubr.msk.f32.gmra.mrb[82].mxu0 %vm355_vm3, %v7018_v43 }
  0xf7   : > { %6099 = vmatpush1.bf16.msra.mxu0 %v6098_v45  ;;  %5339 = vmatmul.mubr.msk.f32.gmra.mrb[82].mxu1 %vm355_vm3, %v7018_v43  ;;  %v6160_v45 = vpack.c.bf16 %v5170_v34, %v5152_v31  ;;  %v5315_v31 = vld [vmem:[%s6474_s17 + $0x10c8] sm:$0x7] }
  0xf8   : > { %6121 = vmatpush1.bf16.msra.mxu1 %v6120_v46  ;;  %6101 = vmatprep.subr.bf16.mxu0 %v6100_v47  ;;  %v6140_v46 = vpack.c.bf16 %v5205_v36, %v5187_v35  ;;  %v5204_v47 = vld [vmem:[%s6474_s17 + $0xd50] sm:$0xff]  ;;  %v5294_v36 = vld [vmem:[%s6474_s17 + $0x1020] sm:$0xff] }
  0xf9   : > { %6123 = vmatprep.subr.bf16.mxu1 %v6122_v51  ;;  %2821 = vmatprep.mubr.f32.mxu0 %v8881_v0  ;;  %v6162_v51 = vpack.c.bf16 %v5207_v41, %v5189_v39  ;;  %v6142_v63 = vpack.c.bf16 %v5204_v47, %v5186_v44  ;;  %v5312_v39 = vld [vmem:[%s6474_s17 + $0x10b0] sm:$0x7]  ;;  %v6174_v44 = vpack.c.bf16 %v5315_v31, %v5297_v29  ;;  %v5173_v47 = vld [vmem:[%s6474_s17 + $0xc58] sm:$0xff]  ;;  %v5227_v29 = vld [vmem:[%s6474_s17 + $0xe08] sm:$0xff] }
  0xfa   : > { %2910 = vmatprep.mubr.f32.mxu1 %v8881_v0  ;;  %5334 = vmatmul.mubr.msk.f32.gmra.mrb[84].mxu0 %vm355_vm3, %v7039_v59  ;;  %v5296_v41 = vld [vmem:[%s6474_s17 + $0x1030] sm:$0xff]  ;;  %v5245_v31 = vld [vmem:[%s6474_s17 + $0xe98] sm:$0xff] }
  0xfb   : > { %6103 = vmatpush1.bf16.msra.mxu0 %v6102_v58  ;;  %5340 = vmatmul.mubr.msk.f32.gmra.mrb[84].mxu1 %vm355_vm3, %v7039_v59 }
  0xfc   : > { %6125 = vmatpush1.bf16.msra.mxu1 %v6124_v60  ;;  %6105 = vmatprep.subr.bf16.mxu0 %v6104_v61  ;;  %v5225_v60 = vld [vmem:[%s6474_s17 + $0xdf8] sm:$0xff]  ;;  %v5243_v61 = vld [vmem:[%s6474_s17 + $0xe88] sm:$0xff] }
  0xfd   : > { %v7343_v15 = vpop.f32.mrb[0].mxu0  ;;  %6127 = vmatprep.subr.bf16.mxu1 %v6126_v2  ;;  %2827 = vmatprep.mubr.f32.mxu0 %v8881_v0  ;;  %v6144_v2 = vpack.c.bf16 %v5241_v56, %v5223_v55  ;;  %v6155_v55 = vpack.c.bf16 %v5312_v39, %v5294_v36  ;;  %v4549_v56 = vld [vmem:[%s8879_s2 + $0x8] sm:$0xff]  ;;  %v5463_v36 = vld [vmem:[%s6474_s17 + $0x13b8] sm:$0xff] }
  0xfe   : > { %9010 = vst [vmem:[#allocation2_spill] sm:$0xff] %v7343_v15  ;;  %v7349_v19 = vpop.f32.mrb[0].mxu1  ;;  %v7351_v20 = vpop.f32.mrb[1].mxu0  ;;  %2916 = vmatprep.mubr.f32.mxu1 %v8881_v0  ;;  %5335 = vmatmul.mubr.msk.f32.gmra.mrb[86].mxu0 %vm355_vm3, %v7058_v9  ;;  %v5387_v15 = vld [vmem:[%s6474_s17 + $0x1158] sm:$0xff] }
  0xff   : > { %9011 = vst [vmem:[#allocation3_spill] sm:$0xff] %v7351_v20  ;;  %v7358_v23 = vpop.f32.mrb[1].mxu1  ;;  %6107 = vmatpush1.bf16.msra.mxu0 %v6106_v7  ;;  %5341 = vmatmul.mubr.msk.f32.gmra.mrb[86].mxu1 %vm355_vm3, %v7058_v9  ;;  %v5259_v7 = vld [vmem:[%s6474_s17 + $0xf08] sm:$0xff] }
 0x100   : > { %6129 = vmatpush1.bf16.msra.mxu1 %v6128_v8  ;;  %6110 = vmatprep.subr.msk.bf16.mxu0 %vm6512_vm2, %v6108_v10  ;;  %v5277_v8 = vld [vmem:[%s6474_s17 + $0xf98] sm:$0xff] }
 0x101   : > { %6132 = vmatprep.subr.msk.bf16.mxu1 %vm6512_vm2, %v6130_v54  ;;  %v7369_v32 = vpop.f32.mrb[2].mxu0  ;;  %2987 = vmatprep.mubr.f32.mxu0 %v8881_v0  ;;  %v6148_v18 = vpack.c.bf16 %v5277_v8, %v5259_v7  ;;  %v5409_v8 = vld [vmem:[%s6474_s17 + $0x1208] sm:$0xff] }
 0x102   : > { %9012 = vst [vmem:[#allocation4_spill] sm:$0xff] %v7369_v32  ;;  %v7375_v37 = vpop.f32.mrb[2].mxu1  ;;  %3076 = vmatprep.mubr.f32.mxu1 %v8881_v0  ;;  %v7378_v38 = vpop.f32.mrb[3].mxu0  ;;  %4559 = vperm.xlu0 %6413, %v4549_v56   ;;  %v5462_v56 = vld [vmem:[%s6474_s17 + $0x13b0] sm:$0xff]  ;;  %v5436_v32 = vld [vmem:[%s6474_s17 + $0x12e0] sm:$0xff] }
 0x103   : > { %9013 = vst [vmem:[#allocation5_spill] sm:$0xff] %v7378_v38  ;;  %6113 = vmatpush1.bf16.msk.msra.mxu0 %vm6512_vm2, %v6111_v24  ;;  %v7384_v42 = vpop.f32.mrb[3].mxu1  ;;  %v5260_v24 = vld [vmem:[%s6474_s17 + $0xf10] sm:$0xff] }
 0x104   : > { %9014 = vst [vmem:[#allocation6_spill] sm:$0xff] %v7384_v42  ;;  %6135 = vmatpush1.bf16.msk.msra.mxu1 %vm6512_vm2, %v6133_v25  ;;  %6137 = vmatprep.subr.bf16.mxu0 %v6136_v26  ;;  %v6170_v25 = vpack.c.bf16 %v5279_v14, %v5261_v12  ;;  %v5278_v26 = vld [vmem:[%s6474_s17 + $0xfa0] sm:$0xff]  ;;  %v5427_v12 = vld [vmem:[%s6474_s17 + $0x1298] sm:$0xff]  ;;  %v4550_v14 = vld [vmem:[%s8879_s2 + $0x10] sm:$0xff] }
 0x105   : > { %6159 = vmatprep.subr.bf16.mxu1 %v6158_v33  ;;  %v7394_v50 = vpop.f32.mrb[4].mxu0  ;;  %v6150_v33 = vpack.c.bf16 %v5276_v22, %v5258_v21  ;;  %v6172_v34 = vpack.c.bf16 %v5278_v26, %v5260_v24  ;;  %v5190_v22 = vld [vmem:[%s6474_s17 + $0xce0] sm:$0xff]  ;;  %v5208_v24 = vld [vmem:[%s6474_s17 + $0xd70] sm:$0xff]  ;;  %4564 = vperm.xlu1 %6414, %v4550_v14  }
 0x106   : > { %9015 = vst [vmem:[#allocation7_spill] sm:$0xff] %v7394_v50  ;;  %5344 = vmatmul.mubr.msk.f32.vlgmr.msra.gmra.mrb[88].mxu0 %vm355_vm3, %v6999_v30  ;;  %v7402_v57 = vpop.f32.mrb[4].mxu1  ;;  %v7404_v58 = vpop.f32.mrb[5].mxu0  ;;  %v5262_v14 = vld [vmem:[%s6474_s17 + $0xf20] sm:$0xff] }
 0x107   : > { %9016 = vst [vmem:[#allocation8_spill] sm:$0xff] %v7404_v58  ;;  %5350 = vmatmul.mubr.msk.f32.vlgmr.msra.gmra.mrb[88].mxu1 %vm355_vm3, %v6999_v30  ;;  %6139 = vmatpush1.bf16.msra.mxu0 %v6138_v13  ;;  %v7410_v62 = vpop.f32.mrb[5].mxu1  ;;  %v6166_v30 = vpack.c.bf16 %v5243_v61, %v5225_v60  ;;  %v5472_v50 = vld [vmem:[%s6474_s17 + $0x1400] sm:$0xff] }
 0x108   : > { %9017 = vst [vmem:[#allocation9_spill] sm:$0xff] %v7410_v62  ;;  %6161 = vmatpush1.bf16.msra.mxu1 %v6160_v45  ;;  %6141 = vmatprep.subr.bf16.mxu0 %v6140_v46  ;;  %v5314_v45 = vld [vmem:[%s6474_s17 + $0x10c0] sm:$0x7]  ;;  %v5155_v46 = vld [vmem:[%s6474_s17 + $0xbc8] sm:$0xff] }
 0x109   : > { %6163 = vmatprep.subr.bf16.mxu1 %v6162_v51  ;;  %v7415_v6 = vpop.f32.mrb[6].mxu0  ;;  %2993 = vmatprep.mubr.f32.mxu0 %v8881_v0  ;;  %v5391_v51 = vld [vmem:[%s6474_s17 + $0x1178] sm:$0xff]  ;;  %v6177_v60 = vpack.c.bf16 %v5314_v45, %v5296_v41  ;;  %v6180_v61 = vpack.c.bf16 %v5173_v47, %v5155_v46  ;;  %v6186_v41 = vpack.c.bf16 %v5208_v24, %v5190_v22  ;;  %v5226_v46 = vld [vmem:[%s6474_s17 + $0xe00] sm:$0xff]  ;;  %v5244_v47 = vld [vmem:[%s6474_s17 + $0xe90] sm:$0xff] }
 0x10a   : > { %9018 = vst [vmem:[#allocation10_spill] sm:$0xff] %v7415_v6  ;;  %v7421_v10 = vpop.f32.mrb[6].mxu1  ;;  %3082 = vmatprep.mubr.f32.mxu1 %v8881_v0  ;;  %v7424_v11 = vpop.f32.mrb[7].mxu0  ;;  %5345 = vmatmul.mubr.msk.f32.gmra.mrb[90].mxu0 %vm355_vm3, %v7018_v43  ;;  %v6202_v3 = vpack.c.bf16 %v5391_v51, %v5373_v49  ;;  %v6188_v45 = vpack.c.bf16 %v5245_v31, %v5227_v29  ;;  %v5444_v49 = vld [vmem:[%s6474_s17 + $0x1320] sm:$0xff]  ;;  %v5498_v22 = vld [vmem:[%s6474_s17 + $0x14d0] sm:$0xff]  ;;  %v5299_v24 = vld [vmem:[%s6474_s17 + $0x1048] sm:$0xff] }
 0x10b   : > { %9019 = vst [vmem:[#allocation11_spill] sm:$0xff] %v7424_v11  ;;  %6143 = vmatpush1.bf16.msra.mxu0 %v6142_v63  ;;  %v7430_v54 = vpop.f32.mrb[7].mxu1  ;;  %5351 = vmatmul.mubr.msk.f32.gmra.mrb[90].mxu1 %vm355_vm3, %v7018_v43  ;;  %v5313_v43 = vld [vmem:[%s6474_s17 + $0x10b8] sm:$0x7]  ;;  %v5154_v63 = vld [vmem:[%s6474_s17 + $0xbc0] sm:$0xff]  ;;  %v5526_v11 = vld [vmem:[%s6474_s17 + $0x15b0] sm:$0xff] }
 0x10c   : > { %9020 = vst [vmem:[#allocation12_spill] sm:$0xff] %v7430_v54  ;;  %6165 = vmatpush1.bf16.msra.mxu1 %v6164_v1  ;;  %6145 = vmatprep.subr.bf16.mxu0 %v6144_v2  ;;  %v6152_v35 = vpack.c.bf16 %v5313_v43, %v5295_v28  ;;  %v5172_v1 = vld [vmem:[%s6474_s17 + $0xc50] sm:$0xff]  ;;  %v5372_v2 = vld [vmem:[%s6474_s17 + $0x10e0] sm:$0xff]  ;;  %v6206_v28 = vpack.c.bf16 %v5427_v12, %v5409_v8  ;;  %v5535_v29 = vld [vmem:[%s6474_s17 + $0x15f8] sm:$0x7] }
 0x10d   : > { %6167 = vmatprep.subr.bf16.mxu1 %v6166_v30  ;;  %2999 = vmatprep.mubr.f32.mxu0 %v8881_v0  ;;  %v5209_v30 = vld [vmem:[%s6474_s17 + $0xd78] sm:$0xff]  ;;  %v5426_v43 = vld [vmem:[%s6474_s17 + $0x1290] sm:$0xff]  ;;  %v6212_v8 = vpack.c.bf16 %v5462_v56, %v5444_v49  ;;  %v5393_v56 = vld [vmem:[%s6474_s17 + $0x1188] sm:$0xff] }
 0x10e   : > { %3088 = vmatprep.mubr.f32.mxu1 %v8881_v0  ;;  %5346 = vmatmul.mubr.msk.f32.gmra.mrb[92].mxu0 %vm355_vm3, %v7039_v59  ;;  %v6184_v21 = vpack.c.bf16 %v5209_v30, %v5191_v5  ;;  %v6190_v30 = vpack.c.bf16 %v5244_v47, %v5226_v46  ;;  %v5534_v49 = vld [vmem:[%s6474_s17 + $0x15f0] sm:$0x7]  ;;  %v5508_v6 = vld [vmem:[%s6474_s17 + $0x1520] sm:$0xff] }
 0x10f   : > { %6147 = vmatpush1.bf16.msra.mxu0 %v6146_v16  ;;  %5352 = vmatmul.mubr.msk.f32.gmra.mrb[92].mxu1 %vm355_vm3, %v7039_v59  ;;  %v5496_v54 = vld [vmem:[%s6474_s17 + $0x14c0] sm:$0xff] }
 0x110   : > { %6169 = vmatpush1.bf16.msra.mxu1 %v6168_v17  ;;  %6149 = vmatprep.subr.bf16.mxu0 %v6148_v18  ;;  %v6182_v17 = vpack.c.bf16 %v5172_v1, %v5154_v63  ;;  %v6204_v18 = vpack.c.bf16 %v5390_v4, %v5372_v2  ;;  %v7545_v2 = vld [vmem:[%s8878_s1 + $0x8] sm:$0xff]  ;;  %v5499_v4 = vld [vmem:[%s6474_s17 + $0x14d8] sm:$0xff] }
 0x111   : > { %v7451_v13 = vpop.f32.mrb[8].mxu0  ;;  %6171 = vmatprep.subr.bf16.mxu1 %v6170_v25  ;;  %3005 = vmatprep.mubr.f32.mxu0 %v8881_v0  ;;  %v5408_v25 = vld [vmem:[%s6474_s17 + $0x1200] sm:$0xff] }
 0x112   : > { %v7457_v59 = vpop.f32.mrb[8].mxu1  ;;  %v7459_v48 = vpop.f32.mrb[9].mxu0  ;;  %3094 = vmatprep.mubr.f32.mxu1 %v8881_v0  ;;  %5347 = vmatmul.mubr.msk.f32.gmra.mrb[94].mxu0 %vm355_vm3, %v7058_v9 }
 0x113   : > { %9021 = vst [vmem:[#allocation13_spill] sm:$0xff] %v7457_v59  ;;  %v7466_v53 = vpop.f32.mrb[9].mxu1  ;;  %6151 = vmatpush1.bf16.msra.mxu0 %v6150_v33  ;;  %5353 = vmatmul.mubr.msk.f32.gmra.mrb[94].mxu1 %vm355_vm3, %v7058_v9 }
 0x114   : > { %9022 = vst [vmem:[#allocation14_spill] sm:$0xff] %v7466_v53  ;;  %6173 = vmatpush1.bf16.msra.mxu1 %v6172_v34  ;;  %6154 = vmatprep.subr.msk.bf16.mxu0 %vm6512_vm2, %v6152_v35  ;;  %v5445_v35 = vld [vmem:[%s6474_s17 + $0x1328] sm:$0xff] }
 0x115   : > { %6176 = vmatprep.subr.msk.bf16.mxu1 %vm6512_vm2, %v6174_v44  ;;  %v7480_v9 = vpop.f32.mrb[10].mxu0  ;;  %3165 = vmatprep.mubr.f32.mxu0 %v8881_v0  ;;  %v6208_v44 = vpack.c.bf16 %v5426_v43, %v5408_v25  ;;  %v5317_v25 = vld [vmem:[%s6474_s17 + $0x10d8] sm:$0x7]  ;;  %v5517_v43 = vld [vmem:[%s6474_s17 + $0x1568] sm:$0xff] }
 0x116   : > { %v7486_v40 = vpop.f32.mrb[10].mxu1  ;;  %3254 = vmatprep.mubr.f32.mxu1 %v8881_v0  ;;  %v7489_v7 = vpop.f32.mrb[11].mxu0  ;;  %v6218_v47 = vpack.c.bf16 %v5535_v29, %v5517_v43  ;;  %v5376_v43 = vld [vmem:[%s6474_s17 + $0x1100] sm:$0xff]  ;;  %v5394_v29 = vld [vmem:[%s6474_s17 + $0x1190] sm:$0xff] }
 0x117   : > { %9023 = vst [vmem:[#allocation15_spill] sm:$0xff] %v7486_v40  ;;  %6157 = vmatpush1.bf16.msk.msra.mxu0 %vm6512_vm2, %v6155_v55  ;;  %v7498_v16 = vpop.f32.mrb[11].mxu1  ;;  %v6210_v55 = vpack.c.bf16 %v5463_v36, %v5445_v35  ;;  %v6196_v36 = vpack.c.bf16 %v5317_v25, %v5299_v24 }
 0x118   : > { %9024 = vst [vmem:[#allocation16_spill] sm:$0xff] %v7498_v16  ;;  %6179 = vmatpush1.bf16.msk.msra.mxu1 %vm6512_vm2, %v6177_v60  ;;  %6181 = vmatprep.subr.bf16.mxu0 %v6180_v61  ;;  %v5263_v60 = vld [vmem:[%s6474_s17 + $0xf28] sm:$0xff]  ;;  %v5281_v61 = vld [vmem:[%s6474_s17 + $0xfb8] sm:$0xff] }
 0x119   : > { %6203 = vmatprep.subr.bf16.mxu1 %v6202_v3  ;;  %v7506_v26 = vpop.f32.mrb[12].mxu0  ;;  %v5481_v3 = vld [vmem:[%s6474_s17 + $0x1448] sm:$0xff]  ;;  %v6192_v12 = vpack.c.bf16 %v5281_v61, %v5263_v60 }
 0x11a   : > { %5356 = vmatmul.mubr.msk.f32.vlgmr.msra.gmra.mrb[96].mxu0 %vm355_vm3, %v7514_v27  ;;  %v7518_v33 = vpop.f32.mrb[12].mxu1  ;;  %v7520_v34 = vpop.f32.mrb[13].mxu0 }
 0x11b   : > { %9025 = vst [vmem:[#allocation17_spill] sm:$0xff] %v7518_v33  ;;  %5362 = vmatmul.mubr.msk.f32.vlgmr.msra.gmra.mrb[96].mxu1 %vm355_vm3, %v7514_v27  ;;  %6183 = vmatpush1.bf16.msra.mxu0 %v6182_v17  ;;  %v7526_v39 = vpop.f32.mrb[13].mxu1  ;;  %v5280_v17 = vld [vmem:[%s6474_s17 + $0xfb0] sm:$0xff] }
 0x11c   : > { %9026 = vst [vmem:[#allocation18_spill] sm:$0xff] %v7526_v39  ;;  %6205 = vmatpush1.bf16.msra.mxu1 %v6204_v18  ;;  %6185 = vmatprep.subr.bf16.mxu0 %v6184_v21  ;;  %v5480_v18 = vld [vmem:[%s6474_s17 + $0x1440] sm:$0xff]  ;;  %v6214_v21 = vpack.c.bf16 %v5499_v4, %v5481_v3  ;;  %v6194_v31 = vpack.c.bf16 %v5280_v17, %v5262_v14  ;;  %v7591_v3 = vld [vmem:[%s8878_s1 + $0x18] sm:$0xff]  ;;  %v5377_v4 = vld [vmem:[%s6474_s17 + $0x1108] sm:$0xff] }
 0x11d   : > { %6207 = vmatprep.subr.bf16.mxu1 %v6206_v28  ;;  %v7531_v51 = vpop.f32.mrb[14].mxu0  ;;  %3171 = vmatprep.mubr.f32.mxu0 %v8881_v0  ;;  %v7566_v28 = vld [vmem:[%s8878_s1 + $0x10] sm:$0xff]  ;;  %v6216_v35 = vpack.c.bf16 %v5498_v22, %v5480_v18  ;;  %v4551_v14 = vld [vmem:[%s8879_s2 + $0x18] sm:$0xff]  ;;  %v5392_v22 = vld [vmem:[%s6474_s17 + $0x1180] sm:$0xff] }
 0x11e   : > { %v7537_v63 = vpop.f32.mrb[14].mxu1  ;;  %3260 = vmatprep.mubr.f32.mxu1 %v8881_v0  ;;  %v7540_v1 = vpop.f32.mrb[15].mxu0  ;;  %5357 = vmatmul.mubr.msk.f32.gmra.mrb[98].mxu0 %vm355_vm3, %v7545_v2 }
 0x11f   : > { %9027 = vst [vmem:[#allocation19_spill] sm:$0xff] %v7537_v63  ;;  %9028 = vst [vmem:[#allocation20_spill] sm:$0xff] %v7540_v1  ;;  %6187 = vmatpush1.bf16.msra.mxu0 %v6186_v41  ;;  %v7551_v5 = vpop.f32.mrb[15].mxu1  ;;  %5363 = vmatmul.mubr.msk.f32.gmra.mrb[98].mxu1 %vm355_vm3, %v7545_v2  ;;  %v5298_v41 = vld [vmem:[%s6474_s17 + $0x1040] sm:$0xff]  ;;  %v5383_v63 = vld [vmem:[%s6474_s17 + $0x1138] sm:$0xff] }
 0x120   : > { %9029 = vst [vmem:[#allocation21_spill] sm:$0xff] %v7551_v5  ;;  %6209 = vmatpush1.bf16.msra.mxu1 %v6208_v44  ;;  %6189 = vmatprep.subr.bf16.mxu0 %v6188_v45  ;;  %v5316_v44 = vld [vmem:[%s6474_s17 + $0x10d0] sm:$0x7]  ;;  %v5516_v45 = vld [vmem:[%s6474_s17 + $0x1560] sm:$0xff] }
 0x121   : > { %6211 = vmatprep.subr.bf16.mxu1 %v6210_v55  ;;  %3177 = vmatprep.mubr.f32.mxu0 %v8881_v0  ;;  %v5375_v55 = vld [vmem:[%s6474_s17 + $0x10f8] sm:$0xff]  ;;  %v6221_v17 = vpack.c.bf16 %v5534_v49, %v5516_v45 }
 0x122   : > { %3266 = vmatprep.mubr.f32.mxu1 %v8881_v0  ;;  %5358 = vmatmul.mubr.msk.f32.gmra.mrb[100].mxu0 %vm355_vm3, %v7566_v28  ;;  %v6224_v18 = vpack.c.bf16 %v5393_v56, %v5375_v55  ;;  %v5431_v45 = vld [vmem:[%s6474_s17 + $0x12b8] sm:$0xff]  ;;  %v6248_v55 = vpack.c.bf16 %v5394_v29, %v5376_v43  ;;  %v5410_v56 = vld [vmem:[%s6474_s17 + $0x1210] sm:$0xff]  ;;  %v5449_v29 = vld [vmem:[%s6474_s17 + $0x1348] sm:$0xff] }
 0x123   : > { %6191 = vmatpush1.bf16.msra.mxu0 %v6190_v30  ;;  %5364 = vmatmul.mubr.msk.f32.gmra.mrb[100].mxu1 %vm355_vm3, %v7566_v28  ;;  %v5395_v30 = vld [vmem:[%s6474_s17 + $0x1198] sm:$0xff] }
 0x124   : > { %6213 = vmatpush1.bf16.msra.mxu1 %v6212_v8  ;;  %6193 = vmatprep.subr.bf16.mxu0 %v6192_v12  ;;  %v6199_v12 = vpack.c.bf16 %v5316_v44, %v5298_v41  ;;  %v6246_v25 = vpack.c.bf16 %v5395_v30, %v5377_v4  ;;  %v5429_v41 = vld [vmem:[%s6474_s17 + $0x12a8] sm:$0xff]  ;;  %v5428_v4 = vld [vmem:[%s6474_s17 + $0x12a0] sm:$0xff] }
 0x125   : > { %v7577_v46 = vpop.f32.mrb[16].mxu0  ;;  %6215 = vmatprep.subr.bf16.mxu1 %v6214_v21  ;;  %3183 = vmatprep.mubr.f32.mxu0 %v8881_v0  ;;  %v5374_v21 = vld [vmem:[%s6474_s17 + $0x10f0] sm:$0xff]  ;;  %v5413_v44 = vld [vmem:[%s6474_s17 + $0x1228] sm:$0xff]  ;;  %v6230_v43 = vpack.c.bf16 %v5428_v4, %v5410_v56  ;;  %v5483_v4 = vld [vmem:[%s6474_s17 + $0x1458] sm:$0xff] }
 0x126   : > { %9030 = vst [vmem:[#allocation22_spill] sm:$0xff] %v7577_v46  ;;  %v7583_v60 = vpop.f32.mrb[16].mxu1  ;;  %v7585_v61 = vpop.f32.mrb[17].mxu0  ;;  %3272 = vmatprep.mubr.f32.mxu1 %v8881_v0  ;;  %5359 = vmatmul.mubr.msk.f32.gmra.mrb[102].mxu0 %vm355_vm3, %v7591_v3  ;;  %v6226_v49 = vpack.c.bf16 %v5392_v22, %v5374_v21  ;;  %v5465_v22 = vld [vmem:[%s6474_s17 + $0x13c8] sm:$0xff] }
 0x127   : > { %9031 = vst [vmem:[#allocation23_spill] sm:$0xff] %v7583_v60  ;;  %9032 = vst [vmem:[#allocation24_spill] sm:$0xff] %v7585_v61  ;;  %v7597_v8 = vpop.f32.mrb[17].mxu1  ;;  %6195 = vmatpush1.bf16.msra.mxu0 %v6194_v31  ;;  %5365 = vmatmul.mubr.msk.f32.gmra.mrb[102].mxu1 %vm355_vm3, %v7591_v3  ;;  %v5411_v31 = vld [vmem:[%s6474_s17 + $0x1218] sm:$0xff]  ;;  %v5484_v60 = vld [vmem:[%s6474_s17 + $0x1460] sm:$0xff] }
 0x128   : > { %9033 = vst [vmem:[#allocation25_spill] sm:$0xff] %v7597_v8  ;;  %6217 = vmatpush1.bf16.msra.mxu1 %v6216_v35  ;;  %6198 = vmatprep.subr.msk.bf16.mxu0 %vm6512_vm2, %v6196_v36  ;;  %v5448_v8 = vld [vmem:[%s6474_s17 + $0x1340] sm:$0xff] }
 0x129   : > { %6220 = vmatprep.subr.msk.bf16.mxu1 %vm6512_vm2, %v6218_v47  ;;  %v7610_v24 = vpop.f32.mrb[18].mxu0  ;;  %3343 = vmatprep.mubr.f32.mxu0 %v8881_v0 }
 0x12a   : > { %9034 = vst [vmem:[#allocation26_spill] sm:$0xff] %v7610_v24  ;;  %v7616_v35 = vpop.f32.mrb[18].mxu1  ;;  %3667 = vmatprep.mubr.f32.mxu1 %v8881_v0  ;;  %v7619_v36 = vpop.f32.mrb[19].mxu0  ;;  %4569 = vperm.xlu1 %6414, %v4551_v14   ;;  %v6228_v14 = vpack.c.bf16 %v5429_v41, %v5411_v31  ;;  %v6250_v0 = vpack.c.bf16 %v5431_v45, %v5413_v44  ;;  %v5467_v31 = vld [vmem:[%s6474_s17 + $0x13d8] sm:$0xff]  ;;  %v9042_v41 = vmov 0.0   ;;  %v5446_v45 = vld [vmem:[%s6474_s17 + $0x1330] sm:$0xff] }
 0x12b   : > { %9035 = vst [vmem:[#allocation27_spill] sm:$0xff] %v7616_v35  ;;  %9036 = vst [vmem:[#allocation28_spill] sm:$0xff] %v7619_v36  ;;  %6201 = vmatpush1.bf16.msk.msra.mxu0 %vm6512_vm2, %v6199_v12  ;;  %v7626_v47 = vpop.f32.mrb[19].mxu1  ;;  %v5412_v12 = vld [vmem:[%s6474_s17 + $0x1220] sm:$0xff] }
 0x12c   : > { %9037 = vst [vmem:[#allocation29_spill] sm:$0xff] %v7626_v47  ;;  %6223 = vmatpush1.bf16.msk.msra.mxu1 %vm6512_vm2, %v6221_v17  ;;  %6225 = vmatprep.subr.bf16.mxu0 %v6224_v18  ;;  %v5430_v47 = vld [vmem:[%s6474_s17 + $0x12b0] sm:$0xff]  ;;  %v5447_v18 = vld [vmem:[%s6474_s17 + $0x1338] sm:$0xff] }
 0x12d   : > { %6247 = vmatprep.subr.bf16.mxu1 %v6246_v25  ;;  %v7632_v30 = vpop.f32.mrb[20].mxu0  ;;  %v6252_v44 = vpack.c.bf16 %v5430_v47, %v5412_v12  ;;  %v6254_v47 = vpack.c.bf16 %v5467_v31, %v5449_v29  ;;  %v5482_v31 = vld [vmem:[%s6474_s17 + $0x1450] sm:$0xff] }
 0x12e   : > { %9038 = vst [vmem:[#allocation30_spill] sm:$0xff] %v7632_v30  ;;  %5368 = vmatmul.mubr.msk.f32.vlgmr.msra.gmra.mrb[104].mxu0 %vm355_vm3, %v7514_v27  ;;  %v7638_v21 = vpop.f32.mrb[20].mxu1  ;;  %v7640_v17 = vpop.f32.mrb[21].mxu0 }
 0x12f   : > { %9039 = vst [vmem:[#allocation31_spill] sm:$0xff] %v7638_v21  ;;  %9040 = vst [vmem:[#allocation32_spill] sm:$0xff] %v7640_v17  ;;  %5554 = vmatmul.mubr.msk.f32.vlgmr.msra.gmra.mrb[104].mxu1 %vm355_vm3, %v7514_v27  ;;  %6227 = vmatpush1.bf16.msra.mxu0 %v6226_v49  ;;  %v7646_v25 = vpop.f32.mrb[21].mxu1  ;;  %v5464_v21 = vld [vmem:[%s6474_s17 + $0x13c0] sm:$0xff]  ;;  %v6232_v49 = vpack.c.bf16 %v5465_v22, %v5447_v18  ;;  %v5485_v18 = vld [vmem:[%s6474_s17 + $0x1468] sm:$0xff] }
 0x130   : > { %9041 = vst [vmem:[#allocation33_spill] sm:$0xff] %v7646_v25  ;;  %6249 = vmatpush1.bf16.msra.mxu1 %v6248_v55  ;;  %3673 = vmatprep.mubr.f32.mxu1 %v9042_v41  ;;  %v5466_v25 = vld [vmem:[%s6474_s17 + $0x13d0] sm:$0xff]  ;;  %v6234_v12 = vpack.c.bf16 %v5464_v21, %v5446_v45  ;;  %v5503_v22 = vld [vmem:[%s6474_s17 + $0x14f8] sm:$0xff]  ;;  %v5537_v45 = vld [vmem:[%s6474_s17 + $0x1608] sm:$0x7] }
 0x131   : > { %6229 = vmatprep.subr.bf16.mxu0 %v6228_v14  ;;  %6251 = vmatprep.subr.bf16.mxu1 %v6250_v0  ;;  %v7653_v35 = vpop.f32.mrb[22].mxu0  ;;  %v5501_v14 = vld [vmem:[%s6474_s17 + $0x14e8] sm:$0xff]  ;;  %v6256_v29 = vpack.c.bf16 %v5466_v25, %v5448_v8  ;;  %v5519_v21 = vld [vmem:[%s6474_s17 + $0x1578] sm:$0xff] }
 0x132   : > { %9043 = vst [vmem:[#allocation34_spill] sm:$0xff] %v7653_v35  ;;  %v7657_v56 = vpop.f32.mrb[22].mxu1  ;;  %3349 = vmatprep.mubr.f32.mxu0 %v9042_v41  ;;  %v7660_v55 = vpop.f32.mrb[23].mxu0  ;;  %v5539_v8 = vld [vmem:[%s6474_s17 + $0x1618] sm:$0x7] }
 0x133   : > { %9044 = vst [vmem:[#allocation35_spill] sm:$0xff] %v7657_v56  ;;  %9045 = vst [vmem:[#allocation36_spill] sm:$0xff] %v7660_v55  ;;  %5555 = vmatmul.mubr.msk.f32.gmra.mrb[106].mxu1 %vm355_vm3, %v7545_v2  ;;  %6231 = vmatpush1.bf16.msra.mxu0 %v6230_v43  ;;  %v7666_v0 = vpop.f32.mrb[23].mxu1  ;;  %v5500_v56 = vld [vmem:[%s6474_s17 + $0x14e0] sm:$0xff]  ;;  %v6236_v43 = vpack.c.bf16 %v5501_v14, %v5483_v4  ;;  %v5502_v55 = vld [vmem:[%s6474_s17 + $0x14f0] sm:$0xff]  ;;  %v6240_v4 = vpack.c.bf16 %v5537_v45, %v5519_v21 }
 0x134   : > { %9046 = vst [vmem:[#allocation37_spill] sm:$0xff] %v7666_v0  ;;  %6253 = vmatpush1.bf16.msra.mxu1 %v6252_v44  ;;  %3679 = vmatprep.mubr.f32.mxu1 %v9042_v41  ;;  %v6258_v44 = vpack.c.bf16 %v5503_v22, %v5485_v18  ;;  %v5521_v0 = vld [vmem:[%s6474_s17 + $0x1588] sm:$0xff]  ;;  %v6238_v25 = vpack.c.bf16 %v5500_v56, %v5482_v31  ;;  %v5536_v14 = vld [vmem:[%s6474_s17 + $0x1600] sm:$0x7]  ;;  %v5538_v35 = vld [vmem:[%s6474_s17 + $0x1610] sm:$0x7] }
 0x135   : > { %5369 = vmatmul.mubr.msk.f32.gmra.mrb[106].mxu0 %vm355_vm3, %v7545_v2  ;;  %6233 = vmatprep.subr.bf16.mxu0 %v6232_v49  ;;  %v6260_v49 = vpack.c.bf16 %v5502_v55, %v5484_v60  ;;  %v5520_v18 = vld [vmem:[%s6474_s17 + $0x1580] sm:$0xff]  ;;  %v6262_v5 = vpack.c.bf16 %v5539_v8, %v5521_v0  ;;  %v5397_v56 = vld [vmem:[%s6474_s17 + $0x11a8] sm:$0xff]  ;;  %v5399_v31 = vld [vmem:[%s6474_s17 + $0x11b8] sm:$0xff] }
 0x136   : > { %6255 = vmatprep.subr.bf16.mxu1 %v6254_v47  ;;  %3355 = vmatprep.mubr.f32.mxu0 %v9042_v41  ;;  %v5518_v47 = vld [vmem:[%s6474_s17 + $0x1570] sm:$0xff]  ;;  %v5381_v55 = vld [vmem:[%s6474_s17 + $0x1128] sm:$0xff]  ;;  %v5396_v8 = vld [vmem:[%s6474_s17 + $0x11a0] sm:$0xff] }
 0x137   : > { %5556 = vmatmul.mubr.msk.f32.gmra.mrb[108].mxu1 %vm355_vm3, %v7566_v28  ;;  %6235 = vmatpush1.bf16.msra.mxu0 %v6234_v12  ;;  %v5379_v12 = vld [vmem:[%s6474_s17 + $0x1118] sm:$0xff]  ;;  %v6243_v0 = vpack.c.bf16 %v5536_v14, %v5518_v47  ;;  %v5380_v47 = vld [vmem:[%s6474_s17 + $0x1120] sm:$0xff]  ;;  %v5398_v14 = vld [vmem:[%s6474_s17 + $0x11b0] sm:$0xff] }
 0x138   : > { %6257 = vmatpush1.bf16.msra.mxu1 %v6256_v29  ;;  %3685 = vmatprep.mubr.f32.mxu1 %v9042_v41  ;;  %v6268_v45 = vpack.c.bf16 %v5397_v56, %v5379_v12  ;;  %v5433_v12 = vld [vmem:[%s6474_s17 + $0x12c8] sm:$0xff] }
 0x139   : > { %v7688_v22 = vpop.f32.mrb[24].mxu0  ;;  %5370 = vmatmul.mubr.msk.f32.gmra.mrb[108].mxu0 %vm355_vm3, %v7566_v28  ;;  %6237 = vmatprep.subr.bf16.mxu0 %v6236_v43  ;;  %v6265_v43 = vpack.c.bf16 %v5538_v35, %v5520_v18  ;;  %v5415_v18 = vld [vmem:[%s6474_s17 + $0x1238] sm:$0xff] }
 0x13a   : > { %9047 = vst [vmem:[#allocation38_spill] sm:$0xff] %v7688_v22  ;;  %v7695_v29 = vpop.f32.mrb[24].mxu1  ;;  %v7697_v60 = vpop.f32.mrb[25].mxu0  ;;  %6259 = vmatprep.subr.bf16.mxu1 %v6258_v44  ;;  %3361 = vmatprep.mubr.f32.mxu0 %v9042_v41  ;;  %v5378_v44 = vld [vmem:[%s6474_s17 + $0x1110] sm:$0xff] }
 0x13b   : > { %9048 = vst [vmem:[#allocation39_spill] sm:$0xff] %v7695_v29  ;;  %9049 = vst [vmem:[#allocation40_spill] sm:$0xff] %v7697_v60  ;;  %v7702_v21 = vpop.f32.mrb[25].mxu1  ;;  %5557 = vmatmul.mubr.msk.f32.gmra.mrb[110].mxu1 %vm355_vm3, %v7591_v3  ;;  %6239 = vmatpush1.bf16.msra.mxu0 %v6238_v25  ;;  %v6270_v56 = vpack.c.bf16 %v5396_v8, %v5378_v44  ;;  %v5432_v29 = vld [vmem:[%s6474_s17 + $0x12c0] sm:$0xff]  ;;  %v5451_v8 = vld [vmem:[%s6474_s17 + $0x1358] sm:$0xff] }
 0x13c   : > { %9050 = vst [vmem:[#allocation41_spill] sm:$0xff] %v7702_v21  ;;  %6261 = vmatpush1.bf16.msra.mxu1 %v6260_v49  ;;  %6242 = vmatprep.subr.msk.bf16.mxu0 %vm6512_vm2, %v6240_v4  ;;  %v6290_v49 = vpack.c.bf16 %v5399_v31, %v5381_v55  ;;  %v5417_v55 = vld [vmem:[%s6474_s17 + $0x1248] sm:$0xff]  ;;  %v5435_v31 = vld [vmem:[%s6474_s17 + $0x12d8] sm:$0xff]  ;;  %v5414_v21 = vld [vmem:[%s6474_s17 + $0x1230] sm:$0xff] }
 0x13d   : > { %5371 = vmatmul.mubr.msk.f32.gmra.mrb[110].mxu0 %vm355_vm3, %v7591_v3  ;;  %6264 = vmatprep.subr.msk.bf16.mxu1 %vm6512_vm2, %v6262_v5  ;;  %v7714_v25 = vpop.f32.mrb[26].mxu0  ;;  %v5542_v22 = vld [vmem:[%s6474_s17 + $0x1630] sm:$0x7] }
 0x13e   : > { %9051 = vst [vmem:[#allocation42_spill] sm:$0xff] %v7714_v25  ;;  %v7718_v4 = vpop.f32.mrb[26].mxu1  ;;  %3756 = vmatprep.mubr.f32.mxu0 %v9042_v41  ;;  %3845 = vmatprep.mubr.f32.mxu1 %v9042_v41  ;;  %v7722_v35 = vpop.f32.mrb[27].mxu0  ;;  %v5416_v25 = vld [vmem:[%s6474_s17 + $0x1240] sm:$0xff] }
 0x13f   : > { %9052 = vst [vmem:[#allocation43_spill] sm:$0xff] %v7718_v4  ;;  %9053 = vst [vmem:[#allocation44_spill] sm:$0xff] %v7722_v35  ;;  %6245 = vmatpush1.bf16.msk.msra.mxu0 %vm6512_vm2, %v6243_v0  ;;  %v7728_v5 = vpop.f32.mrb[27].mxu1  ;;  %v6292_v4 = vpack.c.bf16 %v5398_v14, %v5380_v47  ;;  %v6272_v0 = vpack.c.bf16 %v5433_v12, %v5415_v18  ;;  %v5469_v47 = vld [vmem:[%s6474_s17 + $0x13e8] sm:$0xff]  ;;  %v6274_v14 = vpack.c.bf16 %v5432_v29, %v5414_v21  ;;  %v5471_v12 = vld [vmem:[%s6474_s17 + $0x13f8] sm:$0xff] }
 0x140   : > { %9054 = vst [vmem:[#allocation45_spill] sm:$0xff] %v7728_v5  ;;  %6267 = vmatpush1.bf16.msk.msra.mxu1 %vm6512_vm2, %v6265_v43  ;;  %6269 = vmatprep.subr.bf16.mxu0 %v6268_v45  ;;  %v5434_v5 = vld [vmem:[%s6474_s17 + $0x12d0] sm:$0xff]  ;;  %v6294_v45 = vpack.c.bf16 %v5435_v31, %v5417_v55  ;;  %v5453_v18 = vld [vmem:[%s6474_s17 + $0x1368] sm:$0xff]  ;;  %v5468_v31 = vld [vmem:[%s6474_s17 + $0x13e0] sm:$0xff] }
 0x141   : > { %6291 = vmatprep.subr.bf16.mxu1 %v6290_v49  ;;  %v7736_v35 = vpop.f32.mrb[28].mxu0  ;;  %v5450_v55 = vld [vmem:[%s6474_s17 + $0x1350] sm:$0xff] }
 0x142   : > { %9055 = vst [vmem:[#allocation46_spill] sm:$0xff] %v7736_v35  ;;  %5560 = vmatmul.mubr.msk.f32.vlgmr.msra.gmra.mrb[112].mxu0 %vm355_vm3, %v7514_v27  ;;  %v7742_v44 = vpop.f32.mrb[28].mxu1  ;;  %v7744_v43 = vpop.f32.mrb[29].mxu0  ;;  %v5470_v29 = vld [vmem:[%s6474_s17 + $0x13f0] sm:$0xff] }
 0x143   : > { %9056 = vst [vmem:[#allocation47_spill] sm:$0xff] %v7742_v44  ;;  %9057 = vst [vmem:[#allocation48_spill] sm:$0xff] %v7744_v43  ;;  %5566 = vmatmul.mubr.msk.f32.vlgmr.msra.gmra.mrb[112].mxu1 %vm355_vm3, %v7514_v27  ;;  %6271 = vmatpush1.bf16.msra.mxu0 %v6270_v56  ;;  %v7750_v49 = vpop.f32.mrb[29].mxu1  ;;  %v6296_v44 = vpack.c.bf16 %v5434_v5, %v5416_v25  ;;  %v6276_v56 = vpack.c.bf16 %v5469_v47, %v5451_v8  ;;  %v5487_v5 = vld [vmem:[%s6474_s17 + $0x1478] sm:$0xff] }
 0x144   : > { %9058 = vst [vmem:[#allocation49_spill] sm:$0xff] %v7750_v49  ;;  %6293 = vmatpush1.bf16.msra.mxu1 %v6292_v4  ;;  %3762 = vmatprep.mubr.f32.mxu0 %v9042_v41  ;;  %v5452_v49 = vld [vmem:[%s6474_s17 + $0x1360] sm:$0xff]  ;;  %v6298_v4 = vpack.c.bf16 %v5471_v12, %v5453_v18  ;;  %v6278_v47 = vpack.c.bf16 %v5468_v31, %v5450_v55  ;;  %v5486_v12 = vld [vmem:[%s6474_s17 + $0x1470] sm:$0xff]  ;;  %v5541_v55 = vld [vmem:[%s6474_s17 + $0x1628] sm:$0x7] }
 0x145   : > { %3851 = vmatprep.mubr.f32.mxu1 %v9042_v41  ;;  %6273 = vmatprep.subr.bf16.mxu0 %v6272_v0  ;;  %v7758_v43 = vpop.f32.mrb[30].mxu0  ;;  %v5505_v0 = vld [vmem:[%s6474_s17 + $0x1508] sm:$0xff]  ;;  %v6300_v18 = vpack.c.bf16 %v5470_v29, %v5452_v49  ;;  %v5543_v49 = vld [vmem:[%s6474_s17 + $0x1638] sm:$0x7] }
 0x146   : > { %9059 = vst [vmem:[#allocation50_spill] sm:$0xff] %v7758_v43  ;;  %5561 = vmatmul.mubr.msk.f32.gmra.mrb[114].mxu0 %vm355_vm3, %v7545_v2  ;;  %6295 = vmatprep.subr.bf16.mxu1 %v6294_v45  ;;  %v7764_v21 = vpop.f32.mrb[30].mxu1  ;;  %v7766_v25 = vpop.f32.mrb[31].mxu0  ;;  %v5489_v45 = vld [vmem:[%s6474_s17 + $0x1488] sm:$0xff]  ;;  %v5507_v43 = vld [vmem:[%s6474_s17 + $0x1518] sm:$0xff]  ;;  %v6280_v35 = vpack.c.bf16 %v5505_v0, %v5487_v5  ;;  %v5522_v0 = vld [vmem:[%s6474_s17 + $0x1590] sm:$0xff] }
 0x147   : > { %9060 = vst [vmem:[#allocation51_spill] sm:$0xff] %v7764_v21  ;;  %9061 = vst [vmem:[#allocation52_spill] sm:$0xff] %v7766_v25  ;;  %5567 = vmatmul.mubr.msk.f32.gmra.mrb[114].mxu1 %vm355_vm3, %v7545_v2  ;;  %6275 = vmatpush1.bf16.msra.mxu0 %v6274_v14  ;;  %v7772_v8 = vpop.f32.mrb[31].mxu1  ;;  %v5504_v21 = vld [vmem:[%s6474_s17 + $0x1500] sm:$0xff]  ;;  %v5506_v14 = vld [vmem:[%s6474_s17 + $0x1510] sm:$0xff] }
 0x148   : > { %9062 = vst [vmem:[#allocation53_spill] sm:$0xff] %v7772_v8  ;;  %6297 = vmatpush1.bf16.msra.mxu1 %v6296_v44  ;;  %3768 = vmatprep.mubr.f32.mxu0 %v9042_v41  ;;  %v5488_v25 = vld [vmem:[%s6474_s17 + $0x1480] sm:$0xff]  ;;  %v5523_v8 = vld [vmem:[%s6474_s17 + $0x1598] sm:$0xff]  ;;  %v6302_v44 = vpack.c.bf16 %v5507_v43, %v5489_v45  ;;  %v5525_v31 = vld [vmem:[%s6474_s17 + $0x15a8] sm:$0xff] }
 0x149   : > { %3857 = vmatprep.mubr.f32.mxu1 %v9042_v41  ;;  %6277 = vmatprep.subr.bf16.mxu0 %v6276_v56  ;;  %v6282_v56 = vpack.c.bf16 %v5504_v21, %v5486_v12  ;;  %v6304_v29 = vpack.c.bf16 %v5506_v14, %v5488_v25  ;;  %v6284_v5 = vpack.c.bf16 %v5541_v55, %v5523_v8  ;;  %v5524_v43 = vld [vmem:[%s6474_s17 + $0x15a0] sm:$0xff]  ;;  %v5385_v25 = vld [vmem:[%s6474_s17 + $0x1148] sm:$0xff]  ;;  %v5403_v8 = vld [vmem:[%s6474_s17 + $0x11d8] sm:$0xff] }
 0x14a   : > { %5562 = vmatmul.mubr.msk.f32.gmra.mrb[116].mxu0 %vm355_vm3, %v7566_v28  ;;  %6299 = vmatprep.subr.bf16.mxu1 %v6298_v4  ;;  %v5540_v4 = vld [vmem:[%s6474_s17 + $0x1620] sm:$0x7]  ;;  %v6306_v60 = vpack.c.bf16 %v5543_v49, %v5525_v31  ;;  %v5382_v49 = vld [vmem:[%s6474_s17 + $0x1130] sm:$0xff] }
 0x14b   : > { %5568 = vmatmul.mubr.msk.f32.gmra.mrb[116].mxu1 %vm355_vm3, %v7566_v28  ;;  %6279 = vmatpush1.bf16.msra.mxu0 %v6278_v47  ;;  %v5401_v47 = vld [vmem:[%s6474_s17 + $0x11c8] sm:$0xff]  ;;  %v6287_v14 = vpack.c.bf16 %v5540_v4, %v5522_v0  ;;  %v5384_v0 = vld [vmem:[%s6474_s17 + $0x1140] sm:$0xff]  ;;  %v5402_v4 = vld [vmem:[%s6474_s17 + $0x11d0] sm:$0xff] }
 0x14c   : > { %6301 = vmatpush1.bf16.msra.mxu1 %v6300_v18  ;;  %3774 = vmatprep.mubr.f32.mxu0 %v9042_v41  ;;  %v6312_v31 = vpack.c.bf16 %v5401_v47, %v5383_v63  ;;  %v5437_v63 = vld [vmem:[%s6474_s17 + $0x12e8] sm:$0xff]  ;;  %v5439_v47 = vld [vmem:[%s6474_s17 + $0x12f8] sm:$0xff] }
 0x14d   : > { %v7794_v45 = vpop.f32.mrb[32].mxu0  ;;  %3863 = vmatprep.mubr.f32.mxu1 %v9042_v41  ;;  %6281 = vmatprep.subr.bf16.mxu0 %v6280_v35  ;;  %v5400_v35 = vld [vmem:[%s6474_s17 + $0x11c0] sm:$0xff] }
 0x14e   : > { %9063 = vst [vmem:[#allocation54_spill] sm:$0xff] %v7794_v45  ;;  %v7800_v21 = vpop.f32.mrb[32].mxu1  ;;  %v7802_v18 = vpop.f32.mrb[33].mxu0  ;;  %5563 = vmatmul.mubr.msk.f32.gmra.mrb[118].mxu0 %vm355_vm3, %v7591_v3  ;;  %6303 = vmatprep.subr.bf16.mxu1 %v6302_v44  ;;  %v6309_v44 = vpack.c.bf16 %v5542_v22, %v5524_v43  ;;  %v5419_v22 = vld [vmem:[%s6474_s17 + $0x1258] sm:$0xff]  ;;  %v5421_v43 = vld [vmem:[%s6474_s17 + $0x1268] sm:$0xff] }
 0x14f   : > { %9064 = vst [vmem:[#allocation55_spill] sm:$0xff] %v7800_v21  ;;  %9065 = vst [vmem:[#allocation56_spill] sm:$0xff] %v7802_v18  ;;  %v7810_v12 = vpop.f32.mrb[33].mxu1  ;;  %5569 = vmatmul.mubr.msk.f32.gmra.mrb[118].mxu1 %vm355_vm3, %v7591_v3  ;;  %6283 = vmatpush1.bf16.msra.mxu0 %v6282_v56  ;;  %v6334_v56 = vpack.c.bf16 %v5403_v8, %v5385_v25  ;;  %v5546_v21 = vld [vmem:[%s6474_s17 + $0x1650] sm:$0x7] }
 0x150   : > { %9066 = vst [vmem:[#allocation57_spill] sm:$0xff] %v7810_v12  ;;  %6305 = vmatpush1.bf16.msra.mxu1 %v6304_v29  ;;  %6286 = vmatprep.subr.msk.bf16.mxu0 %vm6512_vm2, %v6284_v5  ;;  %v6336_v29 = vpack.c.bf16 %v5402_v4, %v5384_v0  ;;  %v5473_v0 = vld [vmem:[%s6474_s17 + $0x1408] sm:$0xff] }
 0x151   : > { %6308 = vmatprep.subr.msk.bf16.mxu1 %vm6512_vm2, %v6306_v60  ;;  %3934 = vmatprep.mubr.f32.mxu0 %v9042_v41  ;;  %v6314_v60 = vpack.c.bf16 %v5400_v35, %v5382_v49  ;;  %v6316_v35 = vpack.c.bf16 %v5437_v63, %v5419_v22  ;;  %v5438_v49 = vld [vmem:[%s6474_s17 + $0x12f0] sm:$0xff]  ;;  %v5457_v22 = vld [vmem:[%s6474_s17 + $0x1388] sm:$0xff]  ;;  %v5475_v63 = vld [vmem:[%s6474_s17 + $0x1418] sm:$0xff] }
 0x152   : > { %v7825_v55 = vpop.f32.mrb[34].mxu1  ;;  %4023 = vmatprep.mubr.f32.mxu1 %v9042_v41 }
 0x153   : > { %9067 = vst [vmem:[#allocation58_spill] sm:$0xff] %v7825_v55  ;;  %v7832_v5 = vpop.f32.mrb[35].mxu1  ;;  %6289 = vmatpush1.bf16.msk.msra.mxu0 %vm6512_vm2, %v6287_v14  ;;  %v5418_v55 = vld [vmem:[%s6474_s17 + $0x1250] sm:$0xff]  ;;  %v5420_v14 = vld [vmem:[%s6474_s17 + $0x1260] sm:$0xff] }
 0x154   : > { %9068 = vst [vmem:[#allocation59_spill] sm:$0xff] %v7832_v5  ;;  %6311 = vmatpush1.bf16.msk.msra.mxu1 %vm6512_vm2, %v6309_v44  ;;  %v7842_v8 = vpop.f32.mrb[34].mxu0  ;;  %6313 = vmatprep.subr.bf16.mxu0 %v6312_v31  ;;  %v6338_v44 = vpack.c.bf16 %v5439_v47, %v5421_v43  ;;  %v5455_v31 = vld [vmem:[%s6474_s17 + $0x1378] sm:$0xff]  ;;  %v6340_v4 = vpack.c.bf16 %v5438_v49, %v5420_v14  ;;  %v5474_v43 = vld [vmem:[%s6474_s17 + $0x1410] sm:$0xff] }
 0x155   : > { %9069 = vst [vmem:[#allocation60_spill] sm:$0xff] %v7842_v8  ;;  %v7846_v12 = vpop.f32.mrb[35].mxu0  ;;  %6335 = vmatprep.subr.bf16.mxu1 %v6334_v56  ;;  %v6318_v56 = vpack.c.bf16 %v5436_v32, %v5418_v55  ;;  %v6320_v32 = vpack.c.bf16 %v5473_v0, %v5455_v31  ;;  %v5456_v55 = vld [vmem:[%s6474_s17 + $0x1380] sm:$0xff]  ;;  %v6342_v14 = vpack.c.bf16 %v5475_v63, %v5457_v22  ;;  %v5491_v49 = vld [vmem:[%s6474_s17 + $0x1498] sm:$0xff]  ;;  %v5493_v0 = vld [vmem:[%s6474_s17 + $0x14a8] sm:$0xff] }
 0x156   : > { %9070 = vst [vmem:[#allocation61_spill] sm:$0xff] %v7846_v12  ;;  %v7850_v20 = vpop.f32.mrb[36].mxu1  ;;  %5572 = vmatmul.mubr.msk.f32.vlgmr.msra.gmra.mrb[120].mxu0 %vm355_vm3, %v7514_v27  ;;  %v6344_v58 = vpack.c.bf16 %v5474_v43, %v5456_v55  ;;  %v5510_v5 = vld [vmem:[%s6474_s17 + $0x1530] sm:$0xff]  ;;  %v5545_v22 = vld [vmem:[%s6474_s17 + $0x1648] sm:$0x7] }
 0x157   : > { %9071 = vst [vmem:[#allocation62_spill] sm:$0xff] %v7850_v20  ;;  %v7858_v25 = vpop.f32.mrb[37].mxu1  ;;  %5578 = vmatmul.mubr.msk.f32.vlgmr.msra.gmra.mrb[120].mxu1 %vm355_vm3, %v7514_v27  ;;  %6315 = vmatpush1.bf16.msra.mxu0 %v6314_v60  ;;  %v5454_v20 = vld [vmem:[%s6474_s17 + $0x1370] sm:$0xff]  ;;  %v5529_v55 = vld [vmem:[%s6474_s17 + $0x15c8] sm:$0xff] }
 0x158   : > { %9072 = vst [vmem:[#allocation63_spill] sm:$0xff] %v7858_v25  ;;  %6337 = vmatpush1.bf16.msra.mxu1 %v6336_v29  ;;  %v7866_v47 = vpop.f32.mrb[36].mxu0  ;;  %3940 = vmatprep.mubr.f32.mxu0 %v9042_v41  ;;  %v5509_v25 = vld [vmem:[%s6474_s17 + $0x1528] sm:$0xff]  ;;  %v6322_v31 = vpack.c.bf16 %v5472_v50, %v5454_v20 }
 0x159   : > { %9073 = vst [vmem:[#allocation64_spill] sm:$0xff] %v7866_v47  ;;  %4029 = vmatprep.mubr.f32.mxu1 %v9042_v41  ;;  %v7872_v60 = vpop.f32.mrb[37].mxu0  ;;  %6317 = vmatprep.subr.bf16.mxu0 %v6316_v35  ;;  %v6324_v50 = vpack.c.bf16 %v5509_v25, %v5491_v49 }
 0x15a   : > { %9074 = vst [vmem:[#allocation65_spill] sm:$0xff] %v7872_v60  ;;  %v7876_v29 = vpop.f32.mrb[38].mxu1  ;;  %5573 = vmatmul.mubr.msk.f32.gmra.mrb[122].mxu0 %vm355_vm3, %v7545_v2  ;;  %6339 = vmatprep.subr.bf16.mxu1 %v6338_v44  ;;  %v5511_v44 = vld [vmem:[%s6474_s17 + $0x1538] sm:$0xff] }
 0x15b   : > { %9075 = vst [vmem:[#allocation66_spill] sm:$0xff] %v7876_v29  ;;  %v7884_v35 = vpop.f32.mrb[39].mxu1  ;;  %5579 = vmatmul.mubr.msk.f32.gmra.mrb[122].mxu1 %vm355_vm3, %v7545_v2  ;;  %6319 = vmatpush1.bf16.msra.mxu0 %v6318_v56  ;;  %v5490_v29 = vld [vmem:[%s6474_s17 + $0x1490] sm:$0xff]  ;;  %v5492_v56 = vld [vmem:[%s6474_s17 + $0x14a0] sm:$0xff]  ;;  %v6346_v43 = vpack.c.bf16 %v5511_v44, %v5493_v0 }
 0x15c   : > { %9076 = vst [vmem:[#allocation67_spill] sm:$0xff] %v7884_v35  ;;  %6341 = vmatpush1.bf16.msra.mxu1 %v6340_v4  ;;  %v7892_v63 = vpop.f32.mrb[38].mxu0  ;;  %3946 = vmatprep.mubr.f32.mxu0 %v9042_v41  ;;  %v5527_v4 = vld [vmem:[%s6474_s17 + $0x15b8] sm:$0xff]  ;;  %v6326_v25 = vpack.c.bf16 %v5508_v6, %v5490_v29  ;;  %v5528_v0 = vld [vmem:[%s6474_s17 + $0x15c0] sm:$0xff]  ;;  %v5389_v29 = vld [vmem:[%s6474_s17 + $0x1168] sm:$0xff] }
 0x15d   : > { %9077 = vst [vmem:[#allocation68_spill] sm:$0xff] %v7892_v63  ;;  %4035 = vmatprep.mubr.f32.mxu1 %v9042_v41  ;;  %v7899_v20 = vpop.f32.mrb[39].mxu0  ;;  %6321 = vmatprep.subr.bf16.mxu0 %v6320_v32  ;;  %v5547_v35 = vld [vmem:[%s6474_s17 + $0x1658] sm:$0x7]  ;;  %v6348_v32 = vpack.c.bf16 %v5510_v5, %v5492_v56  ;;  %v6328_v49 = vpack.c.bf16 %v5545_v22, %v5527_v4 }
 0x15e   : > { %9078 = vst [vmem:[#allocation69_spill] sm:$0xff] %v7899_v20  ;;  %5574 = vmatmul.mubr.msk.f32.gmra.mrb[124].mxu0 %vm355_vm3, %v7566_v28  ;;  %6343 = vmatprep.subr.bf16.mxu1 %v6342_v14  ;;  %v5544_v14 = vld [vmem:[%s6474_s17 + $0x1640] sm:$0x7]  ;;  %v6350_v38 = vpack.c.bf16 %v5547_v35, %v5529_v55  ;;  %v5407_v22 = vld [vmem:[%s6474_s17 + $0x11f8] sm:$0xff]  ;;  %v6353_v55 = vpack.c.bf16 %v5546_v21, %v5528_v0  ;;  %v5386_v35 = vld [vmem:[%s6474_s17 + $0x1150] sm:$0xff] }
 0x15f   : > { %5580 = vmatmul.mubr.msk.f32.gmra.mrb[124].mxu1 %vm355_vm3, %v7566_v28  ;;  %6323 = vmatpush1.bf16.msra.mxu0 %v6322_v31  ;;  %v5405_v31 = vld [vmem:[%s6474_s17 + $0x11e8] sm:$0xff]  ;;  %v6331_v4 = vpack.c.bf16 %v5544_v14, %v5526_v11  ;;  %v6378_v11 = vpack.c.bf16 %v5407_v22, %v5389_v29  ;;  %v5423_v21 = vld [vmem:[%s6474_s17 + $0x1278] sm:$0xff] }
 0x160   : > { %6345 = vmatpush1.bf16.msra.mxu1 %v6344_v58  ;;  %3952 = vmatprep.mubr.f32.mxu0 %v9042_v41  ;;  %v6356_v56 = vpack.c.bf16 %v5405_v31, %v5387_v15  ;;  %v5404_v58 = vld [vmem:[%s6474_s17 + $0x11e0] sm:$0xff]  ;;  %v5422_v31 = vld [vmem:[%s6474_s17 + $0x1270] sm:$0xff] }
 0x161   : > { %v7914_v44 = vpop.f32.mrb[40].mxu0  ;;  %4041 = vmatprep.mubr.f32.mxu1 %v9042_v41  ;;  %6325 = vmatprep.subr.bf16.mxu0 %v6324_v50  ;;  %v6358_v22 = vpack.c.bf16 %v5404_v58, %v5386_v35  ;;  %v5424_v58 = vld [vmem:[%s6474_s17 + $0x1280] sm:$0xff]  ;;  %v5442_v35 = vld [vmem:[%s6474_s17 + $0x1310] sm:$0xff] }
 0x162   : > { %v7922_v6 = vpop.f32.mrb[40].mxu1  ;;  %v7924_v5 = vpop.f32.mrb[41].mxu0  ;;  %5575 = vmatmul.mubr.msk.f32.gmra.mrb[126].mxu0 %vm355_vm3, %v7591_v3  ;;  %6347 = vmatprep.subr.bf16.mxu1 %v6346_v43  ;;  %v5443_v43 = vld [vmem:[%s6474_s17 + $0x1318] sm:$0xff] }
 0x163   : > { %9079 = vst [vmem:[#allocation70_spill] sm:$0xff] %v7924_v5  ;;  %v7934_v50 = vpop.f32.mrb[41].mxu1  ;;  %5581 = vmatmul.mubr.msk.f32.gmra.mrb[126].mxu1 %vm355_vm3, %v7591_v3  ;;  %6327 = vmatpush1.bf16.msra.mxu0 %v6326_v25  ;;  %v5388_v25 = vld [vmem:[%s6474_s17 + $0x1160] sm:$0xff] }
 0x164   : > { %6349 = vmatpush1.bf16.msra.mxu1 %v6348_v32  ;;  %6330 = vmatprep.subr.msk.bf16.mxu0 %vm6512_vm2, %v6328_v49  ;;  %v5406_v32 = vld [vmem:[%s6474_s17 + $0x11f0] sm:$0xff]  ;;  %v5425_v49 = vld [vmem:[%s6474_s17 + $0x1288] sm:$0xff] }
 0x165   : > { %v7944_v5 = vpop.f32.mrb[42].mxu0  ;;  %6352 = vmatprep.subr.msk.bf16.mxu1 %vm6512_vm2, %v6350_v38  ;;  %4112 = vmatprep.mubr.f32.mxu0 %v9042_v41  ;;  %v5441_v38 = vld [vmem:[%s6474_s17 + $0x1308] sm:$0xff]  ;;  %v6380_v0 = vpack.c.bf16 %v5406_v32, %v5388_v25  ;;  %v6384_v25 = vpack.c.bf16 %v5442_v35, %v5424_v58  ;;  %v5458_v32 = vld [vmem:[%s6474_s17 + $0x1390] sm:$0xff] }
 0x166   : > { %9080 = vst [vmem:[#allocation71_spill] sm:$0xff] %v7944_v5  ;;  %v7953_v14 = vpop.f32.mrb[42].mxu1  ;;  %v7955_v15 = vpop.f32.mrb[43].mxu0  ;;  %4201 = vmatprep.mubr.f32.mxu1 %v9042_v41  ;;  %v5513_v35 = vld [vmem:[%s6474_s17 + $0x1548] sm:$0xff] }
 0x167   : > { %9081 = vst [vmem:[#allocation72_spill] sm:$0xff] %v7953_v14  ;;  %9082 = vst [vmem:[#allocation73_spill] sm:$0xff] %v7955_v15  ;;  %v7964_v29 = vpop.f32.mrb[43].mxu1  ;;  %6333 = vmatpush1.bf16.msk.msra.mxu0 %vm6512_vm2, %v6331_v4  ;;  %v5440_v15 = vld [vmem:[%s6474_s17 + $0x1300] sm:$0xff]  ;;  %v6360_v14 = vpack.c.bf16 %v5441_v38, %v5423_v21  ;;  %v5461_v4 = vld [vmem:[%s6474_s17 + $0x13a8] sm:$0xff] }
 0x168   : > { %9083 = vst [vmem:[#allocation74_spill] sm:$0xff] %v7964_v29  ;;  %6355 = vmatpush1.bf16.msk.msra.mxu1 %vm6512_vm2, %v6353_v55  ;;  %6357 = vmatprep.subr.bf16.mxu0 %v6356_v56  ;;  %v6382_v56 = vpack.c.bf16 %v5443_v43, %v5425_v49  ;;  %v5459_v55 = vld [vmem:[%s6474_s17 + $0x1398] sm:$0xff]  ;;  %v6362_v38 = vpack.c.bf16 %v5440_v15, %v5422_v31  ;;  %v5460_v15 = vld [vmem:[%s6474_s17 + $0x13a0] sm:$0xff]  ;;  %v5478_v31 = vld [vmem:[%s6474_s17 + $0x1430] sm:$0xff] }
 0x169   : > { %v7976_v42 = vpop.f32.mrb[44].mxu0  ;;  %6379 = vmatprep.subr.bf16.mxu1 %v6378_v11  ;;  %v5477_v11 = vld [vmem:[%s6474_s17 + $0x1428] sm:$0xff]  ;;  %v5479_v43 = vld [vmem:[%s6474_s17 + $0x1438] sm:$0xff] }
 0x16a   : > { %v7982_v5 = vpop.f32.mrb[44].mxu1  ;;  %v7984_v29 = vpop.f32.mrb[45].mxu0  ;;  %5584 = vmatmul.mubr.msk.f32.vlgmr.msra.gmra.mrb[128].mxu0 %vm355_vm3, %v7514_v27  ;;  %v6386_v58 = vpack.c.bf16 %v5479_v43, %v5461_v4  ;;  %v5515_v43 = vld [vmem:[%s6474_s17 + $0x1558] sm:$0xff] }
 0x16b   : > { %9084 = vst [vmem:[#allocation75_spill] sm:$0xff] %v7984_v29  ;;  %v7994_v21 = vpop.f32.mrb[45].mxu1  ;;  %5590 = vmatmul.mubr.msk.f32.vlgmr.msra.gmra.mrb[128].mxu1 %vm355_vm3, %v7514_v27  ;;  %6359 = vmatpush1.bf16.msra.mxu0 %v6358_v22  ;;  %v5476_v29 = vld [vmem:[%s6474_s17 + $0x1420] sm:$0xff]  ;;  %v6364_v27 = vpack.c.bf16 %v5477_v11, %v5459_v55  ;;  %v6388_v11 = vpack.c.bf16 %v5478_v31, %v5460_v15  ;;  %v5494_v55 = vld [vmem:[%s6474_s17 + $0x14b0] sm:$0xff]  ;;  %v5551_v15 = vld [vmem:[%s6474_s17 + $0x1678] sm:$0x7] }
 0x16c   : > { %6381 = vmatpush1.bf16.msra.mxu1 %v6380_v0  ;;  %4118 = vmatprep.mubr.f32.mxu0 %v9042_v41  ;;  %v6366_v4 = vpack.c.bf16 %v5476_v29, %v5458_v32  ;;  %v5514_v29 = vld [vmem:[%s6474_s17 + $0x1550] sm:$0xff]  ;;  %v5531_v32 = vld [vmem:[%s6474_s17 + $0x15d8] sm:$0xff] }
 0x16d   : > { %v8005_v62 = vpop.f32.mrb[46].mxu0  ;;  %4207 = vmatprep.mubr.f32.mxu1 %v9042_v41  ;;  %6361 = vmatprep.subr.bf16.mxu0 %v6360_v14  ;;  %v5495_v14 = vld [vmem:[%s6474_s17 + $0x14b8] sm:$0xff]  ;;  %v6392_v31 = vpack.c.bf16 %v5514_v29, %v5496_v54 }
 0x16e   : > { %9085 = vst [vmem:[#allocation76_spill] sm:$0xff] %v8005_v62  ;;  %v8012_v22 = vpop.f32.mrb[46].mxu1  ;;  %v8014_v49 = vpop.f32.mrb[47].mxu0  ;;  %5585 = vmatmul.mubr.msk.f32.gmra.mrb[130].mxu0 %vm355_vm3, %v7545_v2  ;;  %6383 = vmatprep.subr.bf16.mxu1 %v6382_v56  ;;  %v5497_v56 = vld [vmem:[%s6474_s17 + $0x14c8] sm:$0xff] }
 0x16f   : > { %9086 = vst [vmem:[#allocation77_spill] sm:$0xff] %v8014_v49  ;;  %v8024_v0 = vpop.f32.mrb[47].mxu1  ;;  %5591 = vmatmul.mubr.msk.f32.gmra.mrb[130].mxu1 %vm355_vm3, %v7545_v2  ;;  %6363 = vmatpush1.bf16.msra.mxu0 %v6362_v38  ;;  %v5512_v49 = vld [vmem:[%s6474_s17 + $0x1540] sm:$0xff]  ;;  %v6368_v2 = vpack.c.bf16 %v5513_v35, %v5495_v14  ;;  %v5549_v38 = vld [vmem:[%s6474_s17 + $0x1668] sm:$0x7]  ;;  %v5530_v35 = vld [vmem:[%s6474_s17 + $0x15d0] sm:$0xff] }
 0x170   : > { %9087 = vst [vmem:[#allocation78_spill] sm:$0xff] %v8024_v0  ;;  %6385 = vmatpush1.bf16.msra.mxu1 %v6384_v25  ;;  %4124 = vmatprep.mubr.f32.mxu0 %v9042_v41  ;;  %v6390_v25 = vpack.c.bf16 %v5515_v43, %v5497_v56  ;;  %v5533_v62 = vld [vmem:[%s6474_s17 + $0x15e8] sm:$0xff]  ;;  %v6372_v14 = vpack.c.bf16 %v5549_v38, %v5531_v32  ;;  %v5548_v0 = vld [vmem:[%s6474_s17 + $0x1660] sm:$0x7]  ;;  %v5550_v43 = vld [vmem:[%s6474_s17 + $0x1670] sm:$0x7] }
 0x171   : > { %4213 = vmatprep.mubr.f32.mxu1 %v9042_v41  ;;  %6365 = vmatprep.subr.bf16.mxu0 %v6364_v27  ;;  %v6370_v27 = vpack.c.bf16 %v5512_v49, %v5494_v55  ;;  %v5532_v56 = vld [vmem:[%s6474_s17 + $0x15e0] sm:$0xff] }
 0x172   : > { %5586 = vmatmul.mubr.msk.f32.gmra.mrb[132].mxu0 %vm355_vm3, %v7566_v28  ;;  %6387 = vmatprep.subr.bf16.mxu1 %v6386_v58  ;;  %v6394_v58 = vpack.c.bf16 %v5551_v15, %v5533_v62  ;;  %v6397_v29 = vpack.c.bf16 %v5550_v43, %v5532_v56  ;;  %v6423_v43 = vld [vmem:[%s8878_s1] sm:$0xff] }
 0x173   : > { %5592 = vmatmul.mubr.msk.f32.gmra.mrb[132].mxu1 %vm355_vm3, %v7566_v28  ;;  %6367 = vmatpush1.bf16.msra.mxu0 %v6366_v4 }
 0x174   : > { %6389 = vmatpush1.bf16.msra.mxu1 %v6388_v11  ;;  %4130 = vmatprep.mubr.f32.mxu0 %v9042_v41  ;;  %v6375_v11 = vpack.c.bf16 %v5548_v0, %v5530_v35 }
 0x175   : > { %v8049_v1 = vpop.f32.mrb[48].mxu0  ;;  %4219 = vmatprep.mubr.f32.mxu1 %v9042_v41  ;;  %6369 = vmatprep.subr.bf16.mxu0 %v6368_v2 }
 0x176   : > { %9088 = vst [vmem:[#allocation79_spill] sm:$0xff] %v8049_v1  ;;  %v8056_v4 = vpop.f32.mrb[48].mxu1  ;;  %v8058_v49 = vpop.f32.mrb[49].mxu0  ;;  %5587 = vmatmul.mubr.msk.f32.gmra.mrb[134].mxu0 %vm355_vm3, %v7591_v3  ;;  %6391 = vmatprep.subr.bf16.mxu1 %v6390_v25  ;;  %v6426_v25 = vld [vmem:[%s8878_s1 + $0x18] sm:$0xff] }
 0x177   : > { %9089 = vst [vmem:[#allocation80_spill] sm:$0xff] %v8056_v4  ;;  %9090 = vst [vmem:[#allocation81_spill] sm:$0xff] %v8058_v49  ;;  %v8066_v62 = vpop.f32.mrb[49].mxu1  ;;  %5593 = vmatmul.mubr.msk.f32.gmra.mrb[134].mxu1 %vm355_vm3, %v7591_v3  ;;  %6371 = vmatpush1.bf16.msra.mxu0 %v6370_v27  ;;  %v9204_v49 = vld [vmem:[#allocation55_spill] sm:$0xff]  ;;  %v9207_v4 = vld [vmem:[#allocation57_spill] sm:$0xff] }
 0x178   : > { %9091 = vst [vmem:[#allocation82_spill] sm:$0xff] %v8066_v62  ;;  %6393 = vmatpush1.bf16.msra.mxu1 %v6392_v31  ;;  %6374 = vmatprep.subr.msk.bf16.mxu0 %vm6512_vm2, %v6372_v14 }
 0x179   : > { %v8074_v32 = vpop.f32.mrb[50].mxu0  ;;  %6396 = vmatprep.subr.msk.bf16.mxu1 %vm6512_vm2, %v6394_v58  ;;  %4290 = vmatprep.mubr.f32.mxu0 %v9042_v41 }
 0x17a   : > { %9092 = vst [vmem:[#allocation83_spill] sm:$0xff] %v8074_v32  ;;  %v8081_v38 = vpop.f32.mrb[50].mxu1  ;;  %v8083_v0 = vpop.f32.mrb[51].mxu0  ;;  %4379 = vmatprep.mubr.f32.mxu1 %v9042_v41 }
 0x17b   : > { %9093 = vst [vmem:[#allocation84_spill] sm:$0xff] %v8081_v38  ;;  %9094 = vst [vmem:[#allocation85_spill] sm:$0xff] %v8083_v0  ;;  %v8090_v27 = vpop.f32.mrb[51].mxu1  ;;  %6377 = vmatpush1.bf16.msk.msra.mxu0 %vm6512_vm2, %v6375_v11 }
 0x17c   : > { %9095 = vst [vmem:[#allocation86_spill] sm:$0xff] %v8090_v27  ;;  %6399 = vmatpush1.bf16.msk.msra.mxu1 %vm6512_vm2, %v6397_v29 }
 0x17d   : > { %v8098_v14 = vpop.f32.mrb[52].mxu0 }
 0x17e   : > { %9096 = vst [vmem:[#allocation87_spill] sm:$0xff] %v8098_v14  ;;  %v8102_v58 = vpop.f32.mrb[52].mxu1  ;;  %v8104_v56 = vpop.f32.mrb[53].mxu0  ;;  %5596 = vmatmul.mubr.msk.f32.vlgmr.msra.gmra.mrb[136].mxu0 %vm355_vm3, %v6423_v43 }
 0x17f   : > { %9097 = vst [vmem:[#allocation88_spill] sm:$0xff] %v8102_v58  ;;  %9098 = vst [vmem:[#allocation89_spill] sm:$0xff] %v8104_v56  ;;  %v8114_v29 = vpop.f32.mrb[53].mxu1  ;;  %5602 = vmatmul.mubr.msk.f32.vlgmr.msra.gmra.mrb[136].mxu1 %vm355_vm3, %v6423_v43  ;;  %4296 = vmatprep.mubr.f32.mxu0 %v9042_v41  ;;  %v6424_v43 = vld [vmem:[%s8878_s1 + $0x8] sm:$0xff] }
 0x180   : > { %9099 = vst [vmem:[#allocation90_spill] sm:$0xff] %v8114_v29  ;;  %4385 = vmatprep.mubr.f32.mxu1 %v9042_v41 }
 0x181   : > { %v8121_v31 = vpop.f32.mrb[54].mxu0 }
 0x182   : > { %9100 = vst [vmem:[#allocation91_spill] sm:$0xff] %v8121_v31  ;;  %v8125_v11 = vpop.f32.mrb[54].mxu1  ;;  %v8127_v3 = vpop.f32.mrb[55].mxu0  ;;  %5597 = vmatmul.mubr.msk.f32.gmra.mrb[138].mxu0 %vm355_vm3, %v6424_v43  ;;  %v6425_v31 = vld [vmem:[%s8878_s1 + $0x10] sm:$0xff] }
 0x183   : > { %9102 = vst [vmem:[#allocation92_spill] sm:$0xff] %v8125_v11  ;;  %9103 = vst [vmem:[#allocation93_spill] sm:$0xff] %v8127_v3  ;;  %v8137_v54 = vpop.f32.mrb[55].mxu1  ;;  %5603 = vmatmul.mubr.msk.f32.gmra.mrb[138].mxu1 %vm355_vm3, %v6424_v43  ;;  %4302 = vmatprep.mubr.f32.mxu0 %v9042_v41 }
 0x184   : > { %9106 = vst [vmem:[#allocation94_spill] sm:$0xff] %v8137_v54  ;;  %4391 = vmatprep.mubr.f32.mxu1 %v9042_v41 }
 0x186   : > { %5598 = vmatmul.mubr.msk.f32.gmra.mrb[140].mxu0 %vm355_vm3, %v6425_v31 }
 0x187   : > { %5604 = vmatmul.mubr.msk.f32.gmra.mrb[140].mxu1 %vm355_vm3, %v6425_v31  ;;  %4308 = vmatprep.mubr.f32.mxu0 %v9042_v41 }
 0x188   : > { %4397 = vmatprep.mubr.f32.mxu1 %v9042_v41 }
 0x189   : > { %v8151_v43 = vpop.f32.mrb[56].mxu0 }
 0x18a   : > { %9108 = vst [vmem:[#allocation95_spill] sm:$0xff] %v8151_v43  ;;  %v8155_v28 = vpop.f32.mrb[56].mxu1  ;;  %v8157_v54 = vpop.f32.mrb[57].mxu0  ;;  %5599 = vmatmul.mubr.msk.f32.gmra.mrb[142].mxu0 %vm355_vm3, %v6426_v25 }
 0x18b   : > { %9110 = vst [vmem:[#allocation96_spill] sm:$0xff] %v8155_v28  ;;  %9111 = vst [vmem:[#allocation97_spill] sm:$0xff] %v8157_v54  ;;  %v8167_v11 = vpop.f32.mrb[57].mxu1  ;;  %5605 = vmatmul.mubr.msk.f32.gmra.mrb[142].mxu1 %vm355_vm3, %v6426_v25 }
 0x18c   : > { %9114 = vst [vmem:[#allocation98_spill] sm:$0xff] %v8167_v11 }
 0x18d   : > { %v8172_v55 = vpop.f32.mrb[58].mxu0 }
 0x18e   : > { %9116 = vst [vmem:[#allocation99_spill] sm:$0xff] %v8172_v55  ;;  %v8176_v29 = vpop.f32.mrb[58].mxu1  ;;  %v8178_v17 = vpop.f32.mrb[59].mxu0 }
 0x18f   : > { %9118 = vst [vmem:[#allocation100_spill] sm:$0xff] %v8176_v29  ;;  %9119 = vst [vmem:[#allocation101_spill] sm:$0xff] %v8178_v17  ;;  %v8184_v41 = vpop.f32.mrb[59].mxu1 }
 0x190   : > { %9122 = vst [vmem:[#allocation102_spill] sm:$0xff] %v8184_v41 }
 0x191   : > { %v8188_v11 = vpop.f32.mrb[60].mxu0 }
 0x192   : > { %9124 = vst [vmem:[#allocation103_spill] sm:$0xff] %v8188_v11  ;;  %v8192_v55 = vpop.f32.mrb[60].mxu1  ;;  %v8194_v52 = vpop.f32.mrb[61].mxu0 }
 0x193   : > { %9126 = vst [vmem:[#allocation104_spill] sm:$0xff] %v8192_v55  ;;  %9127 = vst [vmem:[#allocation105_spill] sm:$0xff] %v8194_v52  ;;  %v8200_v17 = vpop.f32.mrb[61].mxu1 }
 0x194   : > { %9130 = vst [vmem:[#allocation106_spill] sm:$0xff] %v8200_v17 }
 0x195   : > { %v8204_v41 = vpop.f32.mrb[62].mxu0 }
 0x196   : > { %9132 = vst [vmem:[#allocation107_spill] sm:$0xff] %v8204_v41  ;;  %v8208_v11 = vpop.f32.mrb[62].mxu1  ;;  %v8210_v35 = vpop.f32.mrb[63].mxu0 }
 0x197   : > { %9134 = vst [vmem:[#allocation108_spill] sm:$0xff] %v8208_v11  ;;  %9135 = vst [vmem:[#allocation109_spill] sm:$0xff] %v8210_v35  ;;  %v8216_v52 = vpop.f32.mrb[63].mxu1 }
 0x198   : > { %9138 = vst [vmem:[#allocation110_spill] sm:$0xff] %v8216_v52 }
 0x19d   : > { %v8220_v17 = vpop.f32.mrb[64].mxu0 }
 0x19e   : > { %9140 = vst [vmem:[#allocation111_spill] sm:$0xff] %v8220_v17  ;;  %v8224_v41 = vpop.f32.mrb[64].mxu1  ;;  %v8226_v25 = vpop.f32.mrb[65].mxu0 }
 0x19f   : > { %9142 = vst [vmem:[#allocation112_spill] sm:$0xff] %v8224_v41  ;;  %9143 = vst [vmem:[#allocation113_spill] sm:$0xff] %v8226_v25  ;;  %v8232_v35 = vpop.f32.mrb[65].mxu1 }
 0x1a0   : > { %9145 = vst [vmem:[#allocation114_spill] sm:$0xff] %v8232_v35 }
 0x1a1   : > { %v8236_v52 = vpop.f32.mrb[66].mxu0 }
 0x1a2   : > { %9146 = vst [vmem:[#allocation115_spill] sm:$0xff] %v8236_v52  ;;  %v8240_v17 = vpop.f32.mrb[66].mxu1  ;;  %v8242_v2 = vpop.f32.mrb[67].mxu0 }
 0x1a3   : > { %9148 = vst [vmem:[#allocation116_spill] sm:$0xff] %v8240_v17  ;;  %9149 = vst [vmem:[#allocation117_spill] sm:$0xff] %v8242_v2  ;;  %v8248_v25 = vpop.f32.mrb[67].mxu1 }
 0x1a4   : > { %9151 = vst [vmem:[#allocation118_spill] sm:$0xff] %v8248_v25 }
 0x1a5   : > { %v8252_v35 = vpop.f32.mrb[68].mxu0 }
 0x1a6   : > { %9152 = vst [vmem:[#allocation119_spill] sm:$0xff] %v8252_v35  ;;  %v8256_v52 = vpop.f32.mrb[68].mxu1  ;;  %v8258_v29 = vpop.f32.mrb[69].mxu0 }
 0x1a7   : > { %9154 = vst [vmem:[#allocation120_spill] sm:$0xff] %v8256_v52  ;;  %9155 = vst [vmem:[#allocation121_spill] sm:$0xff] %v8258_v29  ;;  %v8264_v2 = vpop.f32.mrb[69].mxu1 }
 0x1a8   : > { %9157 = vst [vmem:[#allocation122_spill] sm:$0xff] %v8264_v2 }
 0x1a9   : > { %v8268_v25 = vpop.f32.mrb[70].mxu0 }
 0x1aa   : > { %9158 = vst [vmem:[#allocation123_spill] sm:$0xff] %v8268_v25  ;;  %v8272_v35 = vpop.f32.mrb[70].mxu1  ;;  %v8274_v18 = vpop.f32.mrb[71].mxu0 }
 0x1ab   : > { %9160 = vst [vmem:[#allocation124_spill] sm:$0xff] %v8272_v35  ;;  %9161 = vst [vmem:[#allocation125_spill] sm:$0xff] %v8274_v18  ;;  %v8280_v29 = vpop.f32.mrb[71].mxu1 }
 0x1ac   : > { %9163 = vst [vmem:[#allocation126_spill] sm:$0xff] %v8280_v29 }
 0x1b1   : > { %v8284_v2 = vpop.f32.mrb[72].mxu0 }
 0x1b2   : > { %v8286_v60 = vpop.f32.mrb[72].mxu1  ;;  %v8288_v15 = vpop.f32.mrb[73].mxu0 }
 0x1b3   : > { %v8290_v25 = vpop.f32.mrb[73].mxu1 }
 0x1b5   : > { %v8292_v12 = vpop.f32.mrb[74].mxu0 }
 0x1b6   : > { %v8294_v17 = vpop.f32.mrb[74].mxu1  ;;  %v8296_v28 = vpop.f32.mrb[75].mxu0 }
 0x1b7   : > { %v8298_v54 = vpop.f32.mrb[75].mxu1 }
 0x1b9   : > { %v8300_v18 = vpop.f32.mrb[76].mxu0 }
 0x1ba   : > { %v8302_v52 = vpop.f32.mrb[76].mxu1  ;;  %v8304_v43 = vpop.f32.mrb[77].mxu0 }
 0x1bb   : > { %v8306_v29 = vpop.f32.mrb[77].mxu1 }
 0x1bd   : > { %v8308_v20 = vpop.f32.mrb[78].mxu0 }
 0x1be   : > { %v8310_v35 = vpop.f32.mrb[78].mxu1  ;;  %v8312_v63 = vpop.f32.mrb[79].mxu0 }
 0x1bf   : > { %v8314_v47 = vpop.f32.mrb[79].mxu1 }
 0x1c5   : > { %v8316_v41 = vpop.f32.mrb[80].mxu0 }
 0x1c6   : > { %v8318_v8 = vpop.f32.mrb[80].mxu1  ;;  %v8320_v11 = vpop.f32.mrb[81].mxu0 }
 0x1c7   : > { %v8322_v45 = vpop.f32.mrb[81].mxu1 }
 0x1c9   : > { %v8324_v55 = vpop.f32.mrb[82].mxu0 }
 0x1ca   : > { %v8326_v3 = vpop.f32.mrb[82].mxu1  ;;  %v8328_v31 = vpop.f32.mrb[83].mxu0 }
 0x1cb   : > { %9164 = vst [vmem:[#allocation127_spill] sm:$0xff] %v8326_v3  ;;  %v8330_v56 = vpop.f32.mrb[83].mxu1 }
 0x1cc   : > { %9165 = vst [vmem:[#allocation128_spill] sm:$0xff] %v8330_v56 }
 0x1cd   : > { %v8332_v39 = vpop.f32.mrb[84].mxu0 }
 0x1ce   : > { %v8334_v58 = vpop.f32.mrb[84].mxu1  ;;  %v8336_v30 = vpop.f32.mrb[85].mxu0 }
 0x1cf   : > { %9166 = vst [vmem:[#allocation129_spill] sm:$0xff] %v8334_v58  ;;  %v8338_v14 = vpop.f32.mrb[85].mxu1 }
 0x1d0   : > { %9167 = vst [vmem:[#allocation130_spill] sm:$0xff] %v8338_v14 }
 0x1d1   : > { %v8340_v33 = vpop.f32.mrb[86].mxu0 }
 0x1d2   : > { %v8342_v27 = vpop.f32.mrb[86].mxu1  ;;  %v8344_v36 = vpop.f32.mrb[87].mxu0 }
 0x1d3   : > { %9168 = vst [vmem:[#allocation131_spill] sm:$0xff] %v8342_v27  ;;  %v8346_v0 = vpop.f32.mrb[87].mxu1 }
 0x1d4   : > { %9169 = vst [vmem:[#allocation132_spill] sm:$0xff] %v8346_v0 }
 0x1d9   : > { %v8348_v16 = vpop.f32.mrb[88].mxu0 }
 0x1da   : > { %v8350_v38 = vpop.f32.mrb[88].mxu1  ;;  %v8352_v24 = vpop.f32.mrb[89].mxu0 }
 0x1db   : > { %9170 = vst [vmem:[#allocation133_spill] sm:$0xff] %v8350_v38  ;;  %9171 = vst [vmem:[#allocation134_spill] sm:$0xff] %v8352_v24  ;;  %v8354_v32 = vpop.f32.mrb[89].mxu1 }
 0x1dc   : > { %9172 = vst [vmem:[#allocation135_spill] sm:$0xff] %v8354_v32 }
 0x1dd   : > { %v8356_v58 = vpop.f32.mrb[90].mxu0 }
 0x1de   : > { %9173 = vst [vmem:[#allocation136_spill] sm:$0xff] %v8356_v58  ;;  %v8358_v40 = vpop.f32.mrb[90].mxu1  ;;  %v8360_v14 = vpop.f32.mrb[91].mxu0 }
 0x1df   : > { %9174 = vst [vmem:[#allocation137_spill] sm:$0xff] %v8358_v40  ;;  %9175 = vst [vmem:[#allocation138_spill] sm:$0xff] %v8360_v14  ;;  %v8362_v56 = vpop.f32.mrb[91].mxu1 }
 0x1e0   : > { %9176 = vst [vmem:[#allocation139_spill] sm:$0xff] %v8362_v56 }
 0x1e1   : > { %v8364_v27 = vpop.f32.mrb[92].mxu0 }
 0x1e2   : > { %9177 = vst [vmem:[#allocation140_spill] sm:$0xff] %v8364_v27  ;;  %v8366_v3 = vpop.f32.mrb[92].mxu1  ;;  %v8368_v0 = vpop.f32.mrb[93].mxu0 }
 0x1e3   : > { %9178 = vst [vmem:[#allocation141_spill] sm:$0xff] %v8366_v3  ;;  %9179 = vst [vmem:[#allocation142_spill] sm:$0xff] %v8368_v0  ;;  %v8370_v62 = vpop.f32.mrb[93].mxu1 }
 0x1e4   : > { %9180 = vst [vmem:[#allocation143_spill] sm:$0xff] %v8370_v62 }
 0x1e5   : > { %v8372_v38 = vpop.f32.mrb[94].mxu0 }
 0x1e6   : > { %9181 = vst [vmem:[#allocation144_spill] sm:$0xff] %v8372_v38  ;;  %v8374_v61 = vpop.f32.mrb[94].mxu1  ;;  %v8376_v32 = vpop.f32.mrb[95].mxu0 }
 0x1e7   : > { %9182 = vst [vmem:[#allocation145_spill] sm:$0xff] %v8374_v61  ;;  %9183 = vst [vmem:[#allocation146_spill] sm:$0xff] %v8376_v32  ;;  %v8378_v58 = vpop.f32.mrb[95].mxu1 }
 0x1e8   : > { %9184 = vst [vmem:[#allocation147_spill] sm:$0xff] %v8378_v58 }
 0x1ed   : > { %v8380_v40 = vpop.f32.mrb[96].mxu0 }
 0x1ee   : > { %9185 = vst [vmem:[#allocation148_spill] sm:$0xff] %v8380_v40  ;;  %v8382_v14 = vpop.f32.mrb[96].mxu1  ;;  %v8384_v56 = vpop.f32.mrb[97].mxu0 }
 0x1ef   : > { %9186 = vst [vmem:[#allocation149_spill] sm:$0xff] %v8382_v14  ;;  %9187 = vst [vmem:[#allocation150_spill] sm:$0xff] %v8384_v56  ;;  %v8386_v27 = vpop.f32.mrb[97].mxu1 }
 0x1f0   : > { %9188 = vst [vmem:[#allocation151_spill] sm:$0xff] %v8386_v27 }
 0x1f1   : > { %v8388_v3 = vpop.f32.mrb[98].mxu0 }
 0x1f2   : > { %9189 = vst [vmem:[#allocation152_spill] sm:$0xff] %v8388_v3  ;;  %v8390_v0 = vpop.f32.mrb[98].mxu1  ;;  %v8392_v62 = vpop.f32.mrb[99].mxu0 }
 0x1f3   : > { %9190 = vst [vmem:[#allocation153_spill] sm:$0xff] %v8390_v0  ;;  %9191 = vst [vmem:[#allocation154_spill] sm:$0xff] %v8392_v62  ;;  %v8394_v38 = vpop.f32.mrb[99].mxu1 }
 0x1f4   : > { %9192 = vst [vmem:[#allocation155_spill] sm:$0xff] %v8394_v38  ;;  %v8414_v38 = vpop.permute.xlu0 %4554 }
 0x1f5   : > { %v8396_v61 = vpop.f32.mrb[100].mxu0 }
 0x1f6   : > { %9193 = vst [vmem:[#allocation156_spill] sm:$0xff] %v8396_v61  ;;  %v8398_v58 = vpop.f32.mrb[100].mxu1  ;;  %v8400_v40 = vpop.f32.mrb[101].mxu0 }
 0x1f7   : > { %9194 = vst [vmem:[#allocation157_spill] sm:$0xff] %v8398_v58  ;;  %9195 = vst [vmem:[#allocation158_spill] sm:$0xff] %v8400_v40  ;;  %v8402_v14 = vpop.f32.mrb[101].mxu1 }
 0x1f8   : > { %9196 = vst [vmem:[#allocation159_spill] sm:$0xff] %v8402_v14 }
 0x1f9   : > { %v8404_v56 = vpop.f32.mrb[102].mxu0 }
 0x1fa   : > { %9197 = vst [vmem:[#allocation160_spill] sm:$0xff] %v8404_v56  ;;  %v8406_v27 = vpop.f32.mrb[102].mxu1  ;;  %v8408_v3 = vpop.f32.mrb[103].mxu0  ;;  %v9203_v56 = vld [vmem:[#allocation2_spill] sm:$0xff] }
 0x1fb   : > { %9198 = vst [vmem:[#allocation161_spill] sm:$0xff] %v8406_v27  ;;  %9199 = vst [vmem:[#allocation162_spill] sm:$0xff] %v8408_v3  ;;  %v8410_v0 = vpop.f32.mrb[103].mxu1  ;;  %v9205_v27 = vmax.f32 %v9203_v56, %v9204_v49  ;;  %v9206_v3 = vld [vmem:[#allocation3_spill] sm:$0xff] }
 0x1fc   : > { %9200 = vst [vmem:[#allocation163_spill] sm:$0xff] %v8410_v0  ;;  %v9208_v0 = vmax.f32 %v9206_v3, %v9207_v4  ;;  %v9210_v3 = vld [vmem:[#allocation58_spill] sm:$0xff] }
 0x201   : > { %v8412_v62 = vpop.f32.mrb[104].mxu0 }
 0x202   : > { %9201 = vst [vmem:[#allocation164_spill] sm:$0xff] %v8412_v62  ;;  %v3669_v32 = vpop.f32.mrb[104].mxu1  ;;  %v8416_v61 = vpop.f32.mrb[105].mxu0 }
 0x203   : > { %9202 = vst [vmem:[#allocation165_spill] sm:$0xff] %v8416_v61  ;;  %v4404_v58 = vmax.f32 %v8284_v2, %v3669_v32  ;;  %v3671_v40 = vpop.f32.mrb[105].mxu1  ;;  %v8436_v2 = vpop.permute.xlu0 %4559 }
 0x204   : > { %v4405_v14 = vmax.f32 %v8288_v15, %v3671_v40 }
 0x205   : > { %v4476_v53 = vmax.f32 %v9205_v27, %v4404_v58  ;;  %v9213_v27 = vld [vmem:[#allocation5_spill] sm:$0xff] }
 0x206   : > { %v4477_v46 = vmax.f32 %v9208_v0, %v4405_v14  ;;  %v3675_v62 = vpop.f32.mrb[106].mxu1  ;;  %v9214_v14 = vld [vmem:[#allocation59_spill] sm:$0xff] }
 0x207   : > { %v4572_v24 = vadd.f32 %v8414_v38, %v4476_v53  ;;  %v4422_v1 = vmax.f32 %v8292_v12, %v3675_v62  ;;  %v3677_v61 = vpop.f32.mrb[107].mxu1  ;;  %v9209_v53 = vld [vmem:[#allocation4_spill] sm:$0xff]  ;;  %v9215_v58 = vmax.f32 %v9213_v27, %v9214_v14 }
 0x208   : > { %v4573_v40 = vadd.f32 %v8414_v38, %v4477_v46  ;;  %v4423_v49 = vmax.f32 %v8296_v28, %v3677_v61  ;;  %v8438_v4 = vpop.f32.mrb[106].mxu0  ;;  %v9211_v12 = vmax.f32 %v9209_v53, %v9210_v3  ;;  %v8448_v46 = vpop.permute.xlu1 %4564 }
 0x209   : > { %v4644_v32 = vmax.f32 %v4572_v24, 0.0  ;;  %v8443_v0 = vpop.f32.mrb[107].mxu0 }
 0x20a   : > { %v4494_v62 = vmax.f32 %v9211_v12, %v4422_v1  ;;  %9212 = vst [vmem:[#allocation2_spill] sm:$0xff] %v8443_v0  ;;  %v4645_v15 = vmax.f32 %v4573_v40, 0.0  ;;  %v4495_v56 = vmax.f32 %v9215_v58, %v4423_v49  ;;  %v3681_v59 = vpop.f32.mrb[108].mxu1  ;;  %v9216_v49 = vld [vmem:[#allocation7_spill] sm:$0xff]  ;;  %v9217_v12 = vld [vmem:[#allocation62_spill] sm:$0xff] }
 0x20b   : > { %4716 = vst [vmem:[%s8432_s9] sm:$0xff] %v4644_v32  ;;  %v4440_v24 = vmax.f32 %v8300_v18, %v3681_v59  ;;  %v3683_v28 = vpop.f32.mrb[109].mxu1  ;;  %v9218_v27 = vmax.f32 %v9216_v49, %v9217_v12  ;;  %v9220_v0 = vld [vmem:[#allocation63_spill] sm:$0xff]  ;;  %v9224_v12 = vld [vmem:[#allocation66_spill] sm:$0xff] }
 0x20c   : > { %v4590_v61 = vadd.f32 %v8436_v2, %v4494_v62  ;;  %4717 = vst [vmem:[%s8432_s9 + $0x8] sm:$0xff] %v4645_v15  ;;  %v4591_v1 = vadd.f32 %v8436_v2, %v4495_v56  ;;  %v4441_v40 = vmax.f32 %v8304_v43, %v3683_v28  ;;  %v8456_v53 = vpop.f32.mrb[108].mxu0  ;;  %v9219_v62 = vld [vmem:[#allocation8_spill] sm:$0xff]  ;;  %v8472_v49 = vpop.permute.xlu1 %4569 }
 0x20d   : > { %v4512_v14 = vmax.f32 %v9218_v27, %v4440_v24  ;;  %v8461_v58 = vpop.f32.mrb[109].mxu0  ;;  %v9221_v59 = vmax.f32 %v9219_v62, %v9220_v0 }
 0x20e   : > { %v4662_v3 = vmax.f32 %v4590_v61, 0.0  ;;  %v4663_v32 = vmax.f32 %v4591_v1, 0.0  ;;  %v3687_v15 = vpop.f32.mrb[110].mxu1 }
 0x20f   : > { %v4513_v18 = vmax.f32 %v9221_v59, %v4441_v40  ;;  %v4608_v43 = vadd.f32 %v8448_v46, %v4512_v14  ;;  %v4458_v56 = vmax.f32 %v8308_v20, %v3687_v15  ;;  %v3689_v61 = vpop.f32.mrb[111].mxu1  ;;  %v9223_v40 = vld [vmem:[#allocation10_spill] sm:$0xff]  ;;  %v9226_v20 = vld [vmem:[#allocation11_spill] sm:$0xff] }
 0x210   : > { %4734 = vst [vmem:[%s8432_s9 + $0x90] sm:$0xff] %v4662_v3  ;;  %4735 = vst [vmem:[%s8432_s9 + $0x98] sm:$0xff] %v4663_v32  ;;  %v4459_v24 = vmax.f32 %v8312_v63, %v3689_v61  ;;  %v8474_v1 = vpop.f32.mrb[110].mxu0  ;;  %v9225_v3 = vmax.f32 %v9223_v40, %v9224_v12  ;;  %v9227_v59 = vld [vmem:[#allocation67_spill] sm:$0xff] }
 0x211   : > { %v4609_v28 = vadd.f32 %v8448_v46, %v4513_v18  ;;  %9222 = vst [vmem:[#allocation55_spill] sm:$0xff] %v8474_v1  ;;  %v4680_v0 = vmax.f32 %v4608_v43, 0.0  ;;  %v8479_v62 = vpop.f32.mrb[111].mxu0  ;;  %v9228_v32 = vmax.f32 %v9226_v20, %v9227_v59 }
 0x212   : > { %v4530_v27 = vmax.f32 %v9225_v3, %v4458_v56 }
 0x213   : > { %v4681_v14 = vmax.f32 %v4609_v28, 0.0  ;;  %v4531_v18 = vmax.f32 %v9228_v32, %v4459_v24  ;;  %4752 = vst [vmem:[%s8432_s9 + $0x120] sm:$0xff] %v4680_v0  ;;  %v9229_v24 = vmax.f32 %v7349_v19, %v7914_v44 }
 0x214   : > { %v4626_v63 = vadd.f32 %v8472_v49, %v4530_v27 }
 0x215   : > { %4753 = vst [vmem:[%s8432_s9 + $0x128] sm:$0xff] %v4681_v14  ;;  %v4627_v15 = vadd.f32 %v8472_v49, %v4531_v18  ;;  %v3758_v43 = vpop.f32.mrb[112].mxu0  ;;  %v9230_v14 = vmax.f32 %v7451_v13, %v7922_v6 }
 0x216   : > { %v4698_v61 = vmax.f32 %v4626_v63, 0.0  ;;  %v4406_v40 = vmax.f32 %v8286_v60, %v3758_v43  ;;  %v3847_v56 = vpop.f32.mrb[112].mxu1  ;;  %v3760_v12 = vpop.f32.mrb[113].mxu0  ;;  %v9231_v60 = vld [vmem:[#allocation70_spill] sm:$0xff] }
 0x217   : > { %v4699_v1 = vmax.f32 %v4627_v15, 0.0  ;;  %v4408_v28 = vmax.f32 %v8316_v41, %v3847_v56  ;;  %v4407_v3 = vmax.f32 %v8290_v25, %v3760_v12  ;;  %v3849_v20 = vpop.f32.mrb[113].mxu1  ;;  %v9232_v32 = vmax.f32 %v7358_v23, %v9231_v60  ;;  %v9241_v60 = vld [vmem:[#allocation74_spill] sm:$0xff] }
 0x218   : > { %4770 = vst [vmem:[%s8432_s9 + $0x1b0] sm:$0xff] %v4698_v61  ;;  %v4478_v0 = vmax.f32 %v9229_v24, %v4406_v40  ;;  %v4409_v27 = vmax.f32 %v8320_v11, %v3849_v20  ;;  %v9233_v25 = vmax.f32 %v7459_v48, %v7934_v50  ;;  %v9234_v48 = vld [vmem:[#allocation71_spill] sm:$0xff]  ;;  %v9238_v24 = vld [vmem:[#allocation6_spill] sm:$0xff] }
 0x219   : > { %4771 = vst [vmem:[%s8432_s9 + $0x1b8] sm:$0xff] %v4699_v1  ;;  %v4480_v59 = vmax.f32 %v9230_v14, %v4408_v28  ;;  %v4479_v18 = vmax.f32 %v9232_v32, %v4407_v3  ;;  %v3764_v63 = vpop.f32.mrb[114].mxu0  ;;  %v9235_v50 = vmax.f32 %v7375_v37, %v9234_v48  ;;  %v9236_v3 = vld [vmem:[#allocation72_spill] sm:$0xff]  ;;  %v9242_v32 = vmax.f32 %v7489_v7, %v9241_v60 }
 0x21a   : > { %v4574_v41 = vadd.f32 %v8414_v38, %v4478_v0  ;;  %v4481_v1 = vmax.f32 %v9233_v25, %v4409_v27  ;;  %v4424_v19 = vmax.f32 %v8294_v17, %v3764_v63  ;;  %v3853_v44 = vpop.f32.mrb[114].mxu1  ;;  %v3766_v11 = vpop.f32.mrb[115].mxu0  ;;  %v9237_v20 = vmax.f32 %v7480_v9, %v9236_v3 }
 0x21b   : > { %v4576_v15 = vadd.f32 %v8414_v38, %v4480_v59  ;;  %v4575_v13 = vadd.f32 %v8414_v38, %v4479_v18  ;;  %v4426_v6 = vmax.f32 %v8324_v55, %v3853_v44  ;;  %v4425_v23 = vmax.f32 %v8298_v54, %v3766_v11  ;;  %v3855_v61 = vpop.f32.mrb[115].mxu1  ;;  %v9239_v54 = vld [vmem:[#allocation73_spill] sm:$0xff] }
 0x21c   : > { %v4646_v43 = vmax.f32 %v4574_v41, 0.0  ;;  %v4577_v40 = vadd.f32 %v8414_v38, %v4481_v1  ;;  %v4496_v17 = vmax.f32 %v9235_v50, %v4424_v19  ;;  %v4427_v56 = vmax.f32 %v8328_v31, %v3855_v61 }
 0x21d   : > { %v4648_v12 = vmax.f32 %v4576_v15, 0.0  ;;  %v4647_v28 = vmax.f32 %v4575_v13, 0.0  ;;  %v4498_v55 = vmax.f32 %v9237_v20, %v4426_v6  ;;  %v9240_v0 = vmax.f32 %v9238_v24, %v9239_v54  ;;  %v3770_v14 = vpop.f32.mrb[116].mxu0 }
 0x21e   : > { %4718 = vst [vmem:[%s8432_s9 + $0x10] sm:$0xff] %v4646_v43  ;;  %v4649_v59 = vmax.f32 %v4577_v40, 0.0  ;;  %v4592_v37 = vadd.f32 %v8436_v2, %v4496_v17  ;;  %v4499_v31 = vmax.f32 %v9242_v32, %v4427_v56  ;;  %v4442_v18 = vmax.f32 %v8302_v52, %v3770_v14  ;;  %v3859_v63 = vpop.f32.mrb[116].mxu1  ;;  %v3772_v41 = vpop.f32.mrb[117].mxu0  ;;  %v9246_v43 = vld [vmem:[#allocation75_spill] sm:$0xff] }
 0x21f   : > { %v4497_v27 = vmax.f32 %v9240_v0, %v4425_v23  ;;  %4720 = vst [vmem:[%s8432_s9 + $0x20] sm:$0xff] %v4648_v12  ;;  %4719 = vst [vmem:[%s8432_s9 + $0x18] sm:$0xff] %v4647_v28  ;;  %v4594_v9 = vadd.f32 %v8436_v2, %v4498_v55  ;;  %v4444_v1 = vmax.f32 %v8332_v39, %v3859_v63  ;;  %v3861_v44 = vpop.f32.mrb[117].mxu1  ;;  %v9255_v63 = vld [vmem:[#allocation20_spill] sm:$0xff] }
 0x220   : > { %v4443_v19 = vmax.f32 %v8306_v29, %v3772_v41  ;;  %4721 = vst [vmem:[%s8432_s9 + $0x28] sm:$0xff] %v4649_v59  ;;  %v4664_v11 = vmax.f32 %v4592_v37, 0.0  ;;  %v4595_v7 = vadd.f32 %v8436_v2, %v4499_v31  ;;  %v9243_v52 = vmax.f32 %v7402_v57, %v7976_v42  ;;  %v9245_v29 = vld [vmem:[#allocation9_spill] sm:$0xff] }
 0x221   : > { %v4593_v25 = vadd.f32 %v8436_v2, %v4497_v27  ;;  %v4445_v13 = vmax.f32 %v8336_v30, %v3861_v44  ;;  %v4666_v6 = vmax.f32 %v4594_v9, 0.0  ;;  %v9244_v39 = vmax.f32 %v7506_v26, %v7982_v5  ;;  %v3776_v50 = vpop.f32.mrb[118].mxu0  ;;  %v9253_v37 = vld [vmem:[#allocation77_spill] sm:$0xff] }
 0x222   : > { %v4514_v15 = vmax.f32 %v9243_v52, %v4442_v18  ;;  %v9247_v40 = vmax.f32 %v9245_v29, %v9246_v43  ;;  %4736 = vst [vmem:[%s8432_s9 + $0xa0] sm:$0xff] %v4664_v11  ;;  %v4667_v17 = vmax.f32 %v4595_v7, 0.0  ;;  %v9248_v57 = vmax.f32 %v7520_v34, %v7994_v21  ;;  %v3865_v12 = vpop.f32.mrb[118].mxu1  ;;  %v3778_v28 = vpop.f32.mrb[119].mxu0 }
 0x223   : > { %v4665_v23 = vmax.f32 %v4593_v25, 0.0  ;;  %v4516_v61 = vmax.f32 %v9244_v39, %v4444_v1  ;;  %v4460_v56 = vmax.f32 %v8310_v35, %v3776_v50  ;;  %4738 = vst [vmem:[%s8432_s9 + $0xb0] sm:$0xff] %v4666_v6  ;;  %v4462_v3 = vmax.f32 %v8340_v33, %v3865_v12  ;;  %v3867_v55 = vpop.f32.mrb[119].mxu1  ;;  %v9249_v35 = vld [vmem:[#allocation76_spill] sm:$0xff]  ;;  %v9258_v39 = vld [vmem:[#allocation13_spill] sm:$0xff]  ;;  %v9262_v50 = vld [vmem:[#allocation22_spill] sm:$0xff] }
 0x224   : > { %v4515_v48 = vmax.f32 %v9247_v40, %v4443_v19  ;;  %v4610_v42 = vadd.f32 %v8448_v46, %v4514_v15  ;;  %v4517_v30 = vmax.f32 %v9248_v57, %v4445_v13  ;;  %v4461_v20 = vmax.f32 %v8314_v47, %v3778_v28  ;;  %4739 = vst [vmem:[%s8432_s9 + $0xb8] sm:$0xff] %v4667_v17  ;;  %v9252_v47 = vld [vmem:[#allocation12_spill] sm:$0xff]  ;;  %v9261_v40 = vld [vmem:[#allocation134_spill] sm:$0xff] }
 0x225   : > { %4737 = vst [vmem:[%s8432_s9 + $0xa8] sm:$0xff] %v4665_v23  ;;  %v4612_v26 = vadd.f32 %v8448_v46, %v4516_v61  ;;  %v9250_v24 = vmax.f32 %v7421_v10, %v9249_v35  ;;  %v4463_v0 = vmax.f32 %v8344_v36, %v3867_v55  ;;  %v9251_v33 = vmax.f32 %v7531_v51, %v8012_v22  ;;  %v9256_v10 = vld [vmem:[#allocation78_spill] sm:$0xff]  ;;  %v9259_v61 = vld [vmem:[#allocation79_spill] sm:$0xff]  ;;  %v9263_v17 = vld [vmem:[#allocation80_spill] sm:$0xff] }
 0x226   : > { %v4611_v5 = vadd.f32 %v8448_v46, %v4515_v48  ;;  %v4682_v34 = vmax.f32 %v4610_v42, 0.0  ;;  %v4613_v21 = vadd.f32 %v8448_v46, %v4517_v30  ;;  %v9254_v60 = vmax.f32 %v9252_v47, %v9253_v37  ;;  %v9265_v57 = vld [vmem:[#allocation14_spill] sm:$0xff]  ;;  %v9266_v30 = vld [vmem:[#allocation81_spill] sm:$0xff]  ;;  %v9274_v37 = vld [vmem:[#allocation15_spill] sm:$0xff] }
 0x227   : > { %v4532_v54 = vmax.f32 %v9250_v24, %v4460_v56  ;;  %v4684_v27 = vmax.f32 %v4612_v26, 0.0  ;;  %v4534_v59 = vmax.f32 %v9251_v33, %v4462_v3  ;;  %v9257_v41 = vmax.f32 %v9255_v63, %v9256_v10  ;;  %v9269_v26 = vld [vmem:[#allocation82_spill] sm:$0xff] }
 0x228   : > { %v4683_v14 = vmax.f32 %v4611_v5, 0.0  ;;  %v4533_v32 = vmax.f32 %v9254_v60, %v4461_v20  ;;  %4754 = vst [vmem:[%s8432_s9 + $0x130] sm:$0xff] %v4682_v34  ;;  %v4685_v31 = vmax.f32 %v4613_v21, 0.0  ;;  %v9260_v29 = vmax.f32 %v9258_v39, %v9259_v61  ;;  %v9271_v20 = vld [vmem:[#allocation127_spill] sm:$0xff]  ;;  %v9287_v39 = vld [vmem:[#allocation129_spill] sm:$0xff] }
 0x229   : > { %v4628_v18 = vadd.f32 %v8472_v49, %v4532_v54  ;;  %v4535_v9 = vmax.f32 %v9257_v41, %v4463_v0  ;;  %4756 = vst [vmem:[%s8432_s9 + $0x140] sm:$0xff] %v4684_v27  ;;  %v4630_v51 = vadd.f32 %v8472_v49, %v4534_v59  ;;  %v3936_v44 = vpop.f32.mrb[120].mxu0  ;;  %v9264_v42 = vmax.f32 %v9262_v50, %v9263_v17  ;;  %v9272_v54 = vld [vmem:[#allocation136_spill] sm:$0xff]  ;;  %v9275_v60 = vld [vmem:[#allocation83_spill] sm:$0xff] }
 0x22a   : > { %4755 = vst [vmem:[%s8432_s9 + $0x138] sm:$0xff] %v4683_v14  ;;  %v4629_v36 = vadd.f32 %v8472_v49, %v4533_v32  ;;  %4757 = vst [vmem:[%s8432_s9 + $0x148] sm:$0xff] %v4685_v31  ;;  %v4410_v7 = vmax.f32 %v8318_v8, %v3936_v44  ;;  %v4025_v52 = vpop.f32.mrb[120].mxu1  ;;  %v3938_v15 = vpop.f32.mrb[121].mxu0  ;;  %v9267_v56 = vmax.f32 %v9265_v57, %v9266_v30  ;;  %v9273_v27 = vld [vmem:[#allocation128_spill] sm:$0xff] }
 0x22b   : > { %v4700_v22 = vmax.f32 %v4628_v18, 0.0  ;;  %v4631_v25 = vadd.f32 %v8472_v49, %v4535_v9  ;;  %v4702_v1 = vmax.f32 %v4630_v51, 0.0  ;;  %v4412_v13 = vmax.f32 %v8348_v16, %v4025_v52  ;;  %v4027_v23 = vpop.f32.mrb[121].mxu1  ;;  %v9277_v18 = vld [vmem:[#allocation138_spill] sm:$0xff]  ;;  %v9279_v51 = vld [vmem:[#allocation84_spill] sm:$0xff] }
 0x22c   : > { %v4701_v19 = vmax.f32 %v4629_v36, 0.0  ;;  %v4411_v6 = vmax.f32 %v8322_v45, %v3938_v15  ;;  %v4482_v43 = vmax.f32 %v9260_v29, %v4410_v7  ;;  %v4413_v48 = vmax.f32 %v9261_v40, %v4027_v23  ;;  %v9268_v45 = vld [vmem:[#allocation24_spill] sm:$0xff]  ;;  %v9278_v9 = vld [vmem:[#allocation26_spill] sm:$0xff] }
 0x22d   : > { %4772 = vst [vmem:[%s8432_s9 + $0x1c0] sm:$0xff] %v4700_v22  ;;  %v4703_v11 = vmax.f32 %v4631_v25, 0.0  ;;  %4774 = vst [vmem:[%s8432_s9 + $0x1d0] sm:$0xff] %v4702_v1  ;;  %v4484_v8 = vmax.f32 %v9264_v42, %v4412_v13  ;;  %v3942_v28 = vpop.f32.mrb[122].mxu0  ;;  %v9270_v5 = vmax.f32 %v9268_v45, %v9269_v26  ;;  %v9276_v32 = vmax.f32 %v9274_v37, %v9275_v60  ;;  %v9281_v25 = vld [vmem:[#allocation16_spill] sm:$0xff]  ;;  %v9282_v1 = vld [vmem:[#allocation85_spill] sm:$0xff] }
 0x22e   : > { %4773 = vst [vmem:[%s8432_s9 + $0x1c8] sm:$0xff] %v4701_v19  ;;  %v4483_v12 = vmax.f32 %v9267_v56, %v4411_v6  ;;  %v4578_v16 = vadd.f32 %v8414_v38, %v4482_v43  ;;  %v4428_v55 = vmax.f32 %v9271_v20, %v3942_v28  ;;  %v4031_v34 = vpop.f32.mrb[122].mxu1  ;;  %v3944_v21 = vpop.f32.mrb[123].mxu0  ;;  %v9280_v36 = vmax.f32 %v9278_v9, %v9279_v51  ;;  %v9284_v15 = vld [vmem:[#allocation28_spill] sm:$0xff]  ;;  %v9285_v13 = vld [vmem:[#allocation86_spill] sm:$0xff]  ;;  %v9291_v28 = vld [vmem:[#allocation87_spill] sm:$0xff] }
 0x22f   : > { %4775 = vst [vmem:[%s8432_s9 + $0x1d8] sm:$0xff] %v4703_v11  ;;  %v4485_v3 = vmax.f32 %v9270_v5, %v4413_v48  ;;  %v4580_v35 = vadd.f32 %v8414_v38, %v4484_v8  ;;  %v4430_v0 = vmax.f32 %v9272_v54, %v4031_v34  ;;  %v4429_v14 = vmax.f32 %v9273_v27, %v3944_v21  ;;  %v4033_v33 = vpop.f32.mrb[123].mxu1  ;;  %v9288_v50 = vld [vmem:[#allocation140_spill] sm:$0xff]  ;;  %v9289_v42 = vld [vmem:[#allocation130_spill] sm:$0xff]  ;;  %v9298_v54 = vld [vmem:[#allocation89_spill] sm:$0xff] }
 0x230   : > { %v4579_v24 = vadd.f32 %v8414_v38, %v4483_v12  ;;  %v4650_v59 = vmax.f32 %v4578_v16, 0.0  ;;  %v4500_v31 = vmax.f32 %v9276_v32, %v4428_v55  ;;  %v4431_v63 = vmax.f32 %v9277_v18, %v4033_v33  ;;  %v9290_v12 = vld [vmem:[#allocation17_spill] sm:$0xff]  ;;  %v9293_v26 = vld [vmem:[#allocation142_spill] sm:$0xff]  ;;  %v9295_v34 = vld [vmem:[#allocation88_spill] sm:$0xff] }
 0x231   : > { %v4581_v47 = vadd.f32 %v8414_v38, %v4485_v3  ;;  %v4652_v10 = vmax.f32 %v4580_v35, 0.0  ;;  %v4502_v22 = vmax.f32 %v9280_v36, %v4430_v0  ;;  %v9283_v19 = vmax.f32 %v9281_v25, %v9282_v1  ;;  %v3948_v11 = vpop.f32.mrb[124].mxu0  ;;  %v9294_v55 = vld [vmem:[#allocation30_spill] sm:$0xff]  ;;  %v9304_v51 = vld [vmem:[#allocation144_spill] sm:$0xff] }
 0x232   : > { %v4651_v41 = vmax.f32 %v4579_v24, 0.0  ;;  %4722 = vst [vmem:[%s8432_s9 + $0x30] sm:$0xff] %v4650_v59  ;;  %v4596_v52 = vadd.f32 %v8436_v2, %v4500_v31  ;;  %v9286_v6 = vmax.f32 %v9284_v15, %v9285_v13  ;;  %v4446_v61 = vmax.f32 %v9287_v39, %v3948_v11  ;;  %v4037_v29 = vpop.f32.mrb[124].mxu1  ;;  %v3950_v43 = vpop.f32.mrb[125].mxu0  ;;  %v9297_v24 = vld [vmem:[#allocation18_spill] sm:$0xff]  ;;  %v9303_v31 = vld [vmem:[#allocation131_spill] sm:$0xff] }
 0x233   : > { %v4501_v44 = vmax.f32 %v9283_v19, %v4429_v14  ;;  %v4653_v7 = vmax.f32 %v4581_v47, 0.0  ;;  %4724 = vst [vmem:[%s8432_s9 + $0x40] sm:$0xff] %v4652_v10  ;;  %v4598_v40 = vadd.f32 %v8436_v2, %v4502_v22  ;;  %v4448_v17 = vmax.f32 %v9288_v50, %v4037_v29  ;;  %v4039_v57 = vpop.f32.mrb[125].mxu1  ;;  %v9300_v47 = vld [vmem:[#allocation32_spill] sm:$0xff]  ;;  %v9301_v37 = vld [vmem:[#allocation90_spill] sm:$0xff]  ;;  %v9306_v11 = vld [vmem:[#allocation19_spill] sm:$0xff] }
 0x234   : > { %v4503_v23 = vmax.f32 %v9286_v6, %v4431_v63  ;;  %4723 = vst [vmem:[%s8432_s9 + $0x38] sm:$0xff] %v4651_v41  ;;  %v4447_v8 = vmax.f32 %v9289_v42, %v3950_v43  ;;  %v4668_v30 = vmax.f32 %v4596_v52, 0.0  ;;  %v9292_v16 = vmax.f32 %v9290_v12, %v9291_v28  ;;  %v9305_v22 = vld [vmem:[#allocation132_spill] sm:$0xff]  ;;  %v9309_v13 = vld [vmem:[#allocation146_spill] sm:$0xff]  ;;  %v9314_v50 = vld [vmem:[#allocation93_spill] sm:$0xff] }
 0x235   : > { %v4597_v48 = vadd.f32 %v8436_v2, %v4501_v44  ;;  %4725 = vst [vmem:[%s8432_s9 + $0x48] sm:$0xff] %v4653_v7  ;;  %v4449_v5 = vmax.f32 %v9293_v26, %v4039_v57  ;;  %v4670_v3 = vmax.f32 %v4598_v40, 0.0  ;;  %v9296_v21 = vmax.f32 %v9294_v55, %v9295_v34  ;;  %v3954_v14 = vpop.f32.mrb[126].mxu0  ;;  %v9307_v7 = vld [vmem:[#allocation91_spill] sm:$0xff]  ;;  %v9311_v29 = vld [vmem:[#allocation92_spill] sm:$0xff] }
 0x236   : > { %v4599_v56 = vadd.f32 %v8436_v2, %v4503_v23  ;;  %v4518_v45 = vmax.f32 %v9292_v16, %v4446_v61  ;;  %v9299_v0 = vmax.f32 %v9297_v24, %v9298_v54  ;;  %4740 = vst [vmem:[%s8432_s9 + $0xc0] sm:$0xff] %v4668_v30  ;;  %v9302_v60 = vmax.f32 %v9300_v47, %v9301_v37  ;;  %v4043_v63 = vpop.f32.mrb[126].mxu1  ;;  %v3956_v10 = vpop.f32.mrb[127].mxu0  ;;  %v9310_v61 = vld [vmem:[#allocation34_spill] sm:$0xff]  ;;  %v9316_v30 = vld [vmem:[#allocation36_spill] sm:$0xff]  ;;  %v9322_v47 = vld [vmem:[#allocation23_spill] sm:$0xff] }
 0x237   : > { %v4669_v20 = vmax.f32 %v4597_v48, 0.0  ;;  %v4520_v35 = vmax.f32 %v9296_v21, %v4448_v17  ;;  %v4464_v18 = vmax.f32 %v9303_v31, %v3954_v14  ;;  %4742 = vst [vmem:[%s8432_s9 + $0xd0] sm:$0xff] %v4670_v3  ;;  %v4466_v36 = vmax.f32 %v9304_v51, %v4043_v63  ;;  %v4045_v1 = vpop.f32.mrb[127].mxu1  ;;  %v9313_v48 = vld [vmem:[#allocation21_spill] sm:$0xff]  ;;  %v9321_v14 = vld [vmem:[#allocation135_spill] sm:$0xff]  ;;  %v9325_v31 = vld [vmem:[#allocation150_spill] sm:$0xff] }
 0x238   : > { %v4519_v27 = vmax.f32 %v9299_v0, %v4447_v8  ;;  %v4671_v33 = vmax.f32 %v4599_v56, 0.0  ;;  %v4614_v59 = vadd.f32 %v8448_v46, %v4518_v45  ;;  %v4521_v32 = vmax.f32 %v9302_v60, %v4449_v5  ;;  %v9317_v56 = vld [vmem:[#allocation94_spill] sm:$0xff]  ;;  %v9319_v21 = vld [vmem:[#allocation133_spill] sm:$0xff]  ;;  %v9320_v0 = vld [vmem:[#allocation148_spill] sm:$0xff] }
 0x239   : > { %4741 = vst [vmem:[%s8432_s9 + $0xc8] sm:$0xff] %v4669_v20  ;;  %v4616_v41 = vadd.f32 %v8448_v46, %v4520_v35  ;;  %v4465_v25 = vmax.f32 %v9305_v22, %v3956_v10  ;;  %v9308_v52 = vmax.f32 %v9306_v11, %v9307_v7  ;;  %v4467_v6 = vmax.f32 %v9309_v13, %v4045_v1  ;;  %v9323_v37 = vld [vmem:[#allocation95_spill] sm:$0xff]  ;;  %v9326_v63 = vld [vmem:[#allocation38_spill] sm:$0xff]  ;;  %v9327_v10 = vld [vmem:[#allocation96_spill] sm:$0xff] }
 0x23a   : > { %v4615_v9 = vadd.f32 %v8448_v46, %v4519_v27  ;;  %4743 = vst [vmem:[%s8432_s9 + $0xd8] sm:$0xff] %v4671_v33  ;;  %v4686_v19 = vmax.f32 %v4614_v59, 0.0  ;;  %v4617_v44 = vadd.f32 %v8448_v46, %v4521_v32  ;;  %v9312_v43 = vmax.f32 %v9310_v61, %v9311_v29  ;;  %v9329_v51 = vld [vmem:[#allocation25_spill] sm:$0xff]  ;;  %v9333_v11 = vld [vmem:[#allocation98_spill] sm:$0xff]  ;;  %v9336_v29 = vld [vmem:[#allocation152_spill] sm:$0xff] }
 0x23b   : > { %v4536_v15 = vmax.f32 %v9308_v52, %v4464_v18  ;;  %v4688_v23 = vmax.f32 %v4616_v41, 0.0  ;;  %v9315_v17 = vmax.f32 %v9313_v48, %v9314_v50  ;;  %v9318_v12 = vmax.f32 %v9316_v30, %v9317_v56 }
 0x23c   : > { %v4687_v39 = vmax.f32 %v4615_v9, 0.0  ;;  %v4538_v40 = vmax.f32 %v9312_v43, %v4466_v36  ;;  %4758 = vst [vmem:[%s8432_s9 + $0x150] sm:$0xff] %v4686_v19  ;;  %v4689_v8 = vmax.f32 %v4617_v44, 0.0  ;;  %v9324_v60 = vmax.f32 %v9322_v47, %v9323_v37  ;;  %v9330_v36 = vld [vmem:[#allocation97_spill] sm:$0xff]  ;;  %v9332_v44 = vld [vmem:[#allocation40_spill] sm:$0xff] }
 0x23d   : > { %v4537_v42 = vmax.f32 %v9315_v17, %v4465_v25  ;;  %v4632_v57 = vadd.f32 %v8472_v49, %v4536_v15  ;;  %v4539_v28 = vmax.f32 %v9318_v12, %v4467_v6  ;;  %4760 = vst [vmem:[%s8432_s9 + $0x160] sm:$0xff] %v4688_v23  ;;  %v4114_v55 = vpop.f32.mrb[128].mxu0  ;;  %v9328_v41 = vmax.f32 %v9326_v63, %v9327_v10  ;;  %v9335_v15 = vld [vmem:[#allocation137_spill] sm:$0xff]  ;;  %v9341_v12 = vld [vmem:[#allocation154_spill] sm:$0xff]  ;;  %v9352_v63 = vld [vmem:[#allocation156_spill] sm:$0xff] }
 0x23e   : > { %4759 = vst [vmem:[%s8432_s9 + $0x158] sm:$0xff] %v4687_v39  ;;  %v4634_v16 = vadd.f32 %v8472_v49, %v4538_v40  ;;  %4761 = vst [vmem:[%s8432_s9 + $0x168] sm:$0xff] %v4689_v8  ;;  %v4414_v35 = vmax.f32 %v9319_v21, %v4114_v55  ;;  %v4203_v24 = vpop.f32.mrb[128].mxu1  ;;  %v4116_v54 = vpop.f32.mrb[129].mxu0  ;;  %v9331_v22 = vmax.f32 %v9329_v51, %v9330_v36  ;;  %v9337_v40 = vld [vmem:[#allocation139_spill] sm:$0xff]  ;;  %v9345_v55 = vld [vmem:[#allocation29_spill] sm:$0xff] }
 0x23f   : > { %v4633_v45 = vadd.f32 %v8472_v49, %v4537_v42  ;;  %v4704_v26 = vmax.f32 %v4632_v57, 0.0  ;;  %v4635_v5 = vadd.f32 %v8472_v49, %v4539_v28  ;;  %v4416_v27 = vmax.f32 %v9320_v0, %v4203_v24  ;;  %v4205_v59 = vpop.f32.mrb[129].mxu1  ;;  %v9338_v8 = vld [vmem:[#allocation27_spill] sm:$0xff]  ;;  %v9351_v47 = vld [vmem:[#allocation141_spill] sm:$0xff] }
 0x240   : > { %v4706_v3 = vmax.f32 %v4634_v16, 0.0  ;;  %v4415_v33 = vmax.f32 %v9321_v14, %v4116_v54  ;;  %v4486_v32 = vmax.f32 %v9324_v60, %v4414_v35  ;;  %v4417_v18 = vmax.f32 %v9325_v31, %v4205_v59  ;;  %v9339_v57 = vld [vmem:[#allocation99_spill] sm:$0xff]  ;;  %v9349_v14 = vld [vmem:[#allocation102_spill] sm:$0xff] }
 0x241   : > { %v4705_v20 = vmax.f32 %v4633_v45, 0.0  ;;  %4776 = vst [vmem:[%s8432_s9 + $0x1e0] sm:$0xff] %v4704_v26  ;;  %v4707_v34 = vmax.f32 %v4635_v5, 0.0  ;;  %v4488_v9 = vmax.f32 %v9328_v41, %v4416_v27  ;;  %v4120_v1 = vpop.f32.mrb[130].mxu0  ;;  %v9334_v7 = vmax.f32 %v9332_v44, %v9333_v11  ;;  %v9342_v26 = vld [vmem:[#allocation42_spill] sm:$0xff]  ;;  %v9343_v5 = vld [vmem:[#allocation100_spill] sm:$0xff] }
 0x242   : > { %4778 = vst [vmem:[%s8432_s9 + $0x1f0] sm:$0xff] %v4706_v3  ;;  %v4487_v25 = vmax.f32 %v9331_v22, %v4415_v33  ;;  %v4582_v19 = vadd.f32 %v8414_v38, %v4486_v32  ;;  %v4432_v13 = vmax.f32 %v9335_v15, %v4120_v1  ;;  %v4209_v6 = vpop.f32.mrb[130].mxu1  ;;  %v4122_v23 = vpop.f32.mrb[131].mxu0  ;;  %v9340_v30 = vmax.f32 %v9338_v8, %v9339_v57  ;;  %v9348_v27 = vld [vmem:[#allocation44_spill] sm:$0xff]  ;;  %v9353_v41 = vld [vmem:[#allocation143_spill] sm:$0xff]  ;;  %v9357_v11 = vld [vmem:[#allocation158_spill] sm:$0xff] }
 0x243   : > { %4777 = vst [vmem:[%s8432_s9 + $0x1e8] sm:$0xff] %v4705_v20  ;;  %4779 = vst [vmem:[%s8432_s9 + $0x1f8] sm:$0xff] %v4707_v34  ;;  %v4489_v52 = vmax.f32 %v9334_v7, %v4417_v18  ;;  %v4584_v39 = vadd.f32 %v8414_v38, %v4488_v9  ;;  %v4434_v43 = vmax.f32 %v9336_v29, %v4209_v6  ;;  %v4211_v50 = vpop.f32.mrb[131].mxu1  ;;  %v9346_v34 = vld [vmem:[#allocation101_spill] sm:$0xff]  ;;  %v9355_v1 = vld [vmem:[#allocation103_spill] sm:$0xff] }
 0x244   : > { %v4583_v61 = vadd.f32 %v8414_v38, %v4487_v25  ;;  %v4433_v48 = vmax.f32 %v9337_v40, %v4122_v23  ;;  %v4654_v17 = vmax.f32 %v4582_v19, 0.0  ;;  %v4504_v56 = vmax.f32 %v9340_v30, %v4432_v13  ;;  %v9354_v25 = vld [vmem:[#allocation31_spill] sm:$0xff]  ;;  %v9358_v13 = vld [vmem:[#allocation46_spill] sm:$0xff]  ;;  %v9359_v6 = vld [vmem:[#allocation104_spill] sm:$0xff] }
 0x245   : > { %v4585_v42 = vadd.f32 %v8414_v38, %v4489_v52  ;;  %v4435_v28 = vmax.f32 %v9341_v12, %v4211_v50  ;;  %v4656_v16 = vmax.f32 %v4584_v39, 0.0  ;;  %v9344_v3 = vmax.f32 %v9342_v26, %v9343_v5  ;;  %v4126_v24 = vpop.f32.mrb[132].mxu0  ;;  %v9362_v29 = vld [vmem:[#allocation105_spill] sm:$0xff]  ;;  %v9365_v8 = vld [vmem:[#allocation106_spill] sm:$0xff]  ;;  %v9368_v5 = vld [vmem:[#allocation160_spill] sm:$0xff] }
 0x246   : > { %v4655_v45 = vmax.f32 %v4583_v61, 0.0  ;;  %v9347_v21 = vmax.f32 %v9345_v55, %v9346_v34  ;;  %4726 = vst [vmem:[%s8432_s9 + $0x50] sm:$0xff] %v4654_v17  ;;  %v4600_v0 = vadd.f32 %v8436_v2, %v4504_v56  ;;  %v9350_v33 = vmax.f32 %v9348_v27, %v9349_v14  ;;  %v4215_v60 = vpop.f32.mrb[132].mxu1  ;;  %v4128_v32 = vpop.f32.mrb[133].mxu0  ;;  %v9361_v61 = vld [vmem:[#allocation33_spill] sm:$0xff]  ;;  %v9373_v14 = vld [vmem:[#allocation162_spill] sm:$0xff] }
 0x247   : > { %v4506_v20 = vmax.f32 %v9344_v3, %v4434_v43  ;;  %v4657_v54 = vmax.f32 %v4585_v42, 0.0  ;;  %v4450_v37 = vmax.f32 %v9351_v47, %v4126_v24  ;;  %4728 = vst [vmem:[%s8432_s9 + $0x60] sm:$0xff] %v4656_v16  ;;  %v4452_v10 = vmax.f32 %v9352_v63, %v4215_v60  ;;  %v4217_v51 = vpop.f32.mrb[133].mxu1  ;;  %v9364_v42 = vld [vmem:[#allocation48_spill] sm:$0xff]  ;;  %v9367_v56 = vld [vmem:[#allocation145_spill] sm:$0xff]  ;;  %v9370_v24 = vld [vmem:[#allocation35_spill] sm:$0xff] }
 0x248   : > { %v4505_v35 = vmax.f32 %v9347_v21, %v4433_v48  ;;  %v4507_v59 = vmax.f32 %v9350_v33, %v4435_v28  ;;  %4727 = vst [vmem:[%s8432_s9 + $0x58] sm:$0xff] %v4655_v45  ;;  %v4451_v9 = vmax.f32 %v9353_v41, %v4128_v32  ;;  %v4672_v36 = vmax.f32 %v4600_v0, 0.0  ;;  %v9375_v60 = vld [vmem:[#allocation108_spill] sm:$0xff]  ;;  %v9378_v63 = vld [vmem:[#allocation109_spill] sm:$0xff] }
 0x249   : > { %v4602_v31 = vadd.f32 %v8436_v2, %v4506_v20  ;;  %4729 = vst [vmem:[%s8432_s9 + $0x68] sm:$0xff] %v4657_v54  ;;  %v9356_v19 = vmax.f32 %v9354_v25, %v9355_v1  ;;  %v4453_v7 = vmax.f32 %v9357_v11, %v4217_v51  ;;  %v9360_v23 = vmax.f32 %v9358_v13, %v9359_v6  ;;  %v4132_v48 = vpop.f32.mrb[134].mxu0  ;;  %v9369_v20 = vld [vmem:[#allocation147_spill] sm:$0xff] }
 0x24a   : > { %v4601_v18 = vadd.f32 %v8436_v2, %v4505_v35  ;;  %v4603_v22 = vadd.f32 %v8436_v2, %v4507_v59  ;;  %v9363_v43 = vmax.f32 %v9361_v61, %v9362_v29  ;;  %4744 = vst [vmem:[%s8432_s9 + $0xe0] sm:$0xff] %v4672_v36  ;;  %v9366_v57 = vmax.f32 %v9364_v42, %v9365_v8  ;;  %v4221_v28 = vpop.f32.mrb[134].mxu1  ;;  %v4134_v16 = vpop.f32.mrb[135].mxu0  ;;  %v9371_v54 = vld [vmem:[#allocation107_spill] sm:$0xff]  ;;  %v9380_v36 = vld [vmem:[#allocation52_spill] sm:$0xff] }
 0x24b   : > { %v4522_v44 = vmax.f32 %v9356_v19, %v4450_v37  ;;  %v4674_v52 = vmax.f32 %v4602_v31, 0.0  ;;  %v4524_v39 = vmax.f32 %v9360_v23, %v4452_v10  ;;  %v4468_v12 = vmax.f32 %v9367_v56, %v4132_v48  ;;  %v4223_v34 = vpop.f32.mrb[135].mxu1  ;;  %v9374_v37 = vld [vmem:[#allocation50_spill] sm:$0xff]  ;;  %v9383_v23 = vld [vmem:[#allocation149_spill] sm:$0xff]  ;;  %v9385_v48 = vld [vmem:[#allocation151_spill] sm:$0xff] }
 0x24c   : > { %v4673_v15 = vmax.f32 %v4601_v18, 0.0  ;;  %v4523_v40 = vmax.f32 %v9363_v43, %v4451_v9  ;;  %v4675_v50 = vmax.f32 %v4603_v22, 0.0  ;;  %v4525_v30 = vmax.f32 %v9366_v57, %v4453_v7  ;;  %v9377_v18 = vld [vmem:[#allocation37_spill] sm:$0xff]  ;;  %v9381_v22 = vld [vmem:[#allocation110_spill] sm:$0xff]  ;;  %v9384_v43 = vld [vmem:[#allocation164_spill] sm:$0xff] }
 0x24d   : > { %v4618_v17 = vadd.f32 %v8448_v46, %v4522_v44  ;;  %4746 = vst [vmem:[%s8432_s9 + $0xf0] sm:$0xff] %v4674_v52  ;;  %v4620_v45 = vadd.f32 %v8448_v46, %v4524_v39  ;;  %v4470_v3 = vmax.f32 %v9368_v5, %v4221_v28  ;;  %v4469_v55 = vmax.f32 %v9369_v20, %v4134_v16  ;;  %v9386_v42 = vld [vmem:[#allocation39_spill] sm:$0xff]  ;;  %v9389_v56 = vld [vmem:[#allocation165_spill] sm:$0xff]  ;;  %v9390_v28 = vld [vmem:[#allocation54_spill] sm:$0xff] }
 0x24e   : > { %4745 = vst [vmem:[%s8432_s9 + $0xe8] sm:$0xff] %v4673_v15  ;;  %v4619_v26 = vadd.f32 %v8448_v46, %v4523_v40  ;;  %4747 = vst [vmem:[%s8432_s9 + $0xf8] sm:$0xff] %v4675_v50  ;;  %v4621_v35 = vadd.f32 %v8448_v46, %v4525_v30  ;;  %v9372_v0 = vmax.f32 %v9370_v24, %v9371_v54  ;;  %v9387_v8 = vld [vmem:[#allocation111_spill] sm:$0xff]  ;;  %v9391_v16 = vld [vmem:[#allocation112_spill] sm:$0xff] }
 0x24f   : > { %v4690_v21 = vmax.f32 %v4618_v17, 0.0  ;;  %v4471_v33 = vmax.f32 %v9373_v14, %v4223_v34  ;;  %v4692_v59 = vmax.f32 %v4620_v45, 0.0  ;;  %v9376_v32 = vmax.f32 %v9374_v37, %v9375_v60  ;;  %v9393_v5 = vld [vmem:[#allocation41_spill] sm:$0xff]  ;;  %v9397_v24 = vld [vmem:[#allocation114_spill] sm:$0xff] }
 0x250   : > { %v4540_v27 = vmax.f32 %v9372_v0, %v4468_v12  ;;  %v4691_v47 = vmax.f32 %v4619_v26, 0.0  ;;  %v9379_v10 = vmax.f32 %v9377_v18, %v9378_v63  ;;  %v4693_v9 = vmax.f32 %v4621_v35, 0.0  ;;  %v9396_v35 = vld [vmem:[#allocation56_spill] sm:$0xff] }
 0x251   : > { %v4542_v31 = vmax.f32 %v9376_v32, %v4470_v3  ;;  %4762 = vst [vmem:[%s8432_s9 + $0x170] sm:$0xff] %v4690_v21  ;;  %v9382_v25 = vmax.f32 %v9380_v36, %v9381_v22  ;;  %4764 = vst [vmem:[%s8432_s9 + $0x180] sm:$0xff] %v4692_v59  ;;  %v4292_v13 = vpop.f32.mrb[136].mxu0  ;;  %v9388_v57 = vmax.f32 %v9386_v42, %v9387_v8  ;;  %v9394_v3 = vld [vmem:[#allocation113_spill] sm:$0xff]  ;;  %v9400_v32 = vld [vmem:[#allocation155_spill] sm:$0xff] }
 0x252   : > { %v4541_v41 = vmax.f32 %v9379_v10, %v4469_v55  ;;  %v4636_v51 = vadd.f32 %v8472_v49, %v4540_v27  ;;  %4763 = vst [vmem:[%s8432_s9 + $0x178] sm:$0xff] %v4691_v47  ;;  %4765 = vst [vmem:[%s8432_s9 + $0x188] sm:$0xff] %v4693_v9  ;;  %v4418_v39 = vmax.f32 %v9383_v23, %v4292_v13  ;;  %v4381_v61 = vpop.f32.mrb[136].mxu1  ;;  %v4294_v29 = vpop.f32.mrb[137].mxu0  ;;  %v9399_v27 = vld [vmem:[#allocation153_spill] sm:$0xff]  ;;  %v9402_v9 = vld [vmem:[#allocation115_spill] sm:$0xff] }
 0x253   : > { %v4543_v1 = vmax.f32 %v9382_v25, %v4471_v33  ;;  %v4638_v19 = vadd.f32 %v8472_v49, %v4542_v31  ;;  %v4420_v40 = vmax.f32 %v9384_v43, %v4381_v61  ;;  %v4419_v50 = vmax.f32 %v9385_v48, %v4294_v29  ;;  %v4383_v17 = vpop.f32.mrb[137].mxu1  ;;  %v9404_v22 = vld [vmem:[#allocation2_spill] sm:$0xff]  ;;  %v9411_v61 = vld [vmem:[#allocation61_spill] sm:$0xff] }
 0x254   : > { %v4637_v44 = vadd.f32 %v8472_v49, %v4541_v41  ;;  %v4708_v11 = vmax.f32 %v4636_v51, 0.0  ;;  %v4490_v30 = vmax.f32 %v9388_v57, %v4418_v39  ;;  %v4421_v12 = vmax.f32 %v9389_v56, %v4383_v17  ;;  %v9401_v41 = vld [vmem:[#allocation43_spill] sm:$0xff]  ;;  %v9412_v29 = vld [vmem:[#allocation118_spill] sm:$0xff]  ;;  %v9414_v48 = vld [vmem:[#allocation157_spill] sm:$0xff] }
 0x255   : > { %v4639_v7 = vadd.f32 %v8472_v49, %v4543_v1  ;;  %v4710_v52 = vmax.f32 %v4638_v19, 0.0  ;;  %v9392_v45 = vmax.f32 %v9390_v28, %v9391_v16  ;;  %v9395_v20 = vmax.f32 %v9393_v5, %v9394_v3  ;;  %v4298_v34 = vpop.f32.mrb[138].mxu0  ;;  %v9415_v56 = vld [vmem:[#allocation159_spill] sm:$0xff] }
 0x256   : > { %v4709_v15 = vmax.f32 %v4637_v44, 0.0  ;;  %4780 = vst [vmem:[%s8432_s9 + $0x200] sm:$0xff] %v4708_v11  ;;  %v4586_v21 = vadd.f32 %v8414_v38, %v4490_v30  ;;  %v9398_v54 = vmax.f32 %v9396_v35, %v9397_v24  ;;  %v4436_v14 = vmax.f32 %v9399_v27, %v4298_v34  ;;  %v4387_v33 = vpop.f32.mrb[138].mxu1  ;;  %v4300_v59 = vpop.f32.mrb[139].mxu0  ;;  %v9405_v44 = vld [vmem:[#allocation60_spill] sm:$0xff]  ;;  %v9417_v5 = vld [vmem:[#allocation119_spill] sm:$0xff] }
 0x257   : > { %v4711_v6 = vmax.f32 %v4639_v7, 0.0  ;;  %4782 = vst [vmem:[%s8432_s9 + $0x210] sm:$0xff] %v4710_v52  ;;  %v4492_v26 = vmax.f32 %v9392_v45, %v4420_v40  ;;  %v4491_v55 = vmax.f32 %v9395_v20, %v4419_v50  ;;  %v4438_v60 = vmax.f32 %v8438_v4, %v4387_v33  ;;  %v4389_v18 = vpop.f32.mrb[139].mxu1  ;;  %v9406_v11 = vld [vmem:[#allocation116_spill] sm:$0xff]  ;;  %v9408_v52 = vld [vmem:[#allocation45_spill] sm:$0xff] }
 0x258   : > { %4781 = vst [vmem:[%s8432_s9 + $0x208] sm:$0xff] %v4709_v15  ;;  %v4493_v0 = vmax.f32 %v9398_v54, %v4421_v12  ;;  %v4437_v31 = vmax.f32 %v9400_v32, %v4300_v59  ;;  %v4658_v63 = vmax.f32 %v4586_v21, 0.0  ;;  %v9403_v51 = vmax.f32 %v9401_v41, %v9402_v9  ;;  %v9409_v15 = vld [vmem:[#allocation117_spill] sm:$0xff]  ;;  %v9419_v35 = vld [vmem:[#allocation64_spill] sm:$0xff] }
 0x259   : > { %4783 = vst [vmem:[%s8432_s9 + $0x218] sm:$0xff] %v4711_v6  ;;  %v4588_v47 = vadd.f32 %v8414_v38, %v4492_v26  ;;  %v4587_v37 = vadd.f32 %v8414_v38, %v4491_v55  ;;  %v4439_v25 = vmax.f32 %v9404_v22, %v4389_v18  ;;  %v9407_v7 = vmax.f32 %v9405_v44, %v9406_v11  ;;  %v4304_v23 = vpop.f32.mrb[140].mxu0  ;;  %v9416_v26 = vld [vmem:[#allocation47_spill] sm:$0xff]  ;;  %v9420_v24 = vld [vmem:[#allocation120_spill] sm:$0xff]  ;;  %v9423_v27 = vld [vmem:[#allocation121_spill] sm:$0xff] }
 0x25a   : > { %v4589_v10 = vadd.f32 %v8414_v38, %v4493_v0  ;;  %v4508_v36 = vmax.f32 %v9403_v51, %v4436_v14  ;;  %v9410_v13 = vmax.f32 %v9408_v52, %v9409_v15  ;;  %4730 = vst [vmem:[%s8432_s9 + $0x70] sm:$0xff] %v4658_v63  ;;  %v9413_v43 = vmax.f32 %v9411_v61, %v9412_v29  ;;  %v4393_v17 = vpop.f32.mrb[140].mxu1  ;;  %v4306_v42 = vpop.f32.mrb[141].mxu0  ;;  %v9422_v0 = vld [vmem:[#allocation49_spill] sm:$0xff]  ;;  %v9429_v51 = vld [vmem:[#allocation55_spill] sm:$0xff] }
 0x25b   : > { %v4660_v1 = vmax.f32 %v4588_v47, 0.0  ;;  %v4659_v19 = vmax.f32 %v4587_v37, 0.0  ;;  %v4510_v4 = vmax.f32 %v9407_v7, %v4438_v60  ;;  %v4454_v50 = vmax.f32 %v9414_v48, %v4304_v23  ;;  %v4395_v28 = vpop.f32.mrb[141].mxu1  ;;  %v9425_v37 = vld [vmem:[#allocation65_spill] sm:$0xff]  ;;  %v9426_v60 = vld [vmem:[#allocation122_spill] sm:$0xff]  ;;  %v9430_v22 = vld [vmem:[#allocation163_spill] sm:$0xff] }
 0x25c   : > { %v4509_v6 = vmax.f32 %v9410_v13, %v4437_v31  ;;  %v4661_v38 = vmax.f32 %v4589_v10, 0.0  ;;  %v4604_v39 = vadd.f32 %v8436_v2, %v4508_v36  ;;  %v4511_v40 = vmax.f32 %v9413_v43, %v4439_v25  ;;  %v9428_v31 = vld [vmem:[#allocation161_spill] sm:$0xff]  ;;  %v9431_v11 = vld [vmem:[#allocation51_spill] sm:$0xff]  ;;  %v9434_v23 = vld [vmem:[#allocation68_spill] sm:$0xff] }
 0x25d   : > { %4732 = vst [vmem:[%s8432_s9 + $0x80] sm:$0xff] %v4660_v1  ;;  %4731 = vst [vmem:[%s8432_s9 + $0x78] sm:$0xff] %v4659_v19  ;;  %v4606_v8 = vadd.f32 %v8436_v2, %v4510_v4  ;;  %v4456_v30 = vmax.f32 %v8456_v53, %v4393_v17  ;;  %v4455_v12 = vmax.f32 %v9415_v56, %v4306_v42  ;;  %v4310_v59 = vpop.f32.mrb[142].mxu0  ;;  %v9432_v7 = vld [vmem:[#allocation123_spill] sm:$0xff]  ;;  %v9437_v29 = vld [vmem:[#allocation53_spill] sm:$0xff] }
 0x25e   : > { %v4605_v57 = vadd.f32 %v8436_v2, %v4509_v6  ;;  %4733 = vst [vmem:[%s8432_s9 + $0x88] sm:$0xff] %v4661_v38  ;;  %v4676_v16 = vmax.f32 %v4604_v39, 0.0  ;;  %v4607_v45 = vadd.f32 %v8436_v2, %v4511_v40  ;;  %v9418_v3 = vmax.f32 %v9416_v26, %v9417_v5  ;;  %v4399_v63 = vpop.f32.mrb[142].mxu1  ;;  %v4312_v10 = vpop.f32.mrb[143].mxu0  ;;  %v9435_v38 = vld [vmem:[#allocation124_spill] sm:$0xff]  ;;  %v9438_v43 = vld [vmem:[#allocation125_spill] sm:$0xff] }
 0x25f   : > { %v4457_v55 = vmax.f32 %v8461_v58, %v4395_v28  ;;  %v4678_v34 = vmax.f32 %v4606_v8, 0.0  ;;  %v9421_v53 = vmax.f32 %v9419_v35, %v9420_v24  ;;  %v9424_v14 = vmax.f32 %v9422_v0, %v9423_v27  ;;  %v4401_v1 = vpop.f32.mrb[143].mxu1  ;;  %v9440_v17 = vld [vmem:[#allocation69_spill] sm:$0xff] }
 0x260   : > { %v4526_v20 = vmax.f32 %v9418_v3, %v4454_v50  ;;  %v4677_v21 = vmax.f32 %v4605_v57, 0.0  ;;  %4748 = vst [vmem:[%s8432_s9 + $0x100] sm:$0xff] %v4676_v16  ;;  %v4679_v2 = vmax.f32 %v4607_v45, 0.0  ;;  %v9427_v32 = vmax.f32 %v9425_v37, %v9426_v60 }
 0x261   : > { %v4528_v54 = vmax.f32 %v9421_v53, %v4456_v30  ;;  %v4527_v33 = vmax.f32 %v9424_v14, %v4455_v12  ;;  %v4472_v18 = vmax.f32 %v9428_v31, %v4310_v59  ;;  %4750 = vst [vmem:[%s8432_s9 + $0x110] sm:$0xff] %v4678_v34  ;;  %v4474_v36 = vmax.f32 %v9429_v51, %v4399_v63 }
 0x262   : > { %v4622_v47 = vadd.f32 %v8448_v46, %v4526_v20  ;;  %v4529_v58 = vmax.f32 %v9427_v32, %v4457_v55  ;;  %4749 = vst [vmem:[%s8432_s9 + $0x108] sm:$0xff] %v4677_v21  ;;  %v4473_v25 = vmax.f32 %v9430_v22, %v4312_v10  ;;  %4751 = vst [vmem:[%s8432_s9 + $0x118] sm:$0xff] %v4679_v2 }
 0x263   : > { %v4624_v41 = vadd.f32 %v8448_v46, %v4528_v54  ;;  %v4623_v9 = vadd.f32 %v8448_v46, %v4527_v33  ;;  %v9433_v4 = vmax.f32 %v9431_v11, %v9432_v7  ;;  %v4475_v15 = vmax.f32 %v8479_v62, %v4401_v1  ;;  %v9441_v62 = vld [vmem:[#allocation126_spill] sm:$0xff] }
 0x264   : > { %v4694_v19 = vmax.f32 %v4622_v47, 0.0  ;;  %v4625_v44 = vadd.f32 %v8448_v46, %v4529_v58  ;;  %v9436_v39 = vmax.f32 %v9434_v23, %v9435_v38  ;;  %v9439_v40 = vmax.f32 %v9437_v29, %v9438_v43 }
 0x265   : > { %v4544_v52 = vmax.f32 %v9433_v4, %v4472_v18  ;;  %v4696_v13 = vmax.f32 %v4624_v41, 0.0  ;;  %v4695_v6 = vmax.f32 %v4623_v9, 0.0  ;;  %v9442_v42 = vmax.f32 %v9440_v17, %v9441_v62 }
 0x266   : > { %v4546_v61 = vmax.f32 %v9436_v39, %v4474_v36  ;;  %v4545_v48 = vmax.f32 %v9439_v40, %v4473_v25  ;;  %4766 = vst [vmem:[%s8432_s9 + $0x190] sm:$0xff] %v4694_v19  ;;  %v4697_v46 = vmax.f32 %v4625_v44, 0.0 }
 0x267   : > { %v4640_v50 = vadd.f32 %v8472_v49, %v4544_v52  ;;  %v4547_v8 = vmax.f32 %v9442_v42, %v4475_v15  ;;  %4768 = vst [vmem:[%s8432_s9 + $0x1a0] sm:$0xff] %v4696_v13  ;;  %4767 = vst [vmem:[%s8432_s9 + $0x198] sm:$0xff] %v4695_v6 }
 0x268   : > { %v4642_v57 = vadd.f32 %v8472_v49, %v4546_v61  ;;  %v4641_v30 = vadd.f32 %v8472_v49, %v4545_v48  ;;  %4769 = vst [vmem:[%s8432_s9 + $0x1a8] sm:$0xff] %v4697_v46 }
 0x269   : > { %v4712_v56 = vmax.f32 %v4640_v50, 0.0  ;;  %v4643_v12 = vadd.f32 %v8472_v49, %v4547_v8 }
 0x26a   : > { %v4714_v28 = vmax.f32 %v4642_v57, 0.0  ;;  %v4713_v16 = vmax.f32 %v4641_v30, 0.0 }
 0x26b   : > { %4784 = vst [vmem:[%s8432_s9 + $0x220] sm:$0xff] %v4712_v56  ;;  %v4715_v45 = vmax.f32 %v4643_v12, 0.0 }
 0x26c   : > { %4786 = vst [vmem:[%s8432_s9 + $0x230] sm:$0xff] %v4714_v28  ;;  %4785 = vst [vmem:[%s8432_s9 + $0x228] sm:$0xff] %v4713_v16 }
 0x26d   : > { %4787 = vst [vmem:[%s8432_s9 + $0x238] sm:$0xff] %v4715_v45 }
 0x26e PF: > { %s13_s12 = sadd.s32 1, %s6433_s12  }
 0x26f   : > { %p10_p4 = scmp.ge.s32.totalorder %s13_s12, 4  }
 0x271   :  { %12 = sbr.rel (!%p10_p4) target bundleno = 1 (0x1), region = 65 }

// kernel: cnn_forward.3
= control target key start
LH: loop header
LB: loop body
LE: loop exit
PB: predicated region body
PF: predicated region fallthrough
CT: control target
= control target key end

     0   :  { %10 = vsyncpa [#allocation4], 0  ;;  %s8835_s0 = inlined_call_operand.vmem [shape: f32[2,73728], index: 0, kind: input, shape index: {}]   ;;  %s8836_s1 = inlined_call_operand.hbm [shape: f32[73728,128], index: 1, kind: input, shape index: {}]   ;;  %s8837_s2 = inlined_call_operand.vmem [shape: f32[1,128], index: 2, kind: input, shape index: {}]   ;;  %s8838_s3 = inlined_call_operand.vmem [shape: f32[128,2], index: 3, kind: input, shape index: {}]   ;;  %s8839_s4 = inlined_call_operand.vmem [shape: f32[1,2], index: 4, kind: input, shape index: {}]   ;;  %s8840_s5 = inlined_call_operand.hbm [shape: f32[2,2], index: 5, kind: output, shape index: {}]  }
   0x1   :  { %12 = vsyncpa [#allocation4 + $0x1], 0 }
   0x2   :  { %13 = vsyncpa [#allocation5], 0  ;;  %s7237_s18 = smov 0   ;;  %s7239_s19 = smov 0  }
   0x3   :  { %s7241_s20 = smov 0   ;;  %s7243_s21 = smov 0  }
   0x4 LB: > { %s7256_s22 = sadd.s32 4294967295, %s7196_s21   ;;  %s7259_s23 = sadd.s32 1, %s7196_s21   ;;  %s7196_s21 = sphi %s7243_s21, %s8847_s21   ;;  %s7192_s20 = sphi %s7241_s20, %s8846_s20   ;;  %s7188_s19 = sphi %s7239_s19, %s8845_s19   ;;  %s7184_s18 = sphi %s7237_s18, %s8844_s18  }
   0x5   : > { %s49_s24 = ssub.s32 %s7196_s21, %s7259_s23  ;;  %s52_s25 = sadd.s32 1, %s7192_s20 }
   0x6   : > { %p50_p0 = scmp.eq.s32.totalorder %s49_s24, 0  ;;  %p59_p1 = scmp.ne.s32.totalorder %s7192_s20, %s7188_s19 }
   0x7   : > { %p60_p2 = scmp.eq.s32.totalorder %s7196_s21, 0  ;;  %p65_p3 = scmp.ne.s32.totalorder %s7188_s19, %s7184_s18 }
   0x8   : > { %s7269_s26 = scalar_select %p50_p0, %s7192_s20, %s52_s25  }
   0x9   : > { %p61_p4 = por %p60_p2, %p59_p1  ;;  %p66_p5 = scmp.eq.s32.totalorder %s7256_s22, 0 }
   0xa   : > { %p7041_p6 = scmp.lt.s32.totalorder %s7196_s21, 8  ;;  %s191_s28 = sand.u32 1, %s7192_s20  }
   0xb   : > { %p7273_p7 = por %p66_p5, %p65_p3  ;;  %s7029_s29 = smul.u32 9216, %s191_s28 }
   0xc   : > { %s4540_s30 = smul.u32 147456, %s7196_s21  ;;  %p7279_p8 = pnand %p7041_p6, %p61_p4 }
   0xd   : > { %s195_s10 = scalar_lea.vmem [#allocation3], %s7029_s29  ;;  %s7291_s12 = scalar_lea.sflag [#allocation4], %s191_s28 }
   0xe   : > { %s7286_s9 = scalar_lea.hbm %s8836_s1, %s4540_s30  ;;  %s202_s11 = sshll.u32 %s195_s10, 4  ;;  %s7288_s11 = int_to_ptr.vmem [resolvable:$true] %s202_s11 }
   0xf   : > { %s7102_s13 = scalar_lea.hbm %s7286_s9, 147456  ;;  %p7104_p11 = pneg %p7279_p8 }
  0x10   : > { %p7103_p10 = scmp.ne.s32.totalorder %s7286_s9, %s7102_s13  ;;  %s7107_s16 = scalar_lea.hbm %s8836_s1, 1179648 }
  0x11   : > { %p7108_p0 = scmp.lt.u32.totalorder %s7286_s9, %s8836_s1  ;;  %p7109_p1 = scmp.lt.u32.totalorder %s7107_s16, %s7102_s13 }
  0x12   : > { %p7105_p12 = pnand %p7104_p11, %p7103_p10  ;;  %p7111_p3 = scmp.lt.u32.totalorder %s7102_s13, %s7286_s9 }
  0x13   : > { %p7110_p2 = por %p7109_p1, %p7108_p0 }
  0x14   : > { %p7106_p13 = pneg %p7105_p12 }
  0x15   : > { %p7112_p4 = por %p7111_p3, %p7110_p2 }
  0x17   : > { %p7113_p5 = pnand %p7112_p4, %p7106_p13 }
  0x19   : > { %7116 = shalt.err (!%p7113_p5)
}
  0x1a   : > { %s7117_s24 = scalar_lea.vmem %s7288_s11, 147456  ;;  %s7198_s25 = smov [#allocation3]  }
  0x1b   : > { %p7118_p6 = scmp.ne.s32.totalorder %s7288_s11, %s7117_s24  ;;  %s7122_s28 = sshll.u32 %s7198_s25, 4  ;;  %s7123_s28 = int_to_ptr.vmem [resolvable:$false] %s7122_s28 }
  0x1c   : > { %s7124_s29 = scalar_lea.vmem %s7123_s28, 294912  ;;  %p7125_p9 = scmp.lt.s32.totalorder %s7288_s11, %s7123_s28 }
  0x1d   : > { %p7120_p10 = pnand %p7118_p6, %p7104_p11  ;;  %p7126_p0 = scmp.lt.s32.totalorder %s7124_s29, %s7117_s24 }
  0x1f   : > { %p7121_p12 = pneg %p7120_p10  ;;  %p7127_p1 = por %p7126_p0, %p7125_p9 }
  0x21   : > { %p7128_p2 = pnand %p7127_p1, %p7121_p12 }
  0x23   : > { %7131 = shalt.err (!%p7128_p2)
}
  0x24   : > { %s7199_s30 = smov 128   ;;  %s7200_s7 = smov 8  }
  0x25   : > { %7040 = dma.hbm_to_vmem [thread:$0]  (!%p7279_p8), %s7286_s9, 147456, %s7288_s11, %s7291_s12, %s7199_s30, %s7199_s30, %s7200_s7  }
  0x26   : > { %p210_p11 = scmp.lt.s32.totalorder %s7196_s21, 9  ;;  %p8843_p13 = scmp.ge.s32.totalorder %s7196_s21, 1 }
  0x28   : > { %p211_p3 = pnand %p8843_p13, %p210_p11 }
  0x29   : > { %s216_s8 = sand.u32 (!%p211_p3), 1, %s7188_s19  }
  0x2a   : > { %214 = sbr.rel (%p211_p3) target bundleno = 1112 (0x458), region = 40  ;;  %s217_s13 = scalar_lea.sflag (!%p211_p3), [#allocation4], %s216_s8 }
  0x2b   : > { %s7030_s10 = smul.u32 (!%p211_p3), 9216, %s216_s8 }
  0x2d   : > { %s7323_s14 = scalar_lea.vmem (!%p211_p3), [#allocation3], %s7030_s10 }
  0x31   : > { %7175 = dma.done.wait (%p7273_p7), %s217_s13, 147456  }
  0x32   : > { %7177 = vsyncadd (%p7273_p7), %s217_s13, 4294819840  ;;  %s247_s15 = smul.u32 72, %s7256_s22  ;;  %p4532_p8 = scmp.ne.s32.totalorder %s7256_s22, 0 }
  0x33   : > { %v7201_v0 = vmov (!%p4532_p8), 0.0  }
  0x34   : > { %p248_p9 = scmp.lt.s32.totalorder %s247_s15, 575  ;;  %257 = sbr.rel (%p4532_p8) target bundleno = 59 (0x3b), region = 48  ;;  %258 = vst [vmem:[#allocation2] sm:$0x3] (!%p4532_p8), %v7201_v0 }
  0x36   : > { %s8849_s15 = smov (!%p248_p9, %s247_s15), 575 }
  0x37   : > { %s4531_s6 = sshll.u32 %s8849_s15, 1 }
  0x38   : > { %s7333_s11 = scalar_lea.vmem %s8835_s0, %s4531_s6 }
  0x3b PF: > { %v294_v1 = vld [vmem:[%s7323_s14 + $0x80] sm:$0xff]  ;;  %v295_v2 = vld [vmem:[%s7323_s14 + $0x88] sm:$0xff]  ;;  %v296_v12 = vld [vmem:[%s7323_s14 + $0x90] sm:$0xff]  ;;  %v7202_v48 = vmov 1983009808   ;;  %v1452_v50 = vlaneseq  ;;  %p4533_p7 = scmp.ne.s32.totalorder %s7256_s22, 7 }
  0x3c   : > { %v326_v3 = vld [vmem:[%s7323_s14 + $0x180] sm:$0xff]  ;;  %v5853_v4 = vpack.c.bf16 %v295_v2, %v294_v1  ;;  %v327_v5 = vld [vmem:[%s7323_s14 + $0x188] sm:$0xff]  ;;  %v297_v14 = vld [vmem:[%s7323_s14 + $0x98] sm:$0xff]  ;;  %v1450_v49 = vunpack.c.l.s4 %v7202_v48  ;;  %vm7204_vm0 = vmmov (!%p4533_p7), 0   ;;  %vm4455_vm1 = vcmask (!%p4533_p7), 9216  }
  0x3d   : > { %v278_v6 = vld [vmem:[%s7323_s14] sm:$0xff]  ;;  %v279_v7 = vld [vmem:[%s7323_s14 + $0x8] sm:$0xff]  ;;  %v5885_v8 = vpack.c.bf16 %v327_v5, %v326_v3  ;;  %v328_v15 = vld [vmem:[%s7323_s14 + $0x190] sm:$0xff]  ;;  %v5857_v17 = vpack.c.bf16 %v297_v14, %v296_v12  ;;  %v1453_v1 = vshrl.u32 %v1452_v50, 7 }
  0x3e   : > { %v5855_v9 = vpack.c.bf16 %v279_v7, %v278_v6  ;;  %v310_v10 = vld [vmem:[%s7323_s14 + $0x100] sm:$0xff]  ;;  %v311_v11 = vld [vmem:[%s7323_s14 + $0x108] sm:$0xff]  ;;  %5854 = vmatprep.subr.bf16.mxu0 %v5853_v4  ;;  %v329_v16 = vld [vmem:[%s7323_s14 + $0x198] sm:$0xff]  ;;  %v1451_v0 = vunpack.c.0.s8 %v1450_v49 }
  0x3f   : > { %v5887_v13 = vpack.c.bf16 %v311_v11, %v310_v10  ;;  %5886 = vmatprep.subr.bf16.mxu1 %v5885_v8  ;;  %v5889_v18 = vpack.c.bf16 %v329_v16, %v328_v15  ;;  %v280_v19 = vld [vmem:[%s7323_s14 + $0x10] sm:$0xff]  ;;  %v281_v20 = vld [vmem:[%s7323_s14 + $0x18] sm:$0xff]  ;;  %v298_v24 = vld [vmem:[%s7323_s14 + $0xa0] sm:$0xff] }
  0x40   : > { %5856 = vmatpush3.bf16.msra.mxu0 %v5855_v9  ;;  %v312_v21 = vld [vmem:[%s7323_s14 + $0x110] sm:$0xff]  ;;  %v5859_v22 = vpack.c.bf16 %v281_v20, %v280_v19  ;;  %v313_v23 = vld [vmem:[%s7323_s14 + $0x118] sm:$0xff]  ;;  %v299_v25 = vld [vmem:[%s7323_s14 + $0xa8] sm:$0xff]  ;;  %v7386_v14 = vsub.s32 %v1451_v0, %v1453_v1 }
  0x41   : > { %5888 = vmatpush3.bf16.msra.mxu1 %v5887_v13  ;;  %5858 = vmatprep.subr.bf16.mxu0 %v5857_v17  ;;  %v5891_v26 = vpack.c.bf16 %v313_v23, %v312_v21  ;;  %v5861_v27 = vpack.c.bf16 %v299_v25, %v298_v24  ;;  %v330_v28 = vld [vmem:[%s7323_s14 + $0x1a0] sm:$0xff]  ;;  %v331_v29 = vld [vmem:[%s7323_s14 + $0x1a8] sm:$0xff]  ;;  %v300_v36 = vld [vmem:[%s7323_s14 + $0xb0] sm:$0xff] }
  0x42   : > { %5890 = vmatprep.subr.bf16.mxu1 %v5889_v18  ;;  %v282_v30 = vld [vmem:[%s7323_s14 + $0x20] sm:$0xff]  ;;  %v5893_v31 = vpack.c.bf16 %v331_v29, %v330_v28  ;;  %v283_v32 = vld [vmem:[%s7323_s14 + $0x28] sm:$0xff]  ;;  %v301_v37 = vld [vmem:[%s7323_s14 + $0xb8] sm:$0xff] }
  0x43   : > { %v314_v33 = vld [vmem:[%s7323_s14 + $0x120] sm:$0xff]  ;;  %v315_v34 = vld [vmem:[%s7323_s14 + $0x128] sm:$0xff]  ;;  %v5863_v35 = vpack.c.bf16 %v283_v32, %v282_v30  ;;  %v332_v38 = vld [vmem:[%s7323_s14 + $0x1b0] sm:$0xff]  ;;  %v5865_v40 = vpack.c.bf16 %v301_v37, %v300_v36 }
  0x44   : > { %5860 = vmatpush3.bf16.msra.mxu0 %v5859_v22  ;;  %v5895_v39 = vpack.c.bf16 %v315_v34, %v314_v33  ;;  %v333_v41 = vld [vmem:[%s7323_s14 + $0x1b8] sm:$0xff]  ;;  %v284_v42 = vld [vmem:[%s7323_s14 + $0x30] sm:$0xff]  ;;  %v302_v47 = vld [vmem:[%s7323_s14 + $0xc0] sm:$0xff] }
  0x45   : > { %5892 = vmatpush3.bf16.msra.mxu1 %v5891_v26  ;;  %5862 = vmatprep.subr.bf16.mxu0 %v5861_v27  ;;  %v285_v43 = vld [vmem:[%s7323_s14 + $0x38] sm:$0xff]  ;;  %v5897_v44 = vpack.c.bf16 %v333_v41, %v332_v38  ;;  %v316_v45 = vld [vmem:[%s7323_s14 + $0x130] sm:$0xff]  ;;  %v303_v51 = vld [vmem:[%s7323_s14 + $0xc8] sm:$0xff] }
  0x46   : > { %5894 = vmatprep.subr.bf16.mxu1 %v5893_v31  ;;  %v317_v46 = vld [vmem:[%s7323_s14 + $0x138] sm:$0xff]  ;;  %v334_v52 = vld [vmem:[%s7323_s14 + $0x1c0] sm:$0xff]  ;;  %v335_v53 = vld [vmem:[%s7323_s14 + $0x1c8] sm:$0xff]  ;;  %v5867_v54 = vpack.c.bf16 %v285_v43, %v284_v42  ;;  %v5869_v56 = vpack.c.bf16 %v303_v51, %v302_v47 }
  0x47   : > { %v5899_v55 = vpack.c.bf16 %v317_v46, %v316_v45  ;;  %v286_v57 = vld [vmem:[%s7323_s14 + $0x40] sm:$0xff]  ;;  %v287_v58 = vld [vmem:[%s7323_s14 + $0x48] sm:$0xff]  ;;  %v5901_v60 = vpack.c.bf16 %v335_v53, %v334_v52  ;;  %v304_v62 = vld [vmem:[%s7323_s14 + $0xd0] sm:$0xff] }
  0x48   : > { %5864 = vmatpush3.bf16.msra.mxu0 %v5863_v35  ;;  %v318_v59 = vld [vmem:[%s7323_s14 + $0x140] sm:$0xff]  ;;  %v319_v61 = vld [vmem:[%s7323_s14 + $0x148] sm:$0xff]  ;;  %v305_v63 = vld [vmem:[%s7323_s14 + $0xd8] sm:$0xff]  ;;  %v5871_v4 = vpack.c.bf16 %v287_v58, %v286_v57 }
  0x49   : > { %5896 = vmatpush3.bf16.msra.mxu1 %v5895_v39  ;;  %5866 = vmatprep.subr.bf16.mxu0 %v5865_v40  ;;  %v336_v2 = vld [vmem:[%s7323_s14 + $0x1d0] sm:$0xff]  ;;  %v337_v3 = vld [vmem:[%s7323_s14 + $0x1d8] sm:$0xff]  ;;  %v5903_v5 = vpack.c.bf16 %v319_v61, %v318_v59  ;;  %v5873_v6 = vpack.c.bf16 %v305_v63, %v304_v62  ;;  %v306_v12 = vld [vmem:[%s7323_s14 + $0xe0] sm:$0xff] }
  0x4a   : > { %5898 = vmatprep.subr.bf16.mxu1 %v5897_v44  ;;  %v288_v7 = vld [vmem:[%s7323_s14 + $0x50] sm:$0xff]  ;;  %v289_v8 = vld [vmem:[%s7323_s14 + $0x58] sm:$0xff]  ;;  %v5905_v10 = vpack.c.bf16 %v337_v3, %v336_v2  ;;  %v307_v13 = vld [vmem:[%s7323_s14 + $0xe8] sm:$0xff] }
  0x4b   : > { %v320_v9 = vld [vmem:[%s7323_s14 + $0x150] sm:$0xff]  ;;  %v321_v11 = vld [vmem:[%s7323_s14 + $0x158] sm:$0xff]  ;;  %v338_v15 = vld [vmem:[%s7323_s14 + $0x1e0] sm:$0xff]  ;;  %v5875_v17 = vpack.c.bf16 %v289_v8, %v288_v7  ;;  %v5877_v20 = vpack.c.bf16 %v307_v13, %v306_v12 }
  0x4c   : > { %5868 = vmatpush3.bf16.msra.mxu0 %v5867_v54  ;;  %v339_v16 = vld [vmem:[%s7323_s14 + $0x1e8] sm:$0xff]  ;;  %v290_v18 = vld [vmem:[%s7323_s14 + $0x60] sm:$0xff]  ;;  %v5907_v19 = vpack.c.bf16 %v321_v11, %v320_v9  ;;  %v308_v26 = vld [vmem:[%s7323_s14 + $0xf0] sm:$0xff] }
  0x4d   : > { %5900 = vmatpush3.bf16.msra.mxu1 %v5899_v55  ;;  %5870 = vmatprep.subr.bf16.mxu0 %v5869_v56  ;;  %v291_v21 = vld [vmem:[%s7323_s14 + $0x68] sm:$0xff]  ;;  %v322_v22 = vld [vmem:[%s7323_s14 + $0x160] sm:$0xff]  ;;  %v5909_v24 = vpack.c.bf16 %v339_v16, %v338_v15  ;;  %v309_v27 = vld [vmem:[%s7323_s14 + $0xf8] sm:$0xff] }
  0x4e   : > { %5902 = vmatprep.subr.bf16.mxu1 %v5901_v60  ;;  %v260_v23 = vld [vmem:[%s7333_s11] sm:$0xff]  ;;  %v340_v30 = vld [vmem:[%s7323_s14 + $0x1f0] sm:$0xff]  ;;  %v341_v31 = vld [vmem:[%s7323_s14 + $0x1f8] sm:$0xff]  ;;  %v5879_v32 = vpack.c.bf16 %v291_v21, %v290_v18  ;;  %v5881_v36 = vpack.c.bf16 %v309_v27, %v308_v26 }
  0x4f   : > { %v323_v25 = vld [vmem:[%s7323_s14 + $0x168] sm:$0xff]  ;;  %v1455_v28 = vrot.slane %v260_v23, %v7386_v14  ;;  %v1448_v29 = vcombine.high %v260_v23, %v260_v23  ;;  %v292_v37 = vld [vmem:[%s7323_s14 + $0x70] sm:$0xff]  ;;  %v293_v38 = vld [vmem:[%s7323_s14 + $0x78] sm:$0xff]  ;;  %v5913_v40 = vpack.c.bf16 %v341_v31, %v340_v30 }
  0x50   : > { %5872 = vmatpush3.bf16.msra.mxu0 %v5871_v4  ;;  %v5911_v35 = vpack.c.bf16 %v323_v25, %v322_v22  ;;  %v324_v39 = vld [vmem:[%s7323_s14 + $0x170] sm:$0xff]  ;;  %v325_v41 = vld [vmem:[%s7323_s14 + $0x178] sm:$0xff]  ;;  %v358_v43 = vld [vmem:[%s7323_s14 + $0x280] sm:$0xff]  ;;  %v5883_v47 = vpack.c.bf16 %v293_v38, %v292_v37 }
  0x51   : > { %5904 = vmatpush3.bf16.msra.mxu1 %v5903_v5  ;;  %5874 = vmatprep.subr.bf16.mxu0 %v5873_v6  ;;  %v1463_v33 = vcombine.high %v1455_v28, %v1455_v28  ;;  %v1462_v34 = vrot.slane %v1448_v29, %v7386_v14  ;;  %v359_v44 = vld [vmem:[%s7323_s14 + $0x288] sm:$0xff]  ;;  %v390_v45 = vld [vmem:[%s7323_s14 + $0x380] sm:$0xff]  ;;  %v5915_v48 = vpack.c.bf16 %v325_v41, %v324_v39  ;;  %v360_v55 = vld [vmem:[%s7323_s14 + $0x290] sm:$0xff] }
  0x52   : > { %5906 = vmatprep.subr.bf16.mxu1 %v5905_v10  ;;  %v391_v46 = vld [vmem:[%s7323_s14 + $0x388] sm:$0xff]  ;;  %v5917_v49 = vpack.c.bf16 %v359_v44, %v358_v43  ;;  %v342_v50 = vld [vmem:[%s7323_s14 + $0x200] sm:$0xff]  ;;  %v361_v56 = vld [vmem:[%s7323_s14 + $0x298] sm:$0xff] }
  0x53   : > { %1890 = vmatprep.mubr.f32.mxu0 %v1463_v33  ;;  %v1464_v42 = vcombine.high %v1462_v34, %v1462_v34  ;;  %v343_v51 = vld [vmem:[%s7323_s14 + $0x208] sm:$0xff]  ;;  %v374_v52 = vld [vmem:[%s7323_s14 + $0x300] sm:$0xff]  ;;  %v5949_v53 = vpack.c.bf16 %v391_v46, %v390_v45  ;;  %v392_v57 = vld [vmem:[%s7323_s14 + $0x390] sm:$0xff]  ;;  %v5921_v61 = vpack.c.bf16 %v361_v56, %v360_v55 }
  0x54   : > { %5876 = vmatpush3.bf16.msra.mxu0 %v5875_v17  ;;  %v375_v54 = vld [vmem:[%s7323_s14 + $0x308] sm:$0xff]  ;;  %v393_v58 = vld [vmem:[%s7323_s14 + $0x398] sm:$0xff]  ;;  %v5919_v59 = vpack.c.bf16 %v343_v51, %v342_v50  ;;  %v344_v62 = vld [vmem:[%s7323_s14 + $0x210] sm:$0xff] }
  0x55   : > { %5908 = vmatpush3.bf16.msra.mxu1 %v5907_v19  ;;  %5878 = vmatprep.subr.bf16.mxu0 %v5877_v20  ;;  %v5951_v60 = vpack.c.bf16 %v375_v54, %v374_v52  ;;  %v345_v63 = vld [vmem:[%s7323_s14 + $0x218] sm:$0xff]  ;;  %v376_v0 = vld [vmem:[%s7323_s14 + $0x310] sm:$0xff]  ;;  %v5953_v1 = vpack.c.bf16 %v393_v58, %v392_v57  ;;  %v362_v3 = vld [vmem:[%s7323_s14 + $0x2a0] sm:$0xff] }
  0x56   : > { %5910 = vmatprep.subr.bf16.mxu1 %v5909_v24  ;;  %1960 = vmatprep.mubr.f32.mxu1 %v1464_v42  ;;  %v377_v2 = vld [vmem:[%s7323_s14 + $0x318] sm:$0xff]  ;;  %v363_v4 = vld [vmem:[%s7323_s14 + $0x2a8] sm:$0xff]  ;;  %v394_v5 = vld [vmem:[%s7323_s14 + $0x3a0] sm:$0xff]  ;;  %v5923_v7 = vpack.c.bf16 %v345_v63, %v344_v62 }
  0x57   : > { %v395_v6 = vld [vmem:[%s7323_s14 + $0x3a8] sm:$0xff]  ;;  %v5955_v8 = vpack.c.bf16 %v377_v2, %v376_v0  ;;  %v5925_v9 = vpack.c.bf16 %v363_v4, %v362_v3  ;;  %v346_v10 = vld [vmem:[%s7323_s14 + $0x220] sm:$0xff]  ;;  %v364_v16 = vld [vmem:[%s7323_s14 + $0x2b0] sm:$0xff] }
  0x58   : > { %5880 = vmatpush3.bf16.msra.mxu0 %v5879_v32  ;;  %v347_v11 = vld [vmem:[%s7323_s14 + $0x228] sm:$0xff]  ;;  %v378_v12 = vld [vmem:[%s7323_s14 + $0x320] sm:$0xff]  ;;  %v5957_v13 = vpack.c.bf16 %v395_v6, %v394_v5  ;;  %v365_v17 = vld [vmem:[%s7323_s14 + $0x2b8] sm:$0xff] }
  0x59   : > { %5912 = vmatpush3.bf16.msra.mxu1 %v5911_v35  ;;  %5882 = vmatprep.subr.bf16.mxu0 %v5881_v36  ;;  %v379_v15 = vld [vmem:[%s7323_s14 + $0x328] sm:$0xff]  ;;  %v396_v18 = vld [vmem:[%s7323_s14 + $0x3b0] sm:$0xff]  ;;  %v397_v19 = vld [vmem:[%s7323_s14 + $0x3b8] sm:$0xff]  ;;  %v5927_v20 = vpack.c.bf16 %v347_v11, %v346_v10  ;;  %v5929_v22 = vpack.c.bf16 %v365_v17, %v364_v16 }
  0x5a   : > { %5914 = vmatprep.subr.bf16.mxu1 %v5913_v40  ;;  %v5959_v21 = vpack.c.bf16 %v379_v15, %v378_v12  ;;  %v348_v23 = vld [vmem:[%s7323_s14 + $0x230] sm:$0xff]  ;;  %v349_v24 = vld [vmem:[%s7323_s14 + $0x238] sm:$0xff]  ;;  %v5961_v26 = vpack.c.bf16 %v397_v19, %v396_v18  ;;  %v367_v29 = vld [vmem:[%s7323_s14 + $0x2c8] sm:$0xff] }
  0x5b   : > { %v380_v25 = vld [vmem:[%s7323_s14 + $0x330] sm:$0xff]  ;;  %v381_v27 = vld [vmem:[%s7323_s14 + $0x338] sm:$0xff]  ;;  %v398_v30 = vld [vmem:[%s7323_s14 + $0x3c0] sm:$0xff]  ;;  %v5931_v33 = vpack.c.bf16 %v349_v24, %v348_v23 }
  0x5c   : > { %5884 = vmatpush3.bf16.msra.mxu0 %v5883_v47  ;;  %v399_v31 = vld [vmem:[%s7323_s14 + $0x3c8] sm:$0xff]  ;;  %v5963_v36 = vpack.c.bf16 %v381_v27, %v380_v25  ;;  %v350_v38 = vld [vmem:[%s7323_s14 + $0x240] sm:$0xff]  ;;  %v368_v43 = vld [vmem:[%s7323_s14 + $0x2d0] sm:$0xff] }
  0x5d   : > { %5916 = vmatpush3.bf16.msra.mxu1 %v5915_v48  ;;  %5918 = vmatprep.subr.bf16.mxu0 %v5917_v49  ;;  %v261_v32 = vld [vmem:[%s7333_s11 + $0x8] sm:$0xff]  ;;  %v382_v40 = vld [vmem:[%s7323_s14 + $0x340] sm:$0xff]  ;;  %v5965_v41 = vpack.c.bf16 %v399_v31, %v398_v30  ;;  %v369_v44 = vld [vmem:[%s7323_s14 + $0x2d8] sm:$0xff] }
  0x5e   : > { %5950 = vmatprep.subr.bf16.mxu1 %v5949_v53  ;;  %v1465_v35 = vcombine.high %v261_v32, %v261_v32  ;;  %v351_v39 = vld [vmem:[%s7323_s14 + $0x248] sm:$0xff]  ;;  %v400_v47 = vld [vmem:[%s7323_s14 + $0x3d0] sm:$0xff]  ;;  %v401_v48 = vld [vmem:[%s7323_s14 + $0x3d8] sm:$0xff]  ;;  %v5937_v52 = vpack.c.bf16 %v369_v44, %v368_v43 }
  0x5f   : > { %1891 = vmatmul.mubr.f32.vlgmr.msra.gmra.mrb[0].mxu0 %v1455_v28  ;;  %v366_v28 = vld [vmem:[%s7323_s14 + $0x2c0] sm:$0xff]  ;;  %v383_v42 = vld [vmem:[%s7323_s14 + $0x348] sm:$0xff]  ;;  %v5935_v49 = vpack.c.bf16 %v351_v39, %v350_v38  ;;  %v352_v53 = vld [vmem:[%s7323_s14 + $0x250] sm:$0xff]  ;;  %v5969_v56 = vpack.c.bf16 %v401_v48, %v400_v47 }
  0x60   : > { %1961 = vmatmul.mubr.f32.vlgmr.msra.gmra.mrb[0].mxu1 %v1462_v34  ;;  %5920 = vmatpush3.bf16.msra.mxu0 %v5919_v59  ;;  %v7443_v34 = vrot.slane %v261_v32, %v7386_v14  ;;  %v5933_v37 = vpack.c.bf16 %v367_v29, %v366_v28  ;;  %v7454_v46 = vrot.slane %v1465_v35, %v7386_v14  ;;  %v353_v54 = vld [vmem:[%s7323_s14 + $0x258] sm:$0xff]  ;;  %v384_v55 = vld [vmem:[%s7323_s14 + $0x350] sm:$0xff]  ;;  %v370_v58 = vld [vmem:[%s7323_s14 + $0x2e0] sm:$0xff] }
  0x61   : > { %5952 = vmatpush3.bf16.msra.mxu1 %v5951_v60  ;;  %5922 = vmatprep.subr.bf16.mxu0 %v5921_v61  ;;  %v5967_v51 = vpack.c.bf16 %v383_v42, %v382_v40  ;;  %v385_v57 = vld [vmem:[%s7323_s14 + $0x358] sm:$0xff]  ;;  %v371_v59 = vld [vmem:[%s7323_s14 + $0x2e8] sm:$0xff]  ;;  %v402_v60 = vld [vmem:[%s7323_s14 + $0x3e0] sm:$0xff]  ;;  %v5939_v62 = vpack.c.bf16 %v353_v54, %v352_v53 }
  0x62   : > { %5954 = vmatprep.subr.bf16.mxu1 %v5953_v1  ;;  %v1480_v45 = vcombine.high %v7443_v34, %v7443_v34  ;;  %v1481_v50 = vcombine.high %v7454_v46, %v7454_v46  ;;  %v403_v61 = vld [vmem:[%s7323_s14 + $0x3e8] sm:$0xff]  ;;  %v5971_v63 = vpack.c.bf16 %v385_v57, %v384_v55  ;;  %v5941_v0 = vpack.c.bf16 %v371_v59, %v370_v58  ;;  %v354_v1 = vld [vmem:[%s7323_s14 + $0x260] sm:$0xff]  ;;  %v372_v6 = vld [vmem:[%s7323_s14 + $0x2f0] sm:$0xff] }
  0x63   : > { %v355_v2 = vld [vmem:[%s7323_s14 + $0x268] sm:$0xff]  ;;  %v386_v3 = vld [vmem:[%s7323_s14 + $0x360] sm:$0xff]  ;;  %v5973_v4 = vpack.c.bf16 %v403_v61, %v402_v60  ;;  %v357_v15 = vld [vmem:[%s7323_s14 + $0x278] sm:$0xff] }
  0x64   : > { %5924 = vmatpush3.bf16.msra.mxu0 %v5923_v7  ;;  %2030 = vmatprep.mubr.f32.mxu0 %v1480_v45  ;;  %v387_v5 = vld [vmem:[%s7323_s14 + $0x368] sm:$0xff]  ;;  %v373_v7 = vld [vmem:[%s7323_s14 + $0x2f8] sm:$0xff]  ;;  %v5943_v10 = vpack.c.bf16 %v355_v2, %v354_v1  ;;  %v388_v16 = vld [vmem:[%s7323_s14 + $0x370] sm:$0xff] }
  0x65   : > { %5956 = vmatpush3.bf16.msra.mxu1 %v5955_v8  ;;  %5926 = vmatprep.subr.bf16.mxu0 %v5925_v9  ;;  %v404_v8 = vld [vmem:[%s7323_s14 + $0x3f0] sm:$0xff]  ;;  %v405_v9 = vld [vmem:[%s7323_s14 + $0x3f8] sm:$0xff]  ;;  %v5975_v11 = vpack.c.bf16 %v387_v5, %v386_v3  ;;  %v5945_v12 = vpack.c.bf16 %v373_v7, %v372_v6  ;;  %v422_v19 = vld [vmem:[%s7323_s14 + $0x480] sm:$0xff] }
  0x66   : > { %5958 = vmatprep.subr.bf16.mxu1 %v5957_v13  ;;  %2100 = vmatprep.mubr.f32.mxu1 %v1481_v50  ;;  %v356_v13 = vld [vmem:[%s7323_s14 + $0x270] sm:$0xff]  ;;  %v5977_v17 = vpack.c.bf16 %v405_v9, %v404_v8  ;;  %v389_v18 = vld [vmem:[%s7323_s14 + $0x378] sm:$0xff]  ;;  %v406_v24 = vld [vmem:[%s7323_s14 + $0x400] sm:$0xff] }
  0x67   : > { %v5947_v23 = vpack.c.bf16 %v357_v15, %v356_v13  ;;  %v5979_v25 = vpack.c.bf16 %v389_v18, %v388_v16  ;;  %v407_v27 = vld [vmem:[%s7323_s14 + $0x408] sm:$0xff]  ;;  %v438_v28 = vld [vmem:[%s7323_s14 + $0x500] sm:$0xff]  ;;  %v424_v31 = vld [vmem:[%s7323_s14 + $0x490] sm:$0xff] }
  0x68   : > { %5928 = vmatpush3.bf16.msra.mxu0 %v5927_v20  ;;  %v423_v20 = vld [vmem:[%s7323_s14 + $0x488] sm:$0xff]  ;;  %v425_v32 = vld [vmem:[%s7323_s14 + $0x498] sm:$0xff]  ;;  %v408_v40 = vld [vmem:[%s7323_s14 + $0x410] sm:$0xff] }
  0x69   : > { %5960 = vmatpush3.bf16.msra.mxu1 %v5959_v21  ;;  %5930 = vmatprep.subr.bf16.mxu0 %v5929_v22  ;;  %v454_v21 = vld [vmem:[%s7323_s14 + $0x580] sm:$0xff]  ;;  %v455_v22 = vld [vmem:[%s7323_s14 + $0x588] sm:$0xff]  ;;  %v457_v35 = vld [vmem:[%s7323_s14 + $0x598] sm:$0xff]  ;;  %v5985_v39 = vpack.c.bf16 %v425_v32, %v424_v31 }
  0x6a   : > { %5962 = vmatprep.subr.bf16.mxu1 %v5961_v26  ;;  %v5981_v26 = vpack.c.bf16 %v423_v20, %v422_v19  ;;  %v439_v29 = vld [vmem:[%s7323_s14 + $0x508] sm:$0xff]  ;;  %v6013_v30 = vpack.c.bf16 %v455_v22, %v454_v21  ;;  %v262_v38 = vld [vmem:[%s7333_s11 + $0x10] sm:$0xff]  ;;  %v426_v48 = vld [vmem:[%s7323_s14 + $0x4a0] sm:$0xff] }
  0x6b   : > { %v440_v42 = vld [vmem:[%s7323_s14 + $0x510] sm:$0xff]  ;;  %v7497_v43 = vrot.slane %v262_v38, %v7386_v14  ;;  %v1482_v44 = vcombine.high %v262_v38, %v262_v38  ;;  %v441_v47 = vld [vmem:[%s7323_s14 + $0x518] sm:$0xff]  ;;  %v458_v50 = vld [vmem:[%s7323_s14 + $0x5a0] sm:$0xff] }
  0x6c   : > { %5932 = vmatpush3.bf16.msra.mxu0 %v5931_v33  ;;  %v456_v33 = vld [vmem:[%s7323_s14 + $0x590] sm:$0xff]  ;;  %v411_v57 = vld [vmem:[%s7323_s14 + $0x428] sm:$0xff]  ;;  %v442_v58 = vld [vmem:[%s7323_s14 + $0x520] sm:$0xff] }
  0x6d   : > { %5964 = vmatpush3.bf16.msra.mxu1 %v5963_v36  ;;  %5934 = vmatprep.subr.bf16.mxu0 %v5933_v37  ;;  %v5983_v36 = vpack.c.bf16 %v407_v27, %v406_v24  ;;  %v6015_v37 = vpack.c.bf16 %v439_v29, %v438_v28  ;;  %v6017_v45 = vpack.c.bf16 %v457_v35, %v456_v33  ;;  %v443_v61 = vld [vmem:[%s7323_s14 + $0x528] sm:$0xff]  ;;  %v413_v5 = vld [vmem:[%s7323_s14 + $0x438] sm:$0xff]  ;;  %v444_v6 = vld [vmem:[%s7323_s14 + $0x530] sm:$0xff] }
  0x6e   : > { %5966 = vmatprep.subr.bf16.mxu1 %v5965_v41  ;;  %v409_v41 = vld [vmem:[%s7323_s14 + $0x418] sm:$0xff]  ;;  %v7508_v53 = vrot.slane %v1482_v44, %v7386_v14  ;;  %v6023_v2 = vpack.c.bf16 %v443_v61, %v442_v58  ;;  %v430_v9 = vld [vmem:[%s7323_s14 + $0x4c0] sm:$0xff]  ;;  %v415_v18 = vld [vmem:[%s7323_s14 + $0x448] sm:$0xff] }
  0x6f   : > { %v5987_v54 = vpack.c.bf16 %v409_v41, %v408_v40  ;;  %v445_v8 = vld [vmem:[%s7323_s14 + $0x538] sm:$0xff]  ;;  %v446_v19 = vld [vmem:[%s7323_s14 + $0x540] sm:$0xff]  ;;  %v447_v21 = vld [vmem:[%s7323_s14 + $0x548] sm:$0xff] }
  0x70   : > { %5936 = vmatpush3.bf16.msra.mxu0 %v5935_v49  ;;  %v427_v49 = vld [vmem:[%s7323_s14 + $0x4a8] sm:$0xff]  ;;  %v1498_v59 = vcombine.high %v7508_v53, %v7508_v53  ;;  %v6027_v15 = vpack.c.bf16 %v445_v8, %v444_v6  ;;  %v432_v22 = vld [vmem:[%s7323_s14 + $0x4d0] sm:$0xff]  ;;  %v6031_v27 = vpack.c.bf16 %v447_v21, %v446_v19  ;;  %v449_v33 = vld [vmem:[%s7323_s14 + $0x558] sm:$0xff] }
  0x71   : > { %5968 = vmatpush3.bf16.msra.mxu1 %v5967_v51  ;;  %5938 = vmatprep.subr.bf16.mxu0 %v5937_v52  ;;  %v459_v51 = vld [vmem:[%s7323_s14 + $0x5a8] sm:$0xff]  ;;  %v1497_v52 = vcombine.high %v7497_v43, %v7497_v43  ;;  %v5989_v55 = vpack.c.bf16 %v427_v49, %v426_v48  ;;  %v464_v24 = vld [vmem:[%s7323_s14 + $0x5d0] sm:$0xff]  ;;  %v434_v35 = vld [vmem:[%s7323_s14 + $0x4e0] sm:$0xff] }
  0x72   : > { %5970 = vmatprep.subr.bf16.mxu1 %v5969_v56  ;;  %v410_v56 = vld [vmem:[%s7323_s14 + $0x420] sm:$0xff]  ;;  %v6021_v60 = vpack.c.bf16 %v459_v51, %v458_v50  ;;  %v416_v29 = vld [vmem:[%s7323_s14 + $0x450] sm:$0xff]  ;;  %v467_v38 = vld [vmem:[%s7323_s14 + $0x5e8] sm:$0xff] }
  0x73   : > { %v5991_v1 = vpack.c.bf16 %v411_v57, %v410_v56  ;;  %v448_v31 = vld [vmem:[%s7323_s14 + $0x550] sm:$0xff]  ;;  %v419_v44 = vld [vmem:[%s7323_s14 + $0x468] sm:$0xff]  ;;  %v437_v50 = vld [vmem:[%s7323_s14 + $0x4f8] sm:$0xff] }
  0x74   : > { %5940 = vmatpush3.bf16.msra.mxu0 %v5939_v62  ;;  %v429_v62 = vld [vmem:[%s7323_s14 + $0x4b8] sm:$0xff]  ;;  %v6035_v40 = vpack.c.bf16 %v449_v33, %v448_v31  ;;  %v451_v48 = vld [vmem:[%s7323_s14 + $0x568] sm:$0xff]  ;;  %v436_v49 = vld [vmem:[%s7323_s14 + $0x4f0] sm:$0xff] }
  0x75   : > { %5972 = vmatpush3.bf16.msra.mxu1 %v5971_v63  ;;  %5942 = vmatprep.subr.bf16.mxu0 %v5941_v0  ;;  %v460_v63 = vld [vmem:[%s7323_s14 + $0x5b0] sm:$0xff]  ;;  %v461_v0 = vld [vmem:[%s7323_s14 + $0x5b8] sm:$0xff]  ;;  %v6009_v56 = vpack.c.bf16 %v437_v50, %v436_v49  ;;  %v471_v6 = vld [vmem:[%s7323_s14 + $0x608] sm:$0xff] }
  0x76   : > { %5974 = vmatprep.subr.bf16.mxu1 %v5973_v4  ;;  %v412_v4 = vld [vmem:[%s7323_s14 + $0x430] sm:$0xff]  ;;  %v6025_v7 = vpack.c.bf16 %v461_v0, %v460_v63  ;;  %v421_v58 = vld [vmem:[%s7323_s14 + $0x478] sm:$0xff]  ;;  %v518_v63 = vld [vmem:[%s7323_s14 + $0x780] sm:$0xff] }
  0x77   : > { %v5995_v13 = vpack.c.bf16 %v413_v5, %v412_v4  ;;  %v468_v51 = vld [vmem:[%s7323_s14 + $0x5f0] sm:$0xff]  ;;  %v453_v61 = vld [vmem:[%s7323_s14 + $0x578] sm:$0xff]  ;;  %v519_v0 = vld [vmem:[%s7323_s14 + $0x788] sm:$0xff] }
  0x78   : > { %5944 = vmatpush3.bf16.msra.mxu0 %v5943_v10  ;;  %v431_v10 = vld [vmem:[%s7323_s14 + $0x4c8] sm:$0xff]  ;;  %v420_v57 = vld [vmem:[%s7323_s14 + $0x470] sm:$0xff]  ;;  %v470_v5 = vld [vmem:[%s7323_s14 + $0x600] sm:$0xff]  ;;  %v6077_v8 = vpack.c.bf16 %v519_v0, %v518_v63 }
  0x79   : > { %5976 = vmatpush3.bf16.msra.mxu1 %v5975_v11  ;;  %5946 = vmatprep.subr.bf16.mxu0 %v5945_v12  ;;  %v462_v11 = vld [vmem:[%s7323_s14 + $0x5c0] sm:$0xff]  ;;  %v463_v12 = vld [vmem:[%s7323_s14 + $0x5c8] sm:$0xff]  ;;  %v5997_v16 = vpack.c.bf16 %v431_v10, %v430_v9  ;;  %v488_v10 = vld [vmem:[%s7323_s14 + $0x690] sm:$0xff] }
  0x7a   : > { %5978 = vmatprep.subr.bf16.mxu1 %v5977_v17  ;;  %v414_v17 = vld [vmem:[%s7323_s14 + $0x440] sm:$0xff]  ;;  %v6029_v20 = vpack.c.bf16 %v463_v12, %v462_v11  ;;  %v503_v9 = vld [vmem:[%s7323_s14 + $0x708] sm:$0xff]  ;;  %v489_v11 = vld [vmem:[%s7323_s14 + $0x698] sm:$0xff] }
  0x7b   : > { %v6049_v19 = vpack.c.bf16 %v489_v11, %v488_v10  ;;  %v473_v21 = vld [vmem:[%s7323_s14 + $0x618] sm:$0xff]  ;;  %v508_v49 = vld [vmem:[%s7323_s14 + $0x730] sm:$0xff]  ;;  %v498_v11 = vld [vmem:[%s7323_s14 + $0x6e0] sm:$0xff] }
  0x7c   : > { %5948 = vmatpush3.bf16.msra.mxu0 %v5947_v23  ;;  %v433_v23 = vld [vmem:[%s7323_s14 + $0x4d8] sm:$0xff]  ;;  %v496_v63 = vld [vmem:[%s7323_s14 + $0x6d0] sm:$0xff] }
  0x7d   : > { %5980 = vmatpush3.bf16.msra.mxu1 %v5979_v25  ;;  %5982 = vmatprep.subr.bf16.mxu0 %v5981_v26  ;;  %v465_v25 = vld [vmem:[%s7323_s14 + $0x5d8] sm:$0xff]  ;;  %v5999_v26 = vpack.c.bf16 %v415_v18, %v414_v17  ;;  %v6001_v28 = vpack.c.bf16 %v433_v23, %v432_v22  ;;  %v6047_v17 = vpack.c.bf16 %v471_v6, %v470_v5  ;;  %v504_v22 = vld [vmem:[%s7323_s14 + $0x710] sm:$0xff] }
  0x7e   : > { %6014 = vmatprep.subr.bf16.mxu1 %v6013_v30  ;;  %v417_v30 = vld [vmem:[%s7323_s14 + $0x458] sm:$0xff]  ;;  %v6033_v32 = vpack.c.bf16 %v465_v25, %v464_v24  ;;  %v490_v25 = vld [vmem:[%s7323_s14 + $0x6a0] sm:$0xff]  ;;  %v480_v6 = vld [vmem:[%s7323_s14 + $0x650] sm:$0xff] }
  0x7f   : > { %2031 = vmatmul.mubr.f32.vlgmr.msra.gmra.mrb[2].mxu0 %v7443_v34  ;;  %v6019_v34 = vpack.c.bf16 %v441_v47, %v440_v42  ;;  %v418_v42 = vld [vmem:[%s7323_s14 + $0x460] sm:$0xff]  ;;  %v505_v24 = vld [vmem:[%s7323_s14 + $0x718] sm:$0xff] }
  0x80   : > { %5984 = vmatpush3.bf16.msra.mxu0 %v5983_v36  ;;  %2101 = vmatmul.mubr.f32.vlgmr.msra.gmra.mrb[2].mxu1 %v7454_v46  ;;  %v428_v46 = vld [vmem:[%s7323_s14 + $0x4b0] sm:$0xff]  ;;  %v435_v36 = vld [vmem:[%s7323_s14 + $0x4e8] sm:$0xff]  ;;  %v497_v0 = vld [vmem:[%s7323_s14 + $0x6d8] sm:$0xff] }
  0x81   : > { %6016 = vmatpush3.bf16.msra.mxu1 %v6015_v37  ;;  %5986 = vmatprep.subr.bf16.mxu0 %v5985_v39  ;;  %v5993_v3 = vpack.c.bf16 %v429_v62, %v428_v46  ;;  %v466_v37 = vld [vmem:[%s7323_s14 + $0x5e0] sm:$0xff]  ;;  %v6003_v39 = vpack.c.bf16 %v417_v30, %v416_v29  ;;  %v6005_v41 = vpack.c.bf16 %v435_v36, %v434_v35  ;;  %v487_v62 = vld [vmem:[%s7323_s14 + $0x688] sm:$0xff]  ;;  %v513_v10 = vld [vmem:[%s7323_s14 + $0x758] sm:$0xff] }
  0x82   : > { %6018 = vmatprep.subr.bf16.mxu1 %v6017_v45  ;;  %2170 = vmatprep.mubr.f32.mxu0 %v1497_v52  ;;  %v450_v45 = vld [vmem:[%s7323_s14 + $0x560] sm:$0xff]  ;;  %v6037_v47 = vpack.c.bf16 %v467_v38, %v466_v37  ;;  %v469_v52 = vld [vmem:[%s7323_s14 + $0x5f8] sm:$0xff]  ;;  %v523_v29 = vld [vmem:[%s7323_s14 + $0x7a8] sm:$0xff]  ;;  %v6065_v5 = vpack.c.bf16 %v497_v0, %v496_v63 }
  0x83   : > { %2240 = vmatprep.mubr.f32.mxu1 %v1498_v59  ;;  %v452_v59 = vld [vmem:[%s7323_s14 + $0x570] sm:$0xff]  ;;  %v486_v46 = vld [vmem:[%s7323_s14 + $0x680] sm:$0xff]  ;;  %v507_v38 = vld [vmem:[%s7323_s14 + $0x728] sm:$0xff] }
  0x84   : > { %5988 = vmatpush3.bf16.msra.mxu0 %v5987_v54  ;;  %v6007_v54 = vpack.c.bf16 %v419_v44, %v418_v42  ;;  %v6045_v4 = vpack.c.bf16 %v487_v62, %v486_v46  ;;  %v474_v35 = vld [vmem:[%s7323_s14 + $0x620] sm:$0xff]  ;;  %v511_v62 = vld [vmem:[%s7323_s14 + $0x748] sm:$0xff]  ;;  %v568_v63 = vld [vmem:[%s7323_s14 + $0x910] sm:$0xff] }
  0x85   : > { %6020 = vmatpush3.bf16.msra.mxu1 %v6019_v34  ;;  %5990 = vmatprep.subr.bf16.mxu0 %v5989_v55  ;;  %v263_v34 = vld [vmem:[%s7333_s11 + $0x18] sm:$0xff]  ;;  %v6039_v55 = vpack.c.bf16 %v451_v48, %v450_v45 }
  0x86   : > { %6022 = vmatprep.subr.bf16.mxu1 %v6021_v60  ;;  %v6041_v60 = vpack.c.bf16 %v469_v52, %v468_v51  ;;  %v7569_v12 = vrot.slane %v263_v34, %v7386_v14  ;;  %v506_v36 = vld [vmem:[%s7323_s14 + $0x720] sm:$0xff]  ;;  %v477_v48 = vld [vmem:[%s7323_s14 + $0x638] sm:$0xff] }
  0x87   : > { %v6087_v44 = vpack.c.bf16 %v507_v38, %v506_v36  ;;  %v509_v51 = vld [vmem:[%s7323_s14 + $0x738] sm:$0xff]  ;;  %v494_v52 = vld [vmem:[%s7323_s14 + $0x6c0] sm:$0xff]  ;;  %v516_v36 = vld [vmem:[%s7323_s14 + $0x770] sm:$0xff] }
  0x88   : > { %5992 = vmatpush3.bf16.msra.mxu0 %v5991_v1  ;;  %v1499_v1 = vcombine.high %v263_v34, %v263_v34  ;;  %v526_v34 = vld [vmem:[%s7323_s14 + $0x7c0] sm:$0xff]  ;;  %v517_v38 = vld [vmem:[%s7323_s14 + $0x778] sm:$0xff] }
  0x89   : > { %6024 = vmatpush3.bf16.msra.mxu1 %v6023_v2  ;;  %5994 = vmatprep.subr.bf16.mxu0 %v5993_v3  ;;  %v6011_v2 = vpack.c.bf16 %v421_v58, %v420_v57  ;;  %v6043_v3 = vpack.c.bf16 %v453_v61, %v452_v59  ;;  %v6091_v57 = vpack.c.bf16 %v509_v51, %v508_v49  ;;  %v478_v59 = vld [vmem:[%s7323_s14 + $0x640] sm:$0xff]  ;;  %v535_v49 = vld [vmem:[%s7323_s14 + $0x808] sm:$0xff] }
  0x8a   : > { %6026 = vmatprep.subr.bf16.mxu1 %v6025_v7  ;;  %v502_v7 = vld [vmem:[%s7323_s14 + $0x700] sm:$0xff] }
  0x8b   : > { %v6079_v18 = vpack.c.bf16 %v503_v9, %v502_v7  ;;  %v510_v61 = vld [vmem:[%s7323_s14 + $0x740] sm:$0xff]  ;;  %v481_v7 = vld [vmem:[%s7323_s14 + $0x658] sm:$0xff] }
  0x8c   : > { %5996 = vmatpush3.bf16.msra.mxu0 %v5995_v13  ;;  %v520_v13 = vld [vmem:[%s7323_s14 + $0x790] sm:$0xff] }
  0x8d   : > { %6028 = vmatpush3.bf16.msra.mxu1 %v6027_v15  ;;  %5998 = vmatprep.subr.bf16.mxu0 %v5997_v16  ;;  %v521_v15 = vld [vmem:[%s7323_s14 + $0x798] sm:$0xff]  ;;  %v7574_v16 = vrot.slane %v1499_v1, %v7386_v14  ;;  %v528_v1 = vld [vmem:[%s7323_s14 + $0x7d0] sm:$0xff] }
  0x8e   : > { %6030 = vmatprep.subr.bf16.mxu1 %v6029_v20  ;;  %v472_v20 = vld [vmem:[%s7323_s14 + $0x610] sm:$0xff]  ;;  %v6081_v23 = vpack.c.bf16 %v521_v15, %v520_v13  ;;  %v499_v13 = vld [vmem:[%s7323_s14 + $0x6e8] sm:$0xff]  ;;  %v530_v15 = vld [vmem:[%s7323_s14 + $0x7e0] sm:$0xff] }
  0x8f   : > { %v1515_v30 = vcombine.high %v7574_v16, %v7574_v16  ;;  %v6051_v31 = vpack.c.bf16 %v473_v21, %v472_v20  ;;  %v6069_v20 = vpack.c.bf16 %v499_v13, %v498_v11  ;;  %v482_v21 = vld [vmem:[%s7323_s14 + $0x660] sm:$0xff] }
  0x90   : > { %6000 = vmatpush3.bf16.msra.mxu0 %v5999_v26  ;;  %v491_v26 = vld [vmem:[%s7323_s14 + $0x6a8] sm:$0xff]  ;;  %v538_v11 = vld [vmem:[%s7323_s14 + $0x820] sm:$0xff] }
  0x91   : > { %6032 = vmatpush3.bf16.msra.mxu1 %v6031_v27  ;;  %6002 = vmatprep.subr.bf16.mxu0 %v6001_v28  ;;  %v1514_v27 = vcombine.high %v7569_v12, %v7569_v12  ;;  %v522_v28 = vld [vmem:[%s7323_s14 + $0x7a0] sm:$0xff]  ;;  %v6053_v33 = vpack.c.bf16 %v491_v26, %v490_v25  ;;  %v515_v25 = vld [vmem:[%s7323_s14 + $0x768] sm:$0xff]  ;;  %v500_v26 = vld [vmem:[%s7323_s14 + $0x6f0] sm:$0xff] }
  0x92   : > { %6034 = vmatprep.subr.bf16.mxu1 %v6033_v32  ;;  %v6083_v32 = vpack.c.bf16 %v505_v24, %v504_v22  ;;  %v6085_v37 = vpack.c.bf16 %v523_v29, %v522_v28  ;;  %v483_v22 = vld [vmem:[%s7323_s14 + $0x668] sm:$0xff]  ;;  %v532_v28 = vld [vmem:[%s7323_s14 + $0x7f0] sm:$0xff]  ;;  %v533_v29 = vld [vmem:[%s7323_s14 + $0x7f8] sm:$0xff] }
  0x93   : > { %v570_v13 = vld [vmem:[%s7323_s14 + $0x920] sm:$0xff] }
  0x94   : > { %6004 = vmatpush3.bf16.msra.mxu0 %v6003_v39  ;;  %v492_v39 = vld [vmem:[%s7323_s14 + $0x6b0] sm:$0xff] }
  0x95   : > { %6036 = vmatpush3.bf16.msra.mxu1 %v6035_v40  ;;  %6006 = vmatprep.subr.bf16.mxu0 %v6005_v41  ;;  %v493_v40 = vld [vmem:[%s7323_s14 + $0x6b8] sm:$0xff] }
  0x96   : > { %6038 = vmatprep.subr.bf16.mxu1 %v6037_v47  ;;  %v525_v41 = vld [vmem:[%s7323_s14 + $0x7b8] sm:$0xff]  ;;  %v6057_v45 = vpack.c.bf16 %v493_v40, %v492_v39  ;;  %v476_v47 = vld [vmem:[%s7323_s14 + $0x630] sm:$0xff]  ;;  %v550_v39 = vld [vmem:[%s7323_s14 + $0x880] sm:$0xff] }
  0x97   : > { %v551_v40 = vld [vmem:[%s7323_s14 + $0x888] sm:$0xff] }
  0x98   : > { %6008 = vmatpush3.bf16.msra.mxu0 %v6007_v54  ;;  %v495_v54 = vld [vmem:[%s7323_s14 + $0x6c8] sm:$0xff] }
  0x99   : > { %6040 = vmatpush3.bf16.msra.mxu1 %v6039_v55  ;;  %6010 = vmatprep.subr.bf16.mxu0 %v6009_v56  ;;  %v527_v55 = vld [vmem:[%s7323_s14 + $0x7c8] sm:$0xff]  ;;  %v6059_v56 = vpack.c.bf16 %v477_v48, %v476_v47  ;;  %v6061_v58 = vpack.c.bf16 %v495_v54, %v494_v52  ;;  %v6109_v47 = vpack.c.bf16 %v551_v40, %v550_v39  ;;  %v534_v48 = vld [vmem:[%s7323_s14 + $0x800] sm:$0xff]  ;;  %v552_v54 = vld [vmem:[%s7323_s14 + $0x890] sm:$0xff] }
  0x9a   : > { %6042 = vmatprep.subr.bf16.mxu1 %v6041_v60  ;;  %v479_v60 = vld [vmem:[%s7323_s14 + $0x648] sm:$0xff]  ;;  %v6093_v46 = vpack.c.bf16 %v527_v55, %v526_v34  ;;  %v553_v34 = vld [vmem:[%s7323_s14 + $0x898] sm:$0xff] }
  0x9b   : > { %v567_v52 = vld [vmem:[%s7323_s14 + $0x908] sm:$0xff] }
  0x9c   : > { %6012 = vmatpush3.bf16.msra.mxu0 %v6011_v2  ;;  %v529_v2 = vld [vmem:[%s7323_s14 + $0x7d8] sm:$0xff]  ;;  %v575_v40 = vld [vmem:[%s7323_s14 + $0x948] sm:$0xff] }
  0x9d   : > { %6044 = vmatpush3.bf16.msra.mxu1 %v6043_v3  ;;  %6046 = vmatprep.subr.bf16.mxu0 %v6045_v4  ;;  %v6063_v3 = vpack.c.bf16 %v479_v60, %v478_v59  ;;  %v6095_v4 = vpack.c.bf16 %v511_v62, %v510_v61  ;;  %v6097_v9 = vpack.c.bf16 %v529_v2, %v528_v1  ;;  %v537_v62 = vld [vmem:[%s7323_s14 + $0x818] sm:$0xff]  ;;  %v554_v2 = vld [vmem:[%s7323_s14 + $0x8a0] sm:$0xff] }
  0x9e   : > { %6078 = vmatprep.subr.bf16.mxu1 %v6077_v8  ;;  %v512_v8 = vld [vmem:[%s7323_s14 + $0x750] sm:$0xff]  ;;  %v6111_v59 = vpack.c.bf16 %v535_v49, %v534_v48  ;;  %v6113_v61 = vpack.c.bf16 %v553_v34, %v552_v54  ;;  %v569_v1 = vld [vmem:[%s7323_s14 + $0x918] sm:$0xff]  ;;  %v562_v34 = vld [vmem:[%s7323_s14 + $0x8e0] sm:$0xff] }
  0x9f   : > { %2171 = vmatmul.mubr.f32.vlgmr.msra.gmra.mrb[4].mxu0 %v7497_v43  ;;  %v475_v43 = vld [vmem:[%s7323_s14 + $0x628] sm:$0xff]  ;;  %v544_v49 = vld [vmem:[%s7323_s14 + $0x850] sm:$0xff]  ;;  %v577_v54 = vld [vmem:[%s7323_s14 + $0x958] sm:$0xff] }
  0xa0   : > { %6048 = vmatpush3.bf16.msra.mxu0 %v6047_v17  ;;  %2241 = vmatmul.mubr.f32.vlgmr.msra.gmra.mrb[4].mxu1 %v7508_v53  ;;  %v524_v53 = vld [vmem:[%s7323_s14 + $0x7b0] sm:$0xff]  ;;  %v6055_v42 = vpack.c.bf16 %v475_v43, %v474_v35  ;;  %v531_v17 = vld [vmem:[%s7323_s14 + $0x7e8] sm:$0xff]  ;;  %v485_v43 = vld [vmem:[%s7323_s14 + $0x678] sm:$0xff] }
  0xa1   : > { %6080 = vmatpush3.bf16.msra.mxu1 %v6079_v18  ;;  %6050 = vmatprep.subr.bf16.mxu0 %v6049_v19  ;;  %v6089_v50 = vpack.c.bf16 %v525_v41, %v524_v53  ;;  %v6067_v18 = vpack.c.bf16 %v481_v7, %v480_v6  ;;  %v6099_v19 = vpack.c.bf16 %v513_v10, %v512_v8  ;;  %v484_v35 = vld [vmem:[%s7323_s14 + $0x670] sm:$0xff]  ;;  %v582_v53 = vld [vmem:[%s7323_s14 + $0x980] sm:$0xff]  ;;  %v583_v41 = vld [vmem:[%s7323_s14 + $0x988] sm:$0xff] }
  0xa2   : > { %6082 = vmatprep.subr.bf16.mxu1 %v6081_v23  ;;  %2310 = vmatprep.mubr.f32.mxu0 %v1514_v27  ;;  %v514_v23 = vld [vmem:[%s7323_s14 + $0x760] sm:$0xff]  ;;  %v6101_v24 = vpack.c.bf16 %v531_v17, %v530_v15  ;;  %v501_v27 = vld [vmem:[%s7323_s14 + $0x6f8] sm:$0xff]  ;;  %v6141_v51 = vpack.c.bf16 %v583_v41, %v582_v53  ;;  %v587_v6 = vld [vmem:[%s7323_s14 + $0x9a8] sm:$0xff] }
  0xa3   : > { %2380 = vmatprep.mubr.f32.mxu1 %v1515_v30  ;;  %v6071_v30 = vpack.c.bf16 %v483_v22, %v482_v21  ;;  %v571_v17 = vld [vmem:[%s7323_s14 + $0x928] sm:$0xff]  ;;  %v560_v53 = vld [vmem:[%s7323_s14 + $0x8d0] sm:$0xff]  ;;  %v561_v41 = vld [vmem:[%s7323_s14 + $0x8d8] sm:$0xff] }
  0xa4   : > { %6052 = vmatpush3.bf16.msra.mxu0 %v6051_v31  ;;  %v264_v31 = vld [vmem:[%s7333_s11 + $0x20] sm:$0xff]  ;;  %v6151_v22 = vpack.c.bf16 %v571_v17, %v570_v13  ;;  %v6129_v48 = vpack.c.bf16 %v561_v41, %v560_v53  ;;  %v580_v13 = vld [vmem:[%s7323_s14 + $0x970] sm:$0xff]  ;;  %v581_v17 = vld [vmem:[%s7323_s14 + $0x978] sm:$0xff] }
  0xa5   : > { %6084 = vmatpush3.bf16.msra.mxu1 %v6083_v32  ;;  %6054 = vmatprep.subr.bf16.mxu0 %v6053_v33  ;;  %v6103_v32 = vpack.c.bf16 %v515_v25, %v514_v23  ;;  %v6073_v33 = vpack.c.bf16 %v501_v27, %v500_v26  ;;  %v7646_v55 = vrot.slane %v264_v31, %v7386_v14  ;;  %v541_v25 = vld [vmem:[%s7323_s14 + $0x838] sm:$0xff]  ;;  %v572_v26 = vld [vmem:[%s7323_s14 + $0x930] sm:$0xff] }
  0xa6   : > { %6086 = vmatprep.subr.bf16.mxu1 %v6085_v37  ;;  %v6105_v37 = vpack.c.bf16 %v533_v29, %v532_v28  ;;  %v573_v28 = vld [vmem:[%s7323_s14 + $0x938] sm:$0xff]  ;;  %v558_v29 = vld [vmem:[%s7323_s14 + $0x8c0] sm:$0xff]  ;;  %v632_v53 = vld [vmem:[%s7323_s14 + $0xb10] sm:$0xff] }
  0xa8   : > { %6056 = vmatpush3.bf16.msra.mxu0 %v6055_v42  ;;  %v1516_v42 = vcombine.high %v264_v31, %v264_v31  ;;  %v590_v31 = vld [vmem:[%s7323_s14 + $0x9c0] sm:$0xff] }
  0xa9   : > { %6088 = vmatpush3.bf16.msra.mxu1 %v6087_v44  ;;  %6058 = vmatprep.subr.bf16.mxu0 %v6057_v45  ;;  %v6075_v44 = vpack.c.bf16 %v485_v43, %v484_v35  ;;  %v6107_v45 = vpack.c.bf16 %v517_v38, %v516_v36  ;;  %v6155_v35 = vpack.c.bf16 %v573_v28, %v572_v26  ;;  %v542_v36 = vld [vmem:[%s7323_s14 + $0x840] sm:$0xff]  ;;  %v599_v26 = vld [vmem:[%s7323_s14 + $0xa08] sm:$0xff] }
  0xaa   : > { %6090 = vmatprep.subr.bf16.mxu1 %v6089_v50  ;;  %v566_v50 = vld [vmem:[%s7323_s14 + $0x900] sm:$0xff] }
  0xab   : > { %v6143_v60 = vpack.c.bf16 %v567_v52, %v566_v50  ;;  %v574_v38 = vld [vmem:[%s7323_s14 + $0x940] sm:$0xff]  ;;  %v545_v50 = vld [vmem:[%s7323_s14 + $0x858] sm:$0xff] }
  0xac   : > { %6060 = vmatpush3.bf16.msra.mxu0 %v6059_v56  ;;  %v584_v56 = vld [vmem:[%s7323_s14 + $0x990] sm:$0xff] }
  0xad   : > { %6092 = vmatpush3.bf16.msra.mxu1 %v6091_v57  ;;  %6062 = vmatprep.subr.bf16.mxu0 %v6061_v58  ;;  %v585_v57 = vld [vmem:[%s7323_s14 + $0x998] sm:$0xff]  ;;  %v7651_v58 = vrot.slane %v1516_v42, %v7386_v14  ;;  %v592_v42 = vld [vmem:[%s7323_s14 + $0x9d0] sm:$0xff] }
  0xae   : > { %6094 = vmatprep.subr.bf16.mxu1 %v6093_v46  ;;  %v536_v46 = vld [vmem:[%s7323_s14 + $0x810] sm:$0xff]  ;;  %v6145_v0 = vpack.c.bf16 %v585_v57, %v584_v56  ;;  %v563_v56 = vld [vmem:[%s7323_s14 + $0x8e8] sm:$0xff]  ;;  %v594_v57 = vld [vmem:[%s7323_s14 + $0x9e0] sm:$0xff] }
  0xaf   : > { %v1532_v7 = vcombine.high %v7651_v58, %v7651_v58  ;;  %v6115_v8 = vpack.c.bf16 %v537_v62, %v536_v46  ;;  %v6133_v46 = vpack.c.bf16 %v563_v56, %v562_v34  ;;  %v546_v62 = vld [vmem:[%s7323_s14 + $0x860] sm:$0xff] }
  0xb0   : > { %6064 = vmatpush3.bf16.msra.mxu0 %v6063_v3  ;;  %v555_v3 = vld [vmem:[%s7323_s14 + $0x8a8] sm:$0xff]  ;;  %v602_v34 = vld [vmem:[%s7323_s14 + $0xa20] sm:$0xff] }
  0xb1   : > { %6096 = vmatpush3.bf16.msra.mxu1 %v6095_v4  ;;  %6066 = vmatprep.subr.bf16.mxu0 %v6065_v5  ;;  %v1531_v4 = vcombine.high %v7646_v55, %v7646_v55  ;;  %v586_v5 = vld [vmem:[%s7323_s14 + $0x9a0] sm:$0xff]  ;;  %v6117_v10 = vpack.c.bf16 %v555_v3, %v554_v2  ;;  %v579_v2 = vld [vmem:[%s7323_s14 + $0x968] sm:$0xff]  ;;  %v564_v3 = vld [vmem:[%s7323_s14 + $0x8f0] sm:$0xff] }
  0xb2   : > { %6098 = vmatprep.subr.bf16.mxu1 %v6097_v9  ;;  %v6147_v9 = vpack.c.bf16 %v569_v1, %v568_v63  ;;  %v6149_v15 = vpack.c.bf16 %v587_v6, %v586_v5  ;;  %v547_v63 = vld [vmem:[%s7323_s14 + $0x868] sm:$0xff]  ;;  %v596_v5 = vld [vmem:[%s7323_s14 + $0x9f0] sm:$0xff]  ;;  %v597_v6 = vld [vmem:[%s7323_s14 + $0x9f8] sm:$0xff] }
  0xb3   : > { %v634_v56 = vld [vmem:[%s7323_s14 + $0xb20] sm:$0xff] }
  0xb4   : > { %6068 = vmatpush3.bf16.msra.mxu0 %v6067_v18  ;;  %v556_v18 = vld [vmem:[%s7323_s14 + $0x8b0] sm:$0xff] }
  0xb5   : > { %6100 = vmatpush3.bf16.msra.mxu1 %v6099_v19  ;;  %6070 = vmatprep.subr.bf16.mxu0 %v6069_v20  ;;  %v557_v19 = vld [vmem:[%s7323_s14 + $0x8b8] sm:$0xff] }
  0xb6   : > { %6102 = vmatprep.subr.bf16.mxu1 %v6101_v24  ;;  %v589_v20 = vld [vmem:[%s7323_s14 + $0x9b8] sm:$0xff]  ;;  %v6121_v23 = vpack.c.bf16 %v557_v19, %v556_v18  ;;  %v540_v24 = vld [vmem:[%s7323_s14 + $0x830] sm:$0xff]  ;;  %v614_v18 = vld [vmem:[%s7323_s14 + $0xa80] sm:$0xff] }
  0xb7   : > { %v615_v19 = vld [vmem:[%s7323_s14 + $0xa88] sm:$0xff] }
  0xb8   : > { %6072 = vmatpush3.bf16.msra.mxu0 %v6071_v30  ;;  %v559_v30 = vld [vmem:[%s7323_s14 + $0x8c8] sm:$0xff] }
  0xb9   : > { %6104 = vmatpush3.bf16.msra.mxu1 %v6103_v32  ;;  %6074 = vmatprep.subr.bf16.mxu0 %v6073_v33  ;;  %v591_v32 = vld [vmem:[%s7323_s14 + $0x9c8] sm:$0xff]  ;;  %v6123_v33 = vpack.c.bf16 %v541_v25, %v540_v24  ;;  %v6125_v43 = vpack.c.bf16 %v559_v30, %v558_v29  ;;  %v6173_v24 = vpack.c.bf16 %v615_v19, %v614_v18  ;;  %v598_v25 = vld [vmem:[%s7323_s14 + $0xa00] sm:$0xff]  ;;  %v616_v30 = vld [vmem:[%s7323_s14 + $0xa90] sm:$0xff] }
  0xba   : > { %6106 = vmatprep.subr.bf16.mxu1 %v6105_v37  ;;  %v543_v37 = vld [vmem:[%s7323_s14 + $0x848] sm:$0xff]  ;;  %v6157_v39 = vpack.c.bf16 %v591_v32, %v590_v31  ;;  %v617_v31 = vld [vmem:[%s7323_s14 + $0xa98] sm:$0xff] }
  0xbb   : > { %v631_v29 = vld [vmem:[%s7323_s14 + $0xb08] sm:$0xff] }
  0xbc   : > { %6076 = vmatpush3.bf16.msra.mxu0 %v6075_v44  ;;  %v593_v44 = vld [vmem:[%s7323_s14 + $0x9d8] sm:$0xff]  ;;  %v639_v19 = vld [vmem:[%s7323_s14 + $0xb48] sm:$0xff] }
  0xbd   : > { %6108 = vmatpush3.bf16.msra.mxu1 %v6107_v45  ;;  %6110 = vmatprep.subr.bf16.mxu0 %v6109_v47  ;;  %v6127_v45 = vpack.c.bf16 %v543_v37, %v542_v36  ;;  %v6159_v47 = vpack.c.bf16 %v575_v40, %v574_v38  ;;  %v6161_v52 = vpack.c.bf16 %v593_v44, %v592_v42  ;;  %v601_v40 = vld [vmem:[%s7323_s14 + $0xa18] sm:$0xff]  ;;  %v618_v44 = vld [vmem:[%s7323_s14 + $0xaa0] sm:$0xff] }
  0xbe   : > { %6142 = vmatprep.subr.bf16.mxu1 %v6141_v51  ;;  %v576_v51 = vld [vmem:[%s7323_s14 + $0x950] sm:$0xff]  ;;  %v6175_v36 = vpack.c.bf16 %v599_v26, %v598_v25  ;;  %v6177_v38 = vpack.c.bf16 %v617_v31, %v616_v30  ;;  %v633_v42 = vld [vmem:[%s7323_s14 + $0xb18] sm:$0xff]  ;;  %v626_v31 = vld [vmem:[%s7323_s14 + $0xae0] sm:$0xff] }
  0xbf   : > { %2311 = vmatmul.mubr.f32.vlgmr.msra.gmra.mrb[6].mxu0 %v7569_v12  ;;  %v539_v12 = vld [vmem:[%s7323_s14 + $0x828] sm:$0xff]  ;;  %v608_v26 = vld [vmem:[%s7323_s14 + $0xa50] sm:$0xff]  ;;  %v641_v30 = vld [vmem:[%s7323_s14 + $0xb58] sm:$0xff] }
  0xc0   : > { %6112 = vmatpush3.bf16.msra.mxu0 %v6111_v59  ;;  %2381 = vmatmul.mubr.f32.vlgmr.msra.gmra.mrb[6].mxu1 %v7574_v16  ;;  %v588_v16 = vld [vmem:[%s7323_s14 + $0x9b0] sm:$0xff]  ;;  %v6119_v21 = vpack.c.bf16 %v539_v12, %v538_v11  ;;  %v595_v59 = vld [vmem:[%s7323_s14 + $0x9e8] sm:$0xff]  ;;  %v549_v12 = vld [vmem:[%s7323_s14 + $0x878] sm:$0xff] }
  0xc1   : > { %6144 = vmatpush3.bf16.msra.mxu1 %v6143_v60  ;;  %6114 = vmatprep.subr.bf16.mxu0 %v6113_v61  ;;  %v6153_v27 = vpack.c.bf16 %v589_v20, %v588_v16  ;;  %v6131_v60 = vpack.c.bf16 %v545_v50, %v544_v49  ;;  %v6163_v61 = vpack.c.bf16 %v577_v54, %v576_v51  ;;  %v548_v11 = vld [vmem:[%s7323_s14 + $0x870] sm:$0xff]  ;;  %v646_v16 = vld [vmem:[%s7323_s14 + $0xb80] sm:$0xff]  ;;  %v647_v20 = vld [vmem:[%s7323_s14 + $0xb88] sm:$0xff] }
  0xc2   : > { %6146 = vmatprep.subr.bf16.mxu1 %v6145_v0  ;;  %2450 = vmatprep.mubr.f32.mxu0 %v1531_v4  ;;  %v578_v0 = vld [vmem:[%s7323_s14 + $0x960] sm:$0xff]  ;;  %v6165_v1 = vpack.c.bf16 %v595_v59, %v594_v57  ;;  %v565_v4 = vld [vmem:[%s7323_s14 + $0x8f8] sm:$0xff]  ;;  %v6205_v28 = vpack.c.bf16 %v647_v20, %v646_v16  ;;  %v651_v49 = vld [vmem:[%s7323_s14 + $0xba8] sm:$0xff] }
  0xc3   : > { %2520 = vmatprep.mubr.f32.mxu1 %v1532_v7  ;;  %v6135_v7 = vpack.c.bf16 %v547_v63, %v546_v62  ;;  %v635_v59 = vld [vmem:[%s7323_s14 + $0xb28] sm:$0xff]  ;;  %v624_v16 = vld [vmem:[%s7323_s14 + $0xad0] sm:$0xff]  ;;  %v625_v20 = vld [vmem:[%s7323_s14 + $0xad8] sm:$0xff] }
  0xc4   : > { %6116 = vmatpush3.bf16.msra.mxu0 %v6115_v8  ;;  %v265_v8 = vld [vmem:[%s7333_s11 + $0x28] sm:$0xff]  ;;  %v6215_v63 = vpack.c.bf16 %v635_v59, %v634_v56  ;;  %v6193_v25 = vpack.c.bf16 %v625_v20, %v624_v16  ;;  %v645_v59 = vld [vmem:[%s7323_s14 + $0xb78] sm:$0xff] }
  0xc5   : > { %6148 = vmatpush3.bf16.msra.mxu1 %v6147_v9  ;;  %6118 = vmatprep.subr.bf16.mxu0 %v6117_v10  ;;  %v6167_v9 = vpack.c.bf16 %v579_v2, %v578_v0  ;;  %v6137_v10 = vpack.c.bf16 %v565_v4, %v564_v3  ;;  %v7723_v32 = vrot.slane %v265_v8, %v7386_v14  ;;  %v605_v2 = vld [vmem:[%s7323_s14 + $0xa38] sm:$0xff]  ;;  %v636_v3 = vld [vmem:[%s7323_s14 + $0xb30] sm:$0xff] }
  0xc6   : > { %6150 = vmatprep.subr.bf16.mxu1 %v6149_v15  ;;  %v6169_v15 = vpack.c.bf16 %v597_v6, %v596_v5  ;;  %v637_v5 = vld [vmem:[%s7323_s14 + $0xb38] sm:$0xff]  ;;  %v622_v6 = vld [vmem:[%s7323_s14 + $0xac0] sm:$0xff]  ;;  %v644_v56 = vld [vmem:[%s7323_s14 + $0xb70] sm:$0xff] }
  0xc7   : > { %v696_v16 = vld [vmem:[%s7323_s14 + $0xd10] sm:$0xff] }
  0xc8   : > { %6120 = vmatpush3.bf16.msra.mxu0 %v6119_v21  ;;  %v1533_v21 = vcombine.high %v265_v8, %v265_v8  ;;  %v654_v8 = vld [vmem:[%s7323_s14 + $0xbc0] sm:$0xff] }
  0xc9   : > { %6152 = vmatpush3.bf16.msra.mxu1 %v6151_v22  ;;  %6122 = vmatprep.subr.bf16.mxu0 %v6121_v23  ;;  %v6139_v22 = vpack.c.bf16 %v549_v12, %v548_v11  ;;  %v6171_v23 = vpack.c.bf16 %v581_v17, %v580_v13  ;;  %v6219_v11 = vpack.c.bf16 %v637_v5, %v636_v3  ;;  %v606_v13 = vld [vmem:[%s7323_s14 + $0xa40] sm:$0xff]  ;;  %v663_v3 = vld [vmem:[%s7323_s14 + $0xc08] sm:$0xff] }
  0xca   : > { %6154 = vmatprep.subr.bf16.mxu1 %v6153_v27  ;;  %v630_v27 = vld [vmem:[%s7323_s14 + $0xb00] sm:$0xff] }
  0xcb   : > { %v6207_v37 = vpack.c.bf16 %v631_v29, %v630_v27  ;;  %v638_v17 = vld [vmem:[%s7323_s14 + $0xb40] sm:$0xff]  ;;  %v609_v27 = vld [vmem:[%s7323_s14 + $0xa58] sm:$0xff] }
  0xcc   : > { %6124 = vmatpush3.bf16.msra.mxu0 %v6123_v33  ;;  %v648_v33 = vld [vmem:[%s7323_s14 + $0xb90] sm:$0xff] }
  0xcd   : > { %6156 = vmatpush3.bf16.msra.mxu1 %v6155_v35  ;;  %6126 = vmatprep.subr.bf16.mxu0 %v6125_v43  ;;  %v649_v35 = vld [vmem:[%s7323_s14 + $0xb98] sm:$0xff]  ;;  %v7728_v43 = vrot.slane %v1533_v21, %v7386_v14  ;;  %v656_v21 = vld [vmem:[%s7323_s14 + $0xbd0] sm:$0xff] }
  0xce   : > { %6158 = vmatprep.subr.bf16.mxu1 %v6157_v39  ;;  %v600_v39 = vld [vmem:[%s7323_s14 + $0xa10] sm:$0xff]  ;;  %v6209_v41 = vpack.c.bf16 %v649_v35, %v648_v33  ;;  %v627_v33 = vld [vmem:[%s7323_s14 + $0xae8] sm:$0xff]  ;;  %v658_v35 = vld [vmem:[%s7323_s14 + $0xbe0] sm:$0xff] }
  0xcf   : > { %v1549_v50 = vcombine.high %v7728_v43, %v7728_v43  ;;  %v6179_v51 = vpack.c.bf16 %v601_v40, %v600_v39  ;;  %v6197_v39 = vpack.c.bf16 %v627_v33, %v626_v31  ;;  %v610_v40 = vld [vmem:[%s7323_s14 + $0xa60] sm:$0xff] }
  0xd0   : > { %6128 = vmatpush3.bf16.msra.mxu0 %v6127_v45  ;;  %v619_v45 = vld [vmem:[%s7323_s14 + $0xaa8] sm:$0xff]  ;;  %v666_v31 = vld [vmem:[%s7323_s14 + $0xc20] sm:$0xff] }
  0xd1   : > { %6160 = vmatpush3.bf16.msra.mxu1 %v6159_v47  ;;  %6130 = vmatprep.subr.bf16.mxu0 %v6129_v48  ;;  %v1548_v47 = vcombine.high %v7723_v32, %v7723_v32  ;;  %v650_v48 = vld [vmem:[%s7323_s14 + $0xba0] sm:$0xff]  ;;  %v6181_v54 = vpack.c.bf16 %v619_v45, %v618_v44  ;;  %v643_v44 = vld [vmem:[%s7323_s14 + $0xb68] sm:$0xff]  ;;  %v628_v45 = vld [vmem:[%s7323_s14 + $0xaf0] sm:$0xff] }
  0xd2   : > { %6162 = vmatprep.subr.bf16.mxu1 %v6161_v52  ;;  %v6211_v52 = vpack.c.bf16 %v633_v42, %v632_v53  ;;  %v6213_v57 = vpack.c.bf16 %v651_v49, %v650_v48  ;;  %v611_v53 = vld [vmem:[%s7323_s14 + $0xa68] sm:$0xff]  ;;  %v660_v48 = vld [vmem:[%s7323_s14 + $0xbf0] sm:$0xff]  ;;  %v661_v49 = vld [vmem:[%s7323_s14 + $0xbf8] sm:$0xff] }
  0xd3   : > { %v698_v33 = vld [vmem:[%s7323_s14 + $0xd20] sm:$0xff] }
  0xd4   : > { %6132 = vmatpush3.bf16.msra.mxu0 %v6131_v60  ;;  %v620_v60 = vld [vmem:[%s7323_s14 + $0xab0] sm:$0xff] }
  0xd5   : > { %6164 = vmatpush3.bf16.msra.mxu1 %v6163_v61  ;;  %6134 = vmatprep.subr.bf16.mxu0 %v6133_v46  ;;  %v621_v61 = vld [vmem:[%s7323_s14 + $0xab8] sm:$0xff] }
  0xd6   : > { %6166 = vmatprep.subr.bf16.mxu1 %v6165_v1  ;;  %v653_v46 = vld [vmem:[%s7323_s14 + $0xbb8] sm:$0xff]  ;;  %v6185_v0 = vpack.c.bf16 %v621_v61, %v620_v60  ;;  %v604_v1 = vld [vmem:[%s7323_s14 + $0xa30] sm:$0xff]  ;;  %v678_v60 = vld [vmem:[%s7323_s14 + $0xc80] sm:$0xff] }
  0xd7   : > { %v679_v61 = vld [vmem:[%s7323_s14 + $0xc88] sm:$0xff] }
  0xd8   : > { %6136 = vmatpush3.bf16.msra.mxu0 %v6135_v7  ;;  %v623_v7 = vld [vmem:[%s7323_s14 + $0xac8] sm:$0xff] }
  0xd9   : > { %6168 = vmatpush3.bf16.msra.mxu1 %v6167_v9  ;;  %6138 = vmatprep.subr.bf16.mxu0 %v6137_v10  ;;  %v655_v9 = vld [vmem:[%s7323_s14 + $0xbc8] sm:$0xff]  ;;  %v6187_v10 = vpack.c.bf16 %v605_v2, %v604_v1  ;;  %v6189_v12 = vpack.c.bf16 %v623_v7, %v622_v6  ;;  %v6237_v1 = vpack.c.bf16 %v679_v61, %v678_v60  ;;  %v662_v2 = vld [vmem:[%s7323_s14 + $0xc00] sm:$0xff]  ;;  %v680_v7 = vld [vmem:[%s7323_s14 + $0xc90] sm:$0xff] }
  0xda   : > { %6170 = vmatprep.subr.bf16.mxu1 %v6169_v15  ;;  %v607_v15 = vld [vmem:[%s7323_s14 + $0xa48] sm:$0xff]  ;;  %v6221_v18 = vpack.c.bf16 %v655_v9, %v654_v8  ;;  %v681_v8 = vld [vmem:[%s7323_s14 + $0xc98] sm:$0xff] }
  0xdb   : > { %v695_v6 = vld [vmem:[%s7323_s14 + $0xd08] sm:$0xff] }
  0xdc   : > { %6140 = vmatpush3.bf16.msra.mxu0 %v6139_v22  ;;  %v657_v22 = vld [vmem:[%s7323_s14 + $0xbd8] sm:$0xff]  ;;  %v703_v61 = vld [vmem:[%s7323_s14 + $0xd48] sm:$0xff] }
  0xdd   : > { %6172 = vmatpush3.bf16.msra.mxu1 %v6171_v23  ;;  %6174 = vmatprep.subr.bf16.mxu0 %v6173_v24  ;;  %v6191_v23 = vpack.c.bf16 %v607_v15, %v606_v13  ;;  %v6223_v24 = vpack.c.bf16 %v639_v19, %v638_v17  ;;  %v6225_v29 = vpack.c.bf16 %v657_v22, %v656_v21  ;;  %v665_v19 = vld [vmem:[%s7323_s14 + $0xc18] sm:$0xff]  ;;  %v682_v22 = vld [vmem:[%s7323_s14 + $0xca0] sm:$0xff] }
  0xde   : > { %6206 = vmatprep.subr.bf16.mxu1 %v6205_v28  ;;  %v640_v28 = vld [vmem:[%s7323_s14 + $0xb50] sm:$0xff]  ;;  %v6239_v13 = vpack.c.bf16 %v663_v3, %v662_v2  ;;  %v6241_v17 = vpack.c.bf16 %v681_v8, %v680_v7  ;;  %v697_v21 = vld [vmem:[%s7323_s14 + $0xd18] sm:$0xff]  ;;  %v690_v8 = vld [vmem:[%s7323_s14 + $0xce0] sm:$0xff] }
  0xdf   : > { %2451 = vmatmul.mubr.f32.vlgmr.msra.gmra.mrb[8].mxu0 %v7646_v55  ;;  %v603_v55 = vld [vmem:[%s7323_s14 + $0xa28] sm:$0xff]  ;;  %v672_v3 = vld [vmem:[%s7323_s14 + $0xc50] sm:$0xff]  ;;  %v705_v7 = vld [vmem:[%s7323_s14 + $0xd58] sm:$0xff] }
  0xe0   : > { %6176 = vmatpush3.bf16.msra.mxu0 %v6175_v36  ;;  %2521 = vmatmul.mubr.f32.vlgmr.msra.gmra.mrb[8].mxu1 %v7651_v58  ;;  %v652_v58 = vld [vmem:[%s7323_s14 + $0xbb0] sm:$0xff]  ;;  %v6183_v62 = vpack.c.bf16 %v603_v55, %v602_v34  ;;  %v659_v36 = vld [vmem:[%s7323_s14 + $0xbe8] sm:$0xff]  ;;  %v613_v55 = vld [vmem:[%s7323_s14 + $0xa78] sm:$0xff] }
  0xe1   : > { %6208 = vmatpush3.bf16.msra.mxu1 %v6207_v37  ;;  %6178 = vmatprep.subr.bf16.mxu0 %v6177_v38  ;;  %v6217_v4 = vpack.c.bf16 %v653_v46, %v652_v58  ;;  %v6195_v37 = vpack.c.bf16 %v609_v27, %v608_v26  ;;  %v6227_v38 = vpack.c.bf16 %v641_v30, %v640_v28  ;;  %v612_v34 = vld [vmem:[%s7323_s14 + $0xa70] sm:$0xff]  ;;  %v710_v58 = vld [vmem:[%s7323_s14 + $0xd80] sm:$0xff]  ;;  %v711_v46 = vld [vmem:[%s7323_s14 + $0xd88] sm:$0xff] }
  0xe2   : > { %6210 = vmatprep.subr.bf16.mxu1 %v6209_v41  ;;  %2590 = vmatprep.mubr.f32.mxu0 %v1548_v47  ;;  %v642_v41 = vld [vmem:[%s7323_s14 + $0xb60] sm:$0xff]  ;;  %v6229_v42 = vpack.c.bf16 %v659_v36, %v658_v35  ;;  %v629_v47 = vld [vmem:[%s7323_s14 + $0xaf8] sm:$0xff]  ;;  %v6269_v5 = vpack.c.bf16 %v711_v46, %v710_v58  ;;  %v715_v26 = vld [vmem:[%s7323_s14 + $0xda8] sm:$0xff] }
  0xe3   : > { %2660 = vmatprep.mubr.f32.mxu1 %v1549_v50  ;;  %v6199_v50 = vpack.c.bf16 %v611_v53, %v610_v40  ;;  %v699_v36 = vld [vmem:[%s7323_s14 + $0xd28] sm:$0xff]  ;;  %v688_v58 = vld [vmem:[%s7323_s14 + $0xcd0] sm:$0xff]  ;;  %v689_v46 = vld [vmem:[%s7323_s14 + $0xcd8] sm:$0xff] }
  0xe4   : > { %6180 = vmatpush3.bf16.msra.mxu0 %v6179_v51  ;;  %v266_v51 = vld [vmem:[%s7333_s11 + $0x30] sm:$0xff]  ;;  %v6279_v53 = vpack.c.bf16 %v699_v36, %v698_v33  ;;  %v6257_v2 = vpack.c.bf16 %v689_v46, %v688_v58 }
  0xe5   : > { %6212 = vmatpush3.bf16.msra.mxu1 %v6211_v52  ;;  %6182 = vmatprep.subr.bf16.mxu0 %v6181_v54  ;;  %v6231_v52 = vpack.c.bf16 %v643_v44, %v642_v41  ;;  %v6201_v54 = vpack.c.bf16 %v629_v47, %v628_v45  ;;  %v7800_v9 = vrot.slane %v266_v51, %v7386_v14  ;;  %v669_v44 = vld [vmem:[%s7323_s14 + $0xc38] sm:$0xff]  ;;  %v700_v45 = vld [vmem:[%s7323_s14 + $0xd30] sm:$0xff] }
  0xe6   : > { %6214 = vmatprep.subr.bf16.mxu1 %v6213_v57  ;;  %v6233_v57 = vpack.c.bf16 %v661_v49, %v660_v48  ;;  %v701_v48 = vld [vmem:[%s7323_s14 + $0xd38] sm:$0xff]  ;;  %v686_v49 = vld [vmem:[%s7323_s14 + $0xcc0] sm:$0xff]  ;;  %v708_v33 = vld [vmem:[%s7323_s14 + $0xd70] sm:$0xff] }
  0xe7   : > { %v709_v36 = vld [vmem:[%s7323_s14 + $0xd78] sm:$0xff]  ;;  %v760_v58 = vld [vmem:[%s7323_s14 + $0xf10] sm:$0xff] }
  0xe8   : > { %6184 = vmatpush3.bf16.msra.mxu0 %v6183_v62  ;;  %v1550_v62 = vcombine.high %v266_v51, %v266_v51  ;;  %v718_v51 = vld [vmem:[%s7323_s14 + $0xdc0] sm:$0xff] }
  0xe9   : > { %6216 = vmatpush3.bf16.msra.mxu1 %v6215_v63  ;;  %6186 = vmatprep.subr.bf16.mxu0 %v6185_v0  ;;  %v6203_v63 = vpack.c.bf16 %v613_v55, %v612_v34  ;;  %v6235_v0 = vpack.c.bf16 %v645_v59, %v644_v56  ;;  %v6283_v34 = vpack.c.bf16 %v701_v48, %v700_v45  ;;  %v670_v56 = vld [vmem:[%s7323_s14 + $0xc40] sm:$0xff]  ;;  %v727_v45 = vld [vmem:[%s7323_s14 + $0xe08] sm:$0xff] }
  0xea   : > { %6218 = vmatprep.subr.bf16.mxu1 %v6217_v4  ;;  %v694_v4 = vld [vmem:[%s7323_s14 + $0xd00] sm:$0xff] }
  0xeb   : > { %v6271_v15 = vpack.c.bf16 %v695_v6, %v694_v4  ;;  %v702_v59 = vld [vmem:[%s7323_s14 + $0xd40] sm:$0xff]  ;;  %v673_v4 = vld [vmem:[%s7323_s14 + $0xc58] sm:$0xff] }
  0xec   : > { %6188 = vmatpush3.bf16.msra.mxu0 %v6187_v10  ;;  %v712_v10 = vld [vmem:[%s7323_s14 + $0xd90] sm:$0xff] }
  0xed   : > { %6220 = vmatpush3.bf16.msra.mxu1 %v6219_v11  ;;  %6190 = vmatprep.subr.bf16.mxu0 %v6189_v12  ;;  %v713_v11 = vld [vmem:[%s7323_s14 + $0xd98] sm:$0xff]  ;;  %v7805_v12 = vrot.slane %v1550_v62, %v7386_v14  ;;  %v720_v62 = vld [vmem:[%s7323_s14 + $0xdd0] sm:$0xff] }
  0xee   : > { %6222 = vmatprep.subr.bf16.mxu1 %v6221_v18  ;;  %v664_v18 = vld [vmem:[%s7323_s14 + $0xc10] sm:$0xff]  ;;  %v6273_v20 = vpack.c.bf16 %v713_v11, %v712_v10  ;;  %v691_v10 = vld [vmem:[%s7323_s14 + $0xce8] sm:$0xff]  ;;  %v722_v11 = vld [vmem:[%s7323_s14 + $0xde0] sm:$0xff] }
  0xef   : > { %v1566_v27 = vcombine.high %v7805_v12, %v7805_v12  ;;  %v6243_v28 = vpack.c.bf16 %v665_v19, %v664_v18  ;;  %v6261_v18 = vpack.c.bf16 %v691_v10, %v690_v8  ;;  %v674_v19 = vld [vmem:[%s7323_s14 + $0xc60] sm:$0xff] }
  0xf0   : > { %6192 = vmatpush3.bf16.msra.mxu0 %v6191_v23  ;;  %v683_v23 = vld [vmem:[%s7323_s14 + $0xca8] sm:$0xff]  ;;  %v730_v8 = vld [vmem:[%s7323_s14 + $0xe20] sm:$0xff] }
  0xf1   : > { %6224 = vmatpush3.bf16.msra.mxu1 %v6223_v24  ;;  %6194 = vmatprep.subr.bf16.mxu0 %v6193_v25  ;;  %v1565_v24 = vcombine.high %v7800_v9, %v7800_v9  ;;  %v714_v25 = vld [vmem:[%s7323_s14 + $0xda0] sm:$0xff]  ;;  %v6245_v30 = vpack.c.bf16 %v683_v23, %v682_v22  ;;  %v707_v22 = vld [vmem:[%s7323_s14 + $0xd68] sm:$0xff]  ;;  %v692_v23 = vld [vmem:[%s7323_s14 + $0xcf0] sm:$0xff] }
  0xf2   : > { %6226 = vmatprep.subr.bf16.mxu1 %v6225_v29  ;;  %v6275_v29 = vpack.c.bf16 %v697_v21, %v696_v16  ;;  %v6277_v35 = vpack.c.bf16 %v715_v26, %v714_v25  ;;  %v675_v16 = vld [vmem:[%s7323_s14 + $0xc68] sm:$0xff]  ;;  %v724_v25 = vld [vmem:[%s7323_s14 + $0xdf0] sm:$0xff]  ;;  %v725_v26 = vld [vmem:[%s7323_s14 + $0xdf8] sm:$0xff] }
  0xf3   : > { %v762_v10 = vld [vmem:[%s7323_s14 + $0xf20] sm:$0xff] }
  0xf4   : > { %6196 = vmatpush3.bf16.msra.mxu0 %v6195_v37  ;;  %v684_v37 = vld [vmem:[%s7323_s14 + $0xcb0] sm:$0xff] }
  0xf5   : > { %6228 = vmatpush3.bf16.msra.mxu1 %v6227_v38  ;;  %6198 = vmatprep.subr.bf16.mxu0 %v6197_v39  ;;  %v685_v38 = vld [vmem:[%s7323_s14 + $0xcb8] sm:$0xff] }
  0xf6   : > { %6230 = vmatprep.subr.bf16.mxu1 %v6229_v42  ;;  %v717_v39 = vld [vmem:[%s7323_s14 + $0xdb8] sm:$0xff]  ;;  %v6249_v41 = vpack.c.bf16 %v685_v38, %v684_v37  ;;  %v668_v42 = vld [vmem:[%s7323_s14 + $0xc30] sm:$0xff]  ;;  %v742_v37 = vld [vmem:[%s7323_s14 + $0xe80] sm:$0xff] }
  0xf7   : > { %v743_v38 = vld [vmem:[%s7323_s14 + $0xe88] sm:$0xff] }
  0xf8   : > { %6200 = vmatpush3.bf16.msra.mxu0 %v6199_v50  ;;  %v687_v50 = vld [vmem:[%s7323_s14 + $0xcc8] sm:$0xff] }
  0xf9   : > { %6232 = vmatpush3.bf16.msra.mxu1 %v6231_v52  ;;  %6202 = vmatprep.subr.bf16.mxu0 %v6201_v54  ;;  %v719_v52 = vld [vmem:[%s7323_s14 + $0xdc8] sm:$0xff]  ;;  %v6251_v54 = vpack.c.bf16 %v669_v44, %v668_v42  ;;  %v6253_v55 = vpack.c.bf16 %v687_v50, %v686_v49  ;;  %v6301_v42 = vpack.c.bf16 %v743_v38, %v742_v37  ;;  %v726_v44 = vld [vmem:[%s7323_s14 + $0xe00] sm:$0xff]  ;;  %v744_v50 = vld [vmem:[%s7323_s14 + $0xe90] sm:$0xff] }
  0xfa   : > { %6234 = vmatprep.subr.bf16.mxu1 %v6233_v57  ;;  %v671_v57 = vld [vmem:[%s7323_s14 + $0xc48] sm:$0xff]  ;;  %v6285_v60 = vpack.c.bf16 %v719_v52, %v718_v51  ;;  %v745_v51 = vld [vmem:[%s7323_s14 + $0xe98] sm:$0xff] }
  0xfb   : > { %v759_v49 = vld [vmem:[%s7323_s14 + $0xf08] sm:$0xff] }
  0xfc   : > { %6204 = vmatpush3.bf16.msra.mxu0 %v6203_v63  ;;  %v721_v63 = vld [vmem:[%s7323_s14 + $0xdd8] sm:$0xff]  ;;  %v767_v38 = vld [vmem:[%s7323_s14 + $0xf48] sm:$0xff] }
  0xfd   : > { %6236 = vmatpush3.bf16.msra.mxu1 %v6235_v0  ;;  %6238 = vmatprep.subr.bf16.mxu0 %v6237_v1  ;;  %v6255_v0 = vpack.c.bf16 %v671_v57, %v670_v56  ;;  %v6287_v1 = vpack.c.bf16 %v703_v61, %v702_v59  ;;  %v6289_v6 = vpack.c.bf16 %v721_v63, %v720_v62  ;;  %v729_v61 = vld [vmem:[%s7323_s14 + $0xe18] sm:$0xff]  ;;  %v746_v63 = vld [vmem:[%s7323_s14 + $0xea0] sm:$0xff] }
  0xfe   : > { %6270 = vmatprep.subr.bf16.mxu1 %v6269_v5  ;;  %v704_v5 = vld [vmem:[%s7323_s14 + $0xd50] sm:$0xff]  ;;  %v6303_v56 = vpack.c.bf16 %v727_v45, %v726_v44  ;;  %v6305_v59 = vpack.c.bf16 %v745_v51, %v744_v50  ;;  %v761_v62 = vld [vmem:[%s7323_s14 + $0xf18] sm:$0xff]  ;;  %v754_v51 = vld [vmem:[%s7323_s14 + $0xee0] sm:$0xff] }
  0xff   : > { %2591 = vmatmul.mubr.f32.vlgmr.msra.gmra.mrb[10].mxu0 %v7723_v32  ;;  %v667_v32 = vld [vmem:[%s7323_s14 + $0xc28] sm:$0xff]  ;;  %v736_v45 = vld [vmem:[%s7323_s14 + $0xe50] sm:$0xff]  ;;  %v769_v50 = vld [vmem:[%s7323_s14 + $0xf58] sm:$0xff] }
 0x100   : > { %6240 = vmatpush3.bf16.msra.mxu0 %v6239_v13  ;;  %2661 = vmatmul.mubr.f32.vlgmr.msra.gmra.mrb[10].mxu1 %v7728_v43  ;;  %v716_v43 = vld [vmem:[%s7323_s14 + $0xdb0] sm:$0xff]  ;;  %v6247_v40 = vpack.c.bf16 %v667_v32, %v666_v31  ;;  %v723_v13 = vld [vmem:[%s7323_s14 + $0xde8] sm:$0xff]  ;;  %v677_v32 = vld [vmem:[%s7323_s14 + $0xc78] sm:$0xff] }
 0x101   : > { %6272 = vmatpush3.bf16.msra.mxu1 %v6271_v15  ;;  %6242 = vmatprep.subr.bf16.mxu0 %v6241_v17  ;;  %v6281_v47 = vpack.c.bf16 %v717_v39, %v716_v43  ;;  %v6259_v15 = vpack.c.bf16 %v673_v4, %v672_v3  ;;  %v6291_v17 = vpack.c.bf16 %v705_v7, %v704_v5  ;;  %v676_v31 = vld [vmem:[%s7323_s14 + $0xc70] sm:$0xff]  ;;  %v774_v43 = vld [vmem:[%s7323_s14 + $0xf80] sm:$0xff]  ;;  %v775_v39 = vld [vmem:[%s7323_s14 + $0xf88] sm:$0xff] }
 0x102   : > { %6274 = vmatprep.subr.bf16.mxu1 %v6273_v20  ;;  %2730 = vmatprep.mubr.f32.mxu0 %v1565_v24  ;;  %v706_v20 = vld [vmem:[%s7323_s14 + $0xd60] sm:$0xff]  ;;  %v6293_v21 = vpack.c.bf16 %v723_v13, %v722_v11  ;;  %v693_v24 = vld [vmem:[%s7323_s14 + $0xcf8] sm:$0xff]  ;;  %v6333_v48 = vpack.c.bf16 %v775_v39, %v774_v43  ;;  %v779_v3 = vld [vmem:[%s7323_s14 + $0xfa8] sm:$0xff] }
 0x103   : > { %2800 = vmatprep.mubr.f32.mxu1 %v1566_v27  ;;  %v6263_v27 = vpack.c.bf16 %v675_v16, %v674_v19  ;;  %v763_v13 = vld [vmem:[%s7323_s14 + $0xf28] sm:$0xff]  ;;  %v752_v43 = vld [vmem:[%s7323_s14 + $0xed0] sm:$0xff]  ;;  %v753_v39 = vld [vmem:[%s7323_s14 + $0xed8] sm:$0xff] }
 0x104   : > { %6244 = vmatpush3.bf16.msra.mxu0 %v6243_v28  ;;  %v267_v28 = vld [vmem:[%s7333_s11 + $0x38] sm:$0xff]  ;;  %v6343_v16 = vpack.c.bf16 %v763_v13, %v762_v10  ;;  %v6321_v44 = vpack.c.bf16 %v753_v39, %v752_v43  ;;  %v268_v10 = vld [vmem:[%s7333_s11 + $0x40] sm:$0xff] }
 0x105   : > { %6276 = vmatpush3.bf16.msra.mxu1 %v6275_v29  ;;  %6246 = vmatprep.subr.bf16.mxu0 %v6245_v30  ;;  %v6295_v29 = vpack.c.bf16 %v707_v22, %v706_v20  ;;  %v6265_v30 = vpack.c.bf16 %v693_v24, %v692_v23  ;;  %v7877_v52 = vrot.slane %v267_v28, %v7386_v14  ;;  %v733_v22 = vld [vmem:[%s7323_s14 + $0xe38] sm:$0xff]  ;;  %v764_v23 = vld [vmem:[%s7323_s14 + $0xf30] sm:$0xff] }
 0x106   : > { %6278 = vmatprep.subr.bf16.mxu1 %v6277_v35  ;;  %v6297_v35 = vpack.c.bf16 %v725_v26, %v724_v25  ;;  %v765_v25 = vld [vmem:[%s7323_s14 + $0xf38] sm:$0xff]  ;;  %v750_v26 = vld [vmem:[%s7323_s14 + $0xec0] sm:$0xff] }
 0x107   : > { %v841_v43 = vld [vmem:[%s7323_s14 + $0x1198] sm:$0xff] }
 0x108   : > { %6248 = vmatpush3.bf16.msra.mxu0 %v6247_v40  ;;  %v1567_v40 = vcombine.high %v267_v28, %v267_v28  ;;  %v782_v28 = vld [vmem:[%s7323_s14 + $0xfc0] sm:$0xff] }
 0x109   : > { %6280 = vmatpush3.bf16.msra.mxu1 %v6279_v53  ;;  %6250 = vmatprep.subr.bf16.mxu0 %v6249_v41  ;;  %v6267_v53 = vpack.c.bf16 %v677_v32, %v676_v31  ;;  %v6299_v41 = vpack.c.bf16 %v709_v36, %v708_v33  ;;  %v6347_v31 = vpack.c.bf16 %v765_v25, %v764_v23  ;;  %v734_v33 = vld [vmem:[%s7323_s14 + $0xe40] sm:$0xff] }
 0x10a   : > { %6282 = vmatprep.subr.bf16.mxu1 %v6281_v47  ;;  %v758_v47 = vld [vmem:[%s7323_s14 + $0xf00] sm:$0xff]  ;;  %v1584_v25 = vcombine.high %v268_v10, %v268_v10 }
 0x10b   : > { %v6335_v57 = vpack.c.bf16 %v759_v49, %v758_v47  ;;  %v766_v36 = vld [vmem:[%s7323_s14 + $0xf40] sm:$0xff]  ;;  %v737_v47 = vld [vmem:[%s7323_s14 + $0xe58] sm:$0xff] }
 0x10c   : > { %6252 = vmatpush3.bf16.msra.mxu0 %v6251_v54  ;;  %v776_v54 = vld [vmem:[%s7323_s14 + $0xf90] sm:$0xff]  ;;  %v838_v23 = vld [vmem:[%s7323_s14 + $0x1180] sm:$0xff]  ;;  %v7961_v39 = vrot.slane %v1584_v25, %v7386_v14  ;;  %v817_v25 = vld [vmem:[%s7323_s14 + $0x10d8] sm:$0xff] }
 0x10d   : > { %6284 = vmatpush3.bf16.msra.mxu1 %v6283_v34  ;;  %6254 = vmatprep.subr.bf16.mxu0 %v6253_v55  ;;  %v777_v34 = vld [vmem:[%s7323_s14 + $0xf98] sm:$0xff]  ;;  %v7882_v55 = vrot.slane %v1567_v40, %v7386_v14  ;;  %v784_v40 = vld [vmem:[%s7323_s14 + $0xfd0] sm:$0xff] }
 0x10e   : > { %6286 = vmatprep.subr.bf16.mxu1 %v6285_v60  ;;  %v728_v60 = vld [vmem:[%s7323_s14 + $0xe10] sm:$0xff]  ;;  %v6337_v46 = vpack.c.bf16 %v777_v34, %v776_v54  ;;  %v755_v54 = vld [vmem:[%s7323_s14 + $0xee8] sm:$0xff]  ;;  %v786_v34 = vld [vmem:[%s7323_s14 + $0xfe0] sm:$0xff] }
 0x10f   : > { %v1583_v4 = vcombine.high %v7882_v55, %v7882_v55  ;;  %v6307_v5 = vpack.c.bf16 %v729_v61, %v728_v60  ;;  %v6325_v60 = vpack.c.bf16 %v755_v54, %v754_v51  ;;  %v738_v61 = vld [vmem:[%s7323_s14 + $0xe60] sm:$0xff] }
 0x110   : > { %6256 = vmatpush3.bf16.msra.mxu0 %v6255_v0  ;;  %v747_v0 = vld [vmem:[%s7323_s14 + $0xea8] sm:$0xff]  ;;  %v842_v54 = vld [vmem:[%s7323_s14 + $0x11a0] sm:$0xff] }
 0x111   : > { %6288 = vmatpush3.bf16.msra.mxu1 %v6287_v1  ;;  %6258 = vmatprep.subr.bf16.mxu0 %v6257_v2  ;;  %v1582_v1 = vcombine.high %v7877_v52, %v7877_v52  ;;  %v778_v2 = vld [vmem:[%s7323_s14 + $0xfa0] sm:$0xff]  ;;  %v6309_v7 = vpack.c.bf16 %v747_v0, %v746_v63  ;;  %v771_v0 = vld [vmem:[%s7323_s14 + $0xf68] sm:$0xff] }
 0x112   : > { %6290 = vmatprep.subr.bf16.mxu1 %v6289_v6  ;;  %v6339_v6 = vpack.c.bf16 %v761_v62, %v760_v58  ;;  %v6341_v11 = vpack.c.bf16 %v779_v3, %v778_v2  ;;  %v739_v58 = vld [vmem:[%s7323_s14 + $0xe68] sm:$0xff]  ;;  %v757_v2 = vld [vmem:[%s7323_s14 + $0xef8] sm:$0xff] }
 0x114   : > { %6260 = vmatpush3.bf16.msra.mxu0 %v6259_v15  ;;  %v748_v15 = vld [vmem:[%s7323_s14 + $0xeb0] sm:$0xff] }
 0x115   : > { %6292 = vmatpush3.bf16.msra.mxu1 %v6291_v17  ;;  %6262 = vmatprep.subr.bf16.mxu0 %v6261_v18  ;;  %v749_v17 = vld [vmem:[%s7323_s14 + $0xeb8] sm:$0xff] }
 0x116   : > { %6294 = vmatprep.subr.bf16.mxu1 %v6293_v21  ;;  %v781_v18 = vld [vmem:[%s7323_s14 + $0xfb8] sm:$0xff]  ;;  %v6313_v20 = vpack.c.bf16 %v749_v17, %v748_v15  ;;  %v732_v21 = vld [vmem:[%s7323_s14 + $0xe30] sm:$0xff] }
 0x117   : > { %v740_v17 = vld [vmem:[%s7323_s14 + $0xe70] sm:$0xff] }
 0x118   : > { %6264 = vmatpush3.bf16.msra.mxu0 %v6263_v27  ;;  %v751_v27 = vld [vmem:[%s7323_s14 + $0xec8] sm:$0xff] }
 0x119   : > { %6296 = vmatpush3.bf16.msra.mxu1 %v6295_v29  ;;  %6266 = vmatprep.subr.bf16.mxu0 %v6265_v30  ;;  %v783_v29 = vld [vmem:[%s7323_s14 + $0xfc8] sm:$0xff]  ;;  %v6315_v30 = vpack.c.bf16 %v733_v22, %v732_v21  ;;  %v6317_v32 = vpack.c.bf16 %v751_v27, %v750_v26 }
 0x11a   : > { %6298 = vmatprep.subr.bf16.mxu1 %v6297_v35  ;;  %v735_v35 = vld [vmem:[%s7323_s14 + $0xe48] sm:$0xff]  ;;  %v6349_v37 = vpack.c.bf16 %v783_v29, %v782_v28  ;;  %v790_v29 = vld [vmem:[%s7323_s14 + $0x1000] sm:$0xff] }
 0x11b   : > { %v807_v21 = vld [vmem:[%s7323_s14 + $0x1088] sm:$0xff] }
 0x11c   : > { %6268 = vmatpush3.bf16.msra.mxu0 %v6267_v53  ;;  %v785_v53 = vld [vmem:[%s7323_s14 + $0xfd8] sm:$0xff] }
 0x11d   : > { %6300 = vmatpush3.bf16.msra.mxu1 %v6299_v41  ;;  %6302 = vmatprep.subr.bf16.mxu0 %v6301_v42  ;;  %v6319_v41 = vpack.c.bf16 %v735_v35, %v734_v33  ;;  %v6351_v42 = vpack.c.bf16 %v767_v38, %v766_v36  ;;  %v6353_v49 = vpack.c.bf16 %v785_v53, %v784_v40  ;;  %v823_v33 = vld [vmem:[%s7323_s14 + $0x1108] sm:$0xff]  ;;  %v808_v35 = vld [vmem:[%s7323_s14 + $0x1090] sm:$0xff]  ;;  %v809_v36 = vld [vmem:[%s7323_s14 + $0x1098] sm:$0xff] }
 0x11e   : > { %6334 = vmatprep.subr.bf16.mxu1 %v6333_v48  ;;  %v768_v48 = vld [vmem:[%s7323_s14 + $0xf50] sm:$0xff] }
 0x11f   : > { %2731 = vmatmul.mubr.f32.vlgmr.msra.gmra.mrb[12].mxu0 %v7800_v9  ;;  %v731_v9 = vld [vmem:[%s7323_s14 + $0xe28] sm:$0xff]  ;;  %v840_v38 = vld [vmem:[%s7323_s14 + $0x1190] sm:$0xff] }
 0x120   : > { %6304 = vmatpush3.bf16.msra.mxu0 %v6303_v56  ;;  %2801 = vmatmul.mubr.f32.vlgmr.msra.gmra.mrb[12].mxu1 %v7805_v12  ;;  %v780_v12 = vld [vmem:[%s7323_s14 + $0xfb0] sm:$0xff]  ;;  %v6311_v19 = vpack.c.bf16 %v731_v9, %v730_v8  ;;  %v787_v56 = vld [vmem:[%s7323_s14 + $0xfe8] sm:$0xff]  ;;  %v6327_v9 = vpack.c.bf16 %v739_v58, %v738_v61  ;;  %v794_v61 = vld [vmem:[%s7323_s14 + $0x1020] sm:$0xff] }
 0x121   : > { %6336 = vmatpush3.bf16.msra.mxu1 %v6335_v57  ;;  %6306 = vmatprep.subr.bf16.mxu0 %v6305_v59  ;;  %v6345_v24 = vpack.c.bf16 %v781_v18, %v780_v12  ;;  %v6323_v57 = vpack.c.bf16 %v737_v47, %v736_v45  ;;  %v6355_v59 = vpack.c.bf16 %v769_v50, %v768_v48  ;;  %v741_v12 = vld [vmem:[%s7323_s14 + $0xe78] sm:$0xff]  ;;  %v772_v18 = vld [vmem:[%s7323_s14 + $0xf70] sm:$0xff]  ;;  %v811_v50 = vld [vmem:[%s7323_s14 + $0x10a8] sm:$0xff] }
 0x122   : > { %6338 = vmatprep.subr.bf16.mxu1 %v6337_v46  ;;  %2870 = vmatprep.mubr.f32.mxu0 %v1582_v1  ;;  %v770_v46 = vld [vmem:[%s7323_s14 + $0xf60] sm:$0xff]  ;;  %v6357_v63 = vpack.c.bf16 %v787_v56, %v786_v34  ;;  %v756_v1 = vld [vmem:[%s7323_s14 + $0xef0] sm:$0xff]  ;;  %v6331_v26 = vpack.c.bf16 %v741_v12, %v740_v17  ;;  %v6401_v47 = vpack.c.bf16 %v841_v43, %v840_v38  ;;  %v825_v48 = vld [vmem:[%s7323_s14 + $0x1118] sm:$0xff] }
 0x123   : > { %2940 = vmatprep.mubr.f32.mxu1 %v1583_v4  ;;  %v6359_v13 = vpack.c.bf16 %v771_v0, %v770_v46  ;;  %v6329_v15 = vpack.c.bf16 %v757_v2, %v756_v1  ;;  %v824_v45 = vld [vmem:[%s7323_s14 + $0x1110] sm:$0xff]  ;;  %v843_v34 = vld [vmem:[%s7323_s14 + $0x11a8] sm:$0xff]  ;;  %v1600_v56 = vcombine.high %v7961_v39, %v7961_v39  ;;  %v826_v58 = vld [vmem:[%s7323_s14 + $0x1120] sm:$0xff] }
 0x124   : > { %6308 = vmatpush3.bf16.msra.mxu0 %v6307_v5  ;;  %v788_v5 = vld [vmem:[%s7323_s14 + $0xff0] sm:$0xff]  ;;  %v6405_v46 = vpack.c.bf16 %v843_v34, %v842_v54  ;;  %v813_v0 = vld [vmem:[%s7323_s14 + $0x10b8] sm:$0xff]  ;;  %v818_v38 = vld [vmem:[%s7323_s14 + $0x10e0] sm:$0xff] }
 0x125   : > { %6340 = vmatpush3.bf16.msra.mxu1 %v6339_v6  ;;  %6310 = vmatprep.subr.bf16.mxu0 %v6309_v7  ;;  %v789_v6 = vld [vmem:[%s7323_s14 + $0xff8] sm:$0xff]  ;;  %v819_v43 = vld [vmem:[%s7323_s14 + $0x10e8] sm:$0xff]  ;;  %v820_v54 = vld [vmem:[%s7323_s14 + $0x10f0] sm:$0xff] }
 0x126   : > { %6342 = vmatprep.subr.bf16.mxu1 %v6341_v11  ;;  %v845_v1 = vld [vmem:[%s7323_s14 + $0x11b8] sm:$0xff] }
 0x127   : > { %v821_v34 = vld [vmem:[%s7323_s14 + $0x10f8] sm:$0xff] }
 0x128   : > { %6312 = vmatpush3.bf16.msra.mxu0 %v6311_v19  ;;  %v6361_v19 = vpack.c.bf16 %v789_v6, %v788_v5  ;;  %v796_v5 = vld [vmem:[%s7323_s14 + $0x1030] sm:$0xff]  ;;  %v797_v6 = vld [vmem:[%s7323_s14 + $0x1038] sm:$0xff] }
 0x129   : > { %6344 = vmatpush3.bf16.msra.mxu1 %v6343_v16  ;;  %6314 = vmatprep.subr.bf16.mxu0 %v6313_v20  ;;  %v773_v16 = vld [vmem:[%s7323_s14 + $0xf78] sm:$0xff]  ;;  %v806_v20 = vld [vmem:[%s7323_s14 + $0x1080] sm:$0xff]  ;;  %v6379_v17 = vpack.c.bf16 %v797_v6, %v796_v5 }
 0x12a   : > { %6346 = vmatprep.subr.bf16.mxu1 %v6345_v24  ;;  %v839_v24 = vld [vmem:[%s7323_s14 + $0x1188] sm:$0xff]  ;;  %v6363_v27 = vpack.c.bf16 %v773_v16, %v772_v18  ;;  %v6365_v28 = vpack.c.bf16 %v807_v21, %v806_v20  ;;  %v830_v20 = vld [vmem:[%s7323_s14 + $0x1140] sm:$0xff]  ;;  %v837_v5 = vld [vmem:[%s7323_s14 + $0x1178] sm:$0xff] }
 0x12b   : > { %v799_v16 = vld [vmem:[%s7323_s14 + $0x1048] sm:$0xff]  ;;  %v870_v6 = vld [vmem:[%s7323_s14 + $0x1280] sm:$0xff] }
 0x12c   : > { %6316 = vmatpush3.bf16.msra.mxu0 %v6315_v30  ;;  %v791_v30 = vld [vmem:[%s7323_s14 + $0x1008] sm:$0xff] }
 0x12d   : > { %6348 = vmatpush3.bf16.msra.mxu1 %v6347_v31  ;;  %6318 = vmatprep.subr.bf16.mxu0 %v6317_v32  ;;  %v822_v31 = vld [vmem:[%s7323_s14 + $0x1100] sm:$0xff]  ;;  %v6397_v32 = vpack.c.bf16 %v839_v24, %v838_v23  ;;  %v6367_v40 = vpack.c.bf16 %v791_v30, %v790_v29  ;;  %v831_v23 = vld [vmem:[%s7323_s14 + $0x1148] sm:$0xff]  ;;  %v816_v24 = vld [vmem:[%s7323_s14 + $0x10d0] sm:$0xff] }
 0x12e   : > { %6350 = vmatprep.subr.bf16.mxu1 %v6349_v37  ;;  %v7956_v37 = vrot.slane %v268_v10, %v7386_v14  ;;  %v6399_v53 = vpack.c.bf16 %v823_v33, %v822_v31  ;;  %v814_v10 = vld [vmem:[%s7323_s14 + $0x10c0] sm:$0xff]  ;;  %v6415_v29 = vpack.c.bf16 %v831_v23, %v830_v20  ;;  %v6385_v30 = vpack.c.bf16 %v817_v25, %v816_v24  ;;  %v800_v31 = vld [vmem:[%s7323_s14 + $0x1050] sm:$0xff]  ;;  %v905_v25 = vld [vmem:[%s7323_s14 + $0x1398] sm:$0xff] }
 0x12f   : > { %v832_v33 = vld [vmem:[%s7323_s14 + $0x1150] sm:$0xff] }
 0x130   : > { %6320 = vmatpush3.bf16.msra.mxu0 %v6319_v41  ;;  %v6369_v41 = vpack.c.bf16 %v809_v36, %v808_v35  ;;  %v1599_v51 = vcombine.high %v7956_v37, %v7956_v37  ;;  %v833_v36 = vld [vmem:[%s7323_s14 + $0x1158] sm:$0xff]  ;;  %v872_v20 = vld [vmem:[%s7323_s14 + $0x1290] sm:$0xff] }
 0x131   : > { %6352 = vmatpush3.bf16.msra.mxu1 %v6351_v42  ;;  %6322 = vmatprep.subr.bf16.mxu0 %v6321_v44  ;;  %v792_v42 = vld [vmem:[%s7323_s14 + $0x1010] sm:$0xff]  ;;  %v793_v44 = vld [vmem:[%s7323_s14 + $0x1018] sm:$0xff] }
 0x132   : > { %v4573_v62 = vpop.f32.mrb[0].mxu0  ;;  %6354 = vmatprep.subr.bf16.mxu1 %v6353_v49  ;;  %v810_v49 = vld [vmem:[%s7323_s14 + $0x10a0] sm:$0xff]  ;;  %v904_v24 = vld [vmem:[%s7323_s14 + $0x1390] sm:$0xff] }
 0x133   : > { %v4608_v3 = vpop.f32.mrb[0].mxu1  ;;  %v4574_v4 = vpop.f32.mrb[1].mxu0 }
 0x134   : > { %v4575_v7 = vadd.f32 %v4574_v4, %v4573_v62  ;;  %v4609_v8 = vpop.f32.mrb[1].mxu1  ;;  %6324 = vmatpush3.bf16.msra.mxu0 %v6323_v57  ;;  %v6371_v57 = vpack.c.bf16 %v793_v44, %v792_v42  ;;  %v827_v62 = vld [vmem:[%s7323_s14 + $0x1128] sm:$0xff]  ;;  %v6419_v42 = vpack.c.bf16 %v833_v36, %v832_v33  ;;  %v6389_v44 = vpack.c.bf16 %v819_v43, %v818_v38  ;;  %v874_v36 = vld [vmem:[%s7323_s14 + $0x12a0] sm:$0xff] }
 0x135   : > { %v4610_v11 = vadd.f32 %v4609_v8, %v4608_v3  ;;  %6356 = vmatpush3.bf16.msra.mxu1 %v6355_v59  ;;  %6326 = vmatprep.subr.bf16.mxu0 %v6325_v60  ;;  %v6403_v59 = vpack.c.bf16 %v825_v48, %v824_v45  ;;  %v6373_v60 = vpack.c.bf16 %v811_v50, %v810_v49  ;;  %v802_v45 = vld [vmem:[%s7323_s14 + $0x1060] sm:$0xff]  ;;  %v875_v38 = vld [vmem:[%s7323_s14 + $0x12a8] sm:$0xff] }
 0x136   : > { %6358 = vmatprep.subr.bf16.mxu1 %v6357_v63  ;;  %v812_v63 = vld [vmem:[%s7323_s14 + $0x10b0] sm:$0xff]  ;;  %v6407_v3 = vpack.c.bf16 %v827_v62, %v826_v58  ;;  %v834_v48 = vld [vmem:[%s7323_s14 + $0x1160] sm:$0xff]  ;;  %v6465_v33 = vpack.c.bf16 %v905_v25, %v904_v24  ;;  %v883_v25 = vld [vmem:[%s7323_s14 + $0x12e8] sm:$0xff] }
 0x137   : > { %v7945_v22 = vadd.f32 %v4610_v11, %v4575_v7  ;;  %v6377_v4 = vpack.c.bf16 %v813_v0, %v812_v63  ;;  %v828_v7 = vld [vmem:[%s7323_s14 + $0x1130] sm:$0xff]  ;;  %v815_v11 = vld [vmem:[%s7323_s14 + $0x10c8] sm:$0xff]  ;;  %v6393_v0 = vpack.c.bf16 %v821_v34, %v820_v54  ;;  %v877_v54 = vld [vmem:[%s7323_s14 + $0x12b8] sm:$0xff] }
 0x138   : > { %6328 = vmatpush3.bf16.msra.mxu0 %v6327_v9  ;;  %v829_v9 = vld [vmem:[%s7323_s14 + $0x1138] sm:$0xff]  ;;  %v6381_v18 = vpack.c.bf16 %v815_v11, %v814_v10  ;;  %v882_v24 = vld [vmem:[%s7323_s14 + $0x12e0] sm:$0xff] }
 0x139   : > { %6360 = vmatpush3.bf16.msra.mxu1 %v6359_v13  ;;  %6330 = vmatprep.subr.bf16.mxu0 %v6329_v15  ;;  %v846_v13 = vld [vmem:[%s7323_s14 + $0x11c0] sm:$0xff]  ;;  %v847_v15 = vld [vmem:[%s7323_s14 + $0x11c8] sm:$0xff]  ;;  %v6411_v12 = vpack.c.bf16 %v829_v9, %v828_v7  ;;  %v909_v34 = vld [vmem:[%s7323_s14 + $0x13b8] sm:$0xff] }
 0x13a   : > { %6362 = vmatprep.subr.bf16.mxu1 %v6361_v19  ;;  %v798_v19 = vld [vmem:[%s7323_s14 + $0x1040] sm:$0xff]  ;;  %v6413_v21 = vpack.c.bf16 %v847_v15, %v846_v13  ;;  %v871_v7 = vld [vmem:[%s7323_s14 + $0x1288] sm:$0xff] }
 0x13b   : > { %v903_v9 = vld [vmem:[%s7323_s14 + $0x1388] sm:$0xff]  ;;  %v6429_v15 = vpack.c.bf16 %v871_v7, %v870_v6  ;;  %v894_v6 = vld [vmem:[%s7323_s14 + $0x1340] sm:$0xff] }
 0x13c   : > { %6332 = vmatpush3.bf16.msra.mxu0 %v6331_v26  ;;  %v848_v26 = vld [vmem:[%s7323_s14 + $0x11d0] sm:$0xff] }
 0x13d   : > { %6364 = vmatpush3.bf16.msra.mxu1 %v6363_v27  ;;  %6366 = vmatprep.subr.bf16.mxu0 %v6365_v28  ;;  %v849_v27 = vld [vmem:[%s7323_s14 + $0x11d8] sm:$0xff]  ;;  %v6383_v28 = vpack.c.bf16 %v799_v16, %v798_v19  ;;  %v887_v16 = vld [vmem:[%s7323_s14 + $0x1308] sm:$0xff] }
 0x13e   : > { %6398 = vmatprep.subr.bf16.mxu1 %v6397_v32  ;;  %v801_v32 = vld [vmem:[%s7323_s14 + $0x1058] sm:$0xff]  ;;  %v6417_v35 = vpack.c.bf16 %v849_v27, %v848_v26 }
 0x13f   : > { %2871 = vmatmul.mubr.f32.vlgmr.msra.gmra.mrb[14].mxu0 %v7877_v52  ;;  %v795_v52 = vld [vmem:[%s7323_s14 + $0x1028] sm:$0xff] }
 0x140   : > { %6368 = vmatpush3.bf16.msra.mxu0 %v6367_v40  ;;  %2941 = vmatmul.mubr.f32.vlgmr.msra.gmra.mrb[14].mxu1 %v7882_v55  ;;  %v844_v55 = vld [vmem:[%s7323_s14 + $0x11b0] sm:$0xff]  ;;  %v6375_v2 = vpack.c.bf16 %v795_v52, %v794_v61  ;;  %v850_v40 = vld [vmem:[%s7323_s14 + $0x11e0] sm:$0xff] }
 0x141   : > { %6400 = vmatpush3.bf16.msra.mxu1 %v6399_v53  ;;  %6370 = vmatprep.subr.bf16.mxu0 %v6369_v41  ;;  %v6409_v8 = vpack.c.bf16 %v845_v1, %v844_v55  ;;  %v851_v53 = vld [vmem:[%s7323_s14 + $0x11e8] sm:$0xff]  ;;  %v6387_v41 = vpack.c.bf16 %v801_v32, %v800_v31  ;;  %v804_v55 = vld [vmem:[%s7323_s14 + $0x1070] sm:$0xff]  ;;  %v805_v1 = vld [vmem:[%s7323_s14 + $0x1078] sm:$0xff] }
 0x142   : > { %6402 = vmatprep.subr.bf16.mxu1 %v6401_v47  ;;  %3010 = vmatprep.mubr.f32.mxu0 %v1599_v51  ;;  %v803_v47 = vld [vmem:[%s7323_s14 + $0x1068] sm:$0xff]  ;;  %v6421_v50 = vpack.c.bf16 %v851_v53, %v850_v40  ;;  %v857_v31 = vld [vmem:[%s7323_s14 + $0x1218] sm:$0xff]  ;;  %v888_v32 = vld [vmem:[%s7323_s14 + $0x1310] sm:$0xff] }
 0x143   : > { %3080 = vmatprep.mubr.f32.mxu1 %v1600_v56  ;;  %v835_v51 = vld [vmem:[%s7323_s14 + $0x1168] sm:$0xff]  ;;  %v6391_v58 = vpack.c.bf16 %v803_v47, %v802_v45  ;;  %v906_v40 = vld [vmem:[%s7323_s14 + $0x13a0] sm:$0xff]  ;;  %v6437_v45 = vpack.c.bf16 %v875_v38, %v874_v36 }
 0x144   : > { %6372 = vmatpush3.bf16.msra.mxu0 %v6371_v57  ;;  %v6423_v63 = vpack.c.bf16 %v835_v51, %v834_v48  ;;  %v907_v53 = vld [vmem:[%s7323_s14 + $0x13a8] sm:$0xff]  ;;  %v858_v47 = vld [vmem:[%s7323_s14 + $0x1220] sm:$0xff]  ;;  %v876_v51 = vld [vmem:[%s7323_s14 + $0x12b0] sm:$0xff] }
 0x145   : > { %6404 = vmatpush3.bf16.msra.mxu1 %v6403_v59  ;;  %6374 = vmatprep.subr.bf16.mxu0 %v6373_v60  ;;  %v852_v59 = vld [vmem:[%s7323_s14 + $0x11f0] sm:$0xff]  ;;  %v853_v60 = vld [vmem:[%s7323_s14 + $0x11f8] sm:$0xff]  ;;  %v890_v48 = vld [vmem:[%s7323_s14 + $0x1320] sm:$0xff] }
 0x146   : > { %6406 = vmatprep.subr.bf16.mxu1 %v6405_v46  ;;  %v269_v46 = vld [vmem:[%s7333_s11 + $0x48] sm:$0xff] }
 0x147   : > { %v1601_v10 = vcombine.high %v269_v46, %v269_v46  ;;  %v8036_v23 = vrot.slane %v269_v46, %v7386_v14  ;;  %v893_v46 = vld [vmem:[%s7323_s14 + $0x1338] sm:$0xff] }
 0x148   : > { %6376 = vmatpush3.bf16.msra.mxu0 %v6375_v2  ;;  %v836_v2 = vld [vmem:[%s7323_s14 + $0x1170] sm:$0xff] }
 0x149   : > { %6408 = vmatpush3.bf16.msra.mxu1 %v6407_v3  ;;  %6378 = vmatprep.subr.bf16.mxu0 %v6377_v4  ;;  %v6425_v4 = vpack.c.bf16 %v853_v60, %v852_v59  ;;  %v6427_v13 = vpack.c.bf16 %v837_v5, %v836_v2  ;;  %v8041_v26 = vrot.slane %v1601_v10, %v7386_v14  ;;  %v860_v60 = vld [vmem:[%s7323_s14 + $0x1230] sm:$0xff]  ;;  %v863_v5 = vld [vmem:[%s7323_s14 + $0x1248] sm:$0xff]  ;;  %v881_v10 = vld [vmem:[%s7323_s14 + $0x12d8] sm:$0xff] }
 0x14a   : > { %6410 = vmatprep.subr.bf16.mxu1 %v6409_v8  ;;  %v902_v8 = vld [vmem:[%s7323_s14 + $0x1380] sm:$0xff]  ;;  %v1616_v43 = vcombine.high %v8036_v23, %v8036_v23  ;;  %v6441_v59 = vpack.c.bf16 %v877_v54, %v876_v51 }
 0x14b   : > { %v6461_v19 = vpack.c.bf16 %v903_v9, %v902_v8  ;;  %v895_v8 = vld [vmem:[%s7323_s14 + $0x1348] sm:$0xff]  ;;  %v880_v9 = vld [vmem:[%s7323_s14 + $0x12d0] sm:$0xff] }
 0x14c   : > { %6380 = vmatpush3.bf16.msra.mxu0 %v6379_v17  ;;  %v854_v17 = vld [vmem:[%s7323_s14 + $0x1200] sm:$0xff] }
 0x14d   : > { %6412 = vmatpush3.bf16.msra.mxu1 %v6411_v12  ;;  %6382 = vmatprep.subr.bf16.mxu0 %v6381_v18  ;;  %v855_v12 = vld [vmem:[%s7323_s14 + $0x1208] sm:$0xff]  ;;  %v886_v18 = vld [vmem:[%s7323_s14 + $0x1300] sm:$0xff] }
 0x14e   : > { %6414 = vmatprep.subr.bf16.mxu1 %v6413_v21  ;;  %v873_v21 = vld [vmem:[%s7323_s14 + $0x1298] sm:$0xff]  ;;  %v6431_v27 = vpack.c.bf16 %v855_v12, %v854_v17  ;;  %v6479_v17 = vpack.c.bf16 %v895_v8, %v894_v6  ;;  %v6449_v12 = vpack.c.bf16 %v881_v10, %v880_v9  ;;  %v936_v6 = vld [vmem:[%s7323_s14 + $0x1490] sm:$0xff] }
 0x14f   : > { %v968_v9 = vld [vmem:[%s7323_s14 + $0x1590] sm:$0xff]  ;;  %v969_v10 = vld [vmem:[%s7323_s14 + $0x1598] sm:$0xff] }
 0x150   : > { %6384 = vmatpush3.bf16.msra.mxu0 %v6383_v28  ;;  %v6463_v28 = vpack.c.bf16 %v887_v16, %v886_v18  ;;  %v864_v18 = vld [vmem:[%s7323_s14 + $0x1250] sm:$0xff] }
 0x151   : > { %6416 = vmatpush3.bf16.msra.mxu1 %v6415_v29  ;;  %6386 = vmatprep.subr.bf16.mxu0 %v6385_v30  ;;  %v6433_v29 = vpack.c.bf16 %v873_v21, %v872_v20  ;;  %v856_v30 = vld [vmem:[%s7323_s14 + $0x1210] sm:$0xff]  ;;  %v897_v21 = vld [vmem:[%s7323_s14 + $0x1358] sm:$0xff] }
 0x152   : > { %v4643_v49 = vpop.f32.mrb[2].mxu0  ;;  %6418 = vmatprep.subr.bf16.mxu1 %v6417_v35  ;;  %v889_v35 = vld [vmem:[%s7323_s14 + $0x1318] sm:$0xff]  ;;  %v896_v16 = vld [vmem:[%s7323_s14 + $0x1350] sm:$0xff] }
 0x153   : > { %v4644_v56 = vpop.f32.mrb[3].mxu0  ;;  %v4678_v57 = vpop.f32.mrb[2].mxu1 }
 0x154   : > { %v4645_v61 = vadd.f32 %v4644_v56, %v4643_v49  ;;  %6388 = vmatpush3.bf16.msra.mxu0 %v6387_v41  ;;  %v4679_v52 = vpop.f32.mrb[3].mxu1  ;;  %v1617_v41 = vcombine.high %v8041_v26, %v8041_v26  ;;  %v6469_v49 = vpack.c.bf16 %v907_v53, %v906_v40  ;;  %v884_v40 = vld [vmem:[%s7323_s14 + $0x12f0] sm:$0xff]  ;;  %v885_v53 = vld [vmem:[%s7323_s14 + $0x12f8] sm:$0xff] }
 0x155   : > { %v4680_v62 = vadd.f32 %v4679_v52, %v4678_v57  ;;  %6420 = vmatpush3.bf16.msra.mxu1 %v6419_v42  ;;  %6390 = vmatprep.subr.bf16.mxu0 %v6389_v44  ;;  %v6435_v42 = vpack.c.bf16 %v857_v31, %v856_v30  ;;  %v6467_v44 = vpack.c.bf16 %v889_v35, %v888_v32  ;;  %v892_v52 = vld [vmem:[%s7323_s14 + $0x1330] sm:$0xff]  ;;  %v866_v32 = vld [vmem:[%s7323_s14 + $0x1260] sm:$0xff] }
 0x156   : > { %v2033_v3 = vadd.f32 %v4645_v61, %v7945_v22  ;;  %6422 = vmatprep.subr.bf16.mxu1 %v6421_v50  ;;  %v6395_v22 = vpack.c.bf16 %v805_v1, %v804_v55  ;;  %v891_v50 = vld [vmem:[%s7323_s14 + $0x1328] sm:$0xff]  ;;  %v861_v61 = vld [vmem:[%s7323_s14 + $0x1238] sm:$0xff]  ;;  %v6475_v2 = vpack.c.bf16 %v893_v46, %v892_v52  ;;  %v6483_v30 = vpack.c.bf16 %v897_v21, %v896_v16  ;;  %v898_v35 = vld [vmem:[%s7323_s14 + $0x1360] sm:$0xff] }
 0x157   : > { %v6471_v57 = vpack.c.bf16 %v891_v50, %v890_v48  ;;  %v911_v55 = vld [vmem:[%s7323_s14 + $0x13c8] sm:$0xff]  ;;  %v6443_v1 = vpack.c.bf16 %v861_v61, %v860_v60  ;;  %v6453_v31 = vpack.c.bf16 %v883_v25, %v882_v24  ;;  %v6457_v54 = vpack.c.bf16 %v885_v53, %v884_v40  ;;  %v901_v60 = vld [vmem:[%s7323_s14 + $0x1378] sm:$0xff]  ;;  %v934_v61 = vld [vmem:[%s7323_s14 + $0x1480] sm:$0xff] }
 0x158   : > { %v8027_v11 = vadd.f32 %v4680_v62, %v2033_v3  ;;  %6392 = vmatpush3.bf16.msra.mxu0 %v6391_v58  ;;  %v878_v62 = vld [vmem:[%s7323_s14 + $0x12c0] sm:$0xff]  ;;  %v935_v52 = vld [vmem:[%s7323_s14 + $0x1488] sm:$0xff]  ;;  %v6529_v16 = vpack.c.bf16 %v969_v10, %v968_v9  ;;  %v941_v40 = vld [vmem:[%s7323_s14 + $0x14b8] sm:$0xff] }
 0x159   : > { %6424 = vmatpush3.bf16.msra.mxu1 %v6423_v63  ;;  %6394 = vmatprep.subr.bf16.mxu0 %v6393_v0  ;;  %v879_v63 = vld [vmem:[%s7323_s14 + $0x12c8] sm:$0xff]  ;;  %v910_v0 = vld [vmem:[%s7323_s14 + $0x13c0] sm:$0xff]  ;;  %v973_v53 = vld [vmem:[%s7323_s14 + $0x15b8] sm:$0xff] }
 0x15a   : > { %6426 = vmatprep.subr.bf16.mxu1 %v6425_v4  ;;  %v6445_v3 = vpack.c.bf16 %v879_v63, %v878_v62  ;;  %v862_v4 = vld [vmem:[%s7323_s14 + $0x1240] sm:$0xff]  ;;  %v6477_v7 = vpack.c.bf16 %v911_v55, %v910_v0  ;;  %v967_v46 = vld [vmem:[%s7323_s14 + $0x1588] sm:$0xff]  ;;  %v6493_v55 = vpack.c.bf16 %v935_v52, %v934_v61 }
 0x15b   : > { %v938_v21 = vld [vmem:[%s7323_s14 + $0x14a0] sm:$0xff]  ;;  %v939_v24 = vld [vmem:[%s7323_s14 + $0x14a8] sm:$0xff] }
 0x15c   : > { %6396 = vmatpush3.bf16.msra.mxu0 %v6395_v22  ;;  %v912_v22 = vld [vmem:[%s7323_s14 + $0x13d0] sm:$0xff]  ;;  %v958_v61 = vld [vmem:[%s7323_s14 + $0x1540] sm:$0xff]  ;;  %v947_v10 = vld [vmem:[%s7323_s14 + $0x14e8] sm:$0xff] }
 0x15d   : > { %6428 = vmatpush3.bf16.msra.mxu1 %v6427_v13  ;;  %6430 = vmatprep.subr.bf16.mxu0 %v6429_v15  ;;  %v913_v13 = vld [vmem:[%s7323_s14 + $0x13d8] sm:$0xff]  ;;  %v6447_v15 = vpack.c.bf16 %v863_v5, %v862_v4  ;;  %v951_v5 = vld [vmem:[%s7323_s14 + $0x1508] sm:$0xff]  ;;  %v946_v9 = vld [vmem:[%s7323_s14 + $0x14e0] sm:$0xff] }
 0x15e   : > { %6462 = vmatprep.subr.bf16.mxu1 %v6461_v19  ;;  %v865_v19 = vld [vmem:[%s7323_s14 + $0x1258] sm:$0xff]  ;;  %v6481_v20 = vpack.c.bf16 %v913_v13, %v912_v22 }
 0x15f   : > { %3011 = vmatmul.mubr.f32.vlgmr.msra.gmra.mrb[16].mxu0 %v7956_v37  ;;  %v859_v37 = vld [vmem:[%s7323_s14 + $0x1228] sm:$0xff] }
 0x160   : > { %6432 = vmatpush3.bf16.msra.mxu0 %v6431_v27  ;;  %3081 = vmatmul.mubr.f32.vlgmr.msra.gmra.mrb[16].mxu1 %v7961_v39  ;;  %v908_v39 = vld [vmem:[%s7323_s14 + $0x13b0] sm:$0xff]  ;;  %v6439_v56 = vpack.c.bf16 %v859_v37, %v858_v47  ;;  %v914_v27 = vld [vmem:[%s7323_s14 + $0x13e0] sm:$0xff] }
 0x161   : > { %6464 = vmatpush3.bf16.msra.mxu1 %v6463_v28  ;;  %6434 = vmatprep.subr.bf16.mxu0 %v6433_v29  ;;  %v6473_v58 = vpack.c.bf16 %v909_v34, %v908_v39  ;;  %v915_v28 = vld [vmem:[%s7323_s14 + $0x13e8] sm:$0xff]  ;;  %v6451_v29 = vpack.c.bf16 %v865_v19, %v864_v18  ;;  %v868_v39 = vld [vmem:[%s7323_s14 + $0x1270] sm:$0xff]  ;;  %v869_v34 = vld [vmem:[%s7323_s14 + $0x1278] sm:$0xff] }
 0x162   : > { %6466 = vmatprep.subr.bf16.mxu1 %v6465_v33  ;;  %3150 = vmatprep.mubr.f32.mxu0 %v1616_v43  ;;  %v867_v33 = vld [vmem:[%s7323_s14 + $0x1268] sm:$0xff]  ;;  %v6485_v38 = vpack.c.bf16 %v915_v28, %v914_v27  ;;  %v921_v18 = vld [vmem:[%s7323_s14 + $0x1418] sm:$0xff]  ;;  %v952_v19 = vld [vmem:[%s7323_s14 + $0x1510] sm:$0xff] }
 0x163   : > { %3220 = vmatprep.mubr.f32.mxu1 %v1617_v41  ;;  %v899_v43 = vld [vmem:[%s7323_s14 + $0x1368] sm:$0xff]  ;;  %v6455_v48 = vpack.c.bf16 %v867_v33, %v866_v32  ;;  %v970_v27 = vld [vmem:[%s7323_s14 + $0x15a0] sm:$0xff]  ;;  %v6501_v32 = vpack.c.bf16 %v939_v24, %v938_v21 }
 0x164   : > { %6436 = vmatpush3.bf16.msra.mxu0 %v6435_v42  ;;  %v6487_v51 = vpack.c.bf16 %v899_v43, %v898_v35  ;;  %v971_v28 = vld [vmem:[%s7323_s14 + $0x15a8] sm:$0xff]  ;;  %v922_v33 = vld [vmem:[%s7323_s14 + $0x1420] sm:$0xff]  ;;  %v940_v43 = vld [vmem:[%s7323_s14 + $0x14b0] sm:$0xff] }
 0x165   : > { %6468 = vmatpush3.bf16.msra.mxu1 %v6467_v44  ;;  %6438 = vmatprep.subr.bf16.mxu0 %v6437_v45  ;;  %v916_v44 = vld [vmem:[%s7323_s14 + $0x13f0] sm:$0xff]  ;;  %v917_v45 = vld [vmem:[%s7323_s14 + $0x13f8] sm:$0xff]  ;;  %v954_v35 = vld [vmem:[%s7323_s14 + $0x1520] sm:$0xff] }
 0x166   : > { %6470 = vmatprep.subr.bf16.mxu1 %v6469_v49  ;;  %v270_v49 = vld [vmem:[%s7333_s11 + $0x50] sm:$0xff] }
 0x167   : > { %v1618_v62 = vcombine.high %v270_v49, %v270_v49  ;;  %v8116_v8 = vrot.slane %v270_v49, %v7386_v14  ;;  %v957_v49 = vld [vmem:[%s7323_s14 + $0x1538] sm:$0xff] }
 0x168   : > { %6440 = vmatpush3.bf16.msra.mxu0 %v6439_v56  ;;  %v900_v56 = vld [vmem:[%s7323_s14 + $0x1370] sm:$0xff] }
 0x169   : > { %6472 = vmatpush3.bf16.msra.mxu1 %v6471_v57  ;;  %6442 = vmatprep.subr.bf16.mxu0 %v6441_v59  ;;  %v6489_v59 = vpack.c.bf16 %v917_v45, %v916_v44  ;;  %v6491_v0 = vpack.c.bf16 %v901_v60, %v900_v56  ;;  %v8121_v22 = vrot.slane %v1618_v62, %v7386_v14  ;;  %v924_v45 = vld [vmem:[%s7323_s14 + $0x1430] sm:$0xff]  ;;  %v927_v60 = vld [vmem:[%s7323_s14 + $0x1448] sm:$0xff]  ;;  %v945_v62 = vld [vmem:[%s7323_s14 + $0x14d8] sm:$0xff] }
 0x16a   : > { %6474 = vmatprep.subr.bf16.mxu1 %v6473_v58  ;;  %v966_v58 = vld [vmem:[%s7323_s14 + $0x1580] sm:$0xff]  ;;  %v1633_v25 = vcombine.high %v8116_v8, %v8116_v8  ;;  %v6505_v44 = vpack.c.bf16 %v941_v40, %v940_v43 }
 0x16b   : > { %v6525_v4 = vpack.c.bf16 %v967_v46, %v966_v58  ;;  %v959_v58 = vld [vmem:[%s7323_s14 + $0x1548] sm:$0xff]  ;;  %v944_v46 = vld [vmem:[%s7323_s14 + $0x14d0] sm:$0xff] }
 0x16c   : > { %6444 = vmatpush3.bf16.msra.mxu0 %v6443_v1  ;;  %v918_v1 = vld [vmem:[%s7323_s14 + $0x1400] sm:$0xff] }
 0x16d   : > { %6476 = vmatpush3.bf16.msra.mxu1 %v6475_v2  ;;  %6446 = vmatprep.subr.bf16.mxu0 %v6445_v3  ;;  %v919_v2 = vld [vmem:[%s7323_s14 + $0x1408] sm:$0xff]  ;;  %v950_v3 = vld [vmem:[%s7323_s14 + $0x1500] sm:$0xff] }
 0x16e   : > { %6478 = vmatprep.subr.bf16.mxu1 %v6477_v7  ;;  %v937_v7 = vld [vmem:[%s7323_s14 + $0x1498] sm:$0xff]  ;;  %v6495_v13 = vpack.c.bf16 %v919_v2, %v918_v1  ;;  %v6543_v1 = vpack.c.bf16 %v959_v58, %v958_v61  ;;  %v6513_v2 = vpack.c.bf16 %v945_v62, %v944_v46  ;;  %v1000_v61 = vld [vmem:[%s7323_s14 + $0x1690] sm:$0xff] }
 0x16f   : > { %v1032_v46 = vld [vmem:[%s7323_s14 + $0x1790] sm:$0xff]  ;;  %v1033_v62 = vld [vmem:[%s7323_s14 + $0x1798] sm:$0xff] }
 0x170   : > { %6448 = vmatpush3.bf16.msra.mxu0 %v6447_v15  ;;  %v6527_v15 = vpack.c.bf16 %v951_v5, %v950_v3  ;;  %v928_v3 = vld [vmem:[%s7323_s14 + $0x1450] sm:$0xff] }
 0x171   : > { %6480 = vmatpush3.bf16.msra.mxu1 %v6479_v17  ;;  %6450 = vmatprep.subr.bf16.mxu0 %v6449_v12  ;;  %v6497_v17 = vpack.c.bf16 %v937_v7, %v936_v6  ;;  %v920_v12 = vld [vmem:[%s7323_s14 + $0x1410] sm:$0xff]  ;;  %v961_v7 = vld [vmem:[%s7323_s14 + $0x1558] sm:$0xff] }
 0x172   : > { %v4713_v36 = vpop.f32.mrb[4].mxu0  ;;  %6482 = vmatprep.subr.bf16.mxu1 %v6481_v20  ;;  %v953_v20 = vld [vmem:[%s7323_s14 + $0x1518] sm:$0xff]  ;;  %v960_v5 = vld [vmem:[%s7323_s14 + $0x1550] sm:$0xff] }
 0x173   : > { %v4714_v41 = vpop.f32.mrb[5].mxu0  ;;  %v4748_v42 = vpop.f32.mrb[4].mxu1 }
 0x174   : > { %v4715_v47 = vadd.f32 %v4714_v41, %v4713_v36  ;;  %6452 = vmatpush3.bf16.msra.mxu0 %v6451_v29  ;;  %v4749_v37 = vpop.f32.mrb[5].mxu1  ;;  %v1634_v29 = vcombine.high %v8121_v22, %v8121_v22  ;;  %v6533_v36 = vpack.c.bf16 %v971_v28, %v970_v27  ;;  %v948_v27 = vld [vmem:[%s7323_s14 + $0x14f0] sm:$0xff]  ;;  %v949_v28 = vld [vmem:[%s7323_s14 + $0x14f8] sm:$0xff] }
 0x175   : > { %v4750_v50 = vadd.f32 %v4749_v37, %v4748_v42  ;;  %6484 = vmatpush3.bf16.msra.mxu1 %v6483_v30  ;;  %6454 = vmatprep.subr.bf16.mxu0 %v6453_v31  ;;  %v6499_v30 = vpack.c.bf16 %v921_v18, %v920_v12  ;;  %v6531_v31 = vpack.c.bf16 %v953_v20, %v952_v19  ;;  %v956_v37 = vld [vmem:[%s7323_s14 + $0x1530] sm:$0xff]  ;;  %v930_v19 = vld [vmem:[%s7323_s14 + $0x1460] sm:$0xff] }
 0x176   : > { %v2173_v57 = vadd.f32 %v4715_v47, %v8027_v11  ;;  %6486 = vmatprep.subr.bf16.mxu1 %v6485_v38  ;;  %v6459_v11 = vpack.c.bf16 %v869_v34, %v868_v39  ;;  %v955_v38 = vld [vmem:[%s7323_s14 + $0x1528] sm:$0xff]  ;;  %v925_v47 = vld [vmem:[%s7323_s14 + $0x1438] sm:$0xff]  ;;  %v6539_v56 = vpack.c.bf16 %v957_v49, %v956_v37  ;;  %v6547_v12 = vpack.c.bf16 %v961_v7, %v960_v5  ;;  %v962_v20 = vld [vmem:[%s7323_s14 + $0x1560] sm:$0xff] }
 0x177   : > { %v6535_v42 = vpack.c.bf16 %v955_v38, %v954_v35  ;;  %v975_v39 = vld [vmem:[%s7323_s14 + $0x15c8] sm:$0xff]  ;;  %v6507_v34 = vpack.c.bf16 %v925_v47, %v924_v45  ;;  %v6517_v18 = vpack.c.bf16 %v947_v10, %v946_v9  ;;  %v6521_v40 = vpack.c.bf16 %v949_v28, %v948_v27  ;;  %v965_v45 = vld [vmem:[%s7323_s14 + $0x1578] sm:$0xff]  ;;  %v998_v47 = vld [vmem:[%s7323_s14 + $0x1680] sm:$0xff] }
 0x178   : > { %v8107_v63 = vadd.f32 %v4750_v50, %v2173_v57  ;;  %6456 = vmatpush3.bf16.msra.mxu0 %v6455_v48  ;;  %v942_v50 = vld [vmem:[%s7323_s14 + $0x14c0] sm:$0xff]  ;;  %v999_v37 = vld [vmem:[%s7323_s14 + $0x1688] sm:$0xff]  ;;  %v6593_v5 = vpack.c.bf16 %v1033_v62, %v1032_v46  ;;  %v1005_v27 = vld [vmem:[%s7323_s14 + $0x16b8] sm:$0xff] }
 0x179   : > { %6488 = vmatpush3.bf16.msra.mxu1 %v6487_v51  ;;  %6458 = vmatprep.subr.bf16.mxu0 %v6457_v54  ;;  %v943_v51 = vld [vmem:[%s7323_s14 + $0x14c8] sm:$0xff]  ;;  %v974_v54 = vld [vmem:[%s7323_s14 + $0x15c0] sm:$0xff]  ;;  %v1037_v28 = vld [vmem:[%s7323_s14 + $0x17b8] sm:$0xff] }
 0x17a   : > { %6490 = vmatprep.subr.bf16.mxu1 %v6489_v59  ;;  %v6509_v57 = vpack.c.bf16 %v943_v51, %v942_v50  ;;  %v926_v59 = vld [vmem:[%s7323_s14 + $0x1440] sm:$0xff]  ;;  %v6541_v52 = vpack.c.bf16 %v975_v39, %v974_v54  ;;  %v1031_v49 = vld [vmem:[%s7323_s14 + $0x1788] sm:$0xff]  ;;  %v6557_v39 = vpack.c.bf16 %v999_v37, %v998_v47 }
 0x17b   : > { %v1002_v7 = vld [vmem:[%s7323_s14 + $0x16a0] sm:$0xff]  ;;  %v1003_v9 = vld [vmem:[%s7323_s14 + $0x16a8] sm:$0xff] }
 0x17c   : > { %6460 = vmatpush3.bf16.msra.mxu0 %v6459_v11  ;;  %v976_v11 = vld [vmem:[%s7323_s14 + $0x15d0] sm:$0xff]  ;;  %v1022_v47 = vld [vmem:[%s7323_s14 + $0x1740] sm:$0xff]  ;;  %v1011_v62 = vld [vmem:[%s7323_s14 + $0x16e8] sm:$0xff] }
 0x17d   : > { %6492 = vmatpush3.bf16.msra.mxu1 %v6491_v0  ;;  %6494 = vmatprep.subr.bf16.mxu0 %v6493_v55  ;;  %v977_v0 = vld [vmem:[%s7323_s14 + $0x15d8] sm:$0xff]  ;;  %v6511_v55 = vpack.c.bf16 %v927_v60, %v926_v59  ;;  %v1015_v60 = vld [vmem:[%s7323_s14 + $0x1708] sm:$0xff]  ;;  %v1010_v46 = vld [vmem:[%s7323_s14 + $0x16e0] sm:$0xff] }
 0x17e   : > { %6526 = vmatprep.subr.bf16.mxu1 %v6525_v4  ;;  %v929_v4 = vld [vmem:[%s7323_s14 + $0x1458] sm:$0xff]  ;;  %v6545_v6 = vpack.c.bf16 %v977_v0, %v976_v11 }
 0x17f   : > { %3151 = vmatmul.mubr.f32.vlgmr.msra.gmra.mrb[18].mxu0 %v8036_v23  ;;  %v923_v23 = vld [vmem:[%s7323_s14 + $0x1428] sm:$0xff] }
 0x180   : > { %6496 = vmatpush3.bf16.msra.mxu0 %v6495_v13  ;;  %3221 = vmatmul.mubr.f32.vlgmr.msra.gmra.mrb[18].mxu1 %v8041_v26  ;;  %v972_v26 = vld [vmem:[%s7323_s14 + $0x15b0] sm:$0xff]  ;;  %v6503_v41 = vpack.c.bf16 %v923_v23, %v922_v33  ;;  %v978_v13 = vld [vmem:[%s7323_s14 + $0x15e0] sm:$0xff] }
 0x181   : > { %6528 = vmatpush3.bf16.msra.mxu1 %v6527_v15  ;;  %6498 = vmatprep.subr.bf16.mxu0 %v6497_v17  ;;  %v6537_v48 = vpack.c.bf16 %v973_v53, %v972_v26  ;;  %v979_v15 = vld [vmem:[%s7323_s14 + $0x15e8] sm:$0xff]  ;;  %v6515_v17 = vpack.c.bf16 %v929_v4, %v928_v3  ;;  %v932_v26 = vld [vmem:[%s7323_s14 + $0x1470] sm:$0xff]  ;;  %v933_v53 = vld [vmem:[%s7323_s14 + $0x1478] sm:$0xff] }
 0x182   : > { %6530 = vmatprep.subr.bf16.mxu1 %v6529_v16  ;;  %3290 = vmatprep.mubr.f32.mxu0 %v1633_v25  ;;  %v931_v16 = vld [vmem:[%s7323_s14 + $0x1468] sm:$0xff]  ;;  %v6549_v24 = vpack.c.bf16 %v979_v15, %v978_v13  ;;  %v985_v3 = vld [vmem:[%s7323_s14 + $0x1618] sm:$0xff]  ;;  %v1016_v4 = vld [vmem:[%s7323_s14 + $0x1710] sm:$0xff] }
 0x183   : > { %3360 = vmatprep.mubr.f32.mxu1 %v1634_v29  ;;  %v963_v25 = vld [vmem:[%s7323_s14 + $0x1568] sm:$0xff]  ;;  %v6519_v35 = vpack.c.bf16 %v931_v16, %v930_v19  ;;  %v1034_v13 = vld [vmem:[%s7323_s14 + $0x17a0] sm:$0xff]  ;;  %v6565_v19 = vpack.c.bf16 %v1003_v9, %v1002_v7 }
 0x184   : > { %6500 = vmatpush3.bf16.msra.mxu0 %v6499_v30  ;;  %v6551_v43 = vpack.c.bf16 %v963_v25, %v962_v20  ;;  %v1035_v15 = vld [vmem:[%s7323_s14 + $0x17a8] sm:$0xff]  ;;  %v986_v16 = vld [vmem:[%s7323_s14 + $0x1620] sm:$0xff]  ;;  %v1004_v25 = vld [vmem:[%s7323_s14 + $0x16b0] sm:$0xff] }
 0x185   : > { %6532 = vmatpush3.bf16.msra.mxu1 %v6531_v31  ;;  %6502 = vmatprep.subr.bf16.mxu0 %v6501_v32  ;;  %v980_v31 = vld [vmem:[%s7323_s14 + $0x15f0] sm:$0xff]  ;;  %v981_v32 = vld [vmem:[%s7323_s14 + $0x15f8] sm:$0xff]  ;;  %v1018_v20 = vld [vmem:[%s7323_s14 + $0x1720] sm:$0xff] }
 0x186   : > { %6534 = vmatprep.subr.bf16.mxu1 %v6533_v36  ;;  %v271_v36 = vld [vmem:[%s7333_s11 + $0x58] sm:$0xff] }
 0x187   : > { %v1635_v50 = vcombine.high %v271_v36, %v271_v36  ;;  %v8196_v58 = vrot.slane %v271_v36, %v7386_v14  ;;  %v1021_v36 = vld [vmem:[%s7323_s14 + $0x1738] sm:$0xff] }
 0x188   : > { %6504 = vmatpush3.bf16.msra.mxu0 %v6503_v41  ;;  %v964_v41 = vld [vmem:[%s7323_s14 + $0x1570] sm:$0xff] }
 0x189   : > { %6536 = vmatpush3.bf16.msra.mxu1 %v6535_v42  ;;  %6506 = vmatprep.subr.bf16.mxu0 %v6505_v44  ;;  %v6553_v44 = vpack.c.bf16 %v981_v32, %v980_v31  ;;  %v6555_v54 = vpack.c.bf16 %v965_v45, %v964_v41  ;;  %v8201_v11 = vrot.slane %v1635_v50, %v7386_v14  ;;  %v988_v32 = vld [vmem:[%s7323_s14 + $0x1630] sm:$0xff]  ;;  %v991_v45 = vld [vmem:[%s7323_s14 + $0x1648] sm:$0xff]  ;;  %v1009_v50 = vld [vmem:[%s7323_s14 + $0x16d8] sm:$0xff] }
 0x18a   : > { %6538 = vmatprep.subr.bf16.mxu1 %v6537_v48  ;;  %v1030_v48 = vld [vmem:[%s7323_s14 + $0x1780] sm:$0xff]  ;;  %v1650_v10 = vcombine.high %v8196_v58, %v8196_v58  ;;  %v6569_v31 = vpack.c.bf16 %v1005_v27, %v1004_v25 }
 0x18b   : > { %v6589_v59 = vpack.c.bf16 %v1031_v49, %v1030_v48  ;;  %v1023_v48 = vld [vmem:[%s7323_s14 + $0x1748] sm:$0xff]  ;;  %v1008_v49 = vld [vmem:[%s7323_s14 + $0x16d0] sm:$0xff] }
 0x18c   : > { %6508 = vmatpush3.bf16.msra.mxu0 %v6507_v34  ;;  %v982_v34 = vld [vmem:[%s7323_s14 + $0x1600] sm:$0xff] }
 0x18d   : > { %6540 = vmatpush3.bf16.msra.mxu1 %v6539_v56  ;;  %6510 = vmatprep.subr.bf16.mxu0 %v6509_v57  ;;  %v983_v56 = vld [vmem:[%s7323_s14 + $0x1608] sm:$0xff]  ;;  %v1014_v57 = vld [vmem:[%s7323_s14 + $0x1700] sm:$0xff] }
 0x18e   : > { %6542 = vmatprep.subr.bf16.mxu1 %v6541_v52  ;;  %v1001_v52 = vld [vmem:[%s7323_s14 + $0x1698] sm:$0xff]  ;;  %v6559_v0 = vpack.c.bf16 %v983_v56, %v982_v34  ;;  %v6607_v34 = vpack.c.bf16 %v1023_v48, %v1022_v47  ;;  %v6577_v56 = vpack.c.bf16 %v1009_v50, %v1008_v49  ;;  %v1064_v47 = vld [vmem:[%s7323_s14 + $0x1890] sm:$0xff] }
 0x18f   : > { %v1096_v49 = vld [vmem:[%s7323_s14 + $0x1990] sm:$0xff]  ;;  %v1097_v50 = vld [vmem:[%s7323_s14 + $0x1998] sm:$0xff] }
 0x190   : > { %6512 = vmatpush3.bf16.msra.mxu0 %v6511_v55  ;;  %v6591_v55 = vpack.c.bf16 %v1015_v60, %v1014_v57  ;;  %v992_v57 = vld [vmem:[%s7323_s14 + $0x1650] sm:$0xff] }
 0x191   : > { %6544 = vmatpush3.bf16.msra.mxu1 %v6543_v1  ;;  %6514 = vmatprep.subr.bf16.mxu0 %v6513_v2  ;;  %v6561_v1 = vpack.c.bf16 %v1001_v52, %v1000_v61  ;;  %v984_v2 = vld [vmem:[%s7323_s14 + $0x1610] sm:$0xff]  ;;  %v1025_v52 = vld [vmem:[%s7323_s14 + $0x1758] sm:$0xff] }
 0x192   : > { %v4783_v21 = vpop.f32.mrb[6].mxu0  ;;  %6546 = vmatprep.subr.bf16.mxu1 %v6545_v6  ;;  %v1017_v6 = vld [vmem:[%s7323_s14 + $0x1718] sm:$0xff]  ;;  %v1024_v60 = vld [vmem:[%s7323_s14 + $0x1750] sm:$0xff] }
 0x193   : > { %v4784_v29 = vpop.f32.mrb[7].mxu0  ;;  %v4818_v30 = vpop.f32.mrb[6].mxu1 }
 0x194   : > { %v4785_v33 = vadd.f32 %v4784_v29, %v4783_v21  ;;  %6516 = vmatpush3.bf16.msra.mxu0 %v6515_v17  ;;  %v4819_v23 = vpop.f32.mrb[7].mxu1  ;;  %v1651_v17 = vcombine.high %v8201_v11, %v8201_v11  ;;  %v6597_v21 = vpack.c.bf16 %v1035_v15, %v1034_v13  ;;  %v1012_v13 = vld [vmem:[%s7323_s14 + $0x16f0] sm:$0xff]  ;;  %v1013_v15 = vld [vmem:[%s7323_s14 + $0x16f8] sm:$0xff] }
 0x195   : > { %v4820_v38 = vadd.f32 %v4819_v23, %v4818_v30  ;;  %6548 = vmatpush3.bf16.msra.mxu1 %v6547_v12  ;;  %6518 = vmatprep.subr.bf16.mxu0 %v6517_v18  ;;  %v6563_v12 = vpack.c.bf16 %v985_v3, %v984_v2  ;;  %v6595_v18 = vpack.c.bf16 %v1017_v6, %v1016_v4  ;;  %v1020_v23 = vld [vmem:[%s7323_s14 + $0x1730] sm:$0xff]  ;;  %v994_v4 = vld [vmem:[%s7323_s14 + $0x1660] sm:$0xff] }
 0x196   : > { %v2313_v42 = vadd.f32 %v4785_v33, %v8107_v63  ;;  %6550 = vmatprep.subr.bf16.mxu1 %v6549_v24  ;;  %v6523_v63 = vpack.c.bf16 %v933_v53, %v932_v26  ;;  %v1019_v24 = vld [vmem:[%s7323_s14 + $0x1728] sm:$0xff]  ;;  %v989_v33 = vld [vmem:[%s7323_s14 + $0x1638] sm:$0xff]  ;;  %v6603_v41 = vpack.c.bf16 %v1021_v36, %v1020_v23  ;;  %v6611_v2 = vpack.c.bf16 %v1025_v52, %v1024_v60  ;;  %v1026_v6 = vld [vmem:[%s7323_s14 + $0x1760] sm:$0xff] }
 0x197   : > { %v6599_v30 = vpack.c.bf16 %v1019_v24, %v1018_v20  ;;  %v1039_v26 = vld [vmem:[%s7323_s14 + $0x17c8] sm:$0xff]  ;;  %v6571_v53 = vpack.c.bf16 %v989_v33, %v988_v32  ;;  %v6581_v3 = vpack.c.bf16 %v1011_v62, %v1010_v46  ;;  %v6585_v27 = vpack.c.bf16 %v1013_v15, %v1012_v13  ;;  %v1029_v32 = vld [vmem:[%s7323_s14 + $0x1778] sm:$0xff]  ;;  %v1062_v33 = vld [vmem:[%s7323_s14 + $0x1880] sm:$0xff] }
 0x198   : > { %v8187_v51 = vadd.f32 %v4820_v38, %v2313_v42  ;;  %6520 = vmatpush3.bf16.msra.mxu0 %v6519_v35  ;;  %v1006_v38 = vld [vmem:[%s7323_s14 + $0x16c0] sm:$0xff]  ;;  %v1063_v23 = vld [vmem:[%s7323_s14 + $0x1888] sm:$0xff]  ;;  %v6657_v60 = vpack.c.bf16 %v1097_v50, %v1096_v49  ;;  %v1069_v13 = vld [vmem:[%s7323_s14 + $0x18b8] sm:$0xff] }
 0x199   : > { %6552 = vmatpush3.bf16.msra.mxu1 %v6551_v43  ;;  %6522 = vmatprep.subr.bf16.mxu0 %v6521_v40  ;;  %v1007_v43 = vld [vmem:[%s7323_s14 + $0x16c8] sm:$0xff]  ;;  %v1038_v40 = vld [vmem:[%s7323_s14 + $0x17c0] sm:$0xff]  ;;  %v1101_v15 = vld [vmem:[%s7323_s14 + $0x19b8] sm:$0xff] }
 0x19a   : > { %6554 = vmatprep.subr.bf16.mxu1 %v6553_v44  ;;  %v6573_v42 = vpack.c.bf16 %v1007_v43, %v1006_v38  ;;  %v990_v44 = vld [vmem:[%s7323_s14 + $0x1640] sm:$0xff]  ;;  %v6605_v37 = vpack.c.bf16 %v1039_v26, %v1038_v40  ;;  %v1095_v36 = vld [vmem:[%s7323_s14 + $0x1988] sm:$0xff]  ;;  %v6621_v26 = vpack.c.bf16 %v1063_v23, %v1062_v33 }
 0x19b   : > { %v1066_v52 = vld [vmem:[%s7323_s14 + $0x18a0] sm:$0xff]  ;;  %v1067_v46 = vld [vmem:[%s7323_s14 + $0x18a8] sm:$0xff] }
 0x19c   : > { %6524 = vmatpush3.bf16.msra.mxu0 %v6523_v63  ;;  %v1040_v63 = vld [vmem:[%s7323_s14 + $0x17d0] sm:$0xff]  ;;  %v1086_v33 = vld [vmem:[%s7323_s14 + $0x1940] sm:$0xff]  ;;  %v1075_v50 = vld [vmem:[%s7323_s14 + $0x18e8] sm:$0xff] }
 0x19d   : > { %6556 = vmatpush3.bf16.msra.mxu1 %v6555_v54  ;;  %6558 = vmatprep.subr.bf16.mxu0 %v6557_v39  ;;  %v1041_v54 = vld [vmem:[%s7323_s14 + $0x17d8] sm:$0xff]  ;;  %v6575_v39 = vpack.c.bf16 %v991_v45, %v990_v44  ;;  %v1079_v45 = vld [vmem:[%s7323_s14 + $0x1908] sm:$0xff]  ;;  %v1074_v49 = vld [vmem:[%s7323_s14 + $0x18e0] sm:$0xff] }
 0x19e   : > { %6590 = vmatprep.subr.bf16.mxu1 %v6589_v59  ;;  %v993_v59 = vld [vmem:[%s7323_s14 + $0x1658] sm:$0xff]  ;;  %v6609_v61 = vpack.c.bf16 %v1041_v54, %v1040_v63 }
 0x19f   : > { %3291 = vmatmul.mubr.f32.vlgmr.msra.gmra.mrb[20].mxu0 %v8116_v8  ;;  %v987_v8 = vld [vmem:[%s7323_s14 + $0x1628] sm:$0xff] }
 0x1a0   : > { %6560 = vmatpush3.bf16.msra.mxu0 %v6559_v0  ;;  %3361 = vmatmul.mubr.f32.vlgmr.msra.gmra.mrb[20].mxu1 %v8121_v22  ;;  %v1036_v22 = vld [vmem:[%s7323_s14 + $0x17b0] sm:$0xff]  ;;  %v6567_v29 = vpack.c.bf16 %v987_v8, %v986_v16  ;;  %v1042_v0 = vld [vmem:[%s7323_s14 + $0x17e0] sm:$0xff] }
 0x1a1   : > { %6592 = vmatpush3.bf16.msra.mxu1 %v6591_v55  ;;  %6562 = vmatprep.subr.bf16.mxu0 %v6561_v1  ;;  %v6601_v35 = vpack.c.bf16 %v1037_v28, %v1036_v22  ;;  %v1043_v55 = vld [vmem:[%s7323_s14 + $0x17e8] sm:$0xff]  ;;  %v6579_v1 = vpack.c.bf16 %v993_v59, %v992_v57  ;;  %v996_v22 = vld [vmem:[%s7323_s14 + $0x1670] sm:$0xff]  ;;  %v997_v28 = vld [vmem:[%s7323_s14 + $0x1678] sm:$0xff] }
 0x1a2   : > { %6594 = vmatprep.subr.bf16.mxu1 %v6593_v5  ;;  %3430 = vmatprep.mubr.f32.mxu0 %v1650_v10  ;;  %v995_v5 = vld [vmem:[%s7323_s14 + $0x1668] sm:$0xff]  ;;  %v6613_v9 = vpack.c.bf16 %v1043_v55, %v1042_v0  ;;  %v1049_v57 = vld [vmem:[%s7323_s14 + $0x1818] sm:$0xff]  ;;  %v1080_v59 = vld [vmem:[%s7323_s14 + $0x1910] sm:$0xff] }
 0x1a3   : > { %3500 = vmatprep.mubr.f32.mxu1 %v1651_v17  ;;  %v1027_v10 = vld [vmem:[%s7323_s14 + $0x1768] sm:$0xff]  ;;  %v6583_v20 = vpack.c.bf16 %v995_v5, %v994_v4  ;;  %v1098_v0 = vld [vmem:[%s7323_s14 + $0x19a0] sm:$0xff]  ;;  %v6629_v4 = vpack.c.bf16 %v1067_v46, %v1066_v52 }
 0x1a4   : > { %6564 = vmatpush3.bf16.msra.mxu0 %v6563_v12  ;;  %v6615_v25 = vpack.c.bf16 %v1027_v10, %v1026_v6  ;;  %v1099_v55 = vld [vmem:[%s7323_s14 + $0x19a8] sm:$0xff]  ;;  %v1050_v5 = vld [vmem:[%s7323_s14 + $0x1820] sm:$0xff]  ;;  %v1068_v10 = vld [vmem:[%s7323_s14 + $0x18b0] sm:$0xff] }
 0x1a5   : > { %6596 = vmatpush3.bf16.msra.mxu1 %v6595_v18  ;;  %6566 = vmatprep.subr.bf16.mxu0 %v6565_v19  ;;  %v1044_v18 = vld [vmem:[%s7323_s14 + $0x17f0] sm:$0xff]  ;;  %v1045_v19 = vld [vmem:[%s7323_s14 + $0x17f8] sm:$0xff]  ;;  %v1082_v6 = vld [vmem:[%s7323_s14 + $0x1920] sm:$0xff] }
 0x1a6   : > { %6598 = vmatprep.subr.bf16.mxu1 %v6597_v21  ;;  %v272_v21 = vld [vmem:[%s7333_s11 + $0x60] sm:$0xff] }
 0x1a7   : > { %v1652_v38 = vcombine.high %v272_v21, %v272_v21  ;;  %v8276_v48 = vrot.slane %v272_v21, %v7386_v14  ;;  %v1085_v21 = vld [vmem:[%s7323_s14 + $0x1938] sm:$0xff] }
 0x1a8   : > { %6568 = vmatpush3.bf16.msra.mxu0 %v6567_v29  ;;  %v1028_v29 = vld [vmem:[%s7323_s14 + $0x1770] sm:$0xff] }
 0x1a9   : > { %6600 = vmatpush3.bf16.msra.mxu1 %v6599_v30  ;;  %6570 = vmatprep.subr.bf16.mxu0 %v6569_v31  ;;  %v6617_v31 = vpack.c.bf16 %v1045_v19, %v1044_v18  ;;  %v6619_v40 = vpack.c.bf16 %v1029_v32, %v1028_v29  ;;  %v8281_v63 = vrot.slane %v1652_v38, %v7386_v14  ;;  %v1052_v19 = vld [vmem:[%s7323_s14 + $0x1830] sm:$0xff]  ;;  %v1055_v32 = vld [vmem:[%s7323_s14 + $0x1848] sm:$0xff]  ;;  %v1073_v38 = vld [vmem:[%s7323_s14 + $0x18d8] sm:$0xff] }
 0x1aa   : > { %6602 = vmatprep.subr.bf16.mxu1 %v6601_v35  ;;  %v1094_v35 = vld [vmem:[%s7323_s14 + $0x1980] sm:$0xff]  ;;  %v1667_v62 = vcombine.high %v8276_v48, %v8276_v48  ;;  %v6633_v18 = vpack.c.bf16 %v1069_v13, %v1068_v10 }
 0x1ab   : > { %v6653_v44 = vpack.c.bf16 %v1095_v36, %v1094_v35  ;;  %v1087_v35 = vld [vmem:[%s7323_s14 + $0x1948] sm:$0xff]  ;;  %v1072_v36 = vld [vmem:[%s7323_s14 + $0x18d0] sm:$0xff] }
 0x1ac   : > { %6572 = vmatpush3.bf16.msra.mxu0 %v6571_v53  ;;  %v1046_v53 = vld [vmem:[%s7323_s14 + $0x1800] sm:$0xff] }
 0x1ad   : > { %6604 = vmatpush3.bf16.msra.mxu1 %v6603_v41  ;;  %6574 = vmatprep.subr.bf16.mxu0 %v6573_v42  ;;  %v1047_v41 = vld [vmem:[%s7323_s14 + $0x1808] sm:$0xff]  ;;  %v1078_v42 = vld [vmem:[%s7323_s14 + $0x1900] sm:$0xff] }
 0x1ae   : > { %6606 = vmatprep.subr.bf16.mxu1 %v6605_v37  ;;  %v1065_v37 = vld [vmem:[%s7323_s14 + $0x1898] sm:$0xff]  ;;  %v6623_v54 = vpack.c.bf16 %v1047_v41, %v1046_v53  ;;  %v6671_v53 = vpack.c.bf16 %v1087_v35, %v1086_v33  ;;  %v6641_v41 = vpack.c.bf16 %v1073_v38, %v1072_v36  ;;  %v1128_v33 = vld [vmem:[%s7323_s14 + $0x1a90] sm:$0xff] }
 0x1af   : > { %v1160_v36 = vld [vmem:[%s7323_s14 + $0x1b90] sm:$0xff]  ;;  %v1161_v38 = vld [vmem:[%s7323_s14 + $0x1b98] sm:$0xff] }
 0x1b0   : > { %6576 = vmatpush3.bf16.msra.mxu0 %v6575_v39  ;;  %v6655_v39 = vpack.c.bf16 %v1079_v45, %v1078_v42  ;;  %v1056_v42 = vld [vmem:[%s7323_s14 + $0x1850] sm:$0xff] }
 0x1b1   : > { %6608 = vmatpush3.bf16.msra.mxu1 %v6607_v34  ;;  %6578 = vmatprep.subr.bf16.mxu0 %v6577_v56  ;;  %v6625_v34 = vpack.c.bf16 %v1065_v37, %v1064_v47  ;;  %v1048_v56 = vld [vmem:[%s7323_s14 + $0x1810] sm:$0xff]  ;;  %v1089_v37 = vld [vmem:[%s7323_s14 + $0x1958] sm:$0xff] }
 0x1b2   : > { %v4853_v7 = vpop.f32.mrb[8].mxu0  ;;  %6610 = vmatprep.subr.bf16.mxu1 %v6609_v61  ;;  %v1081_v61 = vld [vmem:[%s7323_s14 + $0x1918] sm:$0xff]  ;;  %v1088_v45 = vld [vmem:[%s7323_s14 + $0x1950] sm:$0xff] }
 0x1b3   : > { %v4854_v17 = vpop.f32.mrb[9].mxu0  ;;  %v4888_v12 = vpop.f32.mrb[8].mxu1 }
 0x1b4   : > { %v4855_v16 = vadd.f32 %v4854_v17, %v4853_v7  ;;  %6580 = vmatpush3.bf16.msra.mxu0 %v6579_v1  ;;  %v4889_v8 = vpop.f32.mrb[9].mxu1  ;;  %v1668_v1 = vcombine.high %v8281_v63, %v8281_v63  ;;  %v6661_v7 = vpack.c.bf16 %v1099_v55, %v1098_v0  ;;  %v1076_v0 = vld [vmem:[%s7323_s14 + $0x18f0] sm:$0xff]  ;;  %v1077_v55 = vld [vmem:[%s7323_s14 + $0x18f8] sm:$0xff] }
 0x1b5   : > { %v4890_v24 = vadd.f32 %v4889_v8, %v4888_v12  ;;  %6612 = vmatpush3.bf16.msra.mxu1 %v6611_v2  ;;  %6582 = vmatprep.subr.bf16.mxu0 %v6581_v3  ;;  %v6627_v2 = vpack.c.bf16 %v1049_v57, %v1048_v56  ;;  %v6659_v3 = vpack.c.bf16 %v1081_v61, %v1080_v59  ;;  %v1084_v8 = vld [vmem:[%s7323_s14 + $0x1930] sm:$0xff]  ;;  %v1058_v59 = vld [vmem:[%s7323_s14 + $0x1860] sm:$0xff] }
 0x1b6   : > { %v2453_v30 = vadd.f32 %v4855_v16, %v8187_v51  ;;  %6614 = vmatprep.subr.bf16.mxu1 %v6613_v9  ;;  %v6587_v51 = vpack.c.bf16 %v997_v28, %v996_v22  ;;  %v1083_v9 = vld [vmem:[%s7323_s14 + $0x1928] sm:$0xff]  ;;  %v1053_v16 = vld [vmem:[%s7323_s14 + $0x1838] sm:$0xff]  ;;  %v6667_v29 = vpack.c.bf16 %v1085_v21, %v1084_v8  ;;  %v6675_v56 = vpack.c.bf16 %v1089_v37, %v1088_v45  ;;  %v1090_v61 = vld [vmem:[%s7323_s14 + $0x1960] sm:$0xff] }
 0x1b7   : > { %v6663_v12 = vpack.c.bf16 %v1083_v9, %v1082_v6  ;;  %v1103_v22 = vld [vmem:[%s7323_s14 + $0x19c8] sm:$0xff]  ;;  %v6635_v28 = vpack.c.bf16 %v1053_v16, %v1052_v19  ;;  %v6645_v57 = vpack.c.bf16 %v1075_v50, %v1074_v49  ;;  %v6649_v13 = vpack.c.bf16 %v1077_v55, %v1076_v0  ;;  %v1093_v19 = vld [vmem:[%s7323_s14 + $0x1978] sm:$0xff]  ;;  %v1126_v16 = vld [vmem:[%s7323_s14 + $0x1a80] sm:$0xff] }
 0x1b8   : > { %v8267_v43 = vadd.f32 %v4890_v24, %v2453_v30  ;;  %6584 = vmatpush3.bf16.msra.mxu0 %v6583_v20  ;;  %v1070_v24 = vld [vmem:[%s7323_s14 + $0x18c0] sm:$0xff]  ;;  %v1127_v8 = vld [vmem:[%s7323_s14 + $0x1a88] sm:$0xff]  ;;  %v6721_v45 = vpack.c.bf16 %v1161_v38, %v1160_v36  ;;  %v1133_v0 = vld [vmem:[%s7323_s14 + $0x1ab8] sm:$0xff] }
 0x1b9   : > { %6616 = vmatpush3.bf16.msra.mxu1 %v6615_v25  ;;  %6586 = vmatprep.subr.bf16.mxu0 %v6585_v27  ;;  %v1071_v25 = vld [vmem:[%s7323_s14 + $0x18c8] sm:$0xff]  ;;  %v1102_v27 = vld [vmem:[%s7323_s14 + $0x19c0] sm:$0xff]  ;;  %v1165_v55 = vld [vmem:[%s7323_s14 + $0x1bb8] sm:$0xff] }
 0x1ba   : > { %6618 = vmatprep.subr.bf16.mxu1 %v6617_v31  ;;  %v6637_v30 = vpack.c.bf16 %v1071_v25, %v1070_v24  ;;  %v1054_v31 = vld [vmem:[%s7323_s14 + $0x1840] sm:$0xff]  ;;  %v6669_v23 = vpack.c.bf16 %v1103_v22, %v1102_v27  ;;  %v1159_v21 = vld [vmem:[%s7323_s14 + $0x1b88] sm:$0xff]  ;;  %v6685_v22 = vpack.c.bf16 %v1127_v8, %v1126_v16 }
 0x1bb   : > { %v1130_v37 = vld [vmem:[%s7323_s14 + $0x1aa0] sm:$0xff]  ;;  %v1131_v49 = vld [vmem:[%s7323_s14 + $0x1aa8] sm:$0xff] }
 0x1bc   : > { %6588 = vmatpush3.bf16.msra.mxu0 %v6587_v51  ;;  %v1104_v51 = vld [vmem:[%s7323_s14 + $0x19d0] sm:$0xff]  ;;  %v1150_v16 = vld [vmem:[%s7323_s14 + $0x1b40] sm:$0xff]  ;;  %v1139_v38 = vld [vmem:[%s7323_s14 + $0x1ae8] sm:$0xff] }
 0x1bd   : > { %6620 = vmatpush3.bf16.msra.mxu1 %v6619_v40  ;;  %6622 = vmatprep.subr.bf16.mxu0 %v6621_v26  ;;  %v1105_v40 = vld [vmem:[%s7323_s14 + $0x19d8] sm:$0xff]  ;;  %v6639_v26 = vpack.c.bf16 %v1055_v32, %v1054_v31  ;;  %v1143_v32 = vld [vmem:[%s7323_s14 + $0x1b08] sm:$0xff]  ;;  %v1138_v36 = vld [vmem:[%s7323_s14 + $0x1ae0] sm:$0xff] }
 0x1be   : > { %6654 = vmatprep.subr.bf16.mxu1 %v6653_v44  ;;  %v1057_v44 = vld [vmem:[%s7323_s14 + $0x1858] sm:$0xff]  ;;  %v6673_v47 = vpack.c.bf16 %v1105_v40, %v1104_v51 }
 0x1bf   : > { %3431 = vmatmul.mubr.f32.vlgmr.msra.gmra.mrb[22].mxu0 %v8196_v58  ;;  %v1051_v58 = vld [vmem:[%s7323_s14 + $0x1828] sm:$0xff] }
 0x1c0   : > { %6624 = vmatpush3.bf16.msra.mxu0 %v6623_v54  ;;  %3501 = vmatmul.mubr.f32.vlgmr.msra.gmra.mrb[22].mxu1 %v8201_v11  ;;  %v1100_v11 = vld [vmem:[%s7323_s14 + $0x19b0] sm:$0xff]  ;;  %v6631_v17 = vpack.c.bf16 %v1051_v58, %v1050_v5  ;;  %v1106_v54 = vld [vmem:[%s7323_s14 + $0x19e0] sm:$0xff] }
 0x1c1   : > { %6656 = vmatpush3.bf16.msra.mxu1 %v6655_v39  ;;  %6626 = vmatprep.subr.bf16.mxu0 %v6625_v34  ;;  %v6665_v20 = vpack.c.bf16 %v1101_v15, %v1100_v11  ;;  %v1107_v39 = vld [vmem:[%s7323_s14 + $0x19e8] sm:$0xff]  ;;  %v6643_v34 = vpack.c.bf16 %v1057_v44, %v1056_v42  ;;  %v1060_v11 = vld [vmem:[%s7323_s14 + $0x1870] sm:$0xff]  ;;  %v1061_v15 = vld [vmem:[%s7323_s14 + $0x1878] sm:$0xff] }
 0x1c2   : > { %6658 = vmatprep.subr.bf16.mxu1 %v6657_v60  ;;  %3570 = vmatprep.mubr.f32.mxu0 %v1667_v62  ;;  %v1059_v60 = vld [vmem:[%s7323_s14 + $0x1868] sm:$0xff]  ;;  %v6677_v46 = vpack.c.bf16 %v1107_v39, %v1106_v54  ;;  %v1113_v42 = vld [vmem:[%s7323_s14 + $0x1a18] sm:$0xff]  ;;  %v1144_v44 = vld [vmem:[%s7323_s14 + $0x1b10] sm:$0xff] }
 0x1c3   : > { %3640 = vmatprep.mubr.f32.mxu1 %v1668_v1  ;;  %v1091_v62 = vld [vmem:[%s7323_s14 + $0x1968] sm:$0xff]  ;;  %v6647_v6 = vpack.c.bf16 %v1059_v60, %v1058_v59  ;;  %v1162_v54 = vld [vmem:[%s7323_s14 + $0x1ba0] sm:$0xff]  ;;  %v6693_v59 = vpack.c.bf16 %v1131_v49, %v1130_v37 }
 0x1c4   : > { %6628 = vmatpush3.bf16.msra.mxu0 %v6627_v2  ;;  %v6679_v10 = vpack.c.bf16 %v1091_v62, %v1090_v61  ;;  %v1163_v39 = vld [vmem:[%s7323_s14 + $0x1ba8] sm:$0xff]  ;;  %v1114_v60 = vld [vmem:[%s7323_s14 + $0x1a20] sm:$0xff]  ;;  %v1132_v62 = vld [vmem:[%s7323_s14 + $0x1ab0] sm:$0xff] }
 0x1c5   : > { %6660 = vmatpush3.bf16.msra.mxu1 %v6659_v3  ;;  %6630 = vmatprep.subr.bf16.mxu0 %v6629_v4  ;;  %v1108_v3 = vld [vmem:[%s7323_s14 + $0x19f0] sm:$0xff]  ;;  %v1109_v4 = vld [vmem:[%s7323_s14 + $0x19f8] sm:$0xff]  ;;  %v1146_v61 = vld [vmem:[%s7323_s14 + $0x1b20] sm:$0xff] }
 0x1c6   : > { %6662 = vmatprep.subr.bf16.mxu1 %v6661_v7  ;;  %v273_v7 = vld [vmem:[%s7333_s11 + $0x68] sm:$0xff] }
 0x1c7   : > { %v1669_v24 = vcombine.high %v273_v7, %v273_v7  ;;  %v8356_v35 = vrot.slane %v273_v7, %v7386_v14  ;;  %v1149_v7 = vld [vmem:[%s7323_s14 + $0x1b38] sm:$0xff] }
 0x1c8   : > { %6632 = vmatpush3.bf16.msra.mxu0 %v6631_v17  ;;  %v1092_v17 = vld [vmem:[%s7323_s14 + $0x1970] sm:$0xff] }
 0x1c9   : > { %6664 = vmatpush3.bf16.msra.mxu1 %v6663_v12  ;;  %6634 = vmatprep.subr.bf16.mxu0 %v6633_v18  ;;  %v6681_v18 = vpack.c.bf16 %v1109_v4, %v1108_v3  ;;  %v6683_v27 = vpack.c.bf16 %v1093_v19, %v1092_v17  ;;  %v8361_v51 = vrot.slane %v1669_v24, %v7386_v14  ;;  %v1116_v4 = vld [vmem:[%s7323_s14 + $0x1a30] sm:$0xff]  ;;  %v1119_v19 = vld [vmem:[%s7323_s14 + $0x1a48] sm:$0xff]  ;;  %v1137_v24 = vld [vmem:[%s7323_s14 + $0x1ad8] sm:$0xff] }
 0x1ca   : > { %6666 = vmatprep.subr.bf16.mxu1 %v6665_v20  ;;  %v1158_v20 = vld [vmem:[%s7323_s14 + $0x1b80] sm:$0xff]  ;;  %v1684_v50 = vcombine.high %v8356_v35, %v8356_v35  ;;  %v6697_v3 = vpack.c.bf16 %v1133_v0, %v1132_v62 }
 0x1cb   : > { %v6717_v31 = vpack.c.bf16 %v1159_v21, %v1158_v20  ;;  %v1151_v20 = vld [vmem:[%s7323_s14 + $0x1b48] sm:$0xff]  ;;  %v1136_v21 = vld [vmem:[%s7323_s14 + $0x1ad0] sm:$0xff] }
 0x1cc   : > { %6636 = vmatpush3.bf16.msra.mxu0 %v6635_v28  ;;  %v1110_v28 = vld [vmem:[%s7323_s14 + $0x1a00] sm:$0xff] }
 0x1cd   : > { %6668 = vmatpush3.bf16.msra.mxu1 %v6667_v29  ;;  %6638 = vmatprep.subr.bf16.mxu0 %v6637_v30  ;;  %v1111_v29 = vld [vmem:[%s7323_s14 + $0x1a08] sm:$0xff]  ;;  %v1142_v30 = vld [vmem:[%s7323_s14 + $0x1b00] sm:$0xff] }
 0x1ce   : > { %6670 = vmatprep.subr.bf16.mxu1 %v6669_v23  ;;  %v1129_v23 = vld [vmem:[%s7323_s14 + $0x1a98] sm:$0xff]  ;;  %v6687_v40 = vpack.c.bf16 %v1111_v29, %v1110_v28  ;;  %v6735_v28 = vpack.c.bf16 %v1151_v20, %v1150_v16  ;;  %v6705_v29 = vpack.c.bf16 %v1137_v24, %v1136_v21  ;;  %v1192_v16 = vld [vmem:[%s7323_s14 + $0x1c90] sm:$0xff] }
 0x1cf   : > { %v1224_v21 = vld [vmem:[%s7323_s14 + $0x1d90] sm:$0xff]  ;;  %v1225_v24 = vld [vmem:[%s7323_s14 + $0x1d98] sm:$0xff] }
 0x1d0   : > { %6640 = vmatpush3.bf16.msra.mxu0 %v6639_v26  ;;  %v6719_v26 = vpack.c.bf16 %v1143_v32, %v1142_v30  ;;  %v1120_v30 = vld [vmem:[%s7323_s14 + $0x1a50] sm:$0xff] }
 0x1d1   : > { %6672 = vmatpush3.bf16.msra.mxu1 %v6671_v53  ;;  %6642 = vmatprep.subr.bf16.mxu0 %v6641_v41  ;;  %v6689_v53 = vpack.c.bf16 %v1129_v23, %v1128_v33  ;;  %v1112_v41 = vld [vmem:[%s7323_s14 + $0x1a10] sm:$0xff]  ;;  %v1153_v23 = vld [vmem:[%s7323_s14 + $0x1b58] sm:$0xff] }
 0x1d2   : > { %v4923_v52 = vpop.f32.mrb[10].mxu0  ;;  %6674 = vmatprep.subr.bf16.mxu1 %v6673_v47  ;;  %v1145_v47 = vld [vmem:[%s7323_s14 + $0x1b18] sm:$0xff]  ;;  %v1152_v32 = vld [vmem:[%s7323_s14 + $0x1b50] sm:$0xff] }
 0x1d3   : > { %v4924_v1 = vpop.f32.mrb[11].mxu0  ;;  %v4958_v2 = vpop.f32.mrb[10].mxu1 }
 0x1d4   : > { %v4925_v5 = vadd.f32 %v4924_v1, %v4923_v52  ;;  %6644 = vmatpush3.bf16.msra.mxu0 %v6643_v34  ;;  %v4959_v58 = vpop.f32.mrb[11].mxu1  ;;  %v1685_v34 = vcombine.high %v8361_v51, %v8361_v51  ;;  %v6725_v52 = vpack.c.bf16 %v1163_v39, %v1162_v54  ;;  %v1140_v54 = vld [vmem:[%s7323_s14 + $0x1af0] sm:$0xff]  ;;  %v1141_v39 = vld [vmem:[%s7323_s14 + $0x1af8] sm:$0xff] }
 0x1d5   : > { %v4960_v9 = vadd.f32 %v4959_v58, %v4958_v2  ;;  %6676 = vmatpush3.bf16.msra.mxu1 %v6675_v56  ;;  %6646 = vmatprep.subr.bf16.mxu0 %v6645_v57  ;;  %v6691_v56 = vpack.c.bf16 %v1113_v42, %v1112_v41  ;;  %v6723_v57 = vpack.c.bf16 %v1145_v47, %v1144_v44  ;;  %v1148_v58 = vld [vmem:[%s7323_s14 + $0x1b30] sm:$0xff]  ;;  %v1122_v44 = vld [vmem:[%s7323_s14 + $0x1a60] sm:$0xff] }
 0x1d6   : > { %v2593_v12 = vadd.f32 %v4925_v5, %v8267_v43  ;;  %6678 = vmatprep.subr.bf16.mxu1 %v6677_v46  ;;  %v6651_v43 = vpack.c.bf16 %v1061_v15, %v1060_v11  ;;  %v1147_v46 = vld [vmem:[%s7323_s14 + $0x1b28] sm:$0xff]  ;;  %v1117_v5 = vld [vmem:[%s7323_s14 + $0x1a38] sm:$0xff]  ;;  %v6731_v17 = vpack.c.bf16 %v1149_v7, %v1148_v58  ;;  %v6739_v41 = vpack.c.bf16 %v1153_v23, %v1152_v32  ;;  %v1154_v47 = vld [vmem:[%s7323_s14 + $0x1b60] sm:$0xff] }
 0x1d7   : > { %v6727_v2 = vpack.c.bf16 %v1147_v46, %v1146_v61  ;;  %v1167_v11 = vld [vmem:[%s7323_s14 + $0x1bc8] sm:$0xff]  ;;  %v6699_v15 = vpack.c.bf16 %v1117_v5, %v1116_v4  ;;  %v6709_v42 = vpack.c.bf16 %v1139_v38, %v1138_v36  ;;  %v6713_v0 = vpack.c.bf16 %v1141_v39, %v1140_v54  ;;  %v1157_v4 = vld [vmem:[%s7323_s14 + $0x1b78] sm:$0xff]  ;;  %v1190_v5 = vld [vmem:[%s7323_s14 + $0x1c80] sm:$0xff] }
 0x1d8   : > { %v8347_v25 = vadd.f32 %v4960_v9, %v2593_v12  ;;  %6648 = vmatpush3.bf16.msra.mxu0 %v6647_v6  ;;  %v1134_v9 = vld [vmem:[%s7323_s14 + $0x1ac0] sm:$0xff]  ;;  %v1191_v58 = vld [vmem:[%s7323_s14 + $0x1c88] sm:$0xff]  ;;  %v6785_v32 = vpack.c.bf16 %v1225_v24, %v1224_v21  ;;  %v1197_v54 = vld [vmem:[%s7323_s14 + $0x1cb8] sm:$0xff] }
 0x1d9   : > { %6680 = vmatpush3.bf16.msra.mxu1 %v6679_v10  ;;  %6650 = vmatprep.subr.bf16.mxu0 %v6649_v13  ;;  %v1135_v10 = vld [vmem:[%s7323_s14 + $0x1ac8] sm:$0xff]  ;;  %v1166_v13 = vld [vmem:[%s7323_s14 + $0x1bc0] sm:$0xff]  ;;  %v1229_v39 = vld [vmem:[%s7323_s14 + $0x1db8] sm:$0xff] }
 0x1da   : > { %6682 = vmatprep.subr.bf16.mxu1 %v6681_v18  ;;  %v6701_v12 = vpack.c.bf16 %v1135_v10, %v1134_v9  ;;  %v1118_v18 = vld [vmem:[%s7323_s14 + $0x1a40] sm:$0xff]  ;;  %v6733_v8 = vpack.c.bf16 %v1167_v11, %v1166_v13  ;;  %v1223_v7 = vld [vmem:[%s7323_s14 + $0x1d88] sm:$0xff]  ;;  %v6749_v11 = vpack.c.bf16 %v1191_v58, %v1190_v5 }
 0x1db   : > { %v1194_v23 = vld [vmem:[%s7323_s14 + $0x1ca0] sm:$0xff]  ;;  %v1195_v36 = vld [vmem:[%s7323_s14 + $0x1ca8] sm:$0xff] }
 0x1dc   : > { %6652 = vmatpush3.bf16.msra.mxu0 %v6651_v43  ;;  %v1168_v43 = vld [vmem:[%s7323_s14 + $0x1bd0] sm:$0xff]  ;;  %v1214_v5 = vld [vmem:[%s7323_s14 + $0x1d40] sm:$0xff]  ;;  %v1203_v24 = vld [vmem:[%s7323_s14 + $0x1ce8] sm:$0xff] }
 0x1dd   : > { %6684 = vmatpush3.bf16.msra.mxu1 %v6683_v27  ;;  %6686 = vmatprep.subr.bf16.mxu0 %v6685_v22  ;;  %v1169_v27 = vld [vmem:[%s7323_s14 + $0x1bd8] sm:$0xff]  ;;  %v6703_v22 = vpack.c.bf16 %v1119_v19, %v1118_v18  ;;  %v1207_v19 = vld [vmem:[%s7323_s14 + $0x1d08] sm:$0xff]  ;;  %v1202_v21 = vld [vmem:[%s7323_s14 + $0x1ce0] sm:$0xff] }
 0x1de   : > { %6718 = vmatprep.subr.bf16.mxu1 %v6717_v31  ;;  %v1121_v31 = vld [vmem:[%s7323_s14 + $0x1a58] sm:$0xff]  ;;  %v6737_v33 = vpack.c.bf16 %v1169_v27, %v1168_v43 }
 0x1df   : > { %3571 = vmatmul.mubr.f32.vlgmr.msra.gmra.mrb[24].mxu0 %v8276_v48  ;;  %v1115_v48 = vld [vmem:[%s7323_s14 + $0x1a28] sm:$0xff] }
 0x1e0   : > { %6688 = vmatpush3.bf16.msra.mxu0 %v6687_v40  ;;  %3641 = vmatmul.mubr.f32.vlgmr.msra.gmra.mrb[24].mxu1 %v8281_v63  ;;  %v1164_v63 = vld [vmem:[%s7323_s14 + $0x1bb0] sm:$0xff]  ;;  %v6695_v1 = vpack.c.bf16 %v1115_v48, %v1114_v60  ;;  %v1170_v40 = vld [vmem:[%s7323_s14 + $0x1be0] sm:$0xff] }
 0x1e1   : > { %6720 = vmatpush3.bf16.msra.mxu1 %v6719_v26  ;;  %6690 = vmatprep.subr.bf16.mxu0 %v6689_v53  ;;  %v6729_v6 = vpack.c.bf16 %v1165_v55, %v1164_v63  ;;  %v1171_v26 = vld [vmem:[%s7323_s14 + $0x1be8] sm:$0xff]  ;;  %v6707_v53 = vpack.c.bf16 %v1121_v31, %v1120_v30  ;;  %v1124_v63 = vld [vmem:[%s7323_s14 + $0x1a70] sm:$0xff]  ;;  %v1125_v55 = vld [vmem:[%s7323_s14 + $0x1a78] sm:$0xff] }
 0x1e2   : > { %6722 = vmatprep.subr.bf16.mxu1 %v6721_v45  ;;  %3710 = vmatprep.mubr.f32.mxu0 %v1684_v50  ;;  %v1123_v45 = vld [vmem:[%s7323_s14 + $0x1a68] sm:$0xff]  ;;  %v6741_v49 = vpack.c.bf16 %v1171_v26, %v1170_v40  ;;  %v1177_v30 = vld [vmem:[%s7323_s14 + $0x1c18] sm:$0xff]  ;;  %v1208_v31 = vld [vmem:[%s7323_s14 + $0x1d10] sm:$0xff] }
 0x1e3   : > { %3780 = vmatprep.mubr.f32.mxu1 %v1685_v34  ;;  %v1155_v50 = vld [vmem:[%s7323_s14 + $0x1b68] sm:$0xff]  ;;  %v6711_v61 = vpack.c.bf16 %v1123_v45, %v1122_v44  ;;  %v1226_v40 = vld [vmem:[%s7323_s14 + $0x1da0] sm:$0xff]  ;;  %v6757_v44 = vpack.c.bf16 %v1195_v36, %v1194_v23 }
 0x1e4   : > { %6692 = vmatpush3.bf16.msra.mxu0 %v6691_v56  ;;  %v6743_v62 = vpack.c.bf16 %v1155_v50, %v1154_v47  ;;  %v1227_v26 = vld [vmem:[%s7323_s14 + $0x1da8] sm:$0xff]  ;;  %v1178_v45 = vld [vmem:[%s7323_s14 + $0x1c20] sm:$0xff]  ;;  %v1196_v50 = vld [vmem:[%s7323_s14 + $0x1cb0] sm:$0xff] }
 0x1e5   : > { %6724 = vmatpush3.bf16.msra.mxu1 %v6723_v57  ;;  %6694 = vmatprep.subr.bf16.mxu0 %v6693_v59  ;;  %v1172_v57 = vld [vmem:[%s7323_s14 + $0x1bf0] sm:$0xff]  ;;  %v1173_v59 = vld [vmem:[%s7323_s14 + $0x1bf8] sm:$0xff]  ;;  %v1210_v47 = vld [vmem:[%s7323_s14 + $0x1d20] sm:$0xff] }
 0x1e6   : > { %6726 = vmatprep.subr.bf16.mxu1 %v6725_v52  ;;  %v274_v52 = vld [vmem:[%s7333_s11 + $0x70] sm:$0xff] }
 0x1e7   : > { %v1686_v9 = vcombine.high %v274_v52, %v274_v52  ;;  %v8436_v20 = vrot.slane %v274_v52, %v7386_v14  ;;  %v1213_v52 = vld [vmem:[%s7323_s14 + $0x1d38] sm:$0xff] }
 0x1e8   : > { %6696 = vmatpush3.bf16.msra.mxu0 %v6695_v1  ;;  %v1156_v1 = vld [vmem:[%s7323_s14 + $0x1b70] sm:$0xff] }
 0x1e9   : > { %6728 = vmatpush3.bf16.msra.mxu1 %v6727_v2  ;;  %6698 = vmatprep.subr.bf16.mxu0 %v6697_v3  ;;  %v6745_v3 = vpack.c.bf16 %v1173_v59, %v1172_v57  ;;  %v6747_v13 = vpack.c.bf16 %v1157_v4, %v1156_v1  ;;  %v8441_v43 = vrot.slane %v1686_v9, %v7386_v14  ;;  %v1180_v59 = vld [vmem:[%s7323_s14 + $0x1c30] sm:$0xff]  ;;  %v1183_v4 = vld [vmem:[%s7323_s14 + $0x1c48] sm:$0xff]  ;;  %v1201_v9 = vld [vmem:[%s7323_s14 + $0x1cd8] sm:$0xff] }
 0x1ea   : > { %6730 = vmatprep.subr.bf16.mxu1 %v6729_v6  ;;  %v1222_v6 = vld [vmem:[%s7323_s14 + $0x1d80] sm:$0xff]  ;;  %v1701_v38 = vcombine.high %v8436_v20, %v8436_v20  ;;  %v6761_v57 = vpack.c.bf16 %v1197_v54, %v1196_v50 }
 0x1eb   : > { %v6781_v18 = vpack.c.bf16 %v1223_v7, %v1222_v6  ;;  %v1215_v6 = vld [vmem:[%s7323_s14 + $0x1d48] sm:$0xff]  ;;  %v1200_v7 = vld [vmem:[%s7323_s14 + $0x1cd0] sm:$0xff] }
 0x1ec   : > { %6700 = vmatpush3.bf16.msra.mxu0 %v6699_v15  ;;  %v1174_v15 = vld [vmem:[%s7323_s14 + $0x1c00] sm:$0xff] }
 0x1ed   : > { %6732 = vmatpush3.bf16.msra.mxu1 %v6731_v17  ;;  %6702 = vmatprep.subr.bf16.mxu0 %v6701_v12  ;;  %v1175_v17 = vld [vmem:[%s7323_s14 + $0x1c08] sm:$0xff]  ;;  %v1206_v12 = vld [vmem:[%s7323_s14 + $0x1d00] sm:$0xff] }
 0x1ee   : > { %6734 = vmatprep.subr.bf16.mxu1 %v6733_v8  ;;  %v1193_v8 = vld [vmem:[%s7323_s14 + $0x1c98] sm:$0xff]  ;;  %v6751_v27 = vpack.c.bf16 %v1175_v17, %v1174_v15  ;;  %v6799_v15 = vpack.c.bf16 %v1215_v6, %v1214_v5  ;;  %v6769_v17 = vpack.c.bf16 %v1201_v9, %v1200_v7  ;;  %v1256_v5 = vld [vmem:[%s7323_s14 + $0x1e90] sm:$0xff] }
 0x1ef   : > { %v1288_v7 = vld [vmem:[%s7323_s14 + $0x1f90] sm:$0xff]  ;;  %v1289_v9 = vld [vmem:[%s7323_s14 + $0x1f98] sm:$0xff] }
 0x1f0   : > { %6704 = vmatpush3.bf16.msra.mxu0 %v6703_v22  ;;  %v6783_v22 = vpack.c.bf16 %v1207_v19, %v1206_v12  ;;  %v1184_v12 = vld [vmem:[%s7323_s14 + $0x1c50] sm:$0xff] }
 0x1f1   : > { %6736 = vmatpush3.bf16.msra.mxu1 %v6735_v28  ;;  %6706 = vmatprep.subr.bf16.mxu0 %v6705_v29  ;;  %v6753_v28 = vpack.c.bf16 %v1193_v8, %v1192_v16  ;;  %v1176_v29 = vld [vmem:[%s7323_s14 + $0x1c10] sm:$0xff]  ;;  %v1217_v8 = vld [vmem:[%s7323_s14 + $0x1d58] sm:$0xff] }
 0x1f2   : > { %v4993_v37 = vpop.f32.mrb[12].mxu0  ;;  %6738 = vmatprep.subr.bf16.mxu1 %v6737_v33  ;;  %v1209_v33 = vld [vmem:[%s7323_s14 + $0x1d18] sm:$0xff]  ;;  %v1216_v19 = vld [vmem:[%s7323_s14 + $0x1d50] sm:$0xff] }
 0x1f3   : > { %v4994_v34 = vpop.f32.mrb[13].mxu0  ;;  %v5028_v56 = vpop.f32.mrb[12].mxu1 }
 0x1f4   : > { %v4995_v60 = vadd.f32 %v4994_v34, %v4993_v37  ;;  %6708 = vmatpush3.bf16.msra.mxu0 %v6707_v53  ;;  %v5029_v48 = vpop.f32.mrb[13].mxu1  ;;  %v1702_v53 = vcombine.high %v8441_v43, %v8441_v43  ;;  %v6789_v37 = vpack.c.bf16 %v1227_v26, %v1226_v40  ;;  %v1204_v40 = vld [vmem:[%s7323_s14 + $0x1cf0] sm:$0xff]  ;;  %v1205_v26 = vld [vmem:[%s7323_s14 + $0x1cf8] sm:$0xff] }
 0x1f5   : > { %v5030_v46 = vadd.f32 %v5029_v48, %v5028_v56  ;;  %6740 = vmatpush3.bf16.msra.mxu1 %v6739_v41  ;;  %6710 = vmatprep.subr.bf16.mxu0 %v6709_v42  ;;  %v6755_v41 = vpack.c.bf16 %v1177_v30, %v1176_v29  ;;  %v6787_v42 = vpack.c.bf16 %v1209_v33, %v1208_v31  ;;  %v1212_v48 = vld [vmem:[%s7323_s14 + $0x1d30] sm:$0xff]  ;;  %v1186_v31 = vld [vmem:[%s7323_s14 + $0x1c60] sm:$0xff] }
 0x1f6   : > { %v2733_v2 = vadd.f32 %v4995_v60, %v8347_v25  ;;  %6742 = vmatprep.subr.bf16.mxu1 %v6741_v49  ;;  %v6715_v25 = vpack.c.bf16 %v1125_v55, %v1124_v63  ;;  %v1211_v49 = vld [vmem:[%s7323_s14 + $0x1d28] sm:$0xff]  ;;  %v1181_v60 = vld [vmem:[%s7323_s14 + $0x1c38] sm:$0xff]  ;;  %v6795_v1 = vpack.c.bf16 %v1213_v52, %v1212_v48  ;;  %v6803_v29 = vpack.c.bf16 %v1217_v8, %v1216_v19  ;;  %v1218_v33 = vld [vmem:[%s7323_s14 + $0x1d60] sm:$0xff] }
 0x1f7   : > { %v6791_v56 = vpack.c.bf16 %v1211_v49, %v1210_v47  ;;  %v1231_v63 = vld [vmem:[%s7323_s14 + $0x1dc8] sm:$0xff]  ;;  %v6763_v55 = vpack.c.bf16 %v1181_v60, %v1180_v59  ;;  %v6773_v30 = vpack.c.bf16 %v1203_v24, %v1202_v21  ;;  %v6777_v54 = vpack.c.bf16 %v1205_v26, %v1204_v40  ;;  %v1221_v59 = vld [vmem:[%s7323_s14 + $0x1d78] sm:$0xff]  ;;  %v1254_v60 = vld [vmem:[%s7323_s14 + $0x1e80] sm:$0xff] }
 0x1f8   : > { %v8427_v10 = vadd.f32 %v5030_v46, %v2733_v2  ;;  %6712 = vmatpush3.bf16.msra.mxu0 %v6711_v61  ;;  %v1198_v46 = vld [vmem:[%s7323_s14 + $0x1cc0] sm:$0xff]  ;;  %v1255_v48 = vld [vmem:[%s7323_s14 + $0x1e88] sm:$0xff]  ;;  %v6849_v19 = vpack.c.bf16 %v1289_v9, %v1288_v7  ;;  %v1261_v40 = vld [vmem:[%s7323_s14 + $0x1eb8] sm:$0xff] }
 0x1f9   : > { %6744 = vmatpush3.bf16.msra.mxu1 %v6743_v62  ;;  %6714 = vmatprep.subr.bf16.mxu0 %v6713_v0  ;;  %v1199_v62 = vld [vmem:[%s7323_s14 + $0x1cc8] sm:$0xff]  ;;  %v1230_v0 = vld [vmem:[%s7323_s14 + $0x1dc0] sm:$0xff]  ;;  %v1293_v26 = vld [vmem:[%s7323_s14 + $0x1fb8] sm:$0xff] }
 0x1fa   : > { %6746 = vmatprep.subr.bf16.mxu1 %v6745_v3  ;;  %v6765_v2 = vpack.c.bf16 %v1199_v62, %v1198_v46  ;;  %v1182_v3 = vld [vmem:[%s7323_s14 + $0x1c40] sm:$0xff]  ;;  %v6797_v58 = vpack.c.bf16 %v1231_v63, %v1230_v0  ;;  %v1287_v52 = vld [vmem:[%s7323_s14 + $0x1f88] sm:$0xff]  ;;  %v6813_v63 = vpack.c.bf16 %v1255_v48, %v1254_v60 }
 0x1fb   : > { %v1258_v8 = vld [vmem:[%s7323_s14 + $0x1ea0] sm:$0xff]  ;;  %v1259_v21 = vld [vmem:[%s7323_s14 + $0x1ea8] sm:$0xff] }
 0x1fc   : > { %6716 = vmatpush3.bf16.msra.mxu0 %v6715_v25  ;;  %v1232_v25 = vld [vmem:[%s7323_s14 + $0x1dd0] sm:$0xff]  ;;  %v1278_v60 = vld [vmem:[%s7323_s14 + $0x1f40] sm:$0xff]  ;;  %v1267_v9 = vld [vmem:[%s7323_s14 + $0x1ee8] sm:$0xff] }
 0x1fd   : > { %6748 = vmatpush3.bf16.msra.mxu1 %v6747_v13  ;;  %6750 = vmatprep.subr.bf16.mxu0 %v6749_v11  ;;  %v1233_v13 = vld [vmem:[%s7323_s14 + $0x1dd8] sm:$0xff]  ;;  %v6767_v11 = vpack.c.bf16 %v1183_v4, %v1182_v3  ;;  %v1271_v4 = vld [vmem:[%s7323_s14 + $0x1f08] sm:$0xff]  ;;  %v1266_v7 = vld [vmem:[%s7323_s14 + $0x1ee0] sm:$0xff] }
 0x1fe   : > { %6782 = vmatprep.subr.bf16.mxu1 %v6781_v18  ;;  %v1185_v18 = vld [vmem:[%s7323_s14 + $0x1c58] sm:$0xff]  ;;  %v6801_v16 = vpack.c.bf16 %v1233_v13, %v1232_v25 }
 0x1ff   : > { %3711 = vmatmul.mubr.f32.vlgmr.msra.gmra.mrb[26].mxu0 %v8356_v35  ;;  %v1179_v35 = vld [vmem:[%s7323_s14 + $0x1c28] sm:$0xff] }
 0x200   : > { %6752 = vmatpush3.bf16.msra.mxu0 %v6751_v27  ;;  %3781 = vmatmul.mubr.f32.vlgmr.msra.gmra.mrb[26].mxu1 %v8361_v51  ;;  %v1228_v51 = vld [vmem:[%s7323_s14 + $0x1db0] sm:$0xff]  ;;  %v6759_v34 = vpack.c.bf16 %v1179_v35, %v1178_v45  ;;  %v1234_v27 = vld [vmem:[%s7323_s14 + $0x1de0] sm:$0xff] }
 0x201   : > { %6784 = vmatpush3.bf16.msra.mxu1 %v6783_v22  ;;  %6754 = vmatprep.subr.bf16.mxu0 %v6753_v28  ;;  %v6793_v61 = vpack.c.bf16 %v1229_v39, %v1228_v51  ;;  %v1235_v22 = vld [vmem:[%s7323_s14 + $0x1de8] sm:$0xff]  ;;  %v6771_v28 = vpack.c.bf16 %v1185_v18, %v1184_v12  ;;  %v1188_v51 = vld [vmem:[%s7323_s14 + $0x1c70] sm:$0xff]  ;;  %v1189_v39 = vld [vmem:[%s7323_s14 + $0x1c78] sm:$0xff] }
 0x202   : > { %6786 = vmatprep.subr.bf16.mxu1 %v6785_v32  ;;  %3850 = vmatprep.mubr.f32.mxu0 %v1701_v38  ;;  %v1187_v32 = vld [vmem:[%s7323_s14 + $0x1c68] sm:$0xff]  ;;  %v6805_v36 = vpack.c.bf16 %v1235_v22, %v1234_v27  ;;  %v1241_v12 = vld [vmem:[%s7323_s14 + $0x1e18] sm:$0xff]  ;;  %v1272_v18 = vld [vmem:[%s7323_s14 + $0x1f10] sm:$0xff] }
 0x203   : > { %3920 = vmatprep.mubr.f32.mxu1 %v1702_v53  ;;  %v1219_v38 = vld [vmem:[%s7323_s14 + $0x1d68] sm:$0xff]  ;;  %v6775_v47 = vpack.c.bf16 %v1187_v32, %v1186_v31  ;;  %v1290_v27 = vld [vmem:[%s7323_s14 + $0x1fa0] sm:$0xff]  ;;  %v6821_v31 = vpack.c.bf16 %v1259_v21, %v1258_v8 }
 0x204   : > { %6756 = vmatpush3.bf16.msra.mxu0 %v6755_v41  ;;  %v6807_v50 = vpack.c.bf16 %v1219_v38, %v1218_v33  ;;  %v1291_v22 = vld [vmem:[%s7323_s14 + $0x1fa8] sm:$0xff]  ;;  %v1242_v32 = vld [vmem:[%s7323_s14 + $0x1e20] sm:$0xff]  ;;  %v1260_v38 = vld [vmem:[%s7323_s14 + $0x1eb0] sm:$0xff] }
 0x205   : > { %6788 = vmatpush3.bf16.msra.mxu1 %v6787_v42  ;;  %6758 = vmatprep.subr.bf16.mxu0 %v6757_v44  ;;  %v1236_v42 = vld [vmem:[%s7323_s14 + $0x1df0] sm:$0xff]  ;;  %v1237_v44 = vld [vmem:[%s7323_s14 + $0x1df8] sm:$0xff]  ;;  %v1274_v33 = vld [vmem:[%s7323_s14 + $0x1f20] sm:$0xff] }
 0x206   : > { %6790 = vmatprep.subr.bf16.mxu1 %v6789_v37  ;;  %v275_v37 = vld [vmem:[%s7333_s11 + $0x78] sm:$0xff] }
 0x207   : > { %v1703_v46 = vcombine.high %v275_v37, %v275_v37  ;;  %v8516_v6 = vrot.slane %v275_v37, %v7386_v14  ;;  %v1277_v37 = vld [vmem:[%s7323_s14 + $0x1f38] sm:$0xff] }
 0x208   : > { %6760 = vmatpush3.bf16.msra.mxu0 %v6759_v34  ;;  %v1220_v34 = vld [vmem:[%s7323_s14 + $0x1d70] sm:$0xff] }
 0x209   : > { %6792 = vmatpush3.bf16.msra.mxu1 %v6791_v56  ;;  %6762 = vmatprep.subr.bf16.mxu0 %v6761_v57  ;;  %v6809_v57 = vpack.c.bf16 %v1237_v44, %v1236_v42  ;;  %v6811_v0 = vpack.c.bf16 %v1221_v59, %v1220_v34  ;;  %v8521_v25 = vrot.slane %v1703_v46, %v7386_v14  ;;  %v1244_v44 = vld [vmem:[%s7323_s14 + $0x1e30] sm:$0xff]  ;;  %v1247_v59 = vld [vmem:[%s7323_s14 + $0x1e48] sm:$0xff]  ;;  %v1265_v46 = vld [vmem:[%s7323_s14 + $0x1ed8] sm:$0xff] }
 0x20a   : > { %6794 = vmatprep.subr.bf16.mxu1 %v6793_v61  ;;  %v1286_v61 = vld [vmem:[%s7323_s14 + $0x1f80] sm:$0xff]  ;;  %v1718_v24 = vcombine.high %v8516_v6, %v8516_v6  ;;  %v6825_v42 = vpack.c.bf16 %v1261_v40, %v1260_v38 }
 0x20b   : > { %v6845_v3 = vpack.c.bf16 %v1287_v52, %v1286_v61  ;;  %v1279_v61 = vld [vmem:[%s7323_s14 + $0x1f48] sm:$0xff]  ;;  %v1264_v52 = vld [vmem:[%s7323_s14 + $0x1ed0] sm:$0xff] }
 0x20c   : > { %6764 = vmatpush3.bf16.msra.mxu0 %v6763_v55  ;;  %v1238_v55 = vld [vmem:[%s7323_s14 + $0x1e00] sm:$0xff] }
 0x20d   : > { %6796 = vmatpush3.bf16.msra.mxu1 %v6795_v1  ;;  %6766 = vmatprep.subr.bf16.mxu0 %v6765_v2  ;;  %v1239_v1 = vld [vmem:[%s7323_s14 + $0x1e08] sm:$0xff]  ;;  %v1270_v2 = vld [vmem:[%s7323_s14 + $0x1f00] sm:$0xff] }
 0x20e   : > { %6798 = vmatprep.subr.bf16.mxu1 %v6797_v58  ;;  %v1257_v58 = vld [vmem:[%s7323_s14 + $0x1e98] sm:$0xff]  ;;  %v6815_v13 = vpack.c.bf16 %v1239_v1, %v1238_v55  ;;  %v6863_v55 = vpack.c.bf16 %v1279_v61, %v1278_v60  ;;  %v6833_v1 = vpack.c.bf16 %v1265_v46, %v1264_v52  ;;  %v1320_v60 = vld [vmem:[%s7323_s14 + $0x2090] sm:$0xff] }
 0x20f   : > { %v1352_v52 = vld [vmem:[%s7323_s14 + $0x2190] sm:$0xff]  ;;  %v1353_v46 = vld [vmem:[%s7323_s14 + $0x2198] sm:$0xff] }
 0x210   : > { %6768 = vmatpush3.bf16.msra.mxu0 %v6767_v11  ;;  %v6847_v11 = vpack.c.bf16 %v1271_v4, %v1270_v2  ;;  %v1248_v2 = vld [vmem:[%s7323_s14 + $0x1e50] sm:$0xff] }
 0x211   : > { %6800 = vmatpush3.bf16.msra.mxu1 %v6799_v15  ;;  %6770 = vmatprep.subr.bf16.mxu0 %v6769_v17  ;;  %v6817_v15 = vpack.c.bf16 %v1257_v58, %v1256_v5  ;;  %v1240_v17 = vld [vmem:[%s7323_s14 + $0x1e10] sm:$0xff]  ;;  %v1281_v58 = vld [vmem:[%s7323_s14 + $0x1f58] sm:$0xff] }
 0x212   : > { %v5063_v23 = vpop.f32.mrb[14].mxu0  ;;  %6802 = vmatprep.subr.bf16.mxu1 %v6801_v16  ;;  %v1273_v16 = vld [vmem:[%s7323_s14 + $0x1f18] sm:$0xff]  ;;  %v1280_v4 = vld [vmem:[%s7323_s14 + $0x1f50] sm:$0xff] }
 0x213   : > { %v5064_v53 = vpop.f32.mrb[15].mxu0  ;;  %v5098_v41 = vpop.f32.mrb[14].mxu1 }
 0x214   : > { %v5065_v45 = vadd.f32 %v5064_v53, %v5063_v23  ;;  %6772 = vmatpush3.bf16.msra.mxu0 %v6771_v28  ;;  %v5099_v35 = vpop.f32.mrb[15].mxu1  ;;  %v1719_v28 = vcombine.high %v8521_v25, %v8521_v25  ;;  %v6853_v23 = vpack.c.bf16 %v1291_v22, %v1290_v27  ;;  %v1268_v27 = vld [vmem:[%s7323_s14 + $0x1ef0] sm:$0xff]  ;;  %v1269_v22 = vld [vmem:[%s7323_s14 + $0x1ef8] sm:$0xff] }
 0x215   : > { %v5100_v49 = vadd.f32 %v5099_v35, %v5098_v41  ;;  %6804 = vmatpush3.bf16.msra.mxu1 %v6803_v29  ;;  %6774 = vmatprep.subr.bf16.mxu0 %v6773_v30  ;;  %v6819_v29 = vpack.c.bf16 %v1241_v12, %v1240_v17  ;;  %v6851_v30 = vpack.c.bf16 %v1273_v16, %v1272_v18  ;;  %v1276_v35 = vld [vmem:[%s7323_s14 + $0x1f30] sm:$0xff]  ;;  %v1250_v18 = vld [vmem:[%s7323_s14 + $0x1e60] sm:$0xff] }
 0x216   : > { %v2873_v56 = vadd.f32 %v5065_v45, %v8427_v10  ;;  %6806 = vmatprep.subr.bf16.mxu1 %v6805_v36  ;;  %v6779_v10 = vpack.c.bf16 %v1189_v39, %v1188_v51  ;;  %v1275_v36 = vld [vmem:[%s7323_s14 + $0x1f28] sm:$0xff]  ;;  %v1245_v45 = vld [vmem:[%s7323_s14 + $0x1e38] sm:$0xff]  ;;  %v6859_v34 = vpack.c.bf16 %v1277_v37, %v1276_v35  ;;  %v6867_v17 = vpack.c.bf16 %v1281_v58, %v1280_v4  ;;  %v1282_v16 = vld [vmem:[%s7323_s14 + $0x1f60] sm:$0xff] }
 0x217   : > { %v6855_v41 = vpack.c.bf16 %v1275_v36, %v1274_v33  ;;  %v1295_v51 = vld [vmem:[%s7323_s14 + $0x1fc8] sm:$0xff]  ;;  %v6827_v39 = vpack.c.bf16 %v1245_v45, %v1244_v44  ;;  %v6837_v12 = vpack.c.bf16 %v1267_v9, %v1266_v7  ;;  %v6841_v40 = vpack.c.bf16 %v1269_v22, %v1268_v27  ;;  %v1285_v44 = vld [vmem:[%s7323_s14 + $0x1f78] sm:$0xff]  ;;  %v1318_v45 = vld [vmem:[%s7323_s14 + $0x2080] sm:$0xff] }
 0x218   : > { %v8507_v62 = vadd.f32 %v5100_v49, %v2873_v56  ;;  %6776 = vmatpush3.bf16.msra.mxu0 %v6775_v47  ;;  %v1262_v49 = vld [vmem:[%s7323_s14 + $0x1ec0] sm:$0xff]  ;;  %v1319_v35 = vld [vmem:[%s7323_s14 + $0x2088] sm:$0xff]  ;;  %v6913_v4 = vpack.c.bf16 %v1353_v46, %v1352_v52  ;;  %v1325_v27 = vld [vmem:[%s7323_s14 + $0x20b8] sm:$0xff] }
 0x219   : > { %6808 = vmatpush3.bf16.msra.mxu1 %v6807_v50  ;;  %6778 = vmatprep.subr.bf16.mxu0 %v6777_v54  ;;  %v1263_v50 = vld [vmem:[%s7323_s14 + $0x1ec8] sm:$0xff]  ;;  %v1294_v54 = vld [vmem:[%s7323_s14 + $0x1fc0] sm:$0xff]  ;;  %v1357_v22 = vld [vmem:[%s7323_s14 + $0x21b8] sm:$0xff] }
 0x21a   : > { %6810 = vmatprep.subr.bf16.mxu1 %v6809_v57  ;;  %v6829_v56 = vpack.c.bf16 %v1263_v50, %v1262_v49  ;;  %v1246_v57 = vld [vmem:[%s7323_s14 + $0x1e40] sm:$0xff]  ;;  %v6861_v48 = vpack.c.bf16 %v1295_v51, %v1294_v54  ;;  %v1351_v37 = vld [vmem:[%s7323_s14 + $0x2188] sm:$0xff]  ;;  %v6877_v51 = vpack.c.bf16 %v1319_v35, %v1318_v45 }
 0x21b   : > { %v1322_v58 = vld [vmem:[%s7323_s14 + $0x20a0] sm:$0xff]  ;;  %v1323_v7 = vld [vmem:[%s7323_s14 + $0x20a8] sm:$0xff] }
 0x21c   : > { %6780 = vmatpush3.bf16.msra.mxu0 %v6779_v10  ;;  %v1296_v10 = vld [vmem:[%s7323_s14 + $0x1fd0] sm:$0xff]  ;;  %v1342_v45 = vld [vmem:[%s7323_s14 + $0x2140] sm:$0xff]  ;;  %v1331_v46 = vld [vmem:[%s7323_s14 + $0x20e8] sm:$0xff] }
 0x21d   : > { %6812 = vmatpush3.bf16.msra.mxu1 %v6811_v0  ;;  %6814 = vmatprep.subr.bf16.mxu0 %v6813_v63  ;;  %v1297_v0 = vld [vmem:[%s7323_s14 + $0x1fd8] sm:$0xff]  ;;  %v6831_v63 = vpack.c.bf16 %v1247_v59, %v1246_v57  ;;  %v1335_v59 = vld [vmem:[%s7323_s14 + $0x2108] sm:$0xff]  ;;  %v1330_v52 = vld [vmem:[%s7323_s14 + $0x20e0] sm:$0xff] }
 0x21e   : > { %6846 = vmatprep.subr.bf16.mxu1 %v6845_v3  ;;  %v1249_v3 = vld [vmem:[%s7323_s14 + $0x1e58] sm:$0xff]  ;;  %v6865_v5 = vpack.c.bf16 %v1297_v0, %v1296_v10 }
 0x21f   : > { %3851 = vmatmul.mubr.f32.vlgmr.msra.gmra.mrb[28].mxu0 %v8436_v20  ;;  %v1243_v20 = vld [vmem:[%s7323_s14 + $0x1e28] sm:$0xff] }
 0x220   : > { %6816 = vmatpush3.bf16.msra.mxu0 %v6815_v13  ;;  %3921 = vmatmul.mubr.f32.vlgmr.msra.gmra.mrb[28].mxu1 %v8441_v43  ;;  %v1292_v43 = vld [vmem:[%s7323_s14 + $0x1fb0] sm:$0xff]  ;;  %v6823_v53 = vpack.c.bf16 %v1243_v20, %v1242_v32  ;;  %v1298_v13 = vld [vmem:[%s7323_s14 + $0x1fe0] sm:$0xff] }
 0x221   : > { %6848 = vmatpush3.bf16.msra.mxu1 %v6847_v11  ;;  %6818 = vmatprep.subr.bf16.mxu0 %v6817_v15  ;;  %v6857_v47 = vpack.c.bf16 %v1293_v26, %v1292_v43  ;;  %v1299_v11 = vld [vmem:[%s7323_s14 + $0x1fe8] sm:$0xff]  ;;  %v6835_v15 = vpack.c.bf16 %v1249_v3, %v1248_v2  ;;  %v1252_v43 = vld [vmem:[%s7323_s14 + $0x1e70] sm:$0xff]  ;;  %v1253_v26 = vld [vmem:[%s7323_s14 + $0x1e78] sm:$0xff] }
 0x222   : > { %6850 = vmatprep.subr.bf16.mxu1 %v6849_v19  ;;  %3990 = vmatprep.mubr.f32.mxu0 %v1718_v24  ;;  %v1251_v19 = vld [vmem:[%s7323_s14 + $0x1e68] sm:$0xff]  ;;  %v6869_v21 = vpack.c.bf16 %v1299_v11, %v1298_v13  ;;  %v1305_v2 = vld [vmem:[%s7323_s14 + $0x2018] sm:$0xff]  ;;  %v1336_v3 = vld [vmem:[%s7323_s14 + $0x2110] sm:$0xff] }
 0x223   : > { %4060 = vmatprep.mubr.f32.mxu1 %v1719_v28  ;;  %v1283_v24 = vld [vmem:[%s7323_s14 + $0x1f68] sm:$0xff]  ;;  %v6839_v33 = vpack.c.bf16 %v1251_v19, %v1250_v18  ;;  %v1354_v13 = vld [vmem:[%s7323_s14 + $0x21a0] sm:$0xff]  ;;  %v6885_v18 = vpack.c.bf16 %v1323_v7, %v1322_v58 }
 0x224   : > { %6820 = vmatpush3.bf16.msra.mxu0 %v6819_v29  ;;  %v6871_v38 = vpack.c.bf16 %v1283_v24, %v1282_v16  ;;  %v1355_v11 = vld [vmem:[%s7323_s14 + $0x21a8] sm:$0xff]  ;;  %v1306_v19 = vld [vmem:[%s7323_s14 + $0x2020] sm:$0xff]  ;;  %v1324_v24 = vld [vmem:[%s7323_s14 + $0x20b0] sm:$0xff] }
 0x225   : > { %6852 = vmatpush3.bf16.msra.mxu1 %v6851_v30  ;;  %6822 = vmatprep.subr.bf16.mxu0 %v6821_v31  ;;  %v1300_v30 = vld [vmem:[%s7323_s14 + $0x1ff0] sm:$0xff]  ;;  %v1301_v31 = vld [vmem:[%s7323_s14 + $0x1ff8] sm:$0xff]  ;;  %v1338_v16 = vld [vmem:[%s7323_s14 + $0x2120] sm:$0xff] }
 0x226   : > { %6854 = vmatprep.subr.bf16.mxu1 %v6853_v23  ;;  %v276_v23 = vld [vmem:[%s7333_s11 + $0x80] sm:$0xff] }
 0x227   : > { %v1720_v49 = vcombine.high %v276_v23, %v276_v23  ;;  %v8596_v61 = vrot.slane %v276_v23, %v7386_v14  ;;  %v1341_v23 = vld [vmem:[%s7323_s14 + $0x2138] sm:$0xff] }
 0x228   : > { %6824 = vmatpush3.bf16.msra.mxu0 %v6823_v53  ;;  %v1284_v53 = vld [vmem:[%s7323_s14 + $0x1f70] sm:$0xff] }
 0x229   : > { %6856 = vmatpush3.bf16.msra.mxu1 %v6855_v41  ;;  %6826 = vmatprep.subr.bf16.mxu0 %v6825_v42  ;;  %v6873_v42 = vpack.c.bf16 %v1301_v31, %v1300_v30  ;;  %v6875_v54 = vpack.c.bf16 %v1285_v44, %v1284_v53  ;;  %v8601_v10 = vrot.slane %v1720_v49, %v7386_v14  ;;  %v1308_v31 = vld [vmem:[%s7323_s14 + $0x2030] sm:$0xff]  ;;  %v1311_v44 = vld [vmem:[%s7323_s14 + $0x2048] sm:$0xff]  ;;  %v1329_v49 = vld [vmem:[%s7323_s14 + $0x20d8] sm:$0xff] }
 0x22a   : > { %6858 = vmatprep.subr.bf16.mxu1 %v6857_v47  ;;  %v1350_v47 = vld [vmem:[%s7323_s14 + $0x2180] sm:$0xff]  ;;  %v1735_v9 = vcombine.high %v8596_v61, %v8596_v61  ;;  %v6889_v30 = vpack.c.bf16 %v1325_v27, %v1324_v24 }
 0x22b   : > { %v6909_v57 = vpack.c.bf16 %v1351_v37, %v1350_v47  ;;  %v1343_v47 = vld [vmem:[%s7323_s14 + $0x2148] sm:$0xff]  ;;  %v1328_v37 = vld [vmem:[%s7323_s14 + $0x20d0] sm:$0xff] }
 0x22c   : > { %6828 = vmatpush3.bf16.msra.mxu0 %v6827_v39  ;;  %v1302_v39 = vld [vmem:[%s7323_s14 + $0x2000] sm:$0xff] }
 0x22d   : > { %6860 = vmatpush3.bf16.msra.mxu1 %v6859_v34  ;;  %6830 = vmatprep.subr.bf16.mxu0 %v6829_v56  ;;  %v1303_v34 = vld [vmem:[%s7323_s14 + $0x2008] sm:$0xff]  ;;  %v1334_v56 = vld [vmem:[%s7323_s14 + $0x2100] sm:$0xff] }
 0x22e   : > { %6862 = vmatprep.subr.bf16.mxu1 %v6861_v48  ;;  %v1321_v48 = vld [vmem:[%s7323_s14 + $0x2098] sm:$0xff]  ;;  %v6879_v0 = vpack.c.bf16 %v1303_v34, %v1302_v39  ;;  %v6927_v39 = vpack.c.bf16 %v1343_v47, %v1342_v45  ;;  %v6897_v34 = vpack.c.bf16 %v1329_v49, %v1328_v37  ;;  %v1384_v45 = vld [vmem:[%s7323_s14 + $0x2290] sm:$0xff] }
 0x22f   : > { %v1416_v37 = vld [vmem:[%s7323_s14 + $0x2390] sm:$0xff]  ;;  %v1417_v49 = vld [vmem:[%s7323_s14 + $0x2398] sm:$0xff] }
 0x230   : > { %6832 = vmatpush3.bf16.msra.mxu0 %v6831_v63  ;;  %v6911_v63 = vpack.c.bf16 %v1335_v59, %v1334_v56  ;;  %v1312_v56 = vld [vmem:[%s7323_s14 + $0x2050] sm:$0xff] }
 0x231   : > { %6864 = vmatpush3.bf16.msra.mxu1 %v6863_v55  ;;  %6834 = vmatprep.subr.bf16.mxu0 %v6833_v1  ;;  %v6881_v55 = vpack.c.bf16 %v1321_v48, %v1320_v60  ;;  %v1304_v1 = vld [vmem:[%s7323_s14 + $0x2010] sm:$0xff]  ;;  %v1345_v48 = vld [vmem:[%s7323_s14 + $0x2158] sm:$0xff] }
 0x232   : > { %v5133_v8 = vpop.f32.mrb[16].mxu0  ;;  %6866 = vmatprep.subr.bf16.mxu1 %v6865_v5  ;;  %v1337_v5 = vld [vmem:[%s7323_s14 + $0x2118] sm:$0xff]  ;;  %v1344_v59 = vld [vmem:[%s7323_s14 + $0x2150] sm:$0xff] }
 0x233   : > { %v5134_v28 = vpop.f32.mrb[17].mxu0  ;;  %v5168_v29 = vpop.f32.mrb[16].mxu1 }
 0x234   : > { %v5135_v32 = vadd.f32 %v5134_v28, %v5133_v8  ;;  %6836 = vmatpush3.bf16.msra.mxu0 %v6835_v15  ;;  %v5169_v20 = vpop.f32.mrb[17].mxu1  ;;  %v1736_v15 = vcombine.high %v8601_v10, %v8601_v10  ;;  %v6917_v8 = vpack.c.bf16 %v1355_v11, %v1354_v13  ;;  %v1332_v13 = vld [vmem:[%s7323_s14 + $0x20f0] sm:$0xff]  ;;  %v1333_v11 = vld [vmem:[%s7323_s14 + $0x20f8] sm:$0xff] }
 0x235   : > { %v5170_v36 = vadd.f32 %v5169_v20, %v5168_v29  ;;  %6868 = vmatpush3.bf16.msra.mxu1 %v6867_v17  ;;  %6838 = vmatprep.subr.bf16.mxu0 %v6837_v12  ;;  %v6883_v17 = vpack.c.bf16 %v1305_v2, %v1304_v1  ;;  %v6915_v12 = vpack.c.bf16 %v1337_v5, %v1336_v3  ;;  %v1340_v20 = vld [vmem:[%s7323_s14 + $0x2130] sm:$0xff]  ;;  %v1314_v3 = vld [vmem:[%s7323_s14 + $0x2060] sm:$0xff] }
 0x236   : > { %v3013_v41 = vadd.f32 %v5135_v32, %v8507_v62  ;;  %6870 = vmatprep.subr.bf16.mxu1 %v6869_v21  ;;  %v6843_v62 = vpack.c.bf16 %v1253_v26, %v1252_v43  ;;  %v1339_v21 = vld [vmem:[%s7323_s14 + $0x2128] sm:$0xff]  ;;  %v1309_v32 = vld [vmem:[%s7323_s14 + $0x2038] sm:$0xff]  ;;  %v6923_v53 = vpack.c.bf16 %v1341_v23, %v1340_v20  ;;  %v6931_v1 = vpack.c.bf16 %v1345_v48, %v1344_v59  ;;  %v1346_v5 = vld [vmem:[%s7323_s14 + $0x2160] sm:$0xff] }
 0x237   : > { %v6919_v29 = vpack.c.bf16 %v1339_v21, %v1338_v16  ;;  %v1359_v43 = vld [vmem:[%s7323_s14 + $0x21c8] sm:$0xff]  ;;  %v6891_v26 = vpack.c.bf16 %v1309_v32, %v1308_v31  ;;  %v6901_v2 = vpack.c.bf16 %v1331_v46, %v1330_v52  ;;  %v6905_v27 = vpack.c.bf16 %v1333_v11, %v1332_v13  ;;  %v1349_v31 = vld [vmem:[%s7323_s14 + $0x2178] sm:$0xff]  ;;  %v1382_v32 = vld [vmem:[%s7323_s14 + $0x2280] sm:$0xff] }
 0x238   : > { %v8587_v50 = vadd.f32 %v5170_v36, %v3013_v41  ;;  %6840 = vmatpush3.bf16.msra.mxu0 %v6839_v33  ;;  %v1326_v36 = vld [vmem:[%s7323_s14 + $0x20c0] sm:$0xff]  ;;  %v1383_v20 = vld [vmem:[%s7323_s14 + $0x2288] sm:$0xff]  ;;  %v6977_v59 = vpack.c.bf16 %v1417_v49, %v1416_v37  ;;  %v1421_v13 = vld [vmem:[%s7323_s14 + $0x23b8] sm:$0xff] }
 0x239   : > { %6872 = vmatpush3.bf16.msra.mxu1 %v6871_v38  ;;  %6842 = vmatprep.subr.bf16.mxu0 %v6841_v40  ;;  %v1327_v38 = vld [vmem:[%s7323_s14 + $0x20c8] sm:$0xff]  ;;  %v1358_v40 = vld [vmem:[%s7323_s14 + $0x21c0] sm:$0xff] }
 0x23a   : > { %6874 = vmatprep.subr.bf16.mxu1 %v6873_v42  ;;  %v6893_v41 = vpack.c.bf16 %v1327_v38, %v1326_v36  ;;  %v1310_v42 = vld [vmem:[%s7323_s14 + $0x2040] sm:$0xff]  ;;  %v6925_v35 = vpack.c.bf16 %v1359_v43, %v1358_v40  ;;  %v1415_v23 = vld [vmem:[%s7323_s14 + $0x2388] sm:$0xff]  ;;  %v6941_v43 = vpack.c.bf16 %v1383_v20, %v1382_v32 }
 0x23b   : > { %v1386_v48 = vld [vmem:[%s7323_s14 + $0x22a0] sm:$0xff]  ;;  %v1407_v20 = vld [vmem:[%s7323_s14 + $0x2348] sm:$0xff] }
 0x23c   : > { %6844 = vmatpush3.bf16.msra.mxu0 %v6843_v62  ;;  %v1360_v62 = vld [vmem:[%s7323_s14 + $0x21d0] sm:$0xff]  ;;  %v1418_v46 = vld [vmem:[%s7323_s14 + $0x23a0] sm:$0xff]  ;;  %v1395_v37 = vld [vmem:[%s7323_s14 + $0x22e8] sm:$0xff] }
 0x23d   : > { %6876 = vmatpush3.bf16.msra.mxu1 %v6875_v54  ;;  %6878 = vmatprep.subr.bf16.mxu0 %v6877_v51  ;;  %v1361_v54 = vld [vmem:[%s7323_s14 + $0x21d8] sm:$0xff]  ;;  %v6895_v51 = vpack.c.bf16 %v1311_v44, %v1310_v42  ;;  %v1399_v44 = vld [vmem:[%s7323_s14 + $0x2308] sm:$0xff]  ;;  %v1426_v49 = vld [vmem:[%s7323_s14 + $0x23e0] sm:$0xff] }
 0x23e   : > { %6910 = vmatprep.subr.bf16.mxu1 %v6909_v57  ;;  %v1313_v57 = vld [vmem:[%s7323_s14 + $0x2058] sm:$0xff]  ;;  %v6929_v60 = vpack.c.bf16 %v1361_v54, %v1360_v62 }
 0x23f   : > { %3991 = vmatmul.mubr.f32.vlgmr.msra.gmra.mrb[30].mxu0 %v8516_v6  ;;  %v1307_v6 = vld [vmem:[%s7323_s14 + $0x2028] sm:$0xff] }
 0x240   : > { %6880 = vmatpush3.bf16.msra.mxu0 %v6879_v0  ;;  %4061 = vmatmul.mubr.f32.vlgmr.msra.gmra.mrb[30].mxu1 %v8521_v25  ;;  %v1356_v25 = vld [vmem:[%s7323_s14 + $0x21b0] sm:$0xff]  ;;  %v6887_v28 = vpack.c.bf16 %v1307_v6, %v1306_v19  ;;  %v1362_v0 = vld [vmem:[%s7323_s14 + $0x21e0] sm:$0xff] }
 0x241   : > { %6912 = vmatpush3.bf16.msra.mxu1 %v6911_v63  ;;  %6882 = vmatprep.subr.bf16.mxu0 %v6881_v55  ;;  %v6921_v33 = vpack.c.bf16 %v1357_v22, %v1356_v25  ;;  %v1363_v63 = vld [vmem:[%s7323_s14 + $0x21e8] sm:$0xff]  ;;  %v6899_v55 = vpack.c.bf16 %v1313_v57, %v1312_v56  ;;  %v1316_v25 = vld [vmem:[%s7323_s14 + $0x2070] sm:$0xff]  ;;  %v1317_v22 = vld [vmem:[%s7323_s14 + $0x2078] sm:$0xff] }
 0x242   : > { %6914 = vmatprep.subr.bf16.mxu1 %v6913_v4  ;;  %4130 = vmatprep.mubr.f32.mxu0 %v1735_v9  ;;  %v1315_v4 = vld [vmem:[%s7323_s14 + $0x2068] sm:$0xff]  ;;  %v6933_v7 = vpack.c.bf16 %v1363_v63, %v1362_v0  ;;  %v1369_v56 = vld [vmem:[%s7323_s14 + $0x2218] sm:$0xff]  ;;  %v1400_v57 = vld [vmem:[%s7323_s14 + $0x2310] sm:$0xff] }
 0x243   : > { %4200 = vmatprep.mubr.f32.mxu1 %v1736_v15  ;;  %v1347_v9 = vld [vmem:[%s7323_s14 + $0x2168] sm:$0xff]  ;;  %v6903_v16 = vpack.c.bf16 %v1315_v4, %v1314_v3  ;;  %v1370_v3 = vld [vmem:[%s7323_s14 + $0x2220] sm:$0xff] }
 0x244   : > { %6884 = vmatpush3.bf16.msra.mxu0 %v6883_v17  ;;  %v6935_v24 = vpack.c.bf16 %v1347_v9, %v1346_v5  ;;  %v1419_v0 = vld [vmem:[%s7323_s14 + $0x23a8] sm:$0xff]  ;;  %v1402_v4 = vld [vmem:[%s7323_s14 + $0x2320] sm:$0xff]  ;;  %v1389_v9 = vld [vmem:[%s7323_s14 + $0x22b8] sm:$0xff] }
 0x245   : > { %6916 = vmatpush3.bf16.msra.mxu1 %v6915_v12  ;;  %6886 = vmatprep.subr.bf16.mxu0 %v6885_v18  ;;  %v1364_v12 = vld [vmem:[%s7323_s14 + $0x21f0] sm:$0xff]  ;;  %v1365_v18 = vld [vmem:[%s7323_s14 + $0x21f8] sm:$0xff]  ;;  %v6981_v5 = vpack.c.bf16 %v1419_v0, %v1418_v46 }
 0x246   : > { %6918 = vmatprep.subr.bf16.mxu1 %v6917_v8  ;;  %v277_v8 = vld [vmem:[%s7333_s11 + $0x88] sm:$0xff]  ;;  %v1397_v46 = vld [vmem:[%s7323_s14 + $0x22f8] sm:$0xff] }
 0x247   : > { %v1737_v36 = vcombine.high %v277_v8, %v277_v8  ;;  %v8676_v47 = vrot.slane %v277_v8, %v7386_v14  ;;  %v1390_v8 = vld [vmem:[%s7323_s14 + $0x22c0] sm:$0xff] }
 0x248   : > { %6888 = vmatpush3.bf16.msra.mxu0 %v6887_v28  ;;  %v1348_v28 = vld [vmem:[%s7323_s14 + $0x2170] sm:$0xff] }
 0x249   : > { %6920 = vmatpush3.bf16.msra.mxu1 %v6919_v29  ;;  %6890 = vmatprep.subr.bf16.mxu0 %v6889_v30  ;;  %v6937_v30 = vpack.c.bf16 %v1365_v18, %v1364_v12  ;;  %v6939_v40 = vpack.c.bf16 %v1349_v31, %v1348_v28  ;;  %v8681_v62 = vrot.slane %v1737_v36, %v7386_v14  ;;  %v1387_v14 = vld [vmem:[%s7323_s14 + $0x22a8] sm:$0xff]  ;;  %v1372_v12 = vld [vmem:[%s7323_s14 + $0x2230] sm:$0xff]  ;;  %v1373_v18 = vld [vmem:[%s7323_s14 + $0x2238] sm:$0xff] }
 0x24a   : > { %6922 = vmatprep.subr.bf16.mxu1 %v6921_v33  ;;  %v1414_v33 = vld [vmem:[%s7323_s14 + $0x2380] sm:$0xff]  ;;  %v1752_v52 = vcombine.high %v8676_v47, %v8676_v47  ;;  %v1424_v36 = vld [vmem:[%s7323_s14 + $0x23d0] sm:$0xff] }
 0x24b   : > { %v6973_v42 = vpack.c.bf16 %v1415_v23, %v1414_v33  ;;  %v1753_v63 = vcombine.high %v8681_v62, %v8681_v62  ;;  %v1406_v31 = vld [vmem:[%s7323_s14 + $0x2340] sm:$0xff]  ;;  %v1392_v33 = vld [vmem:[%s7323_s14 + $0x22d0] sm:$0xff]  ;;  %v1393_v23 = vld [vmem:[%s7323_s14 + $0x22d8] sm:$0xff] }
 0x24c   : > { %6892 = vmatpush3.bf16.msra.mxu0 %v6891_v26  ;;  %v1366_v26 = vld [vmem:[%s7323_s14 + $0x2200] sm:$0xff] }
 0x24d   : > { %6924 = vmatpush3.bf16.msra.mxu1 %v6923_v53  ;;  %6894 = vmatprep.subr.bf16.mxu0 %v6893_v41  ;;  %v1367_v53 = vld [vmem:[%s7323_s14 + $0x2208] sm:$0xff]  ;;  %v1398_v41 = vld [vmem:[%s7323_s14 + $0x2300] sm:$0xff] }
 0x24e   : > { %6926 = vmatprep.subr.bf16.mxu1 %v6925_v35  ;;  %v1385_v35 = vld [vmem:[%s7323_s14 + $0x2298] sm:$0xff]  ;;  %v6943_v54 = vpack.c.bf16 %v1367_v53, %v1366_v26  ;;  %v6961_v26 = vpack.c.bf16 %v1393_v23, %v1392_v33  ;;  %v1376_v53 = vld [vmem:[%s7323_s14 + $0x2250] sm:$0xff] }
 0x250   : > { %6896 = vmatpush3.bf16.msra.mxu0 %v6895_v51  ;;  %v6975_v51 = vpack.c.bf16 %v1399_v44, %v1398_v41  ;;  %v1377_v41 = vld [vmem:[%s7323_s14 + $0x2258] sm:$0xff] }
 0x251   : > { %6928 = vmatpush3.bf16.msra.mxu1 %v6927_v39  ;;  %6898 = vmatprep.subr.bf16.mxu0 %v6897_v34  ;;  %v6945_v39 = vpack.c.bf16 %v1385_v35, %v1384_v45  ;;  %v1368_v34 = vld [vmem:[%s7323_s14 + $0x2210] sm:$0xff]  ;;  %v1409_v45 = vld [vmem:[%s7323_s14 + $0x2358] sm:$0xff]  ;;  %v1394_v35 = vld [vmem:[%s7323_s14 + $0x22e0] sm:$0xff] }
 0x252   : > { %v5203_v58 = vpop.f32.mrb[18].mxu0  ;;  %6930 = vmatprep.subr.bf16.mxu1 %v6929_v60  ;;  %v1401_v60 = vld [vmem:[%s7323_s14 + $0x2318] sm:$0xff] }
 0x253   : > { %v5204_v15 = vpop.f32.mrb[19].mxu0  ;;  %v5238_v17 = vpop.f32.mrb[18].mxu1 }
 0x254   : > { %v5205_v19 = vadd.f32 %v5204_v15, %v5203_v58  ;;  %6900 = vmatpush3.bf16.msra.mxu0 %v6899_v55  ;;  %v5239_v6 = vpop.f32.mrb[19].mxu1  ;;  %v6947_v55 = vpack.c.bf16 %v1369_v56, %v1368_v34  ;;  %v1403_v58 = vld [vmem:[%s7323_s14 + $0x2328] sm:$0xff]  ;;  %v6965_v34 = vpack.c.bf16 %v1395_v37, %v1394_v35  ;;  %v1378_v56 = vld [vmem:[%s7323_s14 + $0x2260] sm:$0xff] }
 0x255   : > { %v5240_v21 = vadd.f32 %v5239_v6, %v5238_v17  ;;  %6932 = vmatpush3.bf16.msra.mxu1 %v6931_v1  ;;  %6902 = vmatprep.subr.bf16.mxu0 %v6901_v2  ;;  %v6979_v1 = vpack.c.bf16 %v1401_v60, %v1400_v57  ;;  %v6949_v2 = vpack.c.bf16 %v1387_v14, %v1386_v48  ;;  %v1379_v57 = vld [vmem:[%s7323_s14 + $0x2268] sm:$0xff] }
 0x256   : > { %v3153_v29 = vadd.f32 %v5205_v19, %v8587_v50  ;;  %6934 = vmatprep.subr.bf16.mxu1 %v6933_v7  ;;  %v6907_v50 = vpack.c.bf16 %v1317_v22, %v1316_v25  ;;  %v1388_v7 = vld [vmem:[%s7323_s14 + $0x22b0] sm:$0xff]  ;;  %v6983_v15 = vpack.c.bf16 %v1403_v58, %v1402_v4  ;;  %v6955_v25 = vpack.c.bf16 %v1373_v18, %v1372_v12  ;;  %v1411_v14 = vld [vmem:[%s7323_s14 + $0x2368] sm:$0xff] }
 0x257   : > { %v6953_v17 = vpack.c.bf16 %v1389_v9, %v1388_v7  ;;  %v1404_v19 = vld [vmem:[%s7323_s14 + $0x2330] sm:$0xff]  ;;  %v1381_v9 = vld [vmem:[%s7323_s14 + $0x2278] sm:$0xff] }
 0x258   : > { %v8667_v38 = vadd.f32 %v5240_v21, %v3153_v29  ;;  %6904 = vmatpush3.bf16.msra.mxu0 %v6903_v16  ;;  %v1405_v16 = vld [vmem:[%s7323_s14 + $0x2338] sm:$0xff]  ;;  %v1391_v21 = vld [vmem:[%s7323_s14 + $0x22c8] sm:$0xff]  ;;  %v1374_v29 = vld [vmem:[%s7323_s14 + $0x2240] sm:$0xff] }
 0x259   : > { %6936 = vmatpush3.bf16.msra.mxu1 %v6935_v24  ;;  %6906 = vmatprep.subr.bf16.mxu0 %v6905_v27  ;;  %v1422_v24 = vld [vmem:[%s7323_s14 + $0x23c0] sm:$0xff]  ;;  %v1423_v27 = vld [vmem:[%s7323_s14 + $0x23c8] sm:$0xff]  ;;  %v6987_v22 = vpack.c.bf16 %v1405_v16, %v1404_v19  ;;  %v6957_v28 = vpack.c.bf16 %v1391_v21, %v1390_v8  ;;  %v1380_v7 = vld [vmem:[%s7323_s14 + $0x2270] sm:$0xff] }
 0x25a   : > { %6938 = vmatprep.subr.bf16.mxu1 %v6937_v30  ;;  %v1375_v30 = vld [vmem:[%s7323_s14 + $0x2248] sm:$0xff]  ;;  %v6989_v32 = vpack.c.bf16 %v1423_v27, %v1422_v24  ;;  %v6971_v12 = vpack.c.bf16 %v1381_v9, %v1380_v7  ;;  %v259_v7 = vld [vmem:[#allocation2] sm:$0x3] }
 0x25c   : > { %6908 = vmatpush3.bf16.msra.mxu0 %v6907_v50  ;;  %v1425_v50 = vld [vmem:[%s7323_s14 + $0x23d8] sm:$0xff] }
 0x25d   : > { %6940 = vmatpush3.bf16.msra.mxu1 %v6939_v40  ;;  %6942 = vmatprep.subr.bf16.mxu0 %v6941_v43  ;;  %v6959_v40 = vpack.c.bf16 %v1375_v30, %v1374_v29  ;;  %v6991_v43 = vpack.c.bf16 %v1407_v20, %v1406_v31  ;;  %v6993_v44 = vpack.c.bf16 %v1425_v50, %v1424_v36 }
 0x25e   : > { %6974 = vmatprep.subr.bf16.mxu1 %v6973_v42  ;;  %v1408_v42 = vld [vmem:[%s7323_s14 + $0x2350] sm:$0xff] }
 0x25f   : > { %4131 = vmatmul.mubr.f32.vlgmr.msra.gmra.mrb[32].mxu0 %v8596_v61  ;;  %v1371_v61 = vld [vmem:[%s7323_s14 + $0x2228] sm:$0xff] }
 0x260   : > { %6944 = vmatpush3.bf16.msra.mxu0 %v6943_v54  ;;  %4201 = vmatmul.mubr.f32.vlgmr.msra.gmra.mrb[32].mxu1 %v8601_v10  ;;  %v1420_v10 = vld [vmem:[%s7323_s14 + $0x23b0] sm:$0xff]  ;;  %v6951_v11 = vpack.c.bf16 %v1371_v61, %v1370_v3  ;;  %v1427_v54 = vld [vmem:[%s7323_s14 + $0x23e8] sm:$0xff]  ;;  %v6967_v61 = vpack.c.bf16 %v1379_v57, %v1378_v56 }
 0x261   : > { %6976 = vmatpush3.bf16.msra.mxu1 %v6975_v51  ;;  %6946 = vmatprep.subr.bf16.mxu0 %v6945_v39  ;;  %v6985_v6 = vpack.c.bf16 %v1421_v13, %v1420_v10  ;;  %v6963_v51 = vpack.c.bf16 %v1377_v41, %v1376_v53  ;;  %v6995_v39 = vpack.c.bf16 %v1409_v45, %v1408_v42 }
 0x262   : > { %6978 = vmatprep.subr.bf16.mxu1 %v6977_v59  ;;  %4270 = vmatprep.mubr.f32.mxu0 %v1752_v52  ;;  %v1410_v59 = vld [vmem:[%s7323_s14 + $0x2360] sm:$0xff]  ;;  %v6997_v48 = vpack.c.bf16 %v1427_v54, %v1426_v49  ;;  %v1396_v52 = vld [vmem:[%s7323_s14 + $0x22f0] sm:$0xff] }
 0x263   : > { %4340 = vmatprep.mubr.f32.mxu1 %v1753_v63  ;;  %v6969_v58 = vpack.c.bf16 %v1397_v46, %v1396_v52 }
 0x264   : > { %6948 = vmatpush3.bf16.msra.mxu0 %v6947_v55  ;;  %v1428_v55 = vld [vmem:[%s7323_s14 + $0x23f0] sm:$0xff] }
 0x265   : > { %6980 = vmatpush3.bf16.msra.mxu1 %v6979_v1  ;;  %6950 = vmatprep.subr.bf16.mxu0 %v6949_v2  ;;  %v1429_v1 = vld [vmem:[%s7323_s14 + $0x23f8] sm:$0xff] }
 0x266   : > { %6982 = vmatprep.subr.bf16.mxu1 %v6981_v5  ;;  %v6999_v5 = vpack.c.bf16 %v1411_v14, %v1410_v59  ;;  %v7001_v13 = vpack.c.bf16 %v1429_v1, %v1428_v55 }
 0x268   : > { %6952 = vmatpush3.bf16.msra.mxu0 %v6951_v11  ;;  %v1412_v11 = vld [vmem:[%s7323_s14 + $0x2370] sm:$0xff] }
 0x269   : > { %6984 = vmatpush3.bf16.msra.mxu1 %v6983_v15  ;;  %6954 = vmatprep.subr.bf16.mxu0 %v6953_v17  ;;  %v1413_v15 = vld [vmem:[%s7323_s14 + $0x2378] sm:$0xff] }
 0x26a   : > { %6986 = vmatprep.subr.bf16.mxu1 %v6985_v6  ;;  %v7003_v18 = vpack.c.bf16 %v1413_v15, %v1412_v11  ;;  %v4363_v11 = vld [vmem:[%s8838_s3 + $0x8] sm:$0xff] (!%p4533_p7)  ;;  %v4364_v15 = vld [vmem:[%s8838_s3 + $0x10] sm:$0xff] (!%p4533_p7) }
 0x26c   : > { %6956 = vmatpush3.bf16.msra.mxu0 %v6955_v25 }
 0x26d   : > { %6988 = vmatpush3.bf16.msra.mxu1 %v6987_v22  ;;  %6958 = vmatprep.subr.bf16.mxu0 %v6957_v28 }
 0x26e   : > { %6990 = vmatprep.subr.bf16.mxu1 %v6989_v32 }
 0x270   : > { %6960 = vmatpush3.bf16.msra.mxu0 %v6959_v40 }
 0x271   : > { %6992 = vmatpush3.bf16.msra.mxu1 %v6991_v43  ;;  %6962 = vmatprep.subr.bf16.mxu0 %v6961_v26 }
 0x272   : > { %v5273_v60 = vpop.f32.mrb[20].mxu0  ;;  %6994 = vmatprep.subr.bf16.mxu1 %v6993_v44 }
 0x273   : > { %v5274_v0 = vpop.f32.mrb[21].mxu0  ;;  %v5308_v63 = vpop.f32.mrb[20].mxu1 }
 0x274   : > { %v5275_v2 = vadd.f32 %v5274_v0, %v5273_v60  ;;  %6964 = vmatpush3.bf16.msra.mxu0 %v6963_v51  ;;  %v5309_v3 = vpop.f32.mrb[21].mxu1 }
 0x275   : > { %v5310_v4 = vadd.f32 %v5309_v3, %v5308_v63  ;;  %6996 = vmatpush3.bf16.msra.mxu1 %v6995_v39  ;;  %6966 = vmatprep.subr.bf16.mxu0 %v6965_v34 }
 0x276   : > { %v3293_v10 = vadd.f32 %v5275_v2, %v8667_v38  ;;  %6998 = vmatprep.subr.bf16.mxu1 %v6997_v48 }
 0x278   : > { %v3363_v17 = vadd.f32 %v5310_v4, %v3293_v10  ;;  %6968 = vmatpush3.bf16.msra.mxu0 %v6967_v61 }
 0x279   : > { %7000 = vmatpush3.bf16.msra.mxu1 %v6999_v5  ;;  %6970 = vmatprep.subr.bf16.mxu0 %v6969_v58 }
 0x27a   : > { %7002 = vmatprep.subr.bf16.mxu1 %v7001_v13  ;;  %v4362_v13 = vld [vmem:[%s8838_s3] sm:$0xff] (!%p4533_p7) }
 0x27c   : > { %6972 = vmatpush3.bf16.msra.mxu0 %v6971_v12  ;;  %v7006_v12 = vpack.c.bf16 (!%p4533_p7), %v4363_v11, %v4362_v13 }
 0x27d   : > { %7004 = vmatpush3.bf16.msra.mxu1 %v7003_v18  ;;  %v4365_v18 = vld [vmem:[%s8838_s3 + $0x18] sm:$0xff] (!%p4533_p7) }
 0x27f   : > { %4271 = vmatmul.mubr.f32.vlgmr.msra.gmra.mrb[34].mxu0 %v8676_v47 }
 0x280   : > { %4341 = vmatmul.mubr.f32.vlgmr.msra.gmra.mrb[34].mxu1 %v8681_v62 }
 0x292   : > { %v5343_v19 = vpop.f32.mrb[22].mxu0 }
 0x293   : > { %v5344_v6 = vpop.f32.mrb[23].mxu0  ;;  %v5378_v38 = vpop.f32.mrb[22].mxu1 }
 0x294   : > { %v5345_v16 = vadd.f32 %v5344_v6, %v5343_v19  ;;  %v5379_v8 = vpop.f32.mrb[23].mxu1  ;;  %v7205_v19 = vmov (!%p4533_p7), 0.0   ;;  %v7009_v6 = vpack.c.bf16 (!%p4533_p7), %v4365_v18, %v4364_v15 }
 0x295   : > { %v5380_v21 = vadd.f32 %v5379_v8, %v5378_v38  ;;  %5850 = vmatprep.mubr.msk.f32.mxu0 (!%p4533_p7), %vm7204_vm0, %v7205_v19  ;;  %v4366_v38 = vld [vmem:[%s8838_s3 + $0x20] sm:$0xff] (!%p4533_p7) }
 0x296   : > { %v3433_v24 = vadd.f32 %v5345_v16, %v3363_v17  ;;  %v7203_v17 = vmov (!%p4533_p7), 0.0|0.0   ;;  %v4367_v16 = vld [vmem:[%s8838_s3 + $0x28] sm:$0xff] (!%p4533_p7) }
 0x297   : > { %7005 = vmatprep.subr.bf16.mxu0 (!%p4533_p7), %v7203_v17  ;;  %v7012_v8 = vpack.c.bf16 (!%p4533_p7), %v4367_v16, %v4366_v38 }
 0x298   : > { %v3503_v27 = vadd.f32 %v5380_v21, %v3433_v24  ;;  %7007 = vmatpush3.bf16.msra.mxu0 (!%p4533_p7), %v7006_v12  ;;  %v4368_v21 = vld [vmem:[%s8838_s3 + $0x30] sm:$0xff] (!%p4533_p7)  ;;  %v4369_v24 = vld [vmem:[%s8838_s3 + $0x38] sm:$0xff] (!%p4533_p7) }
 0x299   : > { %7008 = vmatprep.subr.bf16.mxu0 (!%p4533_p7), %v7203_v17 }
 0x29c   : > { %7010 = vmatpush3.bf16.msra.mxu0 (!%p4533_p7), %v7009_v6 }
 0x29d   : > { %7011 = vmatprep.subr.bf16.mxu0 (!%p4533_p7), %v7203_v17 }
 0x2a0   : > { %7013 = vmatpush3.bf16.msra.mxu0 (!%p4533_p7), %v7012_v8 }
 0x2a1   : > { %7014 = vmatprep.subr.bf16.mxu0 (!%p4533_p7), %v7203_v17 }
 0x2b2   : > { %v5413_v25 = vpop.f32.mrb[24].mxu0 }
 0x2b3   : > { %v5414_v22 = vpop.f32.mrb[25].mxu0  ;;  %v5448_v28 = vpop.f32.mrb[24].mxu1 }
 0x2b4   : > { %v5415_v29 = vadd.f32 %v5414_v22, %v5413_v25  ;;  %v5449_v30 = vpop.f32.mrb[25].mxu1  ;;  %v4370_v25 = vld [vmem:[%s8838_s3 + $0x40] sm:$0xff] (!%p4533_p7)  ;;  %v4371_v22 = vld [vmem:[%s8838_s3 + $0x48] sm:$0xff] (!%p4533_p7) }
 0x2b5   : > { %v5450_v31 = vadd.f32 %v5449_v30, %v5448_v28  ;;  %v7018_v28 = vpack.c.bf16 (!%p4533_p7), %v4371_v22, %v4370_v25  ;;  %v4373_v30 = vld [vmem:[%s8838_s3 + $0x58] sm:$0xff] (!%p4533_p7) }
 0x2b6   : > { %v3573_v32 = vadd.f32 %v5415_v29, %v3503_v27  ;;  %v7015_v27 = vpack.c.bf16 (!%p4533_p7), %v4369_v24, %v4368_v21  ;;  %v4372_v29 = vld [vmem:[%s8838_s3 + $0x50] sm:$0xff] (!%p4533_p7) }
 0x2b8   : > { %v3643_v20 = vadd.f32 %v5450_v31, %v3573_v32  ;;  %7016 = vmatpush3.bf16.msra.mxu0 (!%p4533_p7), %v7015_v27  ;;  %v7021_v31 = vpack.c.bf16 (!%p4533_p7), %v4373_v30, %v4372_v29  ;;  %v4374_v32 = vld [vmem:[%s8838_s3 + $0x60] sm:$0xff] (!%p4533_p7) }
 0x2b9   : > { %7017 = vmatprep.subr.bf16.mxu0 (!%p4533_p7), %v7203_v17 }
 0x2bc   : > { %7019 = vmatpush3.bf16.msra.mxu0 (!%p4533_p7), %v7018_v28 }
 0x2bd   : > { %7020 = vmatprep.subr.bf16.mxu0 (!%p4533_p7), %v7203_v17 }
 0x2c0   : > { %7022 = vmatpush3.bf16.msra.mxu0 (!%p4533_p7), %v7021_v31 }
 0x2c1   : > { %7023 = vmatprep.subr.bf16.mxu0 (!%p4533_p7), %v7203_v17 }
 0x2d2   : > { %v5483_v33 = vpop.f32.mrb[26].mxu0 }
 0x2d3   : > { %v5484_v47 = vpop.f32.mrb[27].mxu0  ;;  %v5518_v23 = vpop.f32.mrb[26].mxu1 }
 0x2d4   : > { %v5485_v62 = vadd.f32 %v5484_v47, %v5483_v33  ;;  %v5519_v36 = vpop.f32.mrb[27].mxu1 }
 0x2d5   : > { %v5520_v50 = vadd.f32 %v5519_v36, %v5518_v23  ;;  %v4534_v23 = vld [vmem:[%s8837_s2] ss:$0 sm:$0xff] (!%p4533_p7)  ;;  %v4377_v36 = vld [vmem:[%s8838_s3 + $0x78] sm:$0xff] (!%p4533_p7) }
 0x2d6   : > { %v3713_v40 = vadd.f32 %v5485_v62, %v3643_v20  ;;  %v4375_v20 = vld [vmem:[%s8838_s3 + $0x68] sm:$0xff] (!%p4533_p7)  ;;  %v4376_v62 = vld [vmem:[%s8838_s3 + $0x70] sm:$0xff] (!%p4533_p7) }
 0x2d7   : > { %v7024_v33 = vpack.c.bf16 (!%p4533_p7), %v4375_v20, %v4374_v32 }
 0x2d8   : > { %v3783_v43 = vadd.f32 %v5520_v50, %v3713_v40  ;;  %v7027_v40 = vpack.c.bf16 (!%p4533_p7), %v4377_v36, %v4376_v62 }
 0x2d9   : > { %7025 = vmatpush3.bf16.msra.mxu0 (!%p4533_p7), %v7024_v33 }
 0x2da   : > { %7026 = vmatprep.subr.bf16.mxu0 (!%p4533_p7), %v7203_v17 }
 0x2dd   : > { %7028 = vmatpush3.bf16.msra.mxu0 (!%p4533_p7), %v7027_v40 }
 0x2f2   : > { %v5553_v26 = vpop.f32.mrb[28].mxu0 }
 0x2f3   : > { %v5554_v53 = vpop.f32.mrb[29].mxu0  ;;  %v5588_v41 = vpop.f32.mrb[28].mxu1 }
 0x2f4   : > { %v5555_v42 = vadd.f32 %v5554_v53, %v5553_v26  ;;  %v5589_v44 = vpop.f32.mrb[29].mxu1  ;;  %v4535_v26 = vld [vmem:[%s8839_s4] ss:$0 sm:$0xff] (!%p4533_p7) }
 0x2f5   : > { %v5590_v45 = vadd.f32 %v5589_v44, %v5588_v41 }
 0x2f6   : > { %v3853_v35 = vadd.f32 %v5555_v42, %v3783_v43 }
 0x2f8   : > { %v3923_v37 = vadd.f32 %v5590_v45, %v3853_v35 }
 0x312   : > { %v5623_v49 = vpop.f32.mrb[30].mxu0 }
 0x313   : > { %v5624_v54 = vpop.f32.mrb[31].mxu0  ;;  %v5658_v51 = vpop.f32.mrb[30].mxu1 }
 0x314   : > { %v5625_v39 = vadd.f32 %v5624_v54, %v5623_v49  ;;  %v5659_v34 = vpop.f32.mrb[31].mxu1 }
 0x315   : > { %v5660_v56 = vadd.f32 %v5659_v34, %v5658_v51 }
 0x316   : > { %v3993_v57 = vadd.f32 %v5625_v39, %v3923_v37 }
 0x318   : > { %v4063_v59 = vadd.f32 %v5660_v56, %v3993_v57 }
 0x332   : > { %v5693_v60 = vpop.f32.mrb[32].mxu0 }
 0x333   : > { %v5694_v48 = vpop.f32.mrb[33].mxu0  ;;  %v5728_v14 = vpop.f32.mrb[32].mxu1 }
 0x334   : > { %v5695_v52 = vadd.f32 %v5694_v48, %v5693_v60  ;;  %v5729_v46 = vpop.f32.mrb[33].mxu1 }
 0x335   : > { %v5730_v0 = vadd.f32 %v5729_v46, %v5728_v14 }
 0x336   : > { %v4133_v63 = vadd.f32 %v5695_v52, %v4063_v59 }
 0x338   : > { %v4203_v55 = vadd.f32 %v5730_v0, %v4133_v63 }
 0x352   : > { %v5763_v1 = vpop.f32.mrb[34].mxu0 }
 0x353   : > { %v5764_v2 = vpop.f32.mrb[35].mxu0  ;;  %v5798_v3 = vpop.f32.mrb[34].mxu1 }
 0x354   : > { %v5765_v61 = vadd.f32 %v5764_v2, %v5763_v1  ;;  %v5799_v4 = vpop.f32.mrb[35].mxu1 }
 0x355   : > { %v5800_v5 = vadd.f32 %v5799_v4, %v5798_v3 }
 0x356   : > { %v4273_v58 = vadd.f32 %v5765_v61, %v4203_v55  ;;  %4351 = sbr.rel (%p4533_p7) target bundleno = 1087 (0x43f), region = 52 }
 0x358   : > { %v4343_v9 = vadd.f32 %v5800_v5, %v4273_v58 }
 0x35a   : > { %v4346_v10 = vadd.f32 %v4343_v9, %v259_v7 }
 0x35c   : > { %4347 = vst [vmem:[#allocation2] sm:$0x3] %v4346_v10 }
 0x363   : > { %v4352_v47 = vld [vmem:[#allocation2] sm:$0x3] }
 0x364   : > { %v4360_v50 = vadd.f32 %v4534_v23, %v4352_v47 }
 0x366   : > { %v4361_v43 = vmax.f32 %v4360_v50, 0.0 }
 0x368   : > { %5851 = vmatmul.mubr.f32.vlgmr.msra.gmra.mrb[0].mxu0 %v4361_v43 }
 0x43b   : > { %v4451_v53 = vpop.f32.mrb[0].mxu0 }
 0x43c   : > { %v4452_v41 = vadd.f32 %v4535_v26, %v4451_v53  ;;  %v5852_v42 = vpop.f32.mrb[1].mxu0 }
 0x43e   : > { %4456 = vst.msk [vmem:[#allocation6] sm:$0x3] %vm4455_vm1, %v4452_v41 }
 0x43f PF: > { %p7042_p4 = scmp.eq.s32.totalorder %s7256_s22, 7  ;;  %s7206_s6 = smov [#allocation6]  }
 0x440   : > { %s4464_s21 = sshll.u32 %s7206_s6, 4  ;;  %s4465_s21 = int_to_ptr.vmem [resolvable:$true] %s4464_s21 }
 0x441   : > { %s7132_s9 = scalar_lea.vmem %s4465_s21, 32  ;;  %p7139_p12 = scmp.lt.s32.totalorder %s4465_s21, %s4465_s21 }
 0x442   : > { %p7133_p5 = scmp.ne.s32.totalorder %s4465_s21, %s7132_s9  ;;  %p7140_p0 = scmp.lt.s32.totalorder %s7132_s9, %s7132_s9 }
 0x444   : > { %p7134_p6 = pnand %p7133_p5, %p7042_p4  ;;  %p7141_p1 = por %p7140_p0, %p7139_p12 }
 0x446   : > { %p7135_p10 = pneg %p7134_p6 }
 0x448   : > { %p7142_p2 = pnand %p7141_p1, %p7135_p10 }
 0x44a   : > { %7145 = shalt.err (!%p7142_p2)
}
 0x44b   : > { %s7146_s12 = scalar_lea.hbm %s8840_s5, 32 }
 0x44c   : > { %p7147_p11 = scmp.ne.s32.totalorder %s8840_s5, %s7146_s12  ;;  %p7152_p9 = scmp.lt.u32.totalorder %s7146_s12, %s8840_s5 }
 0x44e   : > { %p7148_p13 = pnand %p7147_p11, %p7042_p4 }
 0x450   : > { %p7149_p3 = pneg %p7148_p13 }
 0x452   : > { %p7154_p8 = pnand %p7152_p9, %p7149_p3 }
 0x454   : > { %7157 = shalt.err (!%p7154_p8)
}
 0x455   : > { %7034 = dma.vmem_to_hbm [thread:$0]  (%p7042_p4), %s4465_s21, 32, %s8840_s5, [#allocation5]  }
 0x456   : > { %7179 = dma.done.wait (%p7042_p4), [#allocation5], 32  }
 0x457   : > { %7181 = vsyncadd (%p7042_p4), [#allocation5], 4294967264 }
 0x458 PF: > { %p16_p7 = scmp.ge.s32.totalorder %s7259_s23, 10   ;;  %s8844_s18 = smov %s7188_s19 }
 0x459   : > { %s8845_s19 = smov %s7192_s20  ;;  %s8846_s20 = smov %s7269_s26 }
 0x45a   : > { %s8847_s21 = smov %s7259_s23  ;;  %18 = sbr.rel (!%p16_p7) target bundleno = 4 (0x4), region = 88 }
 0x461   :  { %4477 = vsyncpa [#allocation4], 1 }
 0x462   :  { %4479 = vsyncpa [#allocation4 + $0x1], 1 }
 0x463   :  { %4480 = vsyncpa [#allocation5], 1 }
 0x464   :  { %4482 = vsyncpa [#allocation5 + $0x1], 1 }

</bundles_post_ra>
